<compile_context>
chip_gen: v7x
topology: tpu7x:2x2x1
jax: 0.10.0
libtpu: 0.0.40
codegen_flags: <defaults>
</compile_context>

<pallas_src>
import functools

import jax
import jax.numpy as jnp
import numpy as np
from jax import lax
from jax.experimental import pallas as pl
from jax.experimental.pallas import tpu as pltpu


# ----------------------------------------------------------------------------
# Host-side helpers for bilinear (align_corners=True) x2 upsampling
# ----------------------------------------------------------------------------
def _interp_matrix(n_in, n_out):
    """Dense 1-D interpolation matrix (n_out, n_in), align_corners=True."""
    m = np.zeros((n_out, n_in), np.float32)
    if n_in == 1:
        m[:, 0] = 1.0
        return m
    scale = (n_in - 1) / (n_out - 1)
    for i in range(n_out):
        src = i * scale
        i0 = min(int(np.floor(src)), n_in - 1)
        i1 = min(i0 + 1, n_in - 1)
        f = src - i0
        m[i, i0] += 1.0 - f
        m[i, i1] += f
    return m


def _interp_taps(n_in, n_out):
    """Per-output-row 2-tap blend (i0, i1, w0, w1), align_corners=True."""
    if n_in == 1:
        return tuple((0, 0, 1.0, 0.0) for _ in range(n_out))
    scale = (n_in - 1) / (n_out - 1)
    taps = []
    for i in range(n_out):
        src = i * scale
        i0 = min(int(np.floor(src)), n_in - 1)
        i1 = min(i0 + 1, n_in - 1)
        f = float(src - i0)
        taps.append((i0, i1, 1.0 - f, f))
    return tuple(taps)


# ----------------------------------------------------------------------------
# In-kernel conv helper
# ----------------------------------------------------------------------------
def _conv3x3_relu(pad_ref, w_ref, b_ref, Hout, Wout, Wp):
    """3x3 conv + bias + ReLU over a flat zero-padded (Hp*Wp, Cin) bf16 buffer.

    Computed over 'wide' rows: the 2 wrap-contaminated columns per image row
    are kept (and never harvested), so every tap is a contiguous sublane-range
    slice of the flat buffer — no im2col scratch, no window reshapes.
    9 accumulated MXU matmuls with per-tap (Cin, Cout) bf16 weights, f32 acc.
    Valid outputs live at wide rows y*Wp + x with x < Wout.
    """
    R = (Hout - 1) * Wp + Wout
    acc = None
    for dy in range(3):                                # static unroll: 9 taps
        for dx in range(3):
            t = dy * 3 + dx
            off = dy * Wp + dx
            part = jnp.dot(pad_ref[off:off + R, :], w_ref[t],
                           preferred_element_type=jnp.float32)
            acc = part if acc is None else acc + part
    return jnp.maximum(acc + b_ref[...], 0.0)          # (R, Cout) f32


# ----------------------------------------------------------------------------
# Fused kernel
# ----------------------------------------------------------------------------
def _upconv_block_kernel(x_ref, br_ref, aw_ref,
                         w1_ref, b1_ref, w2_ref, b2_ref, w3_ref, b3_ref,
                         o_ref,
                         pad1_ref, pad2_ref, pad3_ref,
                         *, H, W, Hu, Wu, p, Cx, Cb, Cout, h_taps):
    Cin1 = Cx + Cb
    H1, W1 = Hu + 2 * p - 2, Wu + 2 * p - 2
    H2, W2 = H1 + 2 * p - 2, W1 + 2 * p - 2
    H3, W3 = H2 + 2 * p - 2, W2 + 2 * p - 2
    Wp1, Wp2, Wp3 = Wu + 2 * p, W1 + 2 * p, W2 + 2 * p

    # Zero the padded activation buffers (bf16, cheap): borders must stay 0,
    # interiors are fully overwritten below.  Kept per-iteration (not gated on
    # program_id==0) so it is also correct when the parallel grid axis is
    # sharded across TensorCores with per-core scratch.
    pad1_ref[...] = jnp.zeros_like(pad1_ref)
    pad2_ref[...] = jnp.zeros_like(pad2_ref)
    pad3_ref[...] = jnp.zeros_like(pad3_ref)

    aw = aw_ref[...]                                   # (Wu, W) bf16

    # --- bilinear x2 upsample (align_corners=True), separable:
    #       H direction: host-computed 2-tap row blend (VPU)
    #       W direction: one (Wu,W)@(W,Cx) MXU matmul per output row
    #     written (with the bridge) straight into the zero-padded, channel-
    #     concatenated, channels-last conv1 input buffer (flat, bf16).
    for y, (r0, r1, a0, a1) in enumerate(h_taps):      # static unroll: Hu rows
        row0 = x_ref[0, r0 * W:(r0 + 1) * W, :]        # (W, Cx) f32
        if r1 == r0 or a1 == 0.0:
            xr = row0
        else:
            xr = a0 * row0 + a1 * x_ref[0, r1 * W:(r1 + 1) * W, :]
        up_row = jnp.dot(aw, xr.astype(jnp.bfloat16),
                         preferred_element_type=jnp.float32)        # (Wu, Cx)
        base = (y + p) * Wp1 + p
        pad1_ref[base:base + Wu, 0:Cx] = up_row.astype(jnp.bfloat16)
        pad1_ref[base:base + Wu, Cx:Cin1] = (
            br_ref[0, y * Wu:(y + 1) * Wu, :].astype(jnp.bfloat16))

    # --- conv1 + ReLU -> pad2 interior (activations never leave VMEM)
    wide1 = _conv3x3_relu(pad1_ref, w1_ref, b1_ref, H1, W1, Wp1)
    for y in range(H1):
        dst = (y + p) * Wp2 + p
        pad2_ref[dst:dst + W1, :] = (
            wide1[y * Wp1:y * Wp1 + W1, :].astype(jnp.bfloat16))

    # --- conv2 + ReLU -> pad3 interior
    wide2 = _conv3x3_relu(pad2_ref, w2_ref, b2_ref, H2, W2, Wp2)
    for y in range(H2):
        dst = (y + p) * Wp3 + p
        pad3_ref[dst:dst + W2, :] = (
            wide2[y * Wp2:y * Wp2 + W2, :].astype(jnp.bfloat16))

    # --- conv3 + ReLU -> channels-last output block (1, H3*W3, Cout)
    wide3 = _conv3x3_relu(pad3_ref, w3_ref, b3_ref, H3, W3, Wp3)
    for y in range(H3):
        o_ref[0, y * W3:(y + 1) * W3, :] = (
            wide3[y * Wp3:y * Wp3 + W3, :].astype(o_ref.dtype))


# ----------------------------------------------------------------------------
# Wrapper
# ----------------------------------------------------------------------------
def upconv_block(x, bridge, params, padding=1, bilinear=True):
    """UpConvBlock.forward(x, bridge) with NCHW tensors (PyTorch layout)."""
    if not bilinear:
        # TODO(synk): ConvTranspose2d(2x2, stride 2) upsampling path
        # (bilinear=False) is not implemented; default bilinear=True only.
        raise NotImplementedError("bilinear=False path not implemented")

    N, Cx, H, W = x.shape
    Nb, Cb, Hb, Wb = bridge.shape
    Hu, Wu = 2 * H, 2 * W
    assert Nb == N and Hb == Hu and Wb == Wu, "bridge must match 2x-upsampled x"
    p = int(padding)

    (w1, b1), (w2, b2), (w3, b3) = params               # PyTorch OIHW weights
    Cin1 = Cx + Cb
    Cout = w1.shape[0]
    assert w1.shape[1] == Cin1 and w2.shape[1] == Cout and w3.shape[1] == Cout

    H1, W1 = Hu + 2 * p - 2, Wu + 2 * p - 2
    H2, W2 = H1 + 2 * p - 2, W1 + 2 * p - 2
    H3, W3 = H2 + 2 * p - 2, W2 + 2 * p - 2
    assert min(H1, W1, H2, W2, H3, W3) > 0

    # Channels-last layout plumbing done once in HBM by XLA (replaces the
    # in-kernel identity-matmul relayout flagged by the perf review).
    x_cl = jnp.transpose(x, (0, 2, 3, 1)).reshape(N, H * W, Cx)
    br_cl = jnp.transpose(bridge, (0, 2, 3, 1)).reshape(N, Hu * Wu, Cb)

    # Separable upsample constants: tiny (Wu, W) bf16 matrix + scalar H taps.
    aw = jnp.asarray(_interp_matrix(W, Wu), jnp.bfloat16)
    h_taps = _interp_taps(H, Hu)

    # Per-tap conv weights (9, Cin, Cout), bf16; tap index t = dy*3 + dx.
    def conv_w(w):
        co, ci = int(w.shape[0]), int(w.shape[1])
        return (jnp.transpose(jnp.asarray(w), (2, 3, 1, 0))
                .reshape(9, ci, co).astype(jnp.bfloat16))

    w1m, w2m, w3m = conv_w(w1), conv_w(w2), conv_w(w3)
    b1r = jnp.asarray(b1, jnp.float32).reshape(1, Cout)
    b2r = jnp.asarray(b2, jnp.float32).reshape(1, Cout)
    b3r = jnp.asarray(b3, jnp.float32).reshape(1, Cout)

    kernel = functools.partial(
        _upconv_block_kernel,
        H=H, W=W, Hu=Hu, Wu=Wu, p=p, Cx=Cx, Cb=Cb, Cout=Cout, h_taps=h_taps)

    out_cl = pl.pallas_call(
        kernel,
        out_shape=jax.ShapeDtypeStruct((N, H3 * W3, Cout), x.dtype),
        grid=(N,),
        in_specs=[
            pl.BlockSpec((1, H * W, Cx), lambda n: (n, 0, 0)),
            pl.BlockSpec((1, Hu * Wu, Cb), lambda n: (n, 0, 0)),
            pl.BlockSpec((Wu, W), lambda n: (0, 0)),
            pl.BlockSpec((9, Cin1, Cout), lambda n: (0, 0, 0)),
            pl.BlockSpec((1, Cout), lambda n: (0, 0)),
            pl.BlockSpec((9, Cout, Cout), lambda n: (0, 0, 0)),
            pl.BlockSpec((1, Cout), lambda n: (0, 0)),
            pl.BlockSpec((9, Cout, Cout), lambda n: (0, 0, 0)),
            pl.BlockSpec((1, Cout), lambda n: (0, 0)),
        ],
        out_specs=pl.BlockSpec((1, H3 * W3, Cout), lambda n: (n, 0, 0)),
        scratch_shapes=[
            pltpu.VMEM(((Hu + 2 * p) * (Wu + 2 * p), Cin1), jnp.bfloat16),  # pad1
            pltpu.VMEM(((H1 + 2 * p) * (W1 + 2 * p), Cout), jnp.bfloat16),  # pad2
            pltpu.VMEM(((H2 + 2 * p) * (W2 + 2 * p), Cout), jnp.bfloat16),  # pad3
        ],
        compiler_params=pltpu.CompilerParams(dimension_semantics=("parallel",)),
    )(x_cl, br_cl, aw, w1m, b1r, w2m, b2r, w3m, b3r)

    # Channels-last -> NCHW: one small XLA transpose in HBM.
    return jnp.transpose(out_cl.reshape(N, H3, W3, Cout), (0, 3, 1, 2))


# ----------------------------------------------------------------------------
# Parameters
# ----------------------------------------------------------------------------
def init_upconv_params(key, input_dim, output_dim):
    # TODO(synk): original `init_weights` is not defined in the snippet; using
    # a deterministic scaled-normal init of the same (OIHW) shapes instead.
    params = []
    cin = input_dim
    for _ in range(3):
        key, kw, kb = jax.random.split(key, 3)
        w = jax.random.normal(kw, (output_dim, cin, 3, 3), jnp.float32) * 0.1
        b = jax.random.normal(kb, (output_dim,), jnp.float32) * 0.01
        params.append((w, b))
        cin = output_dim
    return params


# ----------------------------------------------------------------------------
# Pure-JAX reference for verification
# ----------------------------------------------------------------------------
def _ref_upsample_bilinear_ac(x, scale=2):
    # F.interpolate(mode='bilinear', scale_factor=2, align_corners=True)
    N, C, H, W = x.shape
    Ho, Wo = H * scale, W * scale

    def coords(n_in, n_out):
        if n_in == 1:
            z = np.zeros(n_out, np.int32)
            return z, z, np.zeros(n_out, np.float32)
        src = np.arange(n_out) * (n_in - 1) / (n_out - 1)
        i0 = np.minimum(np.floor(src).astype(np.int32), n_in - 1)
        i1 = np.minimum(i0 + 1, n_in - 1)
        return i0, i1, (src - i0).astype(np.float32)

    y0, y1, fy = coords(H, Ho)
    x0, x1, fx = coords(W, Wo)
    fy = fy.reshape(1, 1, Ho, 1)
    fx = fx.reshape(1, 1, 1, Wo)
    g = lambda iy, ix: x[:, :, iy][:, :, :, ix]
    top = g(y0, x0) * (1 - fx) + g(y0, x1) * fx
    bot = g(y1, x0) * (1 - fx) + g(y1, x1) * fx
    return top * (1 - fy) + bot * fy


def reference(x, bridge, params, padding=1):
    up = _ref_upsample_bilinear_ac(x)
    out = jnp.concatenate([up, bridge], axis=1)
    for (w, b) in params:
        out = lax.conv_general_dilated(
            out, w, window_strides=(1, 1),
            padding=[(padding, padding), (padding, padding)],
            dimension_numbers=("NCHW", "OIHW", "NCHW"))
        out = jnp.maximum(out + b.reshape(1, -1, 1, 1), 0.0)
    return out


if __name__ == "__main__":
    key = jax.random.PRNGKey(0)
    kx, kb, kp = jax.random.split(key, 3)

    Cx, Cb, Cout, padding = 4, 4, 8, 1
    H = W = 8
    x = jax.random.normal(kx, (2, Cx, H, W), jnp.float32)            # NCHW
    bridge = jax.random.normal(kb, (2, Cb, 2 * H, 2 * W), jnp.float32)
    params = init_upconv_params(kp, Cx + Cb, Cout)

    out = upconv_block(x, bridge, params, padding=padding, bilinear=True)
    out = jax.block_until_ready(out)

    ref = reference(x, bridge, params, padding=padding)
    assert out.shape == (2, Cout, 16, 16), out.shape
    np.testing.assert_allclose(np.asarray(out), np.asarray(ref), rtol=5e-2, atol=5e-2)

    print("KERNEL_OK")
</pallas_src>

<mosaic_0001>
module attributes {stable_mosaic.version = 11 : i64} {
  func.func @_upconv_block_kernel(%arg0: i32, %arg1: memref<1x64x4xf32, #tpu.memory_space<vmem>>, %arg2: memref<1x256x4xf32, #tpu.memory_space<vmem>>, %arg3: memref<16x8xbf16, #tpu.memory_space<vmem>>, %arg4: memref<9x8x8xbf16, #tpu.memory_space<vmem>>, %arg5: memref<1x8xf32, #tpu.memory_space<vmem>>, %arg6: memref<9x8x8xbf16, #tpu.memory_space<vmem>>, %arg7: memref<1x8xf32, #tpu.memory_space<vmem>>, %arg8: memref<9x8x8xbf16, #tpu.memory_space<vmem>>, %arg9: memref<1x8xf32, #tpu.memory_space<vmem>>, %arg10: memref<1x256x8xf32, #tpu.memory_space<vmem>>, %arg11: memref<324x8xbf16, #tpu.memory_space<vmem>>, %arg12: memref<324x8xbf16, #tpu.memory_space<vmem>>, %arg13: memref<324x8xbf16, #tpu.memory_space<vmem>>) attributes {dimension_semantics = [#tpu.dimension_semantics<parallel>], iteration_bounds = array<i64: 2>, scalar_prefetch = 0 : i64, scratch_operands = 3 : i64, tpu.core_type = #tpu.core_type<tc>, window_params = [{transform_indices = @transform_0, window_bounds = array<i64: 1, 64, 4>}, {transform_indices = @transform_1, window_bounds = array<i64: 1, 256, 4>}, {pipeline_mode = #tpu.pipeline_mode<synchronous>, transform_indices = @transform_2, window_bounds = array<i64: 16, 8>}, {pipeline_mode = #tpu.pipeline_mode<synchronous>, transform_indices = @transform_3, window_bounds = array<i64: 9, 8, 8>}, {pipeline_mode = #tpu.pipeline_mode<synchronous>, transform_indices = @transform_4, window_bounds = array<i64: 1, 8>}, {pipeline_mode = #tpu.pipeline_mode<synchronous>, transform_indices = @transform_5, window_bounds = array<i64: 9, 8, 8>}, {pipeline_mode = #tpu.pipeline_mode<synchronous>, transform_indices = @transform_6, window_bounds = array<i64: 1, 8>}, {pipeline_mode = #tpu.pipeline_mode<synchronous>, transform_indices = @transform_7, window_bounds = array<i64: 9, 8, 8>}, {pipeline_mode = #tpu.pipeline_mode<synchronous>, transform_indices = @transform_8, window_bounds = array<i64: 1, 8>}, {transform_indices = @transform_9, window_bounds = array<i64: 1, 256, 8>}]} {
    %cst = arith.constant 0.000000e+00 : bf16
    %0 = vector.broadcast %cst : bf16 to vector<324x8xbf16>
    %c0 = arith.constant 0 : index
    %c0_0 = arith.constant 0 : index
    %1 = vector.load %arg11[%c0, %c0_0] : memref<324x8xbf16, #tpu.memory_space<vmem>>, vector<324x8xbf16>
    tpu.vector_store %arg11[%c0, %c0_0], %0 {strides = array<i32>} : memref<324x8xbf16, #tpu.memory_space<vmem>>, vector<324x8xbf16>,
    %cst_1 = arith.constant 0.000000e+00 : bf16
    %2 = vector.broadcast %cst_1 : bf16 to vector<324x8xbf16>
    %c0_2 = arith.constant 0 : index
    %c0_3 = arith.constant 0 : index
    %3 = vector.load %arg12[%c0_2, %c0_3] : memref<324x8xbf16, #tpu.memory_space<vmem>>, vector<324x8xbf16>
    tpu.vector_store %arg12[%c0_2, %c0_3], %2 {strides = array<i32>} : memref<324x8xbf16, #tpu.memory_space<vmem>>, vector<324x8xbf16>,
    %cst_4 = arith.constant 0.000000e+00 : bf16
    %4 = vector.broadcast %cst_4 : bf16 to vector<324x8xbf16>
    %c0_5 = arith.constant 0 : index
    %c0_6 = arith.constant 0 : index
    %5 = vector.load %arg13[%c0_5, %c0_6] : memref<324x8xbf16, #tpu.memory_space<vmem>>, vector<324x8xbf16>
    tpu.vector_store %arg13[%c0_5, %c0_6], %4 {strides = array<i32>} : memref<324x8xbf16, #tpu.memory_space<vmem>>, vector<324x8xbf16>,
    %c0_7 = arith.constant 0 : index
    %c0_8 = arith.constant 0 : index
    %6 = vector.load %arg3[%c0_7, %c0_8] : memref<16x8xbf16, #tpu.memory_space<vmem>>, vector<16x8xbf16>
    %c0_9 = arith.constant 0 : index
    %c0_10 = arith.constant 0 : index
    %c0_11 = arith.constant 0 : index
    %7 = vector.load %arg1[%c0_9, %c0_10, %c0_11] : memref<1x64x4xf32, #tpu.memory_space<vmem>>, vector<1x8x4xf32>
    %8 = vector.shape_cast %7 : vector<1x8x4xf32> to vector<8x4xf32>
    %9 = arith.truncf %8 : vector<8x4xf32> to vector<8x4xbf16>
    %cst_12 = arith.constant dense<0.000000e+00> : vector<16x4xf32>
    %10 = tpu.matmul %6, %9, %cst_12 {dimension_numbers = #tpu.dot_dimension_numbers<[1], [0], [0], [1], [0, 0, 1, 1], [], []>} : vector<16x8xbf16>, vector<8x4xbf16>, vector<16x4xf32> -> vector<16x4xf32>
    %11 = arith.truncf %10 : vector<16x4xf32> to vector<16x4xbf16>
    %c19 = arith.constant 19 : index
    %c0_13 = arith.constant 0 : index
    %12 = vector.load %arg11[%c19, %c0_13] : memref<324x8xbf16, #tpu.memory_space<vmem>>, vector<16x4xbf16>
    tpu.vector_store %arg11[%c19, %c0_13], %11 {strides = array<i32>} : memref<324x8xbf16, #tpu.memory_space<vmem>>, vector<16x4xbf16>,
    %c0_14 = arith.constant 0 : index
    %c0_15 = arith.constant 0 : index
    %c0_16 = arith.constant 0 : index
    %13 = vector.load %arg2[%c0_14, %c0_15, %c0_16] : memref<1x256x4xf32, #tpu.memory_space<vmem>>, vector<1x16x4xf32>
    %14 = vector.shape_cast %13 : vector<1x16x4xf32> to vector<16x4xf32>
    %15 = arith.truncf %14 : vector<16x4xf32> to vector<16x4xbf16>
    %c19_17 = arith.constant 19 : index
    %c4 = arith.constant 4 : index
    %16 = vector.load %arg11[%c19_17, %c4] : memref<324x8xbf16, #tpu.memory_space<vmem>>, vector<16x4xbf16>
    tpu.vector_store %arg11[%c19_17, %c4], %15 {strides = array<i32>} : memref<324x8xbf16, #tpu.memory_space<vmem>>, vector<16x4xbf16>,
    %c0_18 = arith.constant 0 : index
    %c0_19 = arith.constant 0 : index
    %c0_20 = arith.constant 0 : index
    %17 = vector.load %arg1[%c0_18, %c0_19, %c0_20] : memref<1x64x4xf32, #tpu.memory_space<vmem>>, vector<1x8x4xf32>
    %18 = vector.shape_cast %17 : vector<1x8x4xf32> to vector<8x4xf32>
    %cst_21 = arith.constant 0.533333361 : f32
    %19 = vector.broadcast %cst_21 : f32 to vector<8x4xf32>
    %20 = arith.mulf %19, %18 : vector<8x4xf32>
    %c0_22 = arith.constant 0 : index
    %c8 = arith.constant 8 : index
    %c0_23 = arith.constant 0 : index
    %21 = vector.load %arg1[%c0_22, %c8, %c0_23] : memref<1x64x4xf32, #tpu.memory_space<vmem>>, vector<1x8x4xf32>
    %22 = vector.shape_cast %21 : vector<1x8x4xf32> to vector<8x4xf32>
    %cst_24 = arith.constant 0.466666669 : f32
    %23 = vector.broadcast %cst_24 : f32 to vector<8x4xf32>
    %24 = arith.mulf %23, %22 : vector<8x4xf32>
    %25 = arith.addf %20, %24 : vector<8x4xf32>
    %26 = arith.truncf %25 : vector<8x4xf32> to vector<8x4xbf16>
    %cst_25 = arith.constant dense<0.000000e+00> : vector<16x4xf32>
    %27 = tpu.matmul %6, %26, %cst_25 {dimension_numbers = #tpu.dot_dimension_numbers<[1], [0], [0], [1], [0, 0, 1, 1], [], []>} : vector<16x8xbf16>, vector<8x4xbf16>, vector<16x4xf32> -> vector<16x4xf32>
    %28 = arith.truncf %27 : vector<16x4xf32> to vector<16x4xbf16>
    %c37 = arith.constant 37 : index
    %c0_26 = arith.constant 0 : index
    %29 = vector.load %arg11[%c37, %c0_26] : memref<324x8xbf16, #tpu.memory_space<vmem>>, vector<16x4xbf16>
    tpu.vector_store %arg11[%c37, %c0_26], %28 {strides = array<i32>} : memref<324x8xbf16, #tpu.memory_space<vmem>>, vector<16x4xbf16>,
    %c0_27 = arith.constant 0 : index
    %c16 = arith.constant 16 : index
    %c0_28 = arith.constant 0 : index
    %30 = vector.load %arg2[%c0_27, %c16, %c0_28] : memref<1x256x4xf32, #tpu.memory_space<vmem>>, vector<1x16x4xf32>
    %31 = vector.shape_cast %30 : vector<1x16x4xf32> to vector<16x4xf32>
    %32 = arith.truncf %31 : vector<16x4xf32> to vector<16x4xbf16>
    %c37_29 = arith.constant 37 : index
    %c4_30 = arith.constant 4 : index
    %33 = vector.load %arg11[%c37_29, %c4_30] : memref<324x8xbf16, #tpu.memory_space<vmem>>, vector<16x4xbf16>
    tpu.vector_store %arg11[%c37_29, %c4_30], %32 {strides = array<i32>} : memref<324x8xbf16, #tpu.memory_space<vmem>>, vector<16x4xbf16>,
    %c0_31 = arith.constant 0 : index
    %c0_32 = arith.constant 0 : index
    %c0_33 = arith.constant 0 : index
    %34 = vector.load %arg1[%c0_31, %c0_32, %c0_33] : memref<1x64x4xf32, #tpu.memory_space<vmem>>, vector<1x8x4xf32>
    %35 = vector.shape_cast %34 : vector<1x8x4xf32> to vector<8x4xf32>
    %cst_34 = arith.constant 0.0666666701 : f32
    %36 = vector.broadcast %cst_34 : f32 to vector<8x4xf32>
    %37 = arith.mulf %36, %35 : vector<8x4xf32>
    %c0_35 = arith.constant 0 : index
    %c8_36 = arith.constant 8 : index
    %c0_37 = arith.constant 0 : index
    %38 = vector.load %arg1[%c0_35, %c8_36, %c0_37] : memref<1x64x4xf32, #tpu.memory_space<vmem>>, vector<1x8x4xf32>
    %39 = vector.shape_cast %38 : vector<1x8x4xf32> to vector<8x4xf32>
    %cst_38 = arith.constant 0.933333337 : f32
    %40 = vector.broadcast %cst_38 : f32 to vector<8x4xf32>
    %41 = arith.mulf %40, %39 : vector<8x4xf32>
    %42 = arith.addf %37, %41 : vector<8x4xf32>
    %43 = arith.truncf %42 : vector<8x4xf32> to vector<8x4xbf16>
    %cst_39 = arith.constant dense<0.000000e+00> : vector<16x4xf32>
    %44 = tpu.matmul %6, %43, %cst_39 {dimension_numbers = #tpu.dot_dimension_numbers<[1], [0], [0], [1], [0, 0, 1, 1], [], []>} : vector<16x8xbf16>, vector<8x4xbf16>, vector<16x4xf32> -> vector<16x4xf32>
    %45 = arith.truncf %44 : vector<16x4xf32> to vector<16x4xbf16>
    %c55 = arith.constant 55 : index
    %c0_40 = arith.constant 0 : index
    %46 = vector.load %arg11[%c55, %c0_40] : memref<324x8xbf16, #tpu.memory_space<vmem>>, vector<16x4xbf16>
    tpu.vector_store %arg11[%c55, %c0_40], %45 {strides = array<i32>} : memref<324x8xbf16, #tpu.memory_space<vmem>>, vector<16x4xbf16>,
    %c0_41 = arith.constant 0 : index
    %c32 = arith.constant 32 : index
    %c0_42 = arith.constant 0 : index
    %47 = vector.load %arg2[%c0_41, %c32, %c0_42] : memref<1x256x4xf32, #tpu.memory_space<vmem>>, vector<1x16x4xf32>
    %48 = vector.shape_cast %47 : vector<1x16x4xf32> to vector<16x4xf32>
    %49 = arith.truncf %48 : vector<16x4xf32> to vector<16x4xbf16>
    %c55_43 = arith.constant 55 : index
    %c4_44 = arith.constant 4 : index
    %50 = vector.load %arg11[%c55_43, %c4_44] : memref<324x8xbf16, #tpu.memory_space<vmem>>, vector<16x4xbf16>
    tpu.vector_store %arg11[%c55_43, %c4_44], %49 {strides = array<i32>} : memref<324x8xbf16, #tpu.memory_space<vmem>>, vector<16x4xbf16>,
    %c0_45 = arith.constant 0 : index
    %c8_46 = arith.constant 8 : index
    %c0_47 = arith.constant 0 : index
    %51 = vector.load %arg1[%c0_45, %c8_46, %c0_47] : memref<1x64x4xf32, #tpu.memory_space<vmem>>, vector<1x8x4xf32>
    %52 = vector.shape_cast %51 : vector<1x8x4xf32> to vector<8x4xf32>
    %cst_48 = arith.constant 6.000000e-01 : f32
    %53 = vector.broadcast %cst_48 : f32 to vector<8x4xf32>
    %54 = arith.mulf %53, %52 : vector<8x4xf32>
    %c0_49 = arith.constant 0 : index
    %c16_50 = arith.constant 16 : index
    %c0_51 = arith.constant 0 : index
    %55 = vector.load %arg1[%c0_49, %c16_50, %c0_51] : memref<1x64x4xf32, #tpu.memory_space<vmem>>, vector<1x8x4xf32>
    %56 = vector.shape_cast %55 : vector<1x8x4xf32> to vector<8x4xf32>
    %cst_52 = arith.constant 4.000000e-01 : f32
    %57 = vector.broadcast %cst_52 : f32 to vector<8x4xf32>
    %58 = arith.mulf %57, %56 : vector<8x4xf32>
    %59 = arith.addf %54, %58 : vector<8x4xf32>
    %60 = arith.truncf %59 : vector<8x4xf32> to vector<8x4xbf16>
    %cst_53 = arith.constant dense<0.000000e+00> : vector<16x4xf32>
    %61 = tpu.matmul %6, %60, %cst_53 {dimension_numbers = #tpu.dot_dimension_numbers<[1], [0], [0], [1], [0, 0, 1, 1], [], []>} : vector<16x8xbf16>, vector<8x4xbf16>, vector<16x4xf32> -> vector<16x4xf32>
    %62 = arith.truncf %61 : vector<16x4xf32> to vector<16x4xbf16>
    %c73 = arith.constant 73 : index
    %c0_54 = arith.constant 0 : index
    %63 = vector.load %arg11[%c73, %c0_54] : memref<324x8xbf16, #tpu.memory_space<vmem>>, vector<16x4xbf16>
    tpu.vector_store %arg11[%c73, %c0_54], %62 {strides = array<i32>} : memref<324x8xbf16, #tpu.memory_space<vmem>>, vector<16x4xbf16>,
    %c0_55 = arith.constant 0 : index
    %c48 = arith.constant 48 : index
    %c0_56 = arith.constant 0 : index
    %64 = vector.load %arg2[%c0_55, %c48, %c0_56] : memref<1x256x4xf32, #tpu.memory_space<vmem>>, vector<1x16x4xf32>
    %65 = vector.shape_cast %64 : vector<1x16x4xf32> to vector<16x4xf32>
    %66 = arith.truncf %65 : vector<16x4xf32> to vector<16x4xbf16>
    %c73_57 = arith.constant 73 : index
    %c4_58 = arith.constant 4 : index
    %67 = vector.load %arg11[%c73_57, %c4_58] : memref<324x8xbf16, #tpu.memory_space<vmem>>, vector<16x4xbf16>
    tpu.vector_store %arg11[%c73_57, %c4_58], %66 {strides = array<i32>} : memref<324x8xbf16, #tpu.memory_space<vmem>>, vector<16x4xbf16>,
    %c0_59 = arith.constant 0 : index
    %c8_60 = arith.constant 8 : index
    %c0_61 = arith.constant 0 : index
    %68 = vector.load %arg1[%c0_59, %c8_60, %c0_61] : memref<1x64x4xf32, #tpu.memory_space<vmem>>, vector<1x8x4xf32>
    %69 = vector.shape_cast %68 : vector<1x8x4xf32> to vector<8x4xf32>
    %cst_62 = arith.constant 0.13333334 : f32
    %70 = vector.broadcast %cst_62 : f32 to vector<8x4xf32>
    %71 = arith.mulf %70, %69 : vector<8x4xf32>
    %c0_63 = arith.constant 0 : index
    %c16_64 = arith.constant 16 : index
    %c0_65 = arith.constant 0 : index
    %72 = vector.load %arg1[%c0_63, %c16_64, %c0_65] : memref<1x64x4xf32, #tpu.memory_space<vmem>>, vector<1x8x4xf32>
    %73 = vector.shape_cast %72 : vector<1x8x4xf32> to vector<8x4xf32>
    %cst_66 = arith.constant 0.866666674 : f32
    %74 = vector.broadcast %cst_66 : f32 to vector<8x4xf32>
    %75 = arith.mulf %74, %73 : vector<8x4xf32>
    %76 = arith.addf %71, %75 : vector<8x4xf32>
    %77 = arith.truncf %76 : vector<8x4xf32> to vector<8x4xbf16>
    %cst_67 = arith.constant dense<0.000000e+00> : vector<16x4xf32>
    %78 = tpu.matmul %6, %77, %cst_67 {dimension_numbers = #tpu.dot_dimension_numbers<[1], [0], [0], [1], [0, 0, 1, 1], [], []>} : vector<16x8xbf16>, vector<8x4xbf16>, vector<16x4xf32> -> vector<16x4xf32>
    %79 = arith.truncf %78 : vector<16x4xf32> to vector<16x4xbf16>
    %c91 = arith.constant 91 : index
    %c0_68 = arith.constant 0 : index
    %80 = vector.load %arg11[%c91, %c0_68] : memref<324x8xbf16, #tpu.memory_space<vmem>>, vector<16x4xbf16>
    tpu.vector_store %arg11[%c91, %c0_68], %79 {strides = array<i32>} : memref<324x8xbf16, #tpu.memory_space<vmem>>, vector<16x4xbf16>,
    %c0_69 = arith.constant 0 : index
    %c64 = arith.constant 64 : index
    %c0_70 = arith.constant 0 : index
    %81 = vector.load %arg2[%c0_69, %c64, %c0_70] : memref<1x256x4xf32, #tpu.memory_space<vmem>>, vector<1x16x4xf32>
    %82 = vector.shape_cast %81 : vector<1x16x4xf32> to vector<16x4xf32>
    %83 = arith.truncf %82 : vector<16x4xf32> to vector<16x4xbf16>
    %c91_71 = arith.constant 91 : index
    %c4_72 = arith.constant 4 : index
    %84 = vector.load %arg11[%c91_71, %c4_72] : memref<324x8xbf16, #tpu.memory_space<vmem>>, vector<16x4xbf16>
    tpu.vector_store %arg11[%c91_71, %c4_72], %83 {strides = array<i32>} : memref<324x8xbf16, #tpu.memory_space<vmem>>, vector<16x4xbf16>,
    %c0_73 = arith.constant 0 : index
    %c16_74 = arith.constant 16 : index
    %c0_75 = arith.constant 0 : index
    %85 = vector.load %arg1[%c0_73, %c16_74, %c0_75] : memref<1x64x4xf32, #tpu.memory_space<vmem>>, vector<1x8x4xf32>
    %86 = vector.shape_cast %85 : vector<1x8x4xf32> to vector<8x4xf32>
    %cst_76 = arith.constant 0.666666686 : f32
    %87 = vector.broadcast %cst_76 : f32 to vector<8x4xf32>
    %88 = arith.mulf %87, %86 : vector<8x4xf32>
    %c0_77 = arith.constant 0 : index
    %c24 = arith.constant 24 : index
    %c0_78 = arith.constant 0 : index
    %89 = vector.load %arg1[%c0_77, %c24, %c0_78] : memref<1x64x4xf32, #tpu.memory_space<vmem>>, vector<1x8x4xf32>
    %90 = vector.shape_cast %89 : vector<1x8x4xf32> to vector<8x4xf32>
    %cst_79 = arith.constant 0.333333343 : f32
    %91 = vector.broadcast %cst_79 : f32 to vector<8x4xf32>
    %92 = arith.mulf %91, %90 : vector<8x4xf32>
    %93 = arith.addf %88, %92 : vector<8x4xf32>
    %94 = arith.truncf %93 : vector<8x4xf32> to vector<8x4xbf16>
    %cst_80 = arith.constant dense<0.000000e+00> : vector<16x4xf32>
    %95 = tpu.matmul %6, %94, %cst_80 {dimension_numbers = #tpu.dot_dimension_numbers<[1], [0], [0], [1], [0, 0, 1, 1], [], []>} : vector<16x8xbf16>, vector<8x4xbf16>, vector<16x4xf32> -> vector<16x4xf32>
    %96 = arith.truncf %95 : vector<16x4xf32> to vector<16x4xbf16>
    %c109 = arith.constant 109 : index
    %c0_81 = arith.constant 0 : index
    %97 = vector.load %arg11[%c109, %c0_81] : memref<324x8xbf16, #tpu.memory_space<vmem>>, vector<16x4xbf16>
    tpu.vector_store %arg11[%c109, %c0_81], %96 {strides = array<i32>} : memref<324x8xbf16, #tpu.memory_space<vmem>>, vector<16x4xbf16>,
    %c0_82 = arith.constant 0 : index
    %c80 = arith.constant 80 : index
    %c0_83 = arith.constant 0 : index
    %98 = vector.load %arg2[%c0_82, %c80, %c0_83] : memref<1x256x4xf32, #tpu.memory_space<vmem>>, vector<1x16x4xf32>
    %99 = vector.shape_cast %98 : vector<1x16x4xf32> to vector<16x4xf32>
    %100 = arith.truncf %99 : vector<16x4xf32> to vector<16x4xbf16>
    %c109_84 = arith.constant 109 : index
    %c4_85 = arith.constant 4 : index
    %101 = vector.load %arg11[%c109_84, %c4_85] : memref<324x8xbf16, #tpu.memory_space<vmem>>, vector<16x4xbf16>
    tpu.vector_store %arg11[%c109_84, %c4_85], %100 {strides = array<i32>} : memref<324x8xbf16, #tpu.memory_space<vmem>>, vector<16x4xbf16>,
    %c0_86 = arith.constant 0 : index
    %c16_87 = arith.constant 16 : index
    %c0_88 = arith.constant 0 : index
    %102 = vector.load %arg1[%c0_86, %c16_87, %c0_88] : memref<1x64x4xf32, #tpu.memory_space<vmem>>, vector<1x8x4xf32>
    %103 = vector.shape_cast %102 : vector<1x8x4xf32> to vector<8x4xf32>
    %cst_89 = arith.constant 2.000000e-01 : f32
    %104 = vector.broadcast %cst_89 : f32 to vector<8x4xf32>
    %105 = arith.mulf %104, %103 : vector<8x4xf32>
    %c0_90 = arith.constant 0 : index
    %c24_91 = arith.constant 24 : index
    %c0_92 = arith.constant 0 : index
    %106 = vector.load %arg1[%c0_90, %c24_91, %c0_92] : memref<1x64x4xf32, #tpu.memory_space<vmem>>, vector<1x8x4xf32>
    %107 = vector.shape_cast %106 : vector<1x8x4xf32> to vector<8x4xf32>
    %cst_93 = arith.constant 8.000000e-01 : f32
    %108 = vector.broadcast %cst_93 : f32 to vector<8x4xf32>
    %109 = arith.mulf %108, %107 : vector<8x4xf32>
    %110 = arith.addf %105, %109 : vector<8x4xf32>
    %111 = arith.truncf %110 : vector<8x4xf32> to vector<8x4xbf16>
    %cst_94 = arith.constant dense<0.000000e+00> : vector<16x4xf32>
    %112 = tpu.matmul %6, %111, %cst_94 {dimension_numbers = #tpu.dot_dimension_numbers<[1], [0], [0], [1], [0, 0, 1, 1], [], []>} : vector<16x8xbf16>, vector<8x4xbf16>, vector<16x4xf32> -> vector<16x4xf32>
    %113 = arith.truncf %112 : vector<16x4xf32> to vector<16x4xbf16>
    %c127 = arith.constant 127 : index
    %c0_95 = arith.constant 0 : index
    %114 = vector.load %arg11[%c127, %c0_95] : memref<324x8xbf16, #tpu.memory_space<vmem>>, vector<16x4xbf16>
    tpu.vector_store %arg11[%c127, %c0_95], %113 {strides = array<i32>} : memref<324x8xbf16, #tpu.memory_space<vmem>>, vector<16x4xbf16>,
    %c0_96 = arith.constant 0 : index
    %c96 = arith.constant 96 : index
    %c0_97 = arith.constant 0 : index
    %115 = vector.load %arg2[%c0_96, %c96, %c0_97] : memref<1x256x4xf32, #tpu.memory_space<vmem>>, vector<1x16x4xf32>
    %116 = vector.shape_cast %115 : vector<1x16x4xf32> to vector<16x4xf32>
    %117 = arith.truncf %116 : vector<16x4xf32> to vector<16x4xbf16>
    %c127_98 = arith.constant 127 : index
    %c4_99 = arith.constant 4 : index
    %118 = vector.load %arg11[%c127_98, %c4_99] : memref<324x8xbf16, #tpu.memory_space<vmem>>, vector<16x4xbf16>
    tpu.vector_store %arg11[%c127_98, %c4_99], %117 {strides = array<i32>} : memref<324x8xbf16, #tpu.memory_space<vmem>>, vector<16x4xbf16>,
    %c0_100 = arith.constant 0 : index
    %c24_101 = arith.constant 24 : index
    %c0_102 = arith.constant 0 : index
    %119 = vector.load %arg1[%c0_100, %c24_101, %c0_102] : memref<1x64x4xf32, #tpu.memory_space<vmem>>, vector<1x8x4xf32>
    %120 = vector.shape_cast %119 : vector<1x8x4xf32> to vector<8x4xf32>
    %cst_103 = arith.constant 0.733333349 : f32
    %121 = vector.broadcast %cst_103 : f32 to vector<8x4xf32>
    %122 = arith.mulf %121, %120 : vector<8x4xf32>
    %c0_104 = arith.constant 0 : index
    %c32_105 = arith.constant 32 : index
    %c0_106 = arith.constant 0 : index
    %123 = vector.load %arg1[%c0_104, %c32_105, %c0_106] : memref<1x64x4xf32, #tpu.memory_space<vmem>>, vector<1x8x4xf32>
    %124 = vector.shape_cast %123 : vector<1x8x4xf32> to vector<8x4xf32>
    %cst_107 = arith.constant 0.266666681 : f32
    %125 = vector.broadcast %cst_107 : f32 to vector<8x4xf32>
    %126 = arith.mulf %125, %124 : vector<8x4xf32>
    %127 = arith.addf %122, %126 : vector<8x4xf32>
    %128 = arith.truncf %127 : vector<8x4xf32> to vector<8x4xbf16>
    %cst_108 = arith.constant dense<0.000000e+00> : vector<16x4xf32>
    %129 = tpu.matmul %6, %128, %cst_108 {dimension_numbers = #tpu.dot_dimension_numbers<[1], [0], [0], [1], [0, 0, 1, 1], [], []>} : vector<16x8xbf16>, vector<8x4xbf16>, vector<16x4xf32> -> vector<16x4xf32>
    %130 = arith.truncf %129 : vector<16x4xf32> to vector<16x4xbf16>
    %c145 = arith.constant 145 : index
    %c0_109 = arith.constant 0 : index
    %131 = vector.load %arg11[%c145, %c0_109] : memref<324x8xbf16, #tpu.memory_space<vmem>>, vector<16x4xbf16>
    tpu.vector_store %arg11[%c145, %c0_109], %130 {strides = array<i32>} : memref<324x8xbf16, #tpu.memory_space<vmem>>, vector<16x4xbf16>,
    %c0_110 = arith.constant 0 : index
    %c112 = arith.constant 112 : index
    %c0_111 = arith.constant 0 : index
    %132 = vector.load %arg2[%c0_110, %c112, %c0_111] : memref<1x256x4xf32, #tpu.memory_space<vmem>>, vector<1x16x4xf32>
    %133 = vector.shape_cast %132 : vector<1x16x4xf32> to vector<16x4xf32>
    %134 = arith.truncf %133 : vector<16x4xf32> to vector<16x4xbf16>
    %c145_112 = arith.constant 145 : index
    %c4_113 = arith.constant 4 : index
    %135 = vector.load %arg11[%c145_112, %c4_113] : memref<324x8xbf16, #tpu.memory_space<vmem>>, vector<16x4xbf16>
    tpu.vector_store %arg11[%c145_112, %c4_113], %134 {strides = array<i32>} : memref<324x8xbf16, #tpu.memory_space<vmem>>, vector<16x4xbf16>,
    %c0_114 = arith.constant 0 : index
    %c24_115 = arith.constant 24 : index
    %c0_116 = arith.constant 0 : index
    %136 = vector.load %arg1[%c0_114, %c24_115, %c0_116] : memref<1x64x4xf32, #tpu.memory_space<vmem>>, vector<1x8x4xf32>
    %137 = vector.shape_cast %136 : vector<1x8x4xf32> to vector<8x4xf32>
    %cst_117 = arith.constant 0.266666681 : f32
    %138 = vector.broadcast %cst_117 : f32 to vector<8x4xf32>
    %139 = arith.mulf %138, %137 : vector<8x4xf32>
    %c0_118 = arith.constant 0 : index
    %c32_119 = arith.constant 32 : index
    %c0_120 = arith.constant 0 : index
    %140 = vector.load %arg1[%c0_118, %c32_119, %c0_120] : memref<1x64x4xf32, #tpu.memory_space<vmem>>, vector<1x8x4xf32>
    %141 = vector.shape_cast %140 : vector<1x8x4xf32> to vector<8x4xf32>
    %cst_121 = arith.constant 0.733333349 : f32
    %142 = vector.broadcast %cst_121 : f32 to vector<8x4xf32>
    %143 = arith.mulf %142, %141 : vector<8x4xf32>
    %144 = arith.addf %139, %143 : vector<8x4xf32>
    %145 = arith.truncf %144 : vector<8x4xf32> to vector<8x4xbf16>
    %cst_122 = arith.constant dense<0.000000e+00> : vector<16x4xf32>
    %146 = tpu.matmul %6, %145, %cst_122 {dimension_numbers = #tpu.dot_dimension_numbers<[1], [0], [0], [1], [0, 0, 1, 1], [], []>} : vector<16x8xbf16>, vector<8x4xbf16>, vector<16x4xf32> -> vector<16x4xf32>
    %147 = arith.truncf %146 : vector<16x4xf32> to vector<16x4xbf16>
    %c163 = arith.constant 163 : index
    %c0_123 = arith.constant 0 : index
    %148 = vector.load %arg11[%c163, %c0_123] : memref<324x8xbf16, #tpu.memory_space<vmem>>, vector<16x4xbf16>
    tpu.vector_store %arg11[%c163, %c0_123], %147 {strides = array<i32>} : memref<324x8xbf16, #tpu.memory_space<vmem>>, vector<16x4xbf16>,
    %c0_124 = arith.constant 0 : index
    %c128 = arith.constant 128 : index
    %c0_125 = arith.constant 0 : index
    %149 = vector.load %arg2[%c0_124, %c128, %c0_125] : memref<1x256x4xf32, #tpu.memory_space<vmem>>, vector<1x16x4xf32>
    %150 = vector.shape_cast %149 : vector<1x16x4xf32> to vector<16x4xf32>
    %151 = arith.truncf %150 : vector<16x4xf32> to vector<16x4xbf16>
    %c163_126 = arith.constant 163 : index
    %c4_127 = arith.constant 4 : index
    %152 = vector.load %arg11[%c163_126, %c4_127] : memref<324x8xbf16, #tpu.memory_space<vmem>>, vector<16x4xbf16>
    tpu.vector_store %arg11[%c163_126, %c4_127], %151 {strides = array<i32>} : memref<324x8xbf16, #tpu.memory_space<vmem>>, vector<16x4xbf16>,
    %c0_128 = arith.constant 0 : index
    %c32_129 = arith.constant 32 : index
    %c0_130 = arith.constant 0 : index
    %153 = vector.load %arg1[%c0_128, %c32_129, %c0_130] : memref<1x64x4xf32, #tpu.memory_space<vmem>>, vector<1x8x4xf32>
    %154 = vector.shape_cast %153 : vector<1x8x4xf32> to vector<8x4xf32>
    %cst_131 = arith.constant 8.000000e-01 : f32
    %155 = vector.broadcast %cst_131 : f32 to vector<8x4xf32>
    %156 = arith.mulf %155, %154 : vector<8x4xf32>
    %c0_132 = arith.constant 0 : index
    %c40 = arith.constant 40 : index
    %c0_133 = arith.constant 0 : index
    %157 = vector.load %arg1[%c0_132, %c40, %c0_133] : memref<1x64x4xf32, #tpu.memory_space<vmem>>, vector<1x8x4xf32>
    %158 = vector.shape_cast %157 : vector<1x8x4xf32> to vector<8x4xf32>
    %cst_134 = arith.constant 2.000000e-01 : f32
    %159 = vector.broadcast %cst_134 : f32 to vector<8x4xf32>
    %160 = arith.mulf %159, %158 : vector<8x4xf32>
    %161 = arith.addf %156, %160 : vector<8x4xf32>
    %162 = arith.truncf %161 : vector<8x4xf32> to vector<8x4xbf16>
    %cst_135 = arith.constant dense<0.000000e+00> : vector<16x4xf32>
    %163 = tpu.matmul %6, %162, %cst_135 {dimension_numbers = #tpu.dot_dimension_numbers<[1], [0], [0], [1], [0, 0, 1, 1], [], []>} : vector<16x8xbf16>, vector<8x4xbf16>, vector<16x4xf32> -> vector<16x4xf32>
    %164 = arith.truncf %163 : vector<16x4xf32> to vector<16x4xbf16>
    %c181 = arith.constant 181 : index
    %c0_136 = arith.constant 0 : index
    %165 = vector.load %arg11[%c181, %c0_136] : memref<324x8xbf16, #tpu.memory_space<vmem>>, vector<16x4xbf16>
    tpu.vector_store %arg11[%c181, %c0_136], %164 {strides = array<i32>} : memref<324x8xbf16, #tpu.memory_space<vmem>>, vector<16x4xbf16>,
    %c0_137 = arith.constant 0 : index
    %c144 = arith.constant 144 : index
    %c0_138 = arith.constant 0 : index
    %166 = vector.load %arg2[%c0_137, %c144, %c0_138] : memref<1x256x4xf32, #tpu.memory_space<vmem>>, vector<1x16x4xf32>
    %167 = vector.shape_cast %166 : vector<1x16x4xf32> to vector<16x4xf32>
    %168 = arith.truncf %167 : vector<16x4xf32> to vector<16x4xbf16>
    %c181_139 = arith.constant 181 : index
    %c4_140 = arith.constant 4 : index
    %169 = vector.load %arg11[%c181_139, %c4_140] : memref<324x8xbf16, #tpu.memory_space<vmem>>, vector<16x4xbf16>
    tpu.vector_store %arg11[%c181_139, %c4_140], %168 {strides = array<i32>} : memref<324x8xbf16, #tpu.memory_space<vmem>>, vector<16x4xbf16>,
    %c0_141 = arith.constant 0 : index
    %c32_142 = arith.constant 32 : index
    %c0_143 = arith.constant 0 : index
    %170 = vector.load %arg1[%c0_141, %c32_142, %c0_143] : memref<1x64x4xf32, #tpu.memory_space<vmem>>, vector<1x8x4xf32>
    %171 = vector.shape_cast %170 : vector<1x8x4xf32> to vector<8x4xf32>
    %cst_144 = arith.constant 0.333333343 : f32
    %172 = vector.broadcast %cst_144 : f32 to vector<8x4xf32>
    %173 = arith.mulf %172, %171 : vector<8x4xf32>
    %c0_145 = arith.constant 0 : index
    %c40_146 = arith.constant 40 : index
    %c0_147 = arith.constant 0 : index
    %174 = vector.load %arg1[%c0_145, %c40_146, %c0_147] : memref<1x64x4xf32, #tpu.memory_space<vmem>>, vector<1x8x4xf32>
    %175 = vector.shape_cast %174 : vector<1x8x4xf32> to vector<8x4xf32>
    %cst_148 = arith.constant 0.666666686 : f32
    %176 = vector.broadcast %cst_148 : f32 to vector<8x4xf32>
    %177 = arith.mulf %176, %175 : vector<8x4xf32>
    %178 = arith.addf %173, %177 : vector<8x4xf32>
    %179 = arith.truncf %178 : vector<8x4xf32> to vector<8x4xbf16>
    %cst_149 = arith.constant dense<0.000000e+00> : vector<16x4xf32>
    %180 = tpu.matmul %6, %179, %cst_149 {dimension_numbers = #tpu.dot_dimension_numbers<[1], [0], [0], [1], [0, 0, 1, 1], [], []>} : vector<16x8xbf16>, vector<8x4xbf16>, vector<16x4xf32> -> vector<16x4xf32>
    %181 = arith.truncf %180 : vector<16x4xf32> to vector<16x4xbf16>
    %c199 = arith.constant 199 : index
    %c0_150 = arith.constant 0 : index
    %182 = vector.load %arg11[%c199, %c0_150] : memref<324x8xbf16, #tpu.memory_space<vmem>>, vector<16x4xbf16>
    tpu.vector_store %arg11[%c199, %c0_150], %181 {strides = array<i32>} : memref<324x8xbf16, #tpu.memory_space<vmem>>, vector<16x4xbf16>,
    %c0_151 = arith.constant 0 : index
    %c160 = arith.constant 160 : index
    %c0_152 = arith.constant 0 : index
    %183 = vector.load %arg2[%c0_151, %c160, %c0_152] : memref<1x256x4xf32, #tpu.memory_space<vmem>>, vector<1x16x4xf32>
    %184 = vector.shape_cast %183 : vector<1x16x4xf32> to vector<16x4xf32>
    %185 = arith.truncf %184 : vector<16x4xf32> to vector<16x4xbf16>
    %c199_153 = arith.constant 199 : index
    %c4_154 = arith.constant 4 : index
    %186 = vector.load %arg11[%c199_153, %c4_154] : memref<324x8xbf16, #tpu.memory_space<vmem>>, vector<16x4xbf16>
    tpu.vector_store %arg11[%c199_153, %c4_154], %185 {strides = array<i32>} : memref<324x8xbf16, #tpu.memory_space<vmem>>, vector<16x4xbf16>,
    %c0_155 = arith.constant 0 : index
    %c40_156 = arith.constant 40 : index
    %c0_157 = arith.constant 0 : index
    %187 = vector.load %arg1[%c0_155, %c40_156, %c0_157] : memref<1x64x4xf32, #tpu.memory_space<vmem>>, vector<1x8x4xf32>
    %188 = vector.shape_cast %187 : vector<1x8x4xf32> to vector<8x4xf32>
    %cst_158 = arith.constant 0.866666674 : f32
    %189 = vector.broadcast %cst_158 : f32 to vector<8x4xf32>
    %190 = arith.mulf %189, %188 : vector<8x4xf32>
    %c0_159 = arith.constant 0 : index
    %c48_160 = arith.constant 48 : index
    %c0_161 = arith.constant 0 : index
    %191 = vector.load %arg1[%c0_159, %c48_160, %c0_161] : memref<1x64x4xf32, #tpu.memory_space<vmem>>, vector<1x8x4xf32>
    %192 = vector.shape_cast %191 : vector<1x8x4xf32> to vector<8x4xf32>
    %cst_162 = arith.constant 0.13333334 : f32
    %193 = vector.broadcast %cst_162 : f32 to vector<8x4xf32>
    %194 = arith.mulf %193, %192 : vector<8x4xf32>
    %195 = arith.addf %190, %194 : vector<8x4xf32>
    %196 = arith.truncf %195 : vector<8x4xf32> to vector<8x4xbf16>
    %cst_163 = arith.constant dense<0.000000e+00> : vector<16x4xf32>
    %197 = tpu.matmul %6, %196, %cst_163 {dimension_numbers = #tpu.dot_dimension_numbers<[1], [0], [0], [1], [0, 0, 1, 1], [], []>} : vector<16x8xbf16>, vector<8x4xbf16>, vector<16x4xf32> -> vector<16x4xf32>
    %198 = arith.truncf %197 : vector<16x4xf32> to vector<16x4xbf16>
    %c217 = arith.constant 217 : index
    %c0_164 = arith.constant 0 : index
    %199 = vector.load %arg11[%c217, %c0_164] : memref<324x8xbf16, #tpu.memory_space<vmem>>, vector<16x4xbf16>
    tpu.vector_store %arg11[%c217, %c0_164], %198 {strides = array<i32>} : memref<324x8xbf16, #tpu.memory_space<vmem>>, vector<16x4xbf16>,
    %c0_165 = arith.constant 0 : index
    %c176 = arith.constant 176 : index
    %c0_166 = arith.constant 0 : index
    %200 = vector.load %arg2[%c0_165, %c176, %c0_166] : memref<1x256x4xf32, #tpu.memory_space<vmem>>, vector<1x16x4xf32>
    %201 = vector.shape_cast %200 : vector<1x16x4xf32> to vector<16x4xf32>
    %202 = arith.truncf %201 : vector<16x4xf32> to vector<16x4xbf16>
    %c217_167 = arith.constant 217 : index
    %c4_168 = arith.constant 4 : index
    %203 = vector.load %arg11[%c217_167, %c4_168] : memref<324x8xbf16, #tpu.memory_space<vmem>>, vector<16x4xbf16>
    tpu.vector_store %arg11[%c217_167, %c4_168], %202 {strides = array<i32>} : memref<324x8xbf16, #tpu.memory_space<vmem>>, vector<16x4xbf16>,
    %c0_169 = arith.constant 0 : index
    %c40_170 = arith.constant 40 : index
    %c0_171 = arith.constant 0 : index
    %204 = vector.load %arg1[%c0_169, %c40_170, %c0_171] : memref<1x64x4xf32, #tpu.memory_space<vmem>>, vector<1x8x4xf32>
    %205 = vector.shape_cast %204 : vector<1x8x4xf32> to vector<8x4xf32>
    %cst_172 = arith.constant 4.000000e-01 : f32
    %206 = vector.broadcast %cst_172 : f32 to vector<8x4xf32>
    %207 = arith.mulf %206, %205 : vector<8x4xf32>
    %c0_173 = arith.constant 0 : index
    %c48_174 = arith.constant 48 : index
    %c0_175 = arith.constant 0 : index
    %208 = vector.load %arg1[%c0_173, %c48_174, %c0_175] : memref<1x64x4xf32, #tpu.memory_space<vmem>>, vector<1x8x4xf32>
    %209 = vector.shape_cast %208 : vector<1x8x4xf32> to vector<8x4xf32>
    %cst_176 = arith.constant 6.000000e-01 : f32
    %210 = vector.broadcast %cst_176 : f32 to vector<8x4xf32>
    %211 = arith.mulf %210, %209 : vector<8x4xf32>
    %212 = arith.addf %207, %211 : vector<8x4xf32>
    %213 = arith.truncf %212 : vector<8x4xf32> to vector<8x4xbf16>
    %cst_177 = arith.constant dense<0.000000e+00> : vector<16x4xf32>
    %214 = tpu.matmul %6, %213, %cst_177 {dimension_numbers = #tpu.dot_dimension_numbers<[1], [0], [0], [1], [0, 0, 1, 1], [], []>} : vector<16x8xbf16>, vector<8x4xbf16>, vector<16x4xf32> -> vector<16x4xf32>
    %215 = arith.truncf %214 : vector<16x4xf32> to vector<16x4xbf16>
    %c235 = arith.constant 235 : index
    %c0_178 = arith.constant 0 : index
    %216 = vector.load %arg11[%c235, %c0_178] : memref<324x8xbf16, #tpu.memory_space<vmem>>, vector<16x4xbf16>
    tpu.vector_store %arg11[%c235, %c0_178], %215 {strides = array<i32>} : memref<324x8xbf16, #tpu.memory_space<vmem>>, vector<16x4xbf16>,
    %c0_179 = arith.constant 0 : index
    %c192 = arith.constant 192 : index
    %c0_180 = arith.constant 0 : index
    %217 = vector.load %arg2[%c0_179, %c192, %c0_180] : memref<1x256x4xf32, #tpu.memory_space<vmem>>, vector<1x16x4xf32>
    %218 = vector.shape_cast %217 : vector<1x16x4xf32> to vector<16x4xf32>
    %219 = arith.truncf %218 : vector<16x4xf32> to vector<16x4xbf16>
    %c235_181 = arith.constant 235 : index
    %c4_182 = arith.constant 4 : index
    %220 = vector.load %arg11[%c235_181, %c4_182] : memref<324x8xbf16, #tpu.memory_space<vmem>>, vector<16x4xbf16>
    tpu.vector_store %arg11[%c235_181, %c4_182], %219 {strides = array<i32>} : memref<324x8xbf16, #tpu.memory_space<vmem>>, vector<16x4xbf16>,
    %c0_183 = arith.constant 0 : index
    %c48_184 = arith.constant 48 : index
    %c0_185 = arith.constant 0 : index
    %221 = vector.load %arg1[%c0_183, %c48_184, %c0_185] : memref<1x64x4xf32, #tpu.memory_space<vmem>>, vector<1x8x4xf32>
    %222 = vector.shape_cast %221 : vector<1x8x4xf32> to vector<8x4xf32>
    %cst_186 = arith.constant 0.933333337 : f32
    %223 = vector.broadcast %cst_186 : f32 to vector<8x4xf32>
    %224 = arith.mulf %223, %222 : vector<8x4xf32>
    %c0_187 = arith.constant 0 : index
    %c56 = arith.constant 56 : index
    %c0_188 = arith.constant 0 : index
    %225 = vector.load %arg1[%c0_187, %c56, %c0_188] : memref<1x64x4xf32, #tpu.memory_space<vmem>>, vector<1x8x4xf32>
    %226 = vector.shape_cast %225 : vector<1x8x4xf32> to vector<8x4xf32>
    %cst_189 = arith.constant 0.0666666701 : f32
    %227 = vector.broadcast %cst_189 : f32 to vector<8x4xf32>
    %228 = arith.mulf %227, %226 : vector<8x4xf32>
    %229 = arith.addf %224, %228 : vector<8x4xf32>
    %230 = arith.truncf %229 : vector<8x4xf32> to vector<8x4xbf16>
    %cst_190 = arith.constant dense<0.000000e+00> : vector<16x4xf32>
    %231 = tpu.matmul %6, %230, %cst_190 {dimension_numbers = #tpu.dot_dimension_numbers<[1], [0], [0], [1], [0, 0, 1, 1], [], []>} : vector<16x8xbf16>, vector<8x4xbf16>, vector<16x4xf32> -> vector<16x4xf32>
    %232 = arith.truncf %231 : vector<16x4xf32> to vector<16x4xbf16>
    %c253 = arith.constant 253 : index
    %c0_191 = arith.constant 0 : index
    %233 = vector.load %arg11[%c253, %c0_191] : memref<324x8xbf16, #tpu.memory_space<vmem>>, vector<16x4xbf16>
    tpu.vector_store %arg11[%c253, %c0_191], %232 {strides = array<i32>} : memref<324x8xbf16, #tpu.memory_space<vmem>>, vector<16x4xbf16>,
    %c0_192 = arith.constant 0 : index
    %c208 = arith.constant 208 : index
    %c0_193 = arith.constant 0 : index
    %234 = vector.load %arg2[%c0_192, %c208, %c0_193] : memref<1x256x4xf32, #tpu.memory_space<vmem>>, vector<1x16x4xf32>
    %235 = vector.shape_cast %234 : vector<1x16x4xf32> to vector<16x4xf32>
    %236 = arith.truncf %235 : vector<16x4xf32> to vector<16x4xbf16>
    %c253_194 = arith.constant 253 : index
    %c4_195 = arith.constant 4 : index
    %237 = vector.load %arg11[%c253_194, %c4_195] : memref<324x8xbf16, #tpu.memory_space<vmem>>, vector<16x4xbf16>
    tpu.vector_store %arg11[%c253_194, %c4_195], %236 {strides = array<i32>} : memref<324x8xbf16, #tpu.memory_space<vmem>>, vector<16x4xbf16>,
    %c0_196 = arith.constant 0 : index
    %c48_197 = arith.constant 48 : index
    %c0_198 = arith.constant 0 : index
    %238 = vector.load %arg1[%c0_196, %c48_197, %c0_198] : memref<1x64x4xf32, #tpu.memory_space<vmem>>, vector<1x8x4xf32>
    %239 = vector.shape_cast %238 : vector<1x8x4xf32> to vector<8x4xf32>
    %cst_199 = arith.constant 0.466666669 : f32
    %240 = vector.broadcast %cst_199 : f32 to vector<8x4xf32>
    %241 = arith.mulf %240, %239 : vector<8x4xf32>
    %c0_200 = arith.constant 0 : index
    %c56_201 = arith.constant 56 : index
    %c0_202 = arith.constant 0 : index
    %242 = vector.load %arg1[%c0_200, %c56_201, %c0_202] : memref<1x64x4xf32, #tpu.memory_space<vmem>>, vector<1x8x4xf32>
    %243 = vector.shape_cast %242 : vector<1x8x4xf32> to vector<8x4xf32>
    %cst_203 = arith.constant 0.533333361 : f32
    %244 = vector.broadcast %cst_203 : f32 to vector<8x4xf32>
    %245 = arith.mulf %244, %243 : vector<8x4xf32>
    %246 = arith.addf %241, %245 : vector<8x4xf32>
    %247 = arith.truncf %246 : vector<8x4xf32> to vector<8x4xbf16>
    %cst_204 = arith.constant dense<0.000000e+00> : vector<16x4xf32>
    %248 = tpu.matmul %6, %247, %cst_204 {dimension_numbers = #tpu.dot_dimension_numbers<[1], [0], [0], [1], [0, 0, 1, 1], [], []>} : vector<16x8xbf16>, vector<8x4xbf16>, vector<16x4xf32> -> vector<16x4xf32>
    %249 = arith.truncf %248 : vector<16x4xf32> to vector<16x4xbf16>
    %c271 = arith.constant 271 : index
    %c0_205 = arith.constant 0 : index
    %250 = vector.load %arg11[%c271, %c0_205] : memref<324x8xbf16, #tpu.memory_space<vmem>>, vector<16x4xbf16>
    tpu.vector_store %arg11[%c271, %c0_205], %249 {strides = array<i32>} : memref<324x8xbf16, #tpu.memory_space<vmem>>, vector<16x4xbf16>,
    %c0_206 = arith.constant 0 : index
    %c224 = arith.constant 224 : index
    %c0_207 = arith.constant 0 : index
    %251 = vector.load %arg2[%c0_206, %c224, %c0_207] : memref<1x256x4xf32, #tpu.memory_space<vmem>>, vector<1x16x4xf32>
    %252 = vector.shape_cast %251 : vector<1x16x4xf32> to vector<16x4xf32>
    %253 = arith.truncf %252 : vector<16x4xf32> to vector<16x4xbf16>
    %c271_208 = arith.constant 271 : index
    %c4_209 = arith.constant 4 : index
    %254 = vector.load %arg11[%c271_208, %c4_209] : memref<324x8xbf16, #tpu.memory_space<vmem>>, vector<16x4xbf16>
    tpu.vector_store %arg11[%c271_208, %c4_209], %253 {strides = array<i32>} : memref<324x8xbf16, #tpu.memory_space<vmem>>, vector<16x4xbf16>,
    %c0_210 = arith.constant 0 : index
    %c56_211 = arith.constant 56 : index
    %c0_212 = arith.constant 0 : index
    %255 = vector.load %arg1[%c0_210, %c56_211, %c0_212] : memref<1x64x4xf32, #tpu.memory_space<vmem>>, vector<1x8x4xf32>
    %256 = vector.shape_cast %255 : vector<1x8x4xf32> to vector<8x4xf32>
    %257 = arith.truncf %256 : vector<8x4xf32> to vector<8x4xbf16>
    %cst_213 = arith.constant dense<0.000000e+00> : vector<16x4xf32>
    %258 = tpu.matmul %6, %257, %cst_213 {dimension_numbers = #tpu.dot_dimension_numbers<[1], [0], [0], [1], [0, 0, 1, 1], [], []>} : vector<16x8xbf16>, vector<8x4xbf16>, vector<16x4xf32> -> vector<16x4xf32>
    %259 = arith.truncf %258 : vector<16x4xf32> to vector<16x4xbf16>
    %c289 = arith.constant 289 : index
    %c0_214 = arith.constant 0 : index
    %260 = vector.load %arg11[%c289, %c0_214] : memref<324x8xbf16, #tpu.memory_space<vmem>>, vector<16x4xbf16>
    tpu.vector_store %arg11[%c289, %c0_214], %259 {strides = array<i32>} : memref<324x8xbf16, #tpu.memory_space<vmem>>, vector<16x4xbf16>,
    %c0_215 = arith.constant 0 : index
    %c240 = arith.constant 240 : index
    %c0_216 = arith.constant 0 : index
    %261 = vector.load %arg2[%c0_215, %c240, %c0_216] : memref<1x256x4xf32, #tpu.memory_space<vmem>>, vector<1x16x4xf32>
    %262 = vector.shape_cast %261 : vector<1x16x4xf32> to vector<16x4xf32>
    %263 = arith.truncf %262 : vector<16x4xf32> to vector<16x4xbf16>
    %c289_217 = arith.constant 289 : index
    %c4_218 = arith.constant 4 : index
    %264 = vector.load %arg11[%c289_217, %c4_218] : memref<324x8xbf16, #tpu.memory_space<vmem>>, vector<16x4xbf16>
    tpu.vector_store %arg11[%c289_217, %c4_218], %263 {strides = array<i32>} : memref<324x8xbf16, #tpu.memory_space<vmem>>, vector<16x4xbf16>,
    %c0_219 = arith.constant 0 : index
    %c0_220 = arith.constant 0 : index
    %265 = vector.load %arg11[%c0_219, %c0_220] : memref<324x8xbf16, #tpu.memory_space<vmem>>, vector<286x8xbf16>
    %c0_221 = arith.constant 0 : index
    %c0_222 = arith.constant 0 : index
    %c0_223 = arith.constant 0 : index
    %266 = vector.load %arg4[%c0_221, %c0_222, %c0_223] : memref<9x8x8xbf16, #tpu.memory_space<vmem>>, vector<1x8x8xbf16>
    %267 = vector.shape_cast %266 : vector<1x8x8xbf16> to vector<8x8xbf16>
    %cst_224 = arith.constant dense<0.000000e+00> : vector<286x8xf32>
    %268 = tpu.matmul %265, %267, %cst_224 {dimension_numbers = #tpu.dot_dimension_numbers<[1], [0], [0], [1], [0, 0, 1, 1], [], []>} : vector<286x8xbf16>, vector<8x8xbf16>, vector<286x8xf32> -> vector<286x8xf32>
    %c1 = arith.constant 1 : index
    %c0_225 = arith.constant 0 : index
    %269 = vector.load %arg11[%c1, %c0_225] : memref<324x8xbf16, #tpu.memory_space<vmem>>, vector<286x8xbf16>
    %c1_226 = arith.constant 1 : index
    %c0_227 = arith.constant 0 : index
    %c0_228 = arith.constant 0 : index
    %270 = vector.load %arg4[%c1_226, %c0_227, %c0_228] : memref<9x8x8xbf16, #tpu.memory_space<vmem>>, vector<1x8x8xbf16>
    %271 = vector.shape_cast %270 : vector<1x8x8xbf16> to vector<8x8xbf16>
    %cst_229 = arith.constant dense<0.000000e+00> : vector<286x8xf32>
    %272 = tpu.matmul %269, %271, %cst_229 {dimension_numbers = #tpu.dot_dimension_numbers<[1], [0], [0], [1], [0, 0, 1, 1], [], []>} : vector<286x8xbf16>, vector<8x8xbf16>, vector<286x8xf32> -> vector<286x8xf32>
    %273 = arith.addf %268, %272 : vector<286x8xf32>
    %c2 = arith.constant 2 : index
    %c0_230 = arith.constant 0 : index
    %274 = vector.load %arg11[%c2, %c0_230] : memref<324x8xbf16, #tpu.memory_space<vmem>>, vector<286x8xbf16>
    %c2_231 = arith.constant 2 : index
    %c0_232 = arith.constant 0 : index
    %c0_233 = arith.constant 0 : index
    %275 = vector.load %arg4[%c2_231, %c0_232, %c0_233] : memref<9x8x8xbf16, #tpu.memory_space<vmem>>, vector<1x8x8xbf16>
    %276 = vector.shape_cast %275 : vector<1x8x8xbf16> to vector<8x8xbf16>
    %cst_234 = arith.constant dense<0.000000e+00> : vector<286x8xf32>
    %277 = tpu.matmul %274, %276, %cst_234 {dimension_numbers = #tpu.dot_dimension_numbers<[1], [0], [0], [1], [0, 0, 1, 1], [], []>} : vector<286x8xbf16>, vector<8x8xbf16>, vector<286x8xf32> -> vector<286x8xf32>
    %278 = arith.addf %273, %277 : vector<286x8xf32>
    %c18 = arith.constant 18 : index
    %c0_235 = arith.constant 0 : index
    %279 = vector.load %arg11[%c18, %c0_235] : memref<324x8xbf16, #tpu.memory_space<vmem>>, vector<286x8xbf16>
    %c3 = arith.constant 3 : index
    %c0_236 = arith.constant 0 : index
    %c0_237 = arith.constant 0 : index
    %280 = vector.load %arg4[%c3, %c0_236, %c0_237] : memref<9x8x8xbf16, #tpu.memory_space<vmem>>, vector<1x8x8xbf16>
    %281 = vector.shape_cast %280 : vector<1x8x8xbf16> to vector<8x8xbf16>
    %cst_238 = arith.constant dense<0.000000e+00> : vector<286x8xf32>
    %282 = tpu.matmul %279, %281, %cst_238 {dimension_numbers = #tpu.dot_dimension_numbers<[1], [0], [0], [1], [0, 0, 1, 1], [], []>} : vector<286x8xbf16>, vector<8x8xbf16>, vector<286x8xf32> -> vector<286x8xf32>
    %283 = arith.addf %278, %282 : vector<286x8xf32>
    %c19_239 = arith.constant 19 : index
    %c0_240 = arith.constant 0 : index
    %284 = vector.load %arg11[%c19_239, %c0_240] : memref<324x8xbf16, #tpu.memory_space<vmem>>, vector<286x8xbf16>
    %c4_241 = arith.constant 4 : index
    %c0_242 = arith.constant 0 : index
    %c0_243 = arith.constant 0 : index
    %285 = vector.load %arg4[%c4_241, %c0_242, %c0_243] : memref<9x8x8xbf16, #tpu.memory_space<vmem>>, vector<1x8x8xbf16>
    %286 = vector.shape_cast %285 : vector<1x8x8xbf16> to vector<8x8xbf16>
    %cst_244 = arith.constant dense<0.000000e+00> : vector<286x8xf32>
    %287 = tpu.matmul %284, %286, %cst_244 {dimension_numbers = #tpu.dot_dimension_numbers<[1], [0], [0], [1], [0, 0, 1, 1], [], []>} : vector<286x8xbf16>, vector<8x8xbf16>, vector<286x8xf32> -> vector<286x8xf32>
    %288 = arith.addf %283, %287 : vector<286x8xf32>
    %c20 = arith.constant 20 : index
    %c0_245 = arith.constant 0 : index
    %289 = vector.load %arg11[%c20, %c0_245] : memref<324x8xbf16, #tpu.memory_space<vmem>>, vector<286x8xbf16>
    %c5 = arith.constant 5 : index
    %c0_246 = arith.constant 0 : index
    %c0_247 = arith.constant 0 : index
    %290 = vector.load %arg4[%c5, %c0_246, %c0_247] : memref<9x8x8xbf16, #tpu.memory_space<vmem>>, vector<1x8x8xbf16>
    %291 = vector.shape_cast %290 : vector<1x8x8xbf16> to vector<8x8xbf16>
    %cst_248 = arith.constant dense<0.000000e+00> : vector<286x8xf32>
    %292 = tpu.matmul %289, %291, %cst_248 {dimension_numbers = #tpu.dot_dimension_numbers<[1], [0], [0], [1], [0, 0, 1, 1], [], []>} : vector<286x8xbf16>, vector<8x8xbf16>, vector<286x8xf32> -> vector<286x8xf32>
    %293 = arith.addf %288, %292 : vector<286x8xf32>
    %c36 = arith.constant 36 : index
    %c0_249 = arith.constant 0 : index
    %294 = vector.load %arg11[%c36, %c0_249] : memref<324x8xbf16, #tpu.memory_space<vmem>>, vector<286x8xbf16>
    %c6 = arith.constant 6 : index
    %c0_250 = arith.constant 0 : index
    %c0_251 = arith.constant 0 : index
    %295 = vector.load %arg4[%c6, %c0_250, %c0_251] : memref<9x8x8xbf16, #tpu.memory_space<vmem>>, vector<1x8x8xbf16>
    %296 = vector.shape_cast %295 : vector<1x8x8xbf16> to vector<8x8xbf16>
    %cst_252 = arith.constant dense<0.000000e+00> : vector<286x8xf32>
    %297 = tpu.matmul %294, %296, %cst_252 {dimension_numbers = #tpu.dot_dimension_numbers<[1], [0], [0], [1], [0, 0, 1, 1], [], []>} : vector<286x8xbf16>, vector<8x8xbf16>, vector<286x8xf32> -> vector<286x8xf32>
    %298 = arith.addf %293, %297 : vector<286x8xf32>
    %c37_253 = arith.constant 37 : index
    %c0_254 = arith.constant 0 : index
    %299 = vector.load %arg11[%c37_253, %c0_254] : memref<324x8xbf16, #tpu.memory_space<vmem>>, vector<286x8xbf16>
    %c7 = arith.constant 7 : index
    %c0_255 = arith.constant 0 : index
    %c0_256 = arith.constant 0 : index
    %300 = vector.load %arg4[%c7, %c0_255, %c0_256] : memref<9x8x8xbf16, #tpu.memory_space<vmem>>, vector<1x8x8xbf16>
    %301 = vector.shape_cast %300 : vector<1x8x8xbf16> to vector<8x8xbf16>
    %cst_257 = arith.constant dense<0.000000e+00> : vector<286x8xf32>
    %302 = tpu.matmul %299, %301, %cst_257 {dimension_numbers = #tpu.dot_dimension_numbers<[1], [0], [0], [1], [0, 0, 1, 1], [], []>} : vector<286x8xbf16>, vector<8x8xbf16>, vector<286x8xf32> -> vector<286x8xf32>
    %303 = arith.addf %298, %302 : vector<286x8xf32>
    %c38 = arith.constant 38 : index
    %c0_258 = arith.constant 0 : index
    %304 = vector.load %arg11[%c38, %c0_258] : memref<324x8xbf16, #tpu.memory_space<vmem>>, vector<286x8xbf16>
    %c8_259 = arith.constant 8 : index
    %c0_260 = arith.constant 0 : index
    %c0_261 = arith.constant 0 : index
    %305 = vector.load %arg4[%c8_259, %c0_260, %c0_261] : memref<9x8x8xbf16, #tpu.memory_space<vmem>>, vector<1x8x8xbf16>
    %306 = vector.shape_cast %305 : vector<1x8x8xbf16> to vector<8x8xbf16>
    %cst_262 = arith.constant dense<0.000000e+00> : vector<286x8xf32>
    %307 = tpu.matmul %304, %306, %cst_262 {dimension_numbers = #tpu.dot_dimension_numbers<[1], [0], [0], [1], [0, 0, 1, 1], [], []>} : vector<286x8xbf16>, vector<8x8xbf16>, vector<286x8xf32> -> vector<286x8xf32>
    %308 = arith.addf %303, %307 : vector<286x8xf32>
    %c0_263 = arith.constant 0 : index
    %c0_264 = arith.constant 0 : index
    %309 = vector.load %arg5[%c0_263, %c0_264] : memref<1x8xf32, #tpu.memory_space<vmem>>, vector<1x8xf32>
    %310 = vector.broadcast %309 : vector<1x8xf32> to vector<286x8xf32>
    %311 = arith.addf %308, %310 : vector<286x8xf32>
    %cst_265 = arith.constant 0.000000e+00 : f32
    %312 = vector.broadcast %cst_265 : f32 to vector<286x8xf32>
    %313 = arith.maximumf %311, %312 : vector<286x8xf32>
    %314 = vector.extract_strided_slice %313 {offsets = [0, 0], sizes = [16, 8], strides = [1, 1]} : vector<286x8xf32> to vector<16x8xf32>
    %315 = arith.truncf %314 : vector<16x8xf32> to vector<16x8xbf16>
    %c19_266 = arith.constant 19 : index
    %c0_267 = arith.constant 0 : index
    %316 = vector.load %arg12[%c19_266, %c0_267] : memref<324x8xbf16, #tpu.memory_space<vmem>>, vector<16x8xbf16>
    tpu.vector_store %arg12[%c19_266, %c0_267], %315 {strides = array<i32>} : memref<324x8xbf16, #tpu.memory_space<vmem>>, vector<16x8xbf16>,
    %317 = vector.extract_strided_slice %313 {offsets = [18, 0], sizes = [16, 8], strides = [1, 1]} : vector<286x8xf32> to vector<16x8xf32>
    %318 = arith.truncf %317 : vector<16x8xf32> to vector<16x8xbf16>
    %c37_268 = arith.constant 37 : index
    %c0_269 = arith.constant 0 : index
    %319 = vector.load %arg12[%c37_268, %c0_269] : memref<324x8xbf16, #tpu.memory_space<vmem>>, vector<16x8xbf16>
    tpu.vector_store %arg12[%c37_268, %c0_269], %318 {strides = array<i32>} : memref<324x8xbf16, #tpu.memory_space<vmem>>, vector<16x8xbf16>,
    %320 = vector.extract_strided_slice %313 {offsets = [36, 0], sizes = [16, 8], strides = [1, 1]} : vector<286x8xf32> to vector<16x8xf32>
    %321 = arith.truncf %320 : vector<16x8xf32> to vector<16x8xbf16>
    %c55_270 = arith.constant 55 : index
    %c0_271 = arith.constant 0 : index
    %322 = vector.load %arg12[%c55_270, %c0_271] : memref<324x8xbf16, #tpu.memory_space<vmem>>, vector<16x8xbf16>
    tpu.vector_store %arg12[%c55_270, %c0_271], %321 {strides = array<i32>} : memref<324x8xbf16, #tpu.memory_space<vmem>>, vector<16x8xbf16>,
    %323 = vector.extract_strided_slice %313 {offsets = [54, 0], sizes = [16, 8], strides = [1, 1]} : vector<286x8xf32> to vector<16x8xf32>
    %324 = arith.truncf %323 : vector<16x8xf32> to vector<16x8xbf16>
    %c73_272 = arith.constant 73 : index
    %c0_273 = arith.constant 0 : index
    %325 = vector.load %arg12[%c73_272, %c0_273] : memref<324x8xbf16, #tpu.memory_space<vmem>>, vector<16x8xbf16>
    tpu.vector_store %arg12[%c73_272, %c0_273], %324 {strides = array<i32>} : memref<324x8xbf16, #tpu.memory_space<vmem>>, vector<16x8xbf16>,
    %326 = vector.extract_strided_slice %313 {offsets = [72, 0], sizes = [16, 8], strides = [1, 1]} : vector<286x8xf32> to vector<16x8xf32>
    %327 = arith.truncf %326 : vector<16x8xf32> to vector<16x8xbf16>
    %c91_274 = arith.constant 91 : index
    %c0_275 = arith.constant 0 : index
    %328 = vector.load %arg12[%c91_274, %c0_275] : memref<324x8xbf16, #tpu.memory_space<vmem>>, vector<16x8xbf16>
    tpu.vector_store %arg12[%c91_274, %c0_275], %327 {strides = array<i32>} : memref<324x8xbf16, #tpu.memory_space<vmem>>, vector<16x8xbf16>,
    %329 = vector.extract_strided_slice %313 {offsets = [90, 0], sizes = [16, 8], strides = [1, 1]} : vector<286x8xf32> to vector<16x8xf32>
    %330 = arith.truncf %329 : vector<16x8xf32> to vector<16x8xbf16>
    %c109_276 = arith.constant 109 : index
    %c0_277 = arith.constant 0 : index
    %331 = vector.load %arg12[%c109_276, %c0_277] : memref<324x8xbf16, #tpu.memory_space<vmem>>, vector<16x8xbf16>
    tpu.vector_store %arg12[%c109_276, %c0_277], %330 {strides = array<i32>} : memref<324x8xbf16, #tpu.memory_space<vmem>>, vector<16x8xbf16>,
    %332 = vector.extract_strided_slice %313 {offsets = [108, 0], sizes = [16, 8], strides = [1, 1]} : vector<286x8xf32> to vector<16x8xf32>
    %333 = arith.truncf %332 : vector<16x8xf32> to vector<16x8xbf16>
    %c127_278 = arith.constant 127 : index
    %c0_279 = arith.constant 0 : index
    %334 = vector.load %arg12[%c127_278, %c0_279] : memref<324x8xbf16, #tpu.memory_space<vmem>>, vector<16x8xbf16>
    tpu.vector_store %arg12[%c127_278, %c0_279], %333 {strides = array<i32>} : memref<324x8xbf16, #tpu.memory_space<vmem>>, vector<16x8xbf16>,
    %335 = vector.extract_strided_slice %313 {offsets = [126, 0], sizes = [16, 8], strides = [1, 1]} : vector<286x8xf32> to vector<16x8xf32>
    %336 = arith.truncf %335 : vector<16x8xf32> to vector<16x8xbf16>
    %c145_280 = arith.constant 145 : index
    %c0_281 = arith.constant 0 : index
    %337 = vector.load %arg12[%c145_280, %c0_281] : memref<324x8xbf16, #tpu.memory_space<vmem>>, vector<16x8xbf16>
    tpu.vector_store %arg12[%c145_280, %c0_281], %336 {strides = array<i32>} : memref<324x8xbf16, #tpu.memory_space<vmem>>, vector<16x8xbf16>,
    %338 = vector.extract_strided_slice %313 {offsets = [144, 0], sizes = [16, 8], strides = [1, 1]} : vector<286x8xf32> to vector<16x8xf32>
    %339 = arith.truncf %338 : vector<16x8xf32> to vector<16x8xbf16>
    %c163_282 = arith.constant 163 : index
    %c0_283 = arith.constant 0 : index
    %340 = vector.load %arg12[%c163_282, %c0_283] : memref<324x8xbf16, #tpu.memory_space<vmem>>, vector<16x8xbf16>
    tpu.vector_store %arg12[%c163_282, %c0_283], %339 {strides = array<i32>} : memref<324x8xbf16, #tpu.memory_space<vmem>>, vector<16x8xbf16>,
    %341 = vector.extract_strided_slice %313 {offsets = [162, 0], sizes = [16, 8], strides = [1, 1]} : vector<286x8xf32> to vector<16x8xf32>
    %342 = arith.truncf %341 : vector<16x8xf32> to vector<16x8xbf16>
    %c181_284 = arith.constant 181 : index
    %c0_285 = arith.constant 0 : index
    %343 = vector.load %arg12[%c181_284, %c0_285] : memref<324x8xbf16, #tpu.memory_space<vmem>>, vector<16x8xbf16>
    tpu.vector_store %arg12[%c181_284, %c0_285], %342 {strides = array<i32>} : memref<324x8xbf16, #tpu.memory_space<vmem>>, vector<16x8xbf16>,
    %344 = vector.extract_strided_slice %313 {offsets = [180, 0], sizes = [16, 8], strides = [1, 1]} : vector<286x8xf32> to vector<16x8xf32>
    %345 = arith.truncf %344 : vector<16x8xf32> to vector<16x8xbf16>
    %c199_286 = arith.constant 199 : index
    %c0_287 = arith.constant 0 : index
    %346 = vector.load %arg12[%c199_286, %c0_287] : memref<324x8xbf16, #tpu.memory_space<vmem>>, vector<16x8xbf16>
    tpu.vector_store %arg12[%c199_286, %c0_287], %345 {strides = array<i32>} : memref<324x8xbf16, #tpu.memory_space<vmem>>, vector<16x8xbf16>,
    %347 = vector.extract_strided_slice %313 {offsets = [198, 0], sizes = [16, 8], strides = [1, 1]} : vector<286x8xf32> to vector<16x8xf32>
    %348 = arith.truncf %347 : vector<16x8xf32> to vector<16x8xbf16>
    %c217_288 = arith.constant 217 : index
    %c0_289 = arith.constant 0 : index
    %349 = vector.load %arg12[%c217_288, %c0_289] : memref<324x8xbf16, #tpu.memory_space<vmem>>, vector<16x8xbf16>
    tpu.vector_store %arg12[%c217_288, %c0_289], %348 {strides = array<i32>} : memref<324x8xbf16, #tpu.memory_space<vmem>>, vector<16x8xbf16>,
    %350 = vector.extract_strided_slice %313 {offsets = [216, 0], sizes = [16, 8], strides = [1, 1]} : vector<286x8xf32> to vector<16x8xf32>
    %351 = arith.truncf %350 : vector<16x8xf32> to vector<16x8xbf16>
    %c235_290 = arith.constant 235 : index
    %c0_291 = arith.constant 0 : index
    %352 = vector.load %arg12[%c235_290, %c0_291] : memref<324x8xbf16, #tpu.memory_space<vmem>>, vector<16x8xbf16>
    tpu.vector_store %arg12[%c235_290, %c0_291], %351 {strides = array<i32>} : memref<324x8xbf16, #tpu.memory_space<vmem>>, vector<16x8xbf16>,
    %353 = vector.extract_strided_slice %313 {offsets = [234, 0], sizes = [16, 8], strides = [1, 1]} : vector<286x8xf32> to vector<16x8xf32>
    %354 = arith.truncf %353 : vector<16x8xf32> to vector<16x8xbf16>
    %c253_292 = arith.constant 253 : index
    %c0_293 = arith.constant 0 : index
    %355 = vector.load %arg12[%c253_292, %c0_293] : memref<324x8xbf16, #tpu.memory_space<vmem>>, vector<16x8xbf16>
    tpu.vector_store %arg12[%c253_292, %c0_293], %354 {strides = array<i32>} : memref<324x8xbf16, #tpu.memory_space<vmem>>, vector<16x8xbf16>,
    %356 = vector.extract_strided_slice %313 {offsets = [252, 0], sizes = [16, 8], strides = [1, 1]} : vector<286x8xf32> to vector<16x8xf32>
    %357 = arith.truncf %356 : vector<16x8xf32> to vector<16x8xbf16>
    %c271_294 = arith.constant 271 : index
    %c0_295 = arith.constant 0 : index
    %358 = vector.load %arg12[%c271_294, %c0_295] : memref<324x8xbf16, #tpu.memory_space<vmem>>, vector<16x8xbf16>
    tpu.vector_store %arg12[%c271_294, %c0_295], %357 {strides = array<i32>} : memref<324x8xbf16, #tpu.memory_space<vmem>>, vector<16x8xbf16>,
    %359 = vector.extract_strided_slice %313 {offsets = [270, 0], sizes = [16, 8], strides = [1, 1]} : vector<286x8xf32> to vector<16x8xf32>
    %360 = arith.truncf %359 : vector<16x8xf32> to vector<16x8xbf16>
    %c289_296 = arith.constant 289 : index
    %c0_297 = arith.constant 0 : index
    %361 = vector.load %arg12[%c289_296, %c0_297] : memref<324x8xbf16, #tpu.memory_space<vmem>>, vector<16x8xbf16>
    tpu.vector_store %arg12[%c289_296, %c0_297], %360 {strides = array<i32>} : memref<324x8xbf16, #tpu.memory_space<vmem>>, vector<16x8xbf16>,
    %c0_298 = arith.constant 0 : index
    %c0_299 = arith.constant 0 : index
    %362 = vector.load %arg12[%c0_298, %c0_299] : memref<324x8xbf16, #tpu.memory_space<vmem>>, vector<286x8xbf16>
    %c0_300 = arith.constant 0 : index
    %c0_301 = arith.constant 0 : index
    %c0_302 = arith.constant 0 : index
    %363 = vector.load %arg6[%c0_300, %c0_301, %c0_302] : memref<9x8x8xbf16, #tpu.memory_space<vmem>>, vector<1x8x8xbf16>
    %364 = vector.shape_cast %363 : vector<1x8x8xbf16> to vector<8x8xbf16>
    %cst_303 = arith.constant dense<0.000000e+00> : vector<286x8xf32>
    %365 = tpu.matmul %362, %364, %cst_303 {dimension_numbers = #tpu.dot_dimension_numbers<[1], [0], [0], [1], [0, 0, 1, 1], [], []>} : vector<286x8xbf16>, vector<8x8xbf16>, vector<286x8xf32> -> vector<286x8xf32>
    %c1_304 = arith.constant 1 : index
    %c0_305 = arith.constant 0 : index
    %366 = vector.load %arg12[%c1_304, %c0_305] : memref<324x8xbf16, #tpu.memory_space<vmem>>, vector<286x8xbf16>
    %c1_306 = arith.constant 1 : index
    %c0_307 = arith.constant 0 : index
    %c0_308 = arith.constant 0 : index
    %367 = vector.load %arg6[%c1_306, %c0_307, %c0_308] : memref<9x8x8xbf16, #tpu.memory_space<vmem>>, vector<1x8x8xbf16>
    %368 = vector.shape_cast %367 : vector<1x8x8xbf16> to vector<8x8xbf16>
    %cst_309 = arith.constant dense<0.000000e+00> : vector<286x8xf32>
    %369 = tpu.matmul %366, %368, %cst_309 {dimension_numbers = #tpu.dot_dimension_numbers<[1], [0], [0], [1], [0, 0, 1, 1], [], []>} : vector<286x8xbf16>, vector<8x8xbf16>, vector<286x8xf32> -> vector<286x8xf32>
    %370 = arith.addf %365, %369 : vector<286x8xf32>
    %c2_310 = arith.constant 2 : index
    %c0_311 = arith.constant 0 : index
    %371 = vector.load %arg12[%c2_310, %c0_311] : memref<324x8xbf16, #tpu.memory_space<vmem>>, vector<286x8xbf16>
    %c2_312 = arith.constant 2 : index
    %c0_313 = arith.constant 0 : index
    %c0_314 = arith.constant 0 : index
    %372 = vector.load %arg6[%c2_312, %c0_313, %c0_314] : memref<9x8x8xbf16, #tpu.memory_space<vmem>>, vector<1x8x8xbf16>
    %373 = vector.shape_cast %372 : vector<1x8x8xbf16> to vector<8x8xbf16>
    %cst_315 = arith.constant dense<0.000000e+00> : vector<286x8xf32>
    %374 = tpu.matmul %371, %373, %cst_315 {dimension_numbers = #tpu.dot_dimension_numbers<[1], [0], [0], [1], [0, 0, 1, 1], [], []>} : vector<286x8xbf16>, vector<8x8xbf16>, vector<286x8xf32> -> vector<286x8xf32>
    %375 = arith.addf %370, %374 : vector<286x8xf32>
    %c18_316 = arith.constant 18 : index
    %c0_317 = arith.constant 0 : index
    %376 = vector.load %arg12[%c18_316, %c0_317] : memref<324x8xbf16, #tpu.memory_space<vmem>>, vector<286x8xbf16>
    %c3_318 = arith.constant 3 : index
    %c0_319 = arith.constant 0 : index
    %c0_320 = arith.constant 0 : index
    %377 = vector.load %arg6[%c3_318, %c0_319, %c0_320] : memref<9x8x8xbf16, #tpu.memory_space<vmem>>, vector<1x8x8xbf16>
    %378 = vector.shape_cast %377 : vector<1x8x8xbf16> to vector<8x8xbf16>
    %cst_321 = arith.constant dense<0.000000e+00> : vector<286x8xf32>
    %379 = tpu.matmul %376, %378, %cst_321 {dimension_numbers = #tpu.dot_dimension_numbers<[1], [0], [0], [1], [0, 0, 1, 1], [], []>} : vector<286x8xbf16>, vector<8x8xbf16>, vector<286x8xf32> -> vector<286x8xf32>
    %380 = arith.addf %375, %379 : vector<286x8xf32>
    %c19_322 = arith.constant 19 : index
    %c0_323 = arith.constant 0 : index
    %381 = vector.load %arg12[%c19_322, %c0_323] : memref<324x8xbf16, #tpu.memory_space<vmem>>, vector<286x8xbf16>
    %c4_324 = arith.constant 4 : index
    %c0_325 = arith.constant 0 : index
    %c0_326 = arith.constant 0 : index
    %382 = vector.load %arg6[%c4_324, %c0_325, %c0_326] : memref<9x8x8xbf16, #tpu.memory_space<vmem>>, vector<1x8x8xbf16>
    %383 = vector.shape_cast %382 : vector<1x8x8xbf16> to vector<8x8xbf16>
    %cst_327 = arith.constant dense<0.000000e+00> : vector<286x8xf32>
    %384 = tpu.matmul %381, %383, %cst_327 {dimension_numbers = #tpu.dot_dimension_numbers<[1], [0], [0], [1], [0, 0, 1, 1], [], []>} : vector<286x8xbf16>, vector<8x8xbf16>, vector<286x8xf32> -> vector<286x8xf32>
    %385 = arith.addf %380, %384 : vector<286x8xf32>
    %c20_328 = arith.constant 20 : index
    %c0_329 = arith.constant 0 : index
    %386 = vector.load %arg12[%c20_328, %c0_329] : memref<324x8xbf16, #tpu.memory_space<vmem>>, vector<286x8xbf16>
    %c5_330 = arith.constant 5 : index
    %c0_331 = arith.constant 0 : index
    %c0_332 = arith.constant 0 : index
    %387 = vector.load %arg6[%c5_330, %c0_331, %c0_332] : memref<9x8x8xbf16, #tpu.memory_space<vmem>>, vector<1x8x8xbf16>
    %388 = vector.shape_cast %387 : vector<1x8x8xbf16> to vector<8x8xbf16>
    %cst_333 = arith.constant dense<0.000000e+00> : vector<286x8xf32>
    %389 = tpu.matmul %386, %388, %cst_333 {dimension_numbers = #tpu.dot_dimension_numbers<[1], [0], [0], [1], [0, 0, 1, 1], [], []>} : vector<286x8xbf16>, vector<8x8xbf16>, vector<286x8xf32> -> vector<286x8xf32>
    %390 = arith.addf %385, %389 : vector<286x8xf32>
    %c36_334 = arith.constant 36 : index
    %c0_335 = arith.constant 0 : index
    %391 = vector.load %arg12[%c36_334, %c0_335] : memref<324x8xbf16, #tpu.memory_space<vmem>>, vector<286x8xbf16>
    %c6_336 = arith.constant 6 : index
    %c0_337 = arith.constant 0 : index
    %c0_338 = arith.constant 0 : index
    %392 = vector.load %arg6[%c6_336, %c0_337, %c0_338] : memref<9x8x8xbf16, #tpu.memory_space<vmem>>, vector<1x8x8xbf16>
    %393 = vector.shape_cast %392 : vector<1x8x8xbf16> to vector<8x8xbf16>
    %cst_339 = arith.constant dense<0.000000e+00> : vector<286x8xf32>
    %394 = tpu.matmul %391, %393, %cst_339 {dimension_numbers = #tpu.dot_dimension_numbers<[1], [0], [0], [1], [0, 0, 1, 1], [], []>} : vector<286x8xbf16>, vector<8x8xbf16>, vector<286x8xf32> -> vector<286x8xf32>
    %395 = arith.addf %390, %394 : vector<286x8xf32>
    %c37_340 = arith.constant 37 : index
    %c0_341 = arith.constant 0 : index
    %396 = vector.load %arg12[%c37_340, %c0_341] : memref<324x8xbf16, #tpu.memory_space<vmem>>, vector<286x8xbf16>
    %c7_342 = arith.constant 7 : index
    %c0_343 = arith.constant 0 : index
    %c0_344 = arith.constant 0 : index
    %397 = vector.load %arg6[%c7_342, %c0_343, %c0_344] : memref<9x8x8xbf16, #tpu.memory_space<vmem>>, vector<1x8x8xbf16>
    %398 = vector.shape_cast %397 : vector<1x8x8xbf16> to vector<8x8xbf16>
    %cst_345 = arith.constant dense<0.000000e+00> : vector<286x8xf32>
    %399 = tpu.matmul %396, %398, %cst_345 {dimension_numbers = #tpu.dot_dimension_numbers<[1], [0], [0], [1], [0, 0, 1, 1], [], []>} : vector<286x8xbf16>, vector<8x8xbf16>, vector<286x8xf32> -> vector<286x8xf32>
    %400 = arith.addf %395, %399 : vector<286x8xf32>
    %c38_346 = arith.constant 38 : index
    %c0_347 = arith.constant 0 : index
    %401 = vector.load %arg12[%c38_346, %c0_347] : memref<324x8xbf16, #tpu.memory_space<vmem>>, vector<286x8xbf16>
    %c8_348 = arith.constant 8 : index
    %c0_349 = arith.constant 0 : index
    %c0_350 = arith.constant 0 : index
    %402 = vector.load %arg6[%c8_348, %c0_349, %c0_350] : memref<9x8x8xbf16, #tpu.memory_space<vmem>>, vector<1x8x8xbf16>
    %403 = vector.shape_cast %402 : vector<1x8x8xbf16> to vector<8x8xbf16>
    %cst_351 = arith.constant dense<0.000000e+00> : vector<286x8xf32>
    %404 = tpu.matmul %401, %403, %cst_351 {dimension_numbers = #tpu.dot_dimension_numbers<[1], [0], [0], [1], [0, 0, 1, 1], [], []>} : vector<286x8xbf16>, vector<8x8xbf16>, vector<286x8xf32> -> vector<286x8xf32>
    %405 = arith.addf %400, %404 : vector<286x8xf32>
    %c0_352 = arith.constant 0 : index
    %c0_353 = arith.constant 0 : index
    %406 = vector.load %arg7[%c0_352, %c0_353] : memref<1x8xf32, #tpu.memory_space<vmem>>, vector<1x8xf32>
    %407 = vector.broadcast %406 : vector<1x8xf32> to vector<286x8xf32>
    %408 = arith.addf %405, %407 : vector<286x8xf32>
    %cst_354 = arith.constant 0.000000e+00 : f32
    %409 = vector.broadcast %cst_354 : f32 to vector<286x8xf32>
    %410 = arith.maximumf %408, %409 : vector<286x8xf32>
    %411 = vector.extract_strided_slice %410 {offsets = [0, 0], sizes = [16, 8], strides = [1, 1]} : vector<286x8xf32> to vector<16x8xf32>
    %412 = arith.truncf %411 : vector<16x8xf32> to vector<16x8xbf16>
    %c19_355 = arith.constant 19 : index
    %c0_356 = arith.constant 0 : index
    %413 = vector.load %arg13[%c19_355, %c0_356] : memref<324x8xbf16, #tpu.memory_space<vmem>>, vector<16x8xbf16>
    tpu.vector_store %arg13[%c19_355, %c0_356], %412 {strides = array<i32>} : memref<324x8xbf16, #tpu.memory_space<vmem>>, vector<16x8xbf16>,
    %414 = vector.extract_strided_slice %410 {offsets = [18, 0], sizes = [16, 8], strides = [1, 1]} : vector<286x8xf32> to vector<16x8xf32>
    %415 = arith.truncf %414 : vector<16x8xf32> to vector<16x8xbf16>
    %c37_357 = arith.constant 37 : index
    %c0_358 = arith.constant 0 : index
    %416 = vector.load %arg13[%c37_357, %c0_358] : memref<324x8xbf16, #tpu.memory_space<vmem>>, vector<16x8xbf16>
    tpu.vector_store %arg13[%c37_357, %c0_358], %415 {strides = array<i32>} : memref<324x8xbf16, #tpu.memory_space<vmem>>, vector<16x8xbf16>,
    %417 = vector.extract_strided_slice %410 {offsets = [36, 0], sizes = [16, 8], strides = [1, 1]} : vector<286x8xf32> to vector<16x8xf32>
    %418 = arith.truncf %417 : vector<16x8xf32> to vector<16x8xbf16>
    %c55_359 = arith.constant 55 : index
    %c0_360 = arith.constant 0 : index
    %419 = vector.load %arg13[%c55_359, %c0_360] : memref<324x8xbf16, #tpu.memory_space<vmem>>, vector<16x8xbf16>
    tpu.vector_store %arg13[%c55_359, %c0_360], %418 {strides = array<i32>} : memref<324x8xbf16, #tpu.memory_space<vmem>>, vector<16x8xbf16>,
    %420 = vector.extract_strided_slice %410 {offsets = [54, 0], sizes = [16, 8], strides = [1, 1]} : vector<286x8xf32> to vector<16x8xf32>
    %421 = arith.truncf %420 : vector<16x8xf32> to vector<16x8xbf16>
    %c73_361 = arith.constant 73 : index
    %c0_362 = arith.constant 0 : index
    %422 = vector.load %arg13[%c73_361, %c0_362] : memref<324x8xbf16, #tpu.memory_space<vmem>>, vector<16x8xbf16>
    tpu.vector_store %arg13[%c73_361, %c0_362], %421 {strides = array<i32>} : memref<324x8xbf16, #tpu.memory_space<vmem>>, vector<16x8xbf16>,
    %423 = vector.extract_strided_slice %410 {offsets = [72, 0], sizes = [16, 8], strides = [1, 1]} : vector<286x8xf32> to vector<16x8xf32>
    %424 = arith.truncf %423 : vector<16x8xf32> to vector<16x8xbf16>
    %c91_363 = arith.constant 91 : index
    %c0_364 = arith.constant 0 : index
    %425 = vector.load %arg13[%c91_363, %c0_364] : memref<324x8xbf16, #tpu.memory_space<vmem>>, vector<16x8xbf16>
    tpu.vector_store %arg13[%c91_363, %c0_364], %424 {strides = array<i32>} : memref<324x8xbf16, #tpu.memory_space<vmem>>, vector<16x8xbf16>,
    %426 = vector.extract_strided_slice %410 {offsets = [90, 0], sizes = [16, 8], strides = [1, 1]} : vector<286x8xf32> to vector<16x8xf32>
    %427 = arith.truncf %426 : vector<16x8xf32> to vector<16x8xbf16>
    %c109_365 = arith.constant 109 : index
    %c0_366 = arith.constant 0 : index
    %428 = vector.load %arg13[%c109_365, %c0_366] : memref<324x8xbf16, #tpu.memory_space<vmem>>, vector<16x8xbf16>
    tpu.vector_store %arg13[%c109_365, %c0_366], %427 {strides = array<i32>} : memref<324x8xbf16, #tpu.memory_space<vmem>>, vector<16x8xbf16>,
    %429 = vector.extract_strided_slice %410 {offsets = [108, 0], sizes = [16, 8], strides = [1, 1]} : vector<286x8xf32> to vector<16x8xf32>
    %430 = arith.truncf %429 : vector<16x8xf32> to vector<16x8xbf16>
    %c127_367 = arith.constant 127 : index
    %c0_368 = arith.constant 0 : index
    %431 = vector.load %arg13[%c127_367, %c0_368] : memref<324x8xbf16, #tpu.memory_space<vmem>>, vector<16x8xbf16>
    tpu.vector_store %arg13[%c127_367, %c0_368], %430 {strides = array<i32>} : memref<324x8xbf16, #tpu.memory_space<vmem>>, vector<16x8xbf16>,
    %432 = vector.extract_strided_slice %410 {offsets = [126, 0], sizes = [16, 8], strides = [1, 1]} : vector<286x8xf32> to vector<16x8xf32>
    %433 = arith.truncf %432 : vector<16x8xf32> to vector<16x8xbf16>
    %c145_369 = arith.constant 145 : index
    %c0_370 = arith.constant 0 : index
    %434 = vector.load %arg13[%c145_369, %c0_370] : memref<324x8xbf16, #tpu.memory_space<vmem>>, vector<16x8xbf16>
    tpu.vector_store %arg13[%c145_369, %c0_370], %433 {strides = array<i32>} : memref<324x8xbf16, #tpu.memory_space<vmem>>, vector<16x8xbf16>,
    %435 = vector.extract_strided_slice %410 {offsets = [144, 0], sizes = [16, 8], strides = [1, 1]} : vector<286x8xf32> to vector<16x8xf32>
    %436 = arith.truncf %435 : vector<16x8xf32> to vector<16x8xbf16>
    %c163_371 = arith.constant 163 : index
    %c0_372 = arith.constant 0 : index
    %437 = vector.load %arg13[%c163_371, %c0_372] : memref<324x8xbf16, #tpu.memory_space<vmem>>, vector<16x8xbf16>
    tpu.vector_store %arg13[%c163_371, %c0_372], %436 {strides = array<i32>} : memref<324x8xbf16, #tpu.memory_space<vmem>>, vector<16x8xbf16>,
    %438 = vector.extract_strided_slice %410 {offsets = [162, 0], sizes = [16, 8], strides = [1, 1]} : vector<286x8xf32> to vector<16x8xf32>
    %439 = arith.truncf %438 : vector<16x8xf32> to vector<16x8xbf16>
    %c181_373 = arith.constant 181 : index
    %c0_374 = arith.constant 0 : index
    %440 = vector.load %arg13[%c181_373, %c0_374] : memref<324x8xbf16, #tpu.memory_space<vmem>>, vector<16x8xbf16>
    tpu.vector_store %arg13[%c181_373, %c0_374], %439 {strides = array<i32>} : memref<324x8xbf16, #tpu.memory_space<vmem>>, vector<16x8xbf16>,
    %441 = vector.extract_strided_slice %410 {offsets = [180, 0], sizes = [16, 8], strides = [1, 1]} : vector<286x8xf32> to vector<16x8xf32>
    %442 = arith.truncf %441 : vector<16x8xf32> to vector<16x8xbf16>
    %c199_375 = arith.constant 199 : index
    %c0_376 = arith.constant 0 : index
    %443 = vector.load %arg13[%c199_375, %c0_376] : memref<324x8xbf16, #tpu.memory_space<vmem>>, vector<16x8xbf16>
    tpu.vector_store %arg13[%c199_375, %c0_376], %442 {strides = array<i32>} : memref<324x8xbf16, #tpu.memory_space<vmem>>, vector<16x8xbf16>,
    %444 = vector.extract_strided_slice %410 {offsets = [198, 0], sizes = [16, 8], strides = [1, 1]} : vector<286x8xf32> to vector<16x8xf32>
    %445 = arith.truncf %444 : vector<16x8xf32> to vector<16x8xbf16>
    %c217_377 = arith.constant 217 : index
    %c0_378 = arith.constant 0 : index
    %446 = vector.load %arg13[%c217_377, %c0_378] : memref<324x8xbf16, #tpu.memory_space<vmem>>, vector<16x8xbf16>
    tpu.vector_store %arg13[%c217_377, %c0_378], %445 {strides = array<i32>} : memref<324x8xbf16, #tpu.memory_space<vmem>>, vector<16x8xbf16>,
    %447 = vector.extract_strided_slice %410 {offsets = [216, 0], sizes = [16, 8], strides = [1, 1]} : vector<286x8xf32> to vector<16x8xf32>
    %448 = arith.truncf %447 : vector<16x8xf32> to vector<16x8xbf16>
    %c235_379 = arith.constant 235 : index
    %c0_380 = arith.constant 0 : index
    %449 = vector.load %arg13[%c235_379, %c0_380] : memref<324x8xbf16, #tpu.memory_space<vmem>>, vector<16x8xbf16>
    tpu.vector_store %arg13[%c235_379, %c0_380], %448 {strides = array<i32>} : memref<324x8xbf16, #tpu.memory_space<vmem>>, vector<16x8xbf16>,
    %450 = vector.extract_strided_slice %410 {offsets = [234, 0], sizes = [16, 8], strides = [1, 1]} : vector<286x8xf32> to vector<16x8xf32>
    %451 = arith.truncf %450 : vector<16x8xf32> to vector<16x8xbf16>
    %c253_381 = arith.constant 253 : index
    %c0_382 = arith.constant 0 : index
    %452 = vector.load %arg13[%c253_381, %c0_382] : memref<324x8xbf16, #tpu.memory_space<vmem>>, vector<16x8xbf16>
    tpu.vector_store %arg13[%c253_381, %c0_382], %451 {strides = array<i32>} : memref<324x8xbf16, #tpu.memory_space<vmem>>, vector<16x8xbf16>,
    %453 = vector.extract_strided_slice %410 {offsets = [252, 0], sizes = [16, 8], strides = [1, 1]} : vector<286x8xf32> to vector<16x8xf32>
    %454 = arith.truncf %453 : vector<16x8xf32> to vector<16x8xbf16>
    %c271_383 = arith.constant 271 : index
    %c0_384 = arith.constant 0 : index
    %455 = vector.load %arg13[%c271_383, %c0_384] : memref<324x8xbf16, #tpu.memory_space<vmem>>, vector<16x8xbf16>
    tpu.vector_store %arg13[%c271_383, %c0_384], %454 {strides = array<i32>} : memref<324x8xbf16, #tpu.memory_space<vmem>>, vector<16x8xbf16>,
    %456 = vector.extract_strided_slice %410 {offsets = [270, 0], sizes = [16, 8], strides = [1, 1]} : vector<286x8xf32> to vector<16x8xf32>
    %457 = arith.truncf %456 : vector<16x8xf32> to vector<16x8xbf16>
    %c289_385 = arith.constant 289 : index
    %c0_386 = arith.constant 0 : index
    %458 = vector.load %arg13[%c289_385, %c0_386] : memref<324x8xbf16, #tpu.memory_space<vmem>>, vector<16x8xbf16>
    tpu.vector_store %arg13[%c289_385, %c0_386], %457 {strides = array<i32>} : memref<324x8xbf16, #tpu.memory_space<vmem>>, vector<16x8xbf16>,
    %c0_387 = arith.constant 0 : index
    %c0_388 = arith.constant 0 : index
    %459 = vector.load %arg13[%c0_387, %c0_388] : memref<324x8xbf16, #tpu.memory_space<vmem>>, vector<286x8xbf16>
    %c0_389 = arith.constant 0 : index
    %c0_390 = arith.constant 0 : index
    %c0_391 = arith.constant 0 : index
    %460 = vector.load %arg8[%c0_389, %c0_390, %c0_391] : memref<9x8x8xbf16, #tpu.memory_space<vmem>>, vector<1x8x8xbf16>
    %461 = vector.shape_cast %460 : vector<1x8x8xbf16> to vector<8x8xbf16>
    %cst_392 = arith.constant dense<0.000000e+00> : vector<286x8xf32>
    %462 = tpu.matmul %459, %461, %cst_392 {dimension_numbers = #tpu.dot_dimension_numbers<[1], [0], [0], [1], [0, 0, 1, 1], [], []>} : vector<286x8xbf16>, vector<8x8xbf16>, vector<286x8xf32> -> vector<286x8xf32>
    %c1_393 = arith.constant 1 : index
    %c0_394 = arith.constant 0 : index
    %463 = vector.load %arg13[%c1_393, %c0_394] : memref<324x8xbf16, #tpu.memory_space<vmem>>, vector<286x8xbf16>
    %c1_395 = arith.constant 1 : index
    %c0_396 = arith.constant 0 : index
    %c0_397 = arith.constant 0 : index
    %464 = vector.load %arg8[%c1_395, %c0_396, %c0_397] : memref<9x8x8xbf16, #tpu.memory_space<vmem>>, vector<1x8x8xbf16>
    %465 = vector.shape_cast %464 : vector<1x8x8xbf16> to vector<8x8xbf16>
    %cst_398 = arith.constant dense<0.000000e+00> : vector<286x8xf32>
    %466 = tpu.matmul %463, %465, %cst_398 {dimension_numbers = #tpu.dot_dimension_numbers<[1], [0], [0], [1], [0, 0, 1, 1], [], []>} : vector<286x8xbf16>, vector<8x8xbf16>, vector<286x8xf32> -> vector<286x8xf32>
    %467 = arith.addf %462, %466 : vector<286x8xf32>
    %c2_399 = arith.constant 2 : index
    %c0_400 = arith.constant 0 : index
    %468 = vector.load %arg13[%c2_399, %c0_400] : memref<324x8xbf16, #tpu.memory_space<vmem>>, vector<286x8xbf16>
    %c2_401 = arith.constant 2 : index
    %c0_402 = arith.constant 0 : index
    %c0_403 = arith.constant 0 : index
    %469 = vector.load %arg8[%c2_401, %c0_402, %c0_403] : memref<9x8x8xbf16, #tpu.memory_space<vmem>>, vector<1x8x8xbf16>
    %470 = vector.shape_cast %469 : vector<1x8x8xbf16> to vector<8x8xbf16>
    %cst_404 = arith.constant dense<0.000000e+00> : vector<286x8xf32>
    %471 = tpu.matmul %468, %470, %cst_404 {dimension_numbers = #tpu.dot_dimension_numbers<[1], [0], [0], [1], [0, 0, 1, 1], [], []>} : vector<286x8xbf16>, vector<8x8xbf16>, vector<286x8xf32> -> vector<286x8xf32>
    %472 = arith.addf %467, %471 : vector<286x8xf32>
    %c18_405 = arith.constant 18 : index
    %c0_406 = arith.constant 0 : index
    %473 = vector.load %arg13[%c18_405, %c0_406] : memref<324x8xbf16, #tpu.memory_space<vmem>>, vector<286x8xbf16>
    %c3_407 = arith.constant 3 : index
    %c0_408 = arith.constant 0 : index
    %c0_409 = arith.constant 0 : index
    %474 = vector.load %arg8[%c3_407, %c0_408, %c0_409] : memref<9x8x8xbf16, #tpu.memory_space<vmem>>, vector<1x8x8xbf16>
    %475 = vector.shape_cast %474 : vector<1x8x8xbf16> to vector<8x8xbf16>
    %cst_410 = arith.constant dense<0.000000e+00> : vector<286x8xf32>
    %476 = tpu.matmul %473, %475, %cst_410 {dimension_numbers = #tpu.dot_dimension_numbers<[1], [0], [0], [1], [0, 0, 1, 1], [], []>} : vector<286x8xbf16>, vector<8x8xbf16>, vector<286x8xf32> -> vector<286x8xf32>
    %477 = arith.addf %472, %476 : vector<286x8xf32>
    %c19_411 = arith.constant 19 : index
    %c0_412 = arith.constant 0 : index
    %478 = vector.load %arg13[%c19_411, %c0_412] : memref<324x8xbf16, #tpu.memory_space<vmem>>, vector<286x8xbf16>
    %c4_413 = arith.constant 4 : index
    %c0_414 = arith.constant 0 : index
    %c0_415 = arith.constant 0 : index
    %479 = vector.load %arg8[%c4_413, %c0_414, %c0_415] : memref<9x8x8xbf16, #tpu.memory_space<vmem>>, vector<1x8x8xbf16>
    %480 = vector.shape_cast %479 : vector<1x8x8xbf16> to vector<8x8xbf16>
    %cst_416 = arith.constant dense<0.000000e+00> : vector<286x8xf32>
    %481 = tpu.matmul %478, %480, %cst_416 {dimension_numbers = #tpu.dot_dimension_numbers<[1], [0], [0], [1], [0, 0, 1, 1], [], []>} : vector<286x8xbf16>, vector<8x8xbf16>, vector<286x8xf32> -> vector<286x8xf32>
    %482 = arith.addf %477, %481 : vector<286x8xf32>
    %c20_417 = arith.constant 20 : index
    %c0_418 = arith.constant 0 : index
    %483 = vector.load %arg13[%c20_417, %c0_418] : memref<324x8xbf16, #tpu.memory_space<vmem>>, vector<286x8xbf16>
    %c5_419 = arith.constant 5 : index
    %c0_420 = arith.constant 0 : index
    %c0_421 = arith.constant 0 : index
    %484 = vector.load %arg8[%c5_419, %c0_420, %c0_421] : memref<9x8x8xbf16, #tpu.memory_space<vmem>>, vector<1x8x8xbf16>
    %485 = vector.shape_cast %484 : vector<1x8x8xbf16> to vector<8x8xbf16>
    %cst_422 = arith.constant dense<0.000000e+00> : vector<286x8xf32>
    %486 = tpu.matmul %483, %485, %cst_422 {dimension_numbers = #tpu.dot_dimension_numbers<[1], [0], [0], [1], [0, 0, 1, 1], [], []>} : vector<286x8xbf16>, vector<8x8xbf16>, vector<286x8xf32> -> vector<286x8xf32>
    %487 = arith.addf %482, %486 : vector<286x8xf32>
    %c36_423 = arith.constant 36 : index
    %c0_424 = arith.constant 0 : index
    %488 = vector.load %arg13[%c36_423, %c0_424] : memref<324x8xbf16, #tpu.memory_space<vmem>>, vector<286x8xbf16>
    %c6_425 = arith.constant 6 : index
    %c0_426 = arith.constant 0 : index
    %c0_427 = arith.constant 0 : index
    %489 = vector.load %arg8[%c6_425, %c0_426, %c0_427] : memref<9x8x8xbf16, #tpu.memory_space<vmem>>, vector<1x8x8xbf16>
    %490 = vector.shape_cast %489 : vector<1x8x8xbf16> to vector<8x8xbf16>
    %cst_428 = arith.constant dense<0.000000e+00> : vector<286x8xf32>
    %491 = tpu.matmul %488, %490, %cst_428 {dimension_numbers = #tpu.dot_dimension_numbers<[1], [0], [0], [1], [0, 0, 1, 1], [], []>} : vector<286x8xbf16>, vector<8x8xbf16>, vector<286x8xf32> -> vector<286x8xf32>
    %492 = arith.addf %487, %491 : vector<286x8xf32>
    %c37_429 = arith.constant 37 : index
    %c0_430 = arith.constant 0 : index
    %493 = vector.load %arg13[%c37_429, %c0_430] : memref<324x8xbf16, #tpu.memory_space<vmem>>, vector<286x8xbf16>
    %c7_431 = arith.constant 7 : index
    %c0_432 = arith.constant 0 : index
    %c0_433 = arith.constant 0 : index
    %494 = vector.load %arg8[%c7_431, %c0_432, %c0_433] : memref<9x8x8xbf16, #tpu.memory_space<vmem>>, vector<1x8x8xbf16>
    %495 = vector.shape_cast %494 : vector<1x8x8xbf16> to vector<8x8xbf16>
    %cst_434 = arith.constant dense<0.000000e+00> : vector<286x8xf32>
    %496 = tpu.matmul %493, %495, %cst_434 {dimension_numbers = #tpu.dot_dimension_numbers<[1], [0], [0], [1], [0, 0, 1, 1], [], []>} : vector<286x8xbf16>, vector<8x8xbf16>, vector<286x8xf32> -> vector<286x8xf32>
    %497 = arith.addf %492, %496 : vector<286x8xf32>
    %c38_435 = arith.constant 38 : index
    %c0_436 = arith.constant 0 : index
    %498 = vector.load %arg13[%c38_435, %c0_436] : memref<324x8xbf16, #tpu.memory_space<vmem>>, vector<286x8xbf16>
    %c8_437 = arith.constant 8 : index
    %c0_438 = arith.constant 0 : index
    %c0_439 = arith.constant 0 : index
    %499 = vector.load %arg8[%c8_437, %c0_438, %c0_439] : memref<9x8x8xbf16, #tpu.memory_space<vmem>>, vector<1x8x8xbf16>
    %500 = vector.shape_cast %499 : vector<1x8x8xbf16> to vector<8x8xbf16>
    %cst_440 = arith.constant dense<0.000000e+00> : vector<286x8xf32>
    %501 = tpu.matmul %498, %500, %cst_440 {dimension_numbers = #tpu.dot_dimension_numbers<[1], [0], [0], [1], [0, 0, 1, 1], [], []>} : vector<286x8xbf16>, vector<8x8xbf16>, vector<286x8xf32> -> vector<286x8xf32>
    %502 = arith.addf %497, %501 : vector<286x8xf32>
    %c0_441 = arith.constant 0 : index
    %c0_442 = arith.constant 0 : index
    %503 = vector.load %arg9[%c0_441, %c0_442] : memref<1x8xf32, #tpu.memory_space<vmem>>, vector<1x8xf32>
    %504 = vector.broadcast %503 : vector<1x8xf32> to vector<286x8xf32>
    %505 = arith.addf %502, %504 : vector<286x8xf32>
    %cst_443 = arith.constant 0.000000e+00 : f32
    %506 = vector.broadcast %cst_443 : f32 to vector<286x8xf32>
    %507 = arith.maximumf %505, %506 : vector<286x8xf32>
    %508 = vector.extract_strided_slice %507 {offsets = [0, 0], sizes = [16, 8], strides = [1, 1]} : vector<286x8xf32> to vector<16x8xf32>
    %c0_444 = arith.constant 0 : index
    %c0_445 = arith.constant 0 : index
    %c0_446 = arith.constant 0 : index
    %509 = vector.load %arg10[%c0_444, %c0_445, %c0_446] : memref<1x256x8xf32, #tpu.memory_space<vmem>>, vector<1x16x8xf32>
    %510 = vector.shape_cast %509 : vector<1x16x8xf32> to vector<16x8xf32>
    %511 = vector.shape_cast %508 : vector<16x8xf32> to vector<1x16x8xf32>
    tpu.vector_store %arg10[%c0_444, %c0_445, %c0_446], %511 {strides = array<i32>} : memref<1x256x8xf32, #tpu.memory_space<vmem>>, vector<1x16x8xf32>,
    %512 = vector.extract_strided_slice %507 {offsets = [18, 0], sizes = [16, 8], strides = [1, 1]} : vector<286x8xf32> to vector<16x8xf32>
    %c0_447 = arith.constant 0 : index
    %c16_448 = arith.constant 16 : index
    %c0_449 = arith.constant 0 : index
    %513 = vector.load %arg10[%c0_447, %c16_448, %c0_449] : memref<1x256x8xf32, #tpu.memory_space<vmem>>, vector<1x16x8xf32>
    %514 = vector.shape_cast %513 : vector<1x16x8xf32> to vector<16x8xf32>
    %515 = vector.shape_cast %512 : vector<16x8xf32> to vector<1x16x8xf32>
    tpu.vector_store %arg10[%c0_447, %c16_448, %c0_449], %515 {strides = array<i32>} : memref<1x256x8xf32, #tpu.memory_space<vmem>>, vector<1x16x8xf32>,
    %516 = vector.extract_strided_slice %507 {offsets = [36, 0], sizes = [16, 8], strides = [1, 1]} : vector<286x8xf32> to vector<16x8xf32>
    %c0_450 = arith.constant 0 : index
    %c32_451 = arith.constant 32 : index
    %c0_452 = arith.constant 0 : index
    %517 = vector.load %arg10[%c0_450, %c32_451, %c0_452] : memref<1x256x8xf32, #tpu.memory_space<vmem>>, vector<1x16x8xf32>
    %518 = vector.shape_cast %517 : vector<1x16x8xf32> to vector<16x8xf32>
    %519 = vector.shape_cast %516 : vector<16x8xf32> to vector<1x16x8xf32>
    tpu.vector_store %arg10[%c0_450, %c32_451, %c0_452], %519 {strides = array<i32>} : memref<1x256x8xf32, #tpu.memory_space<vmem>>, vector<1x16x8xf32>,
    %520 = vector.extract_strided_slice %507 {offsets = [54, 0], sizes = [16, 8], strides = [1, 1]} : vector<286x8xf32> to vector<16x8xf32>
    %c0_453 = arith.constant 0 : index
    %c48_454 = arith.constant 48 : index
    %c0_455 = arith.constant 0 : index
    %521 = vector.load %arg10[%c0_453, %c48_454, %c0_455] : memref<1x256x8xf32, #tpu.memory_space<vmem>>, vector<1x16x8xf32>
    %522 = vector.shape_cast %521 : vector<1x16x8xf32> to vector<16x8xf32>
    %523 = vector.shape_cast %520 : vector<16x8xf32> to vector<1x16x8xf32>
    tpu.vector_store %arg10[%c0_453, %c48_454, %c0_455], %523 {strides = array<i32>} : memref<1x256x8xf32, #tpu.memory_space<vmem>>, vector<1x16x8xf32>,
    %524 = vector.extract_strided_slice %507 {offsets = [72, 0], sizes = [16, 8], strides = [1, 1]} : vector<286x8xf32> to vector<16x8xf32>
    %c0_456 = arith.constant 0 : index
    %c64_457 = arith.constant 64 : index
    %c0_458 = arith.constant 0 : index
    %525 = vector.load %arg10[%c0_456, %c64_457, %c0_458] : memref<1x256x8xf32, #tpu.memory_space<vmem>>, vector<1x16x8xf32>
    %526 = vector.shape_cast %525 : vector<1x16x8xf32> to vector<16x8xf32>
    %527 = vector.shape_cast %524 : vector<16x8xf32> to vector<1x16x8xf32>
    tpu.vector_store %arg10[%c0_456, %c64_457, %c0_458], %527 {strides = array<i32>} : memref<1x256x8xf32, #tpu.memory_space<vmem>>, vector<1x16x8xf32>,
    %528 = vector.extract_strided_slice %507 {offsets = [90, 0], sizes = [16, 8], strides = [1, 1]} : vector<286x8xf32> to vector<16x8xf32>
    %c0_459 = arith.constant 0 : index
    %c80_460 = arith.constant 80 : index
    %c0_461 = arith.constant 0 : index
    %529 = vector.load %arg10[%c0_459, %c80_460, %c0_461] : memref<1x256x8xf32, #tpu.memory_space<vmem>>, vector<1x16x8xf32>
    %530 = vector.shape_cast %529 : vector<1x16x8xf32> to vector<16x8xf32>
    %531 = vector.shape_cast %528 : vector<16x8xf32> to vector<1x16x8xf32>
    tpu.vector_store %arg10[%c0_459, %c80_460, %c0_461], %531 {strides = array<i32>} : memref<1x256x8xf32, #tpu.memory_space<vmem>>, vector<1x16x8xf32>,
    %532 = vector.extract_strided_slice %507 {offsets = [108, 0], sizes = [16, 8], strides = [1, 1]} : vector<286x8xf32> to vector<16x8xf32>
    %c0_462 = arith.constant 0 : index
    %c96_463 = arith.constant 96 : index
    %c0_464 = arith.constant 0 : index
    %533 = vector.load %arg10[%c0_462, %c96_463, %c0_464] : memref<1x256x8xf32, #tpu.memory_space<vmem>>, vector<1x16x8xf32>
    %534 = vector.shape_cast %533 : vector<1x16x8xf32> to vector<16x8xf32>
    %535 = vector.shape_cast %532 : vector<16x8xf32> to vector<1x16x8xf32>
    tpu.vector_store %arg10[%c0_462, %c96_463, %c0_464], %535 {strides = array<i32>} : memref<1x256x8xf32, #tpu.memory_space<vmem>>, vector<1x16x8xf32>,
    %536 = vector.extract_strided_slice %507 {offsets = [126, 0], sizes = [16, 8], strides = [1, 1]} : vector<286x8xf32> to vector<16x8xf32>
    %c0_465 = arith.constant 0 : index
    %c112_466 = arith.constant 112 : index
    %c0_467 = arith.constant 0 : index
    %537 = vector.load %arg10[%c0_465, %c112_466, %c0_467] : memref<1x256x8xf32, #tpu.memory_space<vmem>>, vector<1x16x8xf32>
    %538 = vector.shape_cast %537 : vector<1x16x8xf32> to vector<16x8xf32>
    %539 = vector.shape_cast %536 : vector<16x8xf32> to vector<1x16x8xf32>
    tpu.vector_store %arg10[%c0_465, %c112_466, %c0_467], %539 {strides = array<i32>} : memref<1x256x8xf32, #tpu.memory_space<vmem>>, vector<1x16x8xf32>,
    %540 = vector.extract_strided_slice %507 {offsets = [144, 0], sizes = [16, 8], strides = [1, 1]} : vector<286x8xf32> to vector<16x8xf32>
    %c0_468 = arith.constant 0 : index
    %c128_469 = arith.constant 128 : index
    %c0_470 = arith.constant 0 : index
    %541 = vector.load %arg10[%c0_468, %c128_469, %c0_470] : memref<1x256x8xf32, #tpu.memory_space<vmem>>, vector<1x16x8xf32>
    %542 = vector.shape_cast %541 : vector<1x16x8xf32> to vector<16x8xf32>
    %543 = vector.shape_cast %540 : vector<16x8xf32> to vector<1x16x8xf32>
    tpu.vector_store %arg10[%c0_468, %c128_469, %c0_470], %543 {strides = array<i32>} : memref<1x256x8xf32, #tpu.memory_space<vmem>>, vector<1x16x8xf32>,
    %544 = vector.extract_strided_slice %507 {offsets = [162, 0], sizes = [16, 8], strides = [1, 1]} : vector<286x8xf32> to vector<16x8xf32>
    %c0_471 = arith.constant 0 : index
    %c144_472 = arith.constant 144 : index
    %c0_473 = arith.constant 0 : index
    %545 = vector.load %arg10[%c0_471, %c144_472, %c0_473] : memref<1x256x8xf32, #tpu.memory_space<vmem>>, vector<1x16x8xf32>
    %546 = vector.shape_cast %545 : vector<1x16x8xf32> to vector<16x8xf32>
    %547 = vector.shape_cast %544 : vector<16x8xf32> to vector<1x16x8xf32>
    tpu.vector_store %arg10[%c0_471, %c144_472, %c0_473], %547 {strides = array<i32>} : memref<1x256x8xf32, #tpu.memory_space<vmem>>, vector<1x16x8xf32>,
    %548 = vector.extract_strided_slice %507 {offsets = [180, 0], sizes = [16, 8], strides = [1, 1]} : vector<286x8xf32> to vector<16x8xf32>
    %c0_474 = arith.constant 0 : index
    %c160_475 = arith.constant 160 : index
    %c0_476 = arith.constant 0 : index
    %549 = vector.load %arg10[%c0_474, %c160_475, %c0_476] : memref<1x256x8xf32, #tpu.memory_space<vmem>>, vector<1x16x8xf32>
    %550 = vector.shape_cast %549 : vector<1x16x8xf32> to vector<16x8xf32>
    %551 = vector.shape_cast %548 : vector<16x8xf32> to vector<1x16x8xf32>
    tpu.vector_store %arg10[%c0_474, %c160_475, %c0_476], %551 {strides = array<i32>} : memref<1x256x8xf32, #tpu.memory_space<vmem>>, vector<1x16x8xf32>,
    %552 = vector.extract_strided_slice %507 {offsets = [198, 0], sizes = [16, 8], strides = [1, 1]} : vector<286x8xf32> to vector<16x8xf32>
    %c0_477 = arith.constant 0 : index
    %c176_478 = arith.constant 176 : index
    %c0_479 = arith.constant 0 : index
    %553 = vector.load %arg10[%c0_477, %c176_478, %c0_479] : memref<1x256x8xf32, #tpu.memory_space<vmem>>, vector<1x16x8xf32>
    %554 = vector.shape_cast %553 : vector<1x16x8xf32> to vector<16x8xf32>
    %555 = vector.shape_cast %552 : vector<16x8xf32> to vector<1x16x8xf32>
    tpu.vector_store %arg10[%c0_477, %c176_478, %c0_479], %555 {strides = array<i32>} : memref<1x256x8xf32, #tpu.memory_space<vmem>>, vector<1x16x8xf32>,
    %556 = vector.extract_strided_slice %507 {offsets = [216, 0], sizes = [16, 8], strides = [1, 1]} : vector<286x8xf32> to vector<16x8xf32>
    %c0_480 = arith.constant 0 : index
    %c192_481 = arith.constant 192 : index
    %c0_482 = arith.constant 0 : index
    %557 = vector.load %arg10[%c0_480, %c192_481, %c0_482] : memref<1x256x8xf32, #tpu.memory_space<vmem>>, vector<1x16x8xf32>
    %558 = vector.shape_cast %557 : vector<1x16x8xf32> to vector<16x8xf32>
    %559 = vector.shape_cast %556 : vector<16x8xf32> to vector<1x16x8xf32>
    tpu.vector_store %arg10[%c0_480, %c192_481, %c0_482], %559 {strides = array<i32>} : memref<1x256x8xf32, #tpu.memory_space<vmem>>, vector<1x16x8xf32>,
    %560 = vector.extract_strided_slice %507 {offsets = [234, 0], sizes = [16, 8], strides = [1, 1]} : vector<286x8xf32> to vector<16x8xf32>
    %c0_483 = arith.constant 0 : index
    %c208_484 = arith.constant 208 : index
    %c0_485 = arith.constant 0 : index
    %561 = vector.load %arg10[%c0_483, %c208_484, %c0_485] : memref<1x256x8xf32, #tpu.memory_space<vmem>>, vector<1x16x8xf32>
    %562 = vector.shape_cast %561 : vector<1x16x8xf32> to vector<16x8xf32>
    %563 = vector.shape_cast %560 : vector<16x8xf32> to vector<1x16x8xf32>
    tpu.vector_store %arg10[%c0_483, %c208_484, %c0_485], %563 {strides = array<i32>} : memref<1x256x8xf32, #tpu.memory_space<vmem>>, vector<1x16x8xf32>,
    %564 = vector.extract_strided_slice %507 {offsets = [252, 0], sizes = [16, 8], strides = [1, 1]} : vector<286x8xf32> to vector<16x8xf32>
    %c0_486 = arith.constant 0 : index
    %c224_487 = arith.constant 224 : index
    %c0_488 = arith.constant 0 : index
    %565 = vector.load %arg10[%c0_486, %c224_487, %c0_488] : memref<1x256x8xf32, #tpu.memory_space<vmem>>, vector<1x16x8xf32>
    %566 = vector.shape_cast %565 : vector<1x16x8xf32> to vector<16x8xf32>
    %567 = vector.shape_cast %564 : vector<16x8xf32> to vector<1x16x8xf32>
    tpu.vector_store %arg10[%c0_486, %c224_487, %c0_488], %567 {strides = array<i32>} : memref<1x256x8xf32, #tpu.memory_space<vmem>>, vector<1x16x8xf32>,
    %568 = vector.extract_strided_slice %507 {offsets = [270, 0], sizes = [16, 8], strides = [1, 1]} : vector<286x8xf32> to vector<16x8xf32>
    %c0_489 = arith.constant 0 : index
    %c240_490 = arith.constant 240 : index
    %c0_491 = arith.constant 0 : index
    %569 = vector.load %arg10[%c0_489, %c240_490, %c0_491] : memref<1x256x8xf32, #tpu.memory_space<vmem>>, vector<1x16x8xf32>
    %570 = vector.shape_cast %569 : vector<1x16x8xf32> to vector<16x8xf32>
    %571 = vector.shape_cast %568 : vector<16x8xf32> to vector<1x16x8xf32>
    tpu.vector_store %arg10[%c0_489, %c240_490, %c0_491], %571 {strides = array<i32>} : memref<1x256x8xf32, #tpu.memory_space<vmem>>, vector<1x16x8xf32>,
    return
  }
  func.func @transform_0(%arg0: i32) -> (i32, i32, i32) {
    %c0_i32 = arith.constant 0 : i32
    %c0_i32_0 = arith.constant 0 : i32
    %c0_i32_1 = arith.constant 0 : i32
    return %arg0, %c0_i32, %c0_i32_0 : i32, i32, i32
  }
  func.func @transform_1(%arg0: i32) -> (i32, i32, i32) {
    %c0_i32 = arith.constant 0 : i32
    %c0_i32_0 = arith.constant 0 : i32
    %c0_i32_1 = arith.constant 0 : i32
    return %arg0, %c0_i32, %c0_i32_0 : i32, i32, i32
  }
  func.func @transform_2(%arg0: i32) -> (i32, i32) {
    %c0_i32 = arith.constant 0 : i32
    %c0_i32_0 = arith.constant 0 : i32
    %c0_i32_1 = arith.constant 0 : i32
    return %c0_i32, %c0_i32_0 : i32, i32
  }
  func.func @transform_3(%arg0: i32) -> (i32, i32, i32) {
    %c0_i32 = arith.constant 0 : i32
    %c0_i32_0 = arith.constant 0 : i32
    %c0_i32_1 = arith.constant 0 : i32
    %c0_i32_2 = arith.constant 0 : i32
    return %c0_i32, %c0_i32_0, %c0_i32_1 : i32, i32, i32
  }
  func.func @transform_4(%arg0: i32) -> (i32, i32) {
    %c0_i32 = arith.constant 0 : i32
    %c0_i32_0 = arith.constant 0 : i32
    %c0_i32_1 = arith.constant 0 : i32
    return %c0_i32, %c0_i32_0 : i32, i32
  }
  func.func @transform_5(%arg0: i32) -> (i32, i32, i32) {
    %c0_i32 = arith.constant 0 : i32
    %c0_i32_0 = arith.constant 0 : i32
    %c0_i32_1 = arith.constant 0 : i32
    %c0_i32_2 = arith.constant 0 : i32
    return %c0_i32, %c0_i32_0, %c0_i32_1 : i32, i32, i32
  }
  func.func @transform_6(%arg0: i32) -> (i32, i32) {
    %c0_i32 = arith.constant 0 : i32
    %c0_i32_0 = arith.constant 0 : i32
    %c0_i32_1 = arith.constant 0 : i32
    return %c0_i32, %c0_i32_0 : i32, i32
  }
  func.func @transform_7(%arg0: i32) -> (i32, i32, i32) {
    %c0_i32 = arith.constant 0 : i32
    %c0_i32_0 = arith.constant 0 : i32
    %c0_i32_1 = arith.constant 0 : i32
    %c0_i32_2 = arith.constant 0 : i32
    return %c0_i32, %c0_i32_0, %c0_i32_1 : i32, i32, i32
  }
  func.func @transform_8(%arg0: i32) -> (i32, i32) {
    %c0_i32 = arith.constant 0 : i32
    %c0_i32_0 = arith.constant 0 : i32
    %c0_i32_1 = arith.constant 0 : i32
    return %c0_i32, %c0_i32_0 : i32, i32
  }
  func.func @transform_9(%arg0: i32) -> (i32, i32, i32) {
    %c0_i32 = arith.constant 0 : i32
    %c0_i32_0 = arith.constant 0 : i32
    %c0_i32_1 = arith.constant 0 : i32
    return %arg0, %c0_i32, %c0_i32_0 : i32, i32, i32
  }
}

</mosaic_0001>

<bundles_post_ra>
// kernel: tpu_custom_call.1
= control target key start
LH: loop header
LB: loop body
LE: loop exit
PB: predicated region body
PF: predicated region fallthrough
CT: control target
= control target key end

     0   :  { %s19017_s30 = smov 0   ;;  %s23562_s0 = inlined_call_operand.vmem [shape: f32[2,64,4], index: 0, kind: input, shape index: {}]   ;;  %s23563_s1 = inlined_call_operand.vmem [shape: f32[2,256,4], index: 1, kind: input, shape index: {}]   ;;  %s23564_s2 = inlined_call_operand.vmem [shape: bf16[16,8], index: 2, kind: input, shape index: {}]   ;;  %s23565_s3 = inlined_call_operand.vmem [shape: bf16[9,8,8], index: 3, kind: input, shape index: {}]   ;;  %s23566_s4 = inlined_call_operand.vmem [shape: f32[1,8], index: 4, kind: input, shape index: {}]   ;;  %s23567_s5 = inlined_call_operand.vmem [shape: bf16[9,8,8], index: 5, kind: input, shape index: {}]   ;;  %s23568_s6 = inlined_call_operand.vmem [shape: f32[1,8], index: 6, kind: input, shape index: {}]   ;;  %s23569_s7 = inlined_call_operand.vmem [shape: bf16[9,8,8], index: 7, kind: input, shape index: {}]   ;;  %s23570_s8 = inlined_call_operand.vmem [shape: f32[1,8], index: 8, kind: input, shape index: {}]   ;;  %s23571_s9 = inlined_call_operand.vmem [shape: f32[2,256,8], index: 9, kind: output, shape index: {}]  }
   0x1 LB: > { %s15026_s10 = sadd.s32 4294967295, %s18961_s30   ;;  %p15030_p0 = scmp.ge.s32.totalorder %s18961_s30, 1  ;;  %s18961_s30 = sphi %s19017_s30, %s19_s30  }
   0x2   : > { %p297_p1 = scmp.lt.s32.totalorder %s18961_s30, 3 }
   0x4   : > { %p298_p2 = pnand %p15030_p0, %p297_p1 }
   0x6   : > { %301 = sbr.rel (%p298_p2) target bundleno = 2630 (0xa46), region = 56 }
   0xd   : > { %p338_p3 = scmp.lt.s32.totalorder %s15026_s10, 1  ;;  %v18963_v0 = vmov 0.0   ;;  %vm18964_vm0 = vmmov 0   ;;  %vm23577_vm1 = vcmask 1043456   ;;  %vm23573_vm2 = vcmask 64512   ;;  %v19045_v5 = vld [vmem:[%s23564_s2] sm:$0xff]  }
   0xe   : > { %16658 = vmatprep.subr.bf16.mxu0 %v18963_v0  ;;  %16660 = vmatprep.mubr.msk.bf16.mxu0 %vm18964_vm0, %v18963_v0  ;;  %vm23578_vm3 = vsmask.f32 1280  ;;  %vm544_vm4 = vsmask.f32 5392  ;;  %s18965_s21 = smov 4   ;;  %vm23572_vm15 = vcmask 60416  }
   0xf   : > { %s24942_s10 = smov (!%p338_p3, %s15026_s10), 1  ;;  %16664 = vmatprep.subr.bf16.mxu1 %v18963_v0  ;;  %16666 = vmatprep.mubr.msk.bf16.mxu1 %vm18964_vm0, %v18963_v0  ;;  %vm23576_vm5 = vsmask.f32 2304  ;;  %vm686_vm6 = vsmask.f32 6416  ;;  %vm19175_vm11 = vmor %vm23578_vm3, %vm544_vm4  ;;  %vm23587_vm4 = vcmask 27648  }
  0x10   : > { %s15958_s11 = sshll.u32 %s24942_s10, 6  ;;  %s15959_s17 = sshll.u32 %s24942_s10, 8  ;;  %vm23575_vm7 = vsmask.f32 3328  ;;  %vm826_vm8 = vsmask.f32 7440  ;;  %vm19191_vm12 = vmor %vm23576_vm5, %vm686_vm6 }
  0x11   : > { %s19037_s14 = scalar_lea.vmem %s23562_s0, %s15958_s11  ;;  %s19066_s20 = scalar_lea.vmem %s23563_s1, %s15959_s17  ;;  %vm23574_vm9 = vsmask.f32 256  ;;  %vm966_vm10 = vsmask.f32 4368  ;;  %vm19204_vm13 = vmor %vm23575_vm7, %vm826_vm8  ;;  %vm568_vm6 = vcmask 27649   ;;  %vm23582_vm7 = vcmask 60448  }
  0x12   : > { %v481_v1 = vld [vmem:[%s19037_s14] sm:$0xff]  ;;  %v631_v2 = vld [vmem:[%s19037_s14 + $0x8] sm:$0xff]  ;;  %v911_v3 = vld [vmem:[%s19037_s14 + $0x10] sm:$0xff]  ;;  %vm23580_vm8 = vsmask.f32 7942 }
  0x13   : > { %v482_v4 = vpack.c.bf16 %v481_v1, %v481_v1  ;;  %v630_v6 = vmul.f32 0.53333336, %v481_v1  ;;  %v632_v7 = vmul.f32 0.46666667, %v631_v2  ;;  %v770_v8 = vmul.f32 0.06666667, %v481_v1  ;;  %vm19232_vm14 = vmor %vm23574_vm9, %vm966_vm10 }
  0x14   : > { %v772_v9 = vmul.f32 0.93333334, %v631_v2  ;;  %v910_v10 = vmul.f32 0.6, %v631_v2  ;;  %v912_v11 = vmul.f32 0.4, %v911_v3 }
  0x15   : > { %v494_v12 = vsel %vm23577_vm1, %v482_v4, 0  ;;  %v633_v13 = vadd.f32 %v632_v7, %v630_v6  ;;  %v1044_v14 = vmul.f32 0.13333334, %v631_v2  ;;  %v1046_v15 = vmul.f32 0.8666667, %v911_v3  ;;  %v1173_v16 = vld [vmem:[%s19037_s14 + $0x18] sm:$0xff] }
  0x16   : > { %16659 = vmatpush3.bf16.msra.mxu0 %v494_v12  ;;  %v773_v17 = vadd.f32 %v772_v9, %v770_v8  ;;  %v913_v18 = vadd.f32 %v912_v11, %v910_v10  ;;  %v1172_v19 = vmul.f32 0.6666667, %v911_v3  ;;  %v1174_v20 = vmul.f32 0.33333334, %v1173_v16  ;;  %v1429_v27 = vld [vmem:[%s19037_s14 + $0x20] sm:$0xff]  ;;  %v19073_v37 = vld [vmem:[%s19037_s14 + $0x28] sm:$0xff] }
  0x17   : > { %16670 = vmatprep.subr.bf16.mxu0 %v18963_v0  ;;  %v634_v21 = vpack.c.bf16 %v633_v13, %v633_v13  ;;  %v1047_v22 = vadd.f32 %v1046_v15, %v1044_v14  ;;  %v1300_v25 = vmul.f32 0.2, %v911_v3  ;;  %v1302_v26 = vmul.f32 0.8, %v1173_v16  ;;  %v862_v43 = vld [vmem:[%s19066_s20 + $0x20] sm:$0xff]  ;;  %v722_v46 = vld [vmem:[%s19066_s20 + $0x10] sm:$0xff] }
  0x18   : > { %v774_v23 = vpack.c.bf16 %v773_v17, %v773_v17  ;;  %v914_v24 = vpack.c.bf16 %v913_v18, %v913_v18  ;;  %v1175_v30 = vadd.f32 %v1174_v20, %v1172_v19  ;;  %v1428_v33 = vmul.f32 0.73333335, %v1173_v16  ;;  %v19089_v50 = vld [vmem:[%s19037_s14 + $0x30] sm:$0xff]  ;;  %v581_v52 = vld [vmem:[%s19066_s20] sm:$0xff]  ;;  %v582_v7 = vld [vmem:[%s19066_s20 + $0x8] sm:$0xff] }
  0x19   : > { %16661 = vmatmul.mubr.msk.bf16.vlgmr.msra.gmra.mrb[0].mxu0 %vm23573_vm2, %v19045_v5  ;;  %v636_v28 = vsel %vm23577_vm1, %v634_v21, 0  ;;  %v1048_v32 = vpack.c.bf16 %v1047_v22, %v1047_v22  ;;  %v1430_v34 = vmul.f32 0.26666668, %v1429_v27  ;;  %v1303_v35 = vadd.f32 %v1302_v26, %v1300_v25  ;;  %v999_v56 = vld [vmem:[%s19066_s20 + $0x30] sm:$0xff]  ;;  %v723_v8 = vld [vmem:[%s19066_s20 + $0x18] sm:$0xff]  ;;  %v863_v13 = vld [vmem:[%s19066_s20 + $0x28] sm:$0xff] }
  0x1a   : > { %16665 = vmatpush3.bf16.msra.mxu1 %v636_v28  ;;  %v776_v29 = vsel %vm23577_vm1, %v774_v23, 0  ;;  %16672 = vmatprep.mubr.msk.bf16.mxu0 %vm18964_vm0, %v18963_v0  ;;  %v916_v31 = vsel %vm23577_vm1, %v914_v24, 0  ;;  %v1176_v36 = vpack.c.bf16 %v1175_v30, %v1175_v30  ;;  %v1552_v40 = vmul.f32 0.26666668, %v1173_v16  ;;  %v1000_v30 = vld [vmem:[%s19066_s20 + $0x38] sm:$0xff] }
  0x1b   : > { %16671 = vmatpush3.bf16.msra.mxu0 %v776_v29  ;;  %16676 = vmatprep.subr.bf16.mxu1 %v18963_v0  ;;  %v1050_v38 = vsel %vm23577_vm1, %v1048_v32, 0  ;;  %v1431_v39 = vadd.f32 %v1430_v34, %v1428_v33  ;;  %v1554_v41 = vmul.f32 0.73333335, %v1429_v27  ;;  %v1304_v42 = vpack.c.bf16 %v1303_v35, %v1303_v35 }
  0x1c   : > { %16682 = vmatprep.subr.bf16.mxu0 %v18963_v0  ;;  %v1680_v44 = vmul.f32 0.8, %v1429_v27  ;;  %v1682_v45 = vmul.f32 0.2, %v19073_v37  ;;  %v1178_v47 = vsel %vm23577_vm1, %v1176_v36, 0  ;;  %v15971_v51 = vpack.c.bf16 %v862_v43, %v862_v43 }
  0x1d   : > { %16667 = vmatmul.mubr.msk.bf16.vlgmr.msra.gmra.mrb[0].mxu1 %vm23573_vm2, %v19045_v5  ;;  %v1432_v48 = vpack.c.bf16 %v1431_v39, %v1431_v39  ;;  %v19086_v49 = vadd.f32 %v1554_v41, %v1552_v40  ;;  %v1306_v53 = vsel %vm23577_vm1, %v1304_v42, 0  ;;  %v1808_v54 = vmul.f32 0.33333334, %v1429_v27  ;;  %v1128_v40 = vld [vmem:[%s19066_s20 + $0x40] sm:$0xff] }
  0x1e   : > { %16677 = vmatpush3.bf16.msra.mxu1 %v916_v31  ;;  %16678 = vmatprep.mubr.msk.bf16.mxu1 %vm18964_vm0, %v18963_v0  ;;  %v15967_v55 = vpack.c.bf16 %v722_v46, %v722_v46  ;;  %v19096_v57 = vadd.f32 %v1682_v45, %v1680_v44  ;;  %v1810_v58 = vmul.f32 0.6666667, %v19073_v37  ;;  %v19100_v59 = vmul.f32 0.8666667, %v19073_v37 }
  0x1f   : > { %16688 = vmatprep.subr.bf16.mxu1 %v18963_v0  ;;  %v871_v60 = vshll.u32 %v15971_v51, 16  ;;  %v19105_v61 = vmul.f32 0.13333334, %v19089_v50  ;;  %v15963_v1 = vpack.c.bf16 %v581_v52, %v581_v52  ;;  %v1434_v2 = vsel %vm23577_vm1, %v1432_v48, 0 }
  0x20   : > { %v731_v62 = vshrl.u32 %v15967_v55, 16  ;;  %v734_v63 = vshll.u32 %v15967_v55, 16  ;;  %v1556_v3 = vpack.c.bf16 %v19086_v49, %v19086_v49  ;;  %v15975_v6 = vpack.c.bf16 %v999_v56, %v999_v56 }
  0x21   : > { %16673 = vmatmul.mubr.msk.bf16.vlgmr.msra.gmra.mrb[4].mxu0 %vm23573_vm2, %v19045_v5  ;;  %v19111_v4 = vrot.slane %v871_v60, 5  ;;  %v874_v9 = vshrl.u32 %v15971_v51, 16  ;;  %v590_v12 = vshrl.u32 %v15963_v1, 16  ;;  %v1684_v14 = vpack.c.bf16 %v19096_v57, %v19096_v57 }
  0x22   : > { %16683 = vmatpush3.bf16.msra.mxu0 %v1050_v38  ;;  %16684 = vmatprep.mubr.msk.bf16.mxu0 %vm18964_vm0, %v18963_v0  ;;  %v733_v10 = vrot.slane %v731_v62, 5  ;;  %v736_v11 = vrot.slane %v734_v63, 6  ;;  %v593_v15 = vshll.u32 %v15963_v1, 16  ;;  %v1008_v16 = vshrl.u32 %v15975_v6, 16 }
  0x23   : > { %16694 = vmatprep.subr.bf16.mxu0 %v18963_v0  ;;  %889 = vrot.lane.b32.xlu0 %v19111_v4, %s18965_s21  ;;  %v1011_v17 = vshll.u32 %v15975_v6, 16  ;;  %v592_v19 = vrot.slane %v590_v12, 6  ;;  %v15964_v20 = vpack.c.bf16 %v582_v7, %v582_v7  ;;  %v15968_v21 = vpack.c.bf16 %v723_v8, %v723_v8  ;;  %v1256_v6 = vld [vmem:[%s19066_s20 + $0x50] sm:$0xff]  ;;  %v1257_v12 = vld [vmem:[%s19066_s20 + $0x58] sm:$0xff] }
  0x24   : > { %v19124_v18 = vor.u32 %v736_v11, %v733_v10  ;;  %v19127_v22 = vadd.f32 %v1810_v58, %v1808_v54  ;;  %v595_v23 = vrot.slane %v593_v15, 7  ;;  %v19129_v24 = vrot.slane %v1008_v16, 7  ;;  %v1129_v54 = vld [vmem:[%s19066_s20 + $0x48] sm:$0xff] }
  0x25   : > { %16679 = vmatmul.mubr.msk.bf16.vlgmr.msra.gmra.mrb[4].mxu1 %vm23573_vm2, %v19045_v5  ;;  %v15972_v25 = vpack.c.bf16 %v863_v13, %v863_v13  ;;  %v19131_v26 = vrot.slane %v874_v9, 4  ;;  %v599_v27 = vshrl.u32 %v15964_v20, 16  ;;  %v602_v28 = vshll.u32 %v15964_v20, 16 }
  0x26   : > { %16689 = vmatpush3.bf16.msra.mxu1 %v1178_v47  ;;  %16690 = vmatprep.mubr.msk.bf16.mxu1 %vm18964_vm0, %v18963_v0  ;;  %v740_v29 = vshrl.u32 %v15968_v21, 16  ;;  %v596_v31 = vor.u32 %v595_v23, %v592_v19  ;;  %v1013_v32 = vor.u32 %v1011_v17, %v19129_v24  ;;  %v743_v33 = vshll.u32 %v15968_v21, 16 }
  0x27   : > { %16700 = vmatprep.subr.bf16.mxu1 %v18963_v0  ;;  %749 = vrot.lane.b32.xlu1 %v19124_v18, %s18965_s21  ;;  %v880_v34 = vshll.u32 %v15972_v25, 16  ;;  %v601_v35 = vrot.slane %v599_v27, 6  ;;  %v604_v36 = vrot.slane %v602_v28, 7  ;;  %v884_v39 = vshrl.u32 %v15972_v25, 16 }
  0x28   : > { %v742_v38 = vrot.slane %v740_v29, 5  ;;  %v1558_v41 = vsel %vm23577_vm1, %v1556_v3, 0  ;;  %608 = vrot.lane.b32.xlu0 %v596_v31, %s18965_s21  ;;  %v745_v42 = vrot.slane %v743_v33, 6  ;;  %v19147_v44 = vpack.c.bf16 %v1000_v30, %v1000_v30 }
  0x29   : > { %16685 = vmatmul.mubr.msk.bf16.vlgmr.msra.gmra.mrb[8].mxu0 %vm23573_vm2, %v19045_v5  ;;  %v19145_v43 = vrot.slane %v880_v34, 5  ;;  %v2060_v45 = vmul.f32 0.4, %v19073_v37  ;;  %v2062_v46 = vmul.f32 0.6, %v19089_v50  ;;  %v605_v47 = vor.u32 %v604_v36, %v601_v35  ;;  %v19161_v37 = vld [vmem:[%s19037_s14 + $0x38] sm:$0xff] }
  0x2a   : > { %16695 = vmatpush3.bf16.msra.mxu0 %v1306_v53  ;;  %16696 = vmatprep.mubr.msk.bf16.mxu0 %vm18964_vm0, %v18963_v0  ;;  %v886_v48 = vrot.slane %v884_v39, 4  ;;  %v1939_v49 = vadd.f32 %v19105_v61, %v19100_v59  ;;  %v2188_v51 = vmul.f32 0.93333334, %v19089_v50  ;;  %v746_v52 = vor.u32 %v745_v42, %v742_v38  ;;  %v1385_v35 = vld [vmem:[%s19066_s20 + $0x68] sm:$0xff] }
  0x2b   : > { %16706 = vmatprep.subr.bf16.mxu0 %v18963_v0  ;;  %1024 = vrot.lane.b32.xlu1 %v1013_v32, %s18965_s21  ;;  %v15979_v53 = vpack.c.bf16 %v1128_v40, %v1128_v40  ;;  %v877_v55 = vor.u32 %v19131_v26, %v19111_v4  ;;  %v597_v56 = vrot.slane %v596_v31, 4  ;;  %v607_v58 = vrot.slane %v605_v47, 4  ;;  %v1384_v31 = vld [vmem:[%s19066_s20 + $0x60] sm:$0xff] }
  0x2c   : > { %v887_v59 = vor.u32 %v886_v48, %v19145_v43  ;;  %v1686_v60 = vsel %vm23577_vm1, %v1684_v14, 0  ;;  %v1812_v61 = vpack.c.bf16 %v19127_v22, %v19127_v22  ;;  %v748_v62 = vrot.slane %v746_v52, 4 }
  0x2d   : > { %16691 = vmatmul.mubr.msk.bf16.vlgmr.msra.gmra.mrb[8].mxu1 %vm23573_vm2, %v19045_v5  ;;  %v23699_v63 = vmov 0  ;;  %v1016_v1 = vshrl.u32 %v19147_v44, 16  ;;  %v738_v57 = vrot.slane %v19124_v18, 4  ;;  %612 = vrot.lane.b32.xlu0 %v607_v58, %s18965_s21  ;;  %v15980_v4 = vpack.c.bf16 %v1129_v54, %v1129_v54 }
  0x2e   : > { %16701 = vmatpush3.bf16.msra.mxu1 %v1434_v2  ;;  %16702 = vmatprep.mubr.msk.bf16.mxu1 %vm18964_vm0, %v18963_v0  ;;  %v23700_v63 = vsel %vm19175_vm11, 4294967295, %v23699_v63  ;;  %v19180_v2 = vadd.f32 %v2062_v46, %v2060_v45  ;;  %v888_v3 = vrot.slane %v887_v59, 4  ;;  %v1940_v7 = vpack.c.bf16 %v1939_v49, %v1939_v49 }
  0x2f   : > { %16712 = vmatprep.subr.bf16.mxu1 %v18963_v0  ;;  %23701 = vst [vmem:[#allocation5_spill] sm:$0xff] %v23700_v63  ;;  %v2190_v8 = vmul.f32 0.06666667, %v19161_v37  ;;  %753 = vrot.lane.b32.xlu1 %v748_v62, %s18965_s21  ;;  %v23702_v9 = vmov 0  ;;  %v1137_v10 = vshrl.u32 %v15979_v53, 16  ;;  %v1140_v11 = vshll.u32 %v15979_v53, 16 }
  0x30   : > { %v23703_v9 = vsel %vm19191_vm12, 4294967295, %v23702_v9  ;;  %v878_v13 = vrot.slane %v877_v55, 4  ;;  %v606_v14 = vsel %vm19175_vm11, %v597_v56, %v605_v47  ;;  %v1146_v15 = vshrl.u32 %v15980_v4, 16 }
  0x31   : > { %16697 = vmatmul.mubr.msk.bf16.vlgmr.msra.gmra.mrb[12].mxu0 %vm23573_vm2, %v19045_v5  ;;  %v1149_v16 = vshll.u32 %v15980_v4, 16  ;;  %v1814_v17 = vsel %vm23577_vm1, %v1812_v61, 0  ;;  %v23704_v18 = vmov 0  ;;  %v1018_v19 = vrot.slane %v1016_v1, 7  ;;  %893 = vrot.lane.b32.xlu0 %v888_v3, %s18965_s21  ;;  %v1510_v1 = vld [vmem:[%s19066_s20 + $0x70] sm:$0xff] }
  0x32   : > { %16707 = vmatpush3.bf16.msra.mxu0 %v1558_v41  ;;  %16708 = vmatprep.mubr.msk.bf16.mxu0 %vm18964_vm0, %v18963_v0  ;;  %v23705_v18 = vsel %vm19204_vm13, 4294967295, %v23704_v18  ;;  %v1019_v20 = vshll.u32 %v19147_v44, 16  ;;  %v15983_v21 = vpack.c.bf16 %v1256_v6, %v1256_v6  ;;  %v2316_v22 = vmul.f32 0.46666667, %v19089_v50  ;;  %v1636_v6 = vld [vmem:[%s19066_s20 + $0x80] sm:$0xff] }
  0x33   : > { %16718 = vmatprep.subr.bf16.mxu0 %v18963_v0  ;;  %v2318_v23 = vmul.f32 0.53333336, %v19161_v37  ;;  %v747_v25 = vsel %vm19191_vm12, %v738_v57, %v746_v52  ;;  %v15984_v26 = vpack.c.bf16 %v1257_v12, %v1257_v12  ;;  %610 = vrot.lane.b32.xlu1 %v606_v14, %s18965_s21  ;;  %v1139_v27 = vrot.slane %v1137_v10, 6  ;;  %v1511_v57 = vld [vmem:[%s19066_s20 + $0x78] sm:$0xff] }
  0x34   : > { %v1142_v28 = vrot.slane %v1140_v11, 7  ;;  %v1148_v29 = vrot.slane %v1146_v15, 6  ;;  %v1151_v30 = vrot.slane %v1149_v16, 7  ;;  %v1942_v50 = vsel %vm23577_vm1, %v1940_v7, 0 }
  0x35   : > { %16703 = vmatmul.mubr.msk.bf16.vlgmr.msra.gmra.mrb[12].mxu1 %vm23573_vm2, %v19045_v5  ;;  %v2064_v32 = vpack.c.bf16 %v19180_v2, %v19180_v2  ;;  %v2191_v33 = vadd.f32 %v2190_v8, %v2188_v51  ;;  %v883_v34 = vsel %vm19204_vm13, %v878_v13, %v19145_v43  ;;  %v1023_v36 = vrot.slane %v1018_v19, 4  ;;  %751 = vrot.lane.b32.xlu0 %v747_v25, %s18965_s21 }
  0x36   : > { %16713 = vmatpush3.bf16.msra.mxu1 %v1686_v60  ;;  %16714 = vmatprep.mubr.msk.bf16.mxu1 %vm18964_vm0, %v18963_v0  ;;  %v1014_v38 = vrot.slane %v19129_v24, 4  ;;  %v1021_v39 = vor.u32 %v1019_v20, %v1018_v19  ;;  %v1265_v40 = vshrl.u32 %v15983_v21, 16  ;;  %v23706_v41 = vmov 0 }
  0x37   : > { %16724 = vmatprep.subr.bf16.mxu1 %v18963_v0  ;;  %v23707_v41 = vsel %vm19232_vm14, 4294967295, %v23706_v41  ;;  %v1268_v42 = vshll.u32 %v15983_v21, 16  ;;  %v1274_v44 = vshrl.u32 %v15984_v26, 16  ;;  %v1277_v45 = vshll.u32 %v15984_v26, 16  ;;  %891 = vrot.lane.b32.xlu1 %v883_v34, %s18965_s21  ;;  %v1637_v21 = vld [vmem:[%s19066_s20 + $0x88] sm:$0xff] }
  0x38   : > { %v15987_v43 = vpack.c.bf16 %v1384_v31, %v1384_v31  ;;  %v1143_v24 = vor.u32 %v1142_v28, %v1139_v27  ;;  %v1152_v46 = vor.u32 %v1151_v30, %v1148_v29  ;;  %v15988_v47 = vpack.c.bf16 %v1385_v35, %v1385_v35  ;;  %v1764_v29 = vld [vmem:[%s19066_s20 + $0x90] sm:$0xff] }
  0x39   : > { %16709 = vmatmul.mubr.msk.bf16.vlgmr.msra.gmra.mrb[16].mxu0 %vm23573_vm2, %v19045_v5  ;;  %v2319_v48 = vadd.f32 %v2318_v23, %v2316_v22  ;;  %v2066_v49 = vsel %vm23577_vm1, %v2064_v32, 0  ;;  %v2192_v51 = vpack.c.bf16 %v2191_v33, %v2191_v33  ;;  %v1022_v52 = vsel %vm19232_vm14, %v1014_v38, %v1021_v39  ;;  %1028 = vrot.lane.b32.xlu0 %v1023_v36, %s18965_s21 }
  0x3a   : > { %16719 = vmatpush3.bf16.msra.mxu0 %v1814_v17  ;;  %16720 = vmatprep.mubr.msk.bf16.mxu0 %vm18964_vm0, %v18963_v0  ;;  %v1267_v53 = vrot.slane %v1265_v40, 5  ;;  %v1270_v54 = vrot.slane %v1268_v42, 6  ;;  %v1276_v55 = vrot.slane %v1274_v44, 5  ;;  %v1279_v56 = vrot.slane %v1277_v45, 6  ;;  %v1765_v42 = vld [vmem:[%s19066_s20 + $0x98] sm:$0xff] }
  0x3b   : > { %16730 = vmatprep.subr.bf16.mxu0 %v18963_v0  ;;  %v1393_v58 = vshll.u32 %v15987_v43, 16  ;;  %1155 = vrot.lane.b32.xlu1 %v1143_v24, %s18965_s21  ;;  %v1154_v59 = vrot.slane %v1152_v46, 4  ;;  %v1396_v60 = vshrl.u32 %v15987_v43, 16  ;;  %v1402_v61 = vshll.u32 %v15988_v47, 16 }
  0x3c   : > { %v1406_v62 = vshrl.u32 %v15988_v47, 16  ;;  %v1144_v2 = vrot.slane %v1143_v24, 4  ;;  %v2194_v3 = vsel %vm23577_vm1, %v2192_v51, 0  ;;  %v2320_v4 = vpack.c.bf16 %v2319_v48, %v2319_v48 }
  0x3d   : > { %16715 = vmatmul.mubr.msk.bf16.vlgmr.msra.gmra.mrb[16].mxu1 %vm23573_vm2, %v19045_v5  ;;  %1026 = vrot.lane.b32.xlu0 %v1022_v52, %s18965_s21  ;;  %v1271_v7 = vor.u32 %v1270_v54, %v1267_v53  ;;  %v1280_v8 = vor.u32 %v1279_v56, %v1276_v55  ;;  %v1395_v10 = vrot.slane %v1393_v58, 5  ;;  %v15991_v11 = vpack.c.bf16 %v1510_v1, %v1510_v1 }
  0x3e   : > { %16725 = vmatpush3.bf16.msra.mxu1 %v1942_v50  ;;  %16726 = vmatprep.mubr.msk.bf16.mxu1 %vm18964_vm0, %v18963_v0  ;;  %v1398_v12 = vrot.slane %v1396_v60, 4  ;;  %v1404_v13 = vrot.slane %v1402_v61, 5  ;;  %v1408_v14 = vrot.slane %v1406_v62, 4  ;;  %v15992_v15 = vpack.c.bf16 %v1511_v57, %v1511_v57  ;;  %v1893_v57 = vld [vmem:[%s19066_s20 + $0xa8] sm:$0xff] }
  0x3f   : > { %16736 = vmatprep.subr.bf16.mxu1 %v18963_v0  ;;  %1159 = vrot.lane.b32.xlu1 %v1154_v59, %s18965_s21  ;;  %v1153_v16 = vsel %vm19175_vm11, %v1144_v2, %v1152_v46  ;;  %v15995_v17 = vpack.c.bf16 %v1636_v6, %v1636_v6  ;;  %v2322_v19 = vsel %vm23577_vm1, %v2320_v4, 0  ;;  %v2444_v20 = vpack.c.bf16 %v19161_v37, %v19161_v37  ;;  %v1892_v46 = vld [vmem:[%s19066_s20 + $0xa0] sm:$0xff] }
  0x40   : > { %v1272_v22 = vrot.slane %v1271_v7, 4  ;;  %v1282_v23 = vrot.slane %v1280_v8, 4  ;;  %v1519_v25 = vshrl.u32 %v15991_v11, 16  ;;  %v1399_v26 = vor.u32 %v1398_v12, %v1395_v10 }
  0x41   : > { %16721 = vmatmul.mubr.msk.bf16.vlgmr.msra.gmra.mrb[20].mxu0 %vm23573_vm2, %v19045_v5  ;;  %1283 = vrot.lane.b32.xlu0 %v1271_v7, %s18965_s21  ;;  %v1409_v27 = vor.u32 %v1408_v14, %v1404_v13  ;;  %v1527_v28 = vshrl.u32 %v15992_v15, 16  ;;  %v1645_v37 = vshrl.u32 %v15995_v17, 16  ;;  %v1648_v30 = vshll.u32 %v15995_v17, 16 }
  0x42   : > { %16731 = vmatpush3.bf16.msra.mxu0 %v2066_v49  ;;  %16732 = vmatprep.mubr.msk.bf16.mxu0 %vm18964_vm0, %v18963_v0  ;;  %v15996_v31 = vpack.c.bf16 %v1637_v21, %v1637_v21  ;;  %v2446_v50 = vsel %vm23577_vm1, %v2444_v20, 0  ;;  %v1281_v32 = vsel %vm19191_vm12, %v1272_v22, %v1280_v8  ;;  %v1521_v33 = vrot.slane %v1519_v25, 7  ;;  %v2019_v20 = vld [vmem:[%s19066_s20 + $0xb8] sm:$0xff]  ;;  %v2144_v25 = vld [vmem:[%s19066_s20 + $0xc0] sm:$0xff] }
  0x43   : > { %16742 = vmatprep.subr.bf16.mxu0 %v18963_v0  ;;  %1157 = vrot.lane.b32.xlu1 %v1153_v16, %s18965_s21  ;;  %v1522_v34 = vshll.u32 %v15991_v11, 16  ;;  %v15999_v35 = vpack.c.bf16 %v1764_v29, %v1764_v29  ;;  %v1410_v36 = vrot.slane %v1409_v27, 4  ;;  %v1400_v38 = vrot.slane %v1399_v26, 4  ;;  %v2145_v27 = vld [vmem:[%s19066_s20 + $0xc8] sm:$0xff] }
  0x44   : > { %v1529_v39 = vrot.slane %v1527_v28, 7  ;;  %v1530_v40 = vshll.u32 %v15992_v15, 16  ;;  %v1647_v44 = vrot.slane %v1645_v37, 6  ;;  %v1650_v45 = vrot.slane %v1648_v30, 7  ;;  %v2018_v15 = vld [vmem:[%s19066_s20 + $0xb0] sm:$0xff] }
  0x45   : > { %16727 = vmatmul.mubr.msk.bf16.vlgmr.msra.gmra.mrb[20].mxu1 %vm23573_vm2, %v19045_v5  ;;  %1287 = vrot.lane.b32.xlu0 %v1282_v23, %s18965_s21  ;;  %v1654_v43 = vshrl.u32 %v15996_v31, 16  ;;  %v1657_v24 = vshll.u32 %v15996_v31, 16  ;;  %v1524_v47 = vor.u32 %v1522_v34, %v1521_v33  ;;  %v1773_v48 = vshrl.u32 %v15999_v35, 16 }
  0x46   : > { %16737 = vmatpush3.bf16.msra.mxu1 %v2194_v3  ;;  %16738 = vmatprep.mubr.msk.bf16.mxu1 %vm18964_vm0, %v18963_v0  ;;  %v16000_v49 = vpack.c.bf16 %v1765_v42, %v1765_v42  ;;  %v1405_v51 = vsel %vm19204_vm13, %v1400_v38, %v1404_v13  ;;  %v1525_v52 = vrot.slane %v1521_v33, 4  ;;  %v1776_v53 = vshll.u32 %v15999_v35, 16 }
  0x47   : > { %16748 = vmatprep.subr.bf16.mxu1 %v18963_v0  ;;  %1411 = vrot.lane.b32.xlu1 %v1395_v10, %s18965_s21  ;;  %v1651_v54 = vor.u32 %v1650_v45, %v1647_v44  ;;  %v1656_v55 = vrot.slane %v1654_v43, 6  ;;  %v1659_v56 = vrot.slane %v1657_v24, 7  ;;  %v16003_v58 = vpack.c.bf16 %v1892_v46, %v1892_v46  ;;  %v2273_v24 = vld [vmem:[%s19066_s20 + $0xd8] sm:$0xff] }
  0x48   : > { %v1534_v59 = vrot.slane %v1529_v39, 4  ;;  %v1775_v60 = vrot.slane %v1773_v48, 5  ;;  %v1778_v62 = vrot.slane %v1776_v53, 6  ;;  %v1782_v1 = vshrl.u32 %v16000_v49, 16 }
  0x49   : > { %16733 = vmatmul.mubr.msk.bf16.vlgmr.msra.gmra.mrb[24].mxu0 %vm23573_vm2, %v19045_v5  ;;  %1285 = vrot.lane.b32.xlu0 %v1281_v32, %s18965_s21  ;;  %v1785_v2 = vshll.u32 %v16000_v49, 16  ;;  %v1652_v3 = vrot.slane %v1651_v54, 4  ;;  %v1660_v4 = vor.u32 %v1659_v56, %v1656_v55  ;;  %v1901_v6 = vshll.u32 %v16003_v58, 16 }
  0x4a   : > { %16743 = vmatpush3.bf16.msra.mxu0 %v2322_v19  ;;  %16744 = vmatprep.mubr.msk.bf16.mxu0 %vm18964_vm0, %v18963_v0  ;;  %v1904_v7 = vshrl.u32 %v16003_v58, 16  ;;  %v16004_v8 = vpack.c.bf16 %v1893_v57, %v1893_v57  ;;  %v1784_v10 = vrot.slane %v1782_v1, 5  ;;  %v16007_v23 = vpack.c.bf16 %v2018_v15, %v2018_v15  ;;  %v2401_v58 = vld [vmem:[%s19066_s20 + $0xe8] sm:$0xff] }
  0x4b   : > { %1415 = vrot.lane.b32.xlu1 %v1410_v36, %s18965_s21  ;;  %v1787_v11 = vrot.slane %v1785_v2, 6  ;;  %v1661_v12 = vsel %vm19175_vm11, %v1652_v3, %v1660_v4  ;;  %v1903_v13 = vrot.slane %v1901_v6, 5  ;;  %v1662_v16 = vrot.slane %v1660_v4, 4  ;;  %v19343_v3 = vld [vmem:[%s19066_s20 + $0xe0] sm:$0xff] }
  0x4c   : > { %v1906_v14 = vrot.slane %v1904_v7, 4  ;;  %v1910_v17 = vshll.u32 %v16004_v8, 16  ;;  %v1914_v19 = vshrl.u32 %v16004_v8, 16  ;;  %v16008_v28 = vpack.c.bf16 %v2019_v20, %v2019_v20  ;;  %v2522_v20 = vld [vmem:[%s19066_s20 + $0xf0] sm:$0xff] }
  0x4d   : > { %16739 = vmatmul.mubr.msk.bf16.vlgmr.msra.gmra.mrb[24].mxu1 %vm23573_vm2, %v19045_v5  ;;  %1413 = vrot.lane.b32.xlu0 %v1405_v51, %s18965_s21  ;;  %v1788_v22 = vor.u32 %v1787_v11, %v1784_v10  ;;  %v16011_v30 = vpack.c.bf16 %v2144_v25, %v2144_v25  ;;  %v2027_v32 = vshrl.u32 %v16007_v23, 16  ;;  %v16012_v33 = vpack.c.bf16 %v2145_v27, %v2145_v27 }
  0x4e   : > { %16749 = vmatpush3.bf16.msra.mxu1 %v2446_v50  ;;  %16750 = vmatprep.mubr.msk.bf16.mxu1 %vm18964_vm0, %v18963_v0  ;;  %v1532_v0 = vor.u32 %v1530_v40, %v1529_v39  ;;  %v1907_v26 = vor.u32 %v1906_v14, %v1903_v13  ;;  %v1912_v29 = vrot.slane %v1910_v17, 5  ;;  %v1916_v37 = vrot.slane %v1914_v19, 4  ;;  %v2272_v40 = vld [vmem:[%s19066_s20 + $0xd0] sm:$0xff] }
  0x4f   : > { %1535 = vrot.lane.b32.xlu1 %v1524_v47, %s18965_s21  ;;  %v1790_v50 = vrot.slane %v1788_v22, 4  ;;  %v2035_v35 = vshrl.u32 %v16008_v28, 16  ;;  %v2030_v38 = vshll.u32 %v16007_v23, 16  ;;  %v2153_v39 = vshrl.u32 %v16011_v30, 16 }
  0x50   : > { %v1533_v61 = vsel %vm19232_vm14, %v1525_v52, %v1532_v0  ;;  %v1908_v34 = vrot.slane %v1907_v26, 4  ;;  %v1917_v36 = vor.u32 %v1916_v37, %v1912_v29  ;;  %v19317_v42 = vrot.slane %v2027_v32, 7 }
  0x51   : > { %16745 = vmatmul.mubr.msk.bf16.vlgmr.msra.gmra.mrb[28].mxu0 %vm23573_vm2, %v19045_v5  ;;  %1537 = vrot.lane.b32.xlu0 %v1533_v61, %s18965_s21  ;;  %v2156_v44 = vshll.u32 %v16011_v30, 16  ;;  %v2162_v45 = vshrl.u32 %v16012_v33, 16  ;;  %v2165_v43 = vshll.u32 %v16012_v33, 16  ;;  %v19322_v47 = vrot.slane %v2035_v35, 7 }
  0x52   : > { %v1913_v46 = vsel %vm19204_vm13, %v1908_v34, %v1912_v29  ;;  %v2038_v48 = vshll.u32 %v16008_v28, 16  ;;  %v19324_v49 = vpack.c.bf16 %v2272_v40, %v2272_v40  ;;  %v1918_v51 = vrot.slane %v1917_v36, 4 }
  0x53   : > { %1539 = vrot.lane.b32.xlu1 %v1534_v59, %s18965_s21  ;;  %v2155_v52 = vrot.slane %v2153_v39, 6  ;;  %v19327_v0 = vpack.c.bf16 %v2273_v24, %v2273_v24  ;;  %v2032_v53 = vor.u32 %v2030_v38, %v19317_v42  ;;  %v2164_v55 = vrot.slane %v2162_v45, 6 }
  0x54   : > { %v2167_v56 = vrot.slane %v2165_v43, 7  ;;  %v2042_v59 = vrot.slane %v19322_v47, 4  ;;  %v19335_v61 = vor.u32 %v2038_v48, %v19322_v47  ;;  %v2284_v1 = vshll.u32 %v19324_v49, 16 }
  0x55   : > { %16751 = vmatmul.mubr.msk.bf16.vlgmr.msra.gmra.mrb[28].mxu1 %vm23573_vm2, %v19045_v5  ;;  %v1779_v5 = vor.u32 %v1778_v62, %v1775_v60  ;;  %1663 = vrot.lane.b32.xlu0 %v1651_v54, %s18965_s21  ;;  %v2158_v54 = vrot.slane %v2156_v44, 7  ;;  %v2033_v60 = vrot.slane %v19317_v42, 4  ;;  %v2281_v62 = vshrl.u32 %v19324_v49, 16  ;;  %vm19694_vm2 = vmand %vm568_vm6, %vm23580_vm8 }
  0x56   : > { %v2290_v2 = vshrl.u32 %v19327_v0, 16  ;;  %v2293_v57 = vshll.u32 %v19327_v0, 16  ;;  %v19348_v6 = vor.u32 %v2167_v56, %v2164_v55  ;;  %v19350_v7 = vpack.c.bf16 %v2401_v58, %v2401_v58  ;;  %v15118_v0 = vld [vmem:[%s23565_s3 + $0x4] sm:$0xf]  ;;  %v19655_v56 = vld [vmem:[%s23565_s3 + $0x14] sm:$0xf] }
  0x57   : > { %1665 = vrot.lane.b32.xlu1 %v1661_v12, %s18965_s21  ;;  %v1780_v21 = vrot.slane %v1779_v5, 4  ;;  %v19346_v4 = vor.u32 %v2158_v54, %v2155_v52  ;;  %v23600_v8 = vmov 0   ;;  %v16019_v10 = vpack.c.bf16 %v19343_v3, %v19343_v3  ;;  %18646 = vmatprep.subr.msk.bf16.mxu1 %vm23577_vm1, %v15118_v0  ;;  %v15231_v54 = vld [vmem:[%s23565_s3 + $0x10] sm:$0xf]  ;;  %v19662_v58 = vld [vmem:[%s23565_s3] sm:$0xf] }
  0x58   : > { %359 = vst.msk [vmem:[#allocation2 + $0x10] sm:$0xf] %vm23572_vm15, %v23600_v8  ;;  %355 = vst.msk [vmem:[#allocation2] sm:$0xf] %vm23572_vm15, %v23600_v8  ;;  %v2283_v11 = vrot.slane %v2281_v62, 5  ;;  %v2286_v12 = vrot.slane %v2284_v1, 6  ;;  %v16023_v27 = vpack.c.bf16 %v2522_v20, %v2522_v20  ;;  %18650 = vmatprep.subr.msk.bf16.mxu0 %vm23577_vm1, %v15231_v54 }
  0x59   : > { %1667 = vrot.lane.b32.xlu0 %v1662_v16, %s18965_s21  ;;  %v1789_v31 = vsel %vm19191_vm12, %v1780_v21, %v1788_v22  ;;  %356 = vst.msk [vmem:[#allocation2 + $0x4] sm:$0xf] %vm23572_vm15, %v23600_v8  ;;  %357 = vst.msk [vmem:[#allocation2 + $0x8] sm:$0xf] %vm23572_vm15, %v23600_v8  ;;  %v2295_v14 = vrot.slane %v2293_v57, 6  ;;  %v2170_v15 = vrot.slane %v19348_v6, 4 }
  0x5a   : > { %358 = vst.msk [vmem:[#allocation2 + $0xc] sm:$0xf] %vm23572_vm15, %v23600_v8  ;;  %360 = vst.msk [vmem:[#allocation2 + $0x14] sm:$0xf] %vm23572_vm15, %v23600_v8  ;;  %v2412_v16 = vshrl.u32 %v16019_v10, 16  ;;  %v2418_v17 = vshll.u32 %v19350_v7, 16  ;;  %v2287_v25 = vor.u32 %v2286_v12, %v2283_v11 }
  0x5b   : > { %1791 = vrot.lane.b32.xlu1 %v1779_v5, %s18965_s21  ;;  %361 = vst.msk [vmem:[#allocation2 + $0x18] sm:$0xf] %vm23572_vm15, %v23600_v8  ;;  %362 = vst.msk [vmem:[#allocation2 + $0x1c] sm:$0xf] %vm23572_vm15, %v23600_v8  ;;  %v2041_v5 = vsel %vm19232_vm14, %v2033_v60, %v19335_v61  ;;  %v2422_v19 = vshrl.u32 %v19350_v7, 16  ;;  %v2160_v21 = vrot.slane %v19346_v4, 4 }
  0x5c   : > { %363 = vst.msk [vmem:[#allocation2 + $0x20] sm:$0xf] %vm23572_vm15, %v23600_v8  ;;  %364 = vst.msk [vmem:[#allocation2 + $0x24] sm:$0xf] %vm23572_vm15, %v23600_v8  ;;  %v2523_v22 = vld [vmem:[%s19066_s20 + $0xf8] sm:$0xff]  ;;  %v2409_v23 = vshll.u32 %v16019_v10, 16  ;;  %s23434_s20 = scalar_lea.vmem %s23571_s9, %s15959_s17 }
  0x5d   : > { %1793 = vrot.lane.b32.xlu0 %v1789_v31, %s18965_s21  ;;  %365 = vst.msk [vmem:[#allocation2 + $0x28] sm:$0xf] %vm23572_vm15, %v23600_v8  ;;  %366 = vst.msk [vmem:[#allocation2 + $0x2c] sm:$0xf] %vm23572_vm15, %v23600_v8  ;;  %v2414_v28 = vrot.slane %v2412_v16, 4  ;;  %v2420_v29 = vrot.slane %v2418_v17, 5  ;;  %v16024_v30 = vpack.c.bf16 %v2523_v22, %v2523_v22  ;;  %v2169_v31 = vsel %vm19175_vm11, %v2160_v21, %v19348_v6 }
  0x5e   : > { %367 = vst.msk [vmem:[#allocation2 + $0x30] sm:$0xf] %vm23572_vm15, %v23600_v8  ;;  %368 = vst.msk [vmem:[#allocation2 + $0x34] sm:$0xf] %vm23572_vm15, %v23600_v8  ;;  %v2424_v37 = vrot.slane %v2422_v19, 4  ;;  %v2288_v32 = vrot.slane %v2287_v25, 4 }
  0x5f   : > { %1795 = vrot.lane.b32.xlu1 %v1790_v50, %s18965_s21  ;;  %369 = vst.msk [vmem:[#allocation2 + $0x38] sm:$0xf] %vm23572_vm15, %v23600_v8  ;;  %370 = vst.msk [vmem:[#allocation2 + $0x3c] sm:$0xf] %vm23572_vm15, %v23600_v8  ;;  %v2411_v50 = vrot.slane %v2409_v23, 5  ;;  %v2531_v34 = vshrl.u32 %v16023_v27, 16 }
  0x60   : > { %371 = vst.msk [vmem:[#allocation2 + $0x40] sm:$0xf] %vm23572_vm15, %v23600_v8  ;;  %372 = vst.msk [vmem:[#allocation2 + $0x44] sm:$0xf] %vm23572_vm15, %v23600_v8  ;;  %v2425_v36 = vor.u32 %v2424_v37, %v2420_v29  ;;  %v2539_v38 = vshrl.u32 %v16024_v30, 16  ;;  %v2534_v42 = vshll.u32 %v16023_v27, 16 }
  0x61   : > { %1919 = vrot.lane.b32.xlu0 %v1903_v13, %s18965_s21  ;;  %373 = vst.msk [vmem:[#allocation2 + $0x48] sm:$0xf] %vm23572_vm15, %v23600_v8  ;;  %374 = vst.msk [vmem:[#allocation2 + $0x4c] sm:$0xf] %vm23572_vm15, %v23600_v8  ;;  %v2292_v13 = vrot.slane %v2290_v2, 5  ;;  %v2415_v35 = vor.u32 %v2414_v28, %v2411_v50  ;;  %v2533_v40 = vrot.slane %v2531_v34, 7 }
  0x62   : > { %375 = vst.msk [vmem:[#allocation2 + $0x50] sm:$0xf] %vm23572_vm15, %v23600_v8  ;;  %376 = vst.msk [vmem:[#allocation2 + $0x54] sm:$0xf] %vm23572_vm15, %v23600_v8  ;;  %v2426_v44 = vrot.slane %v2425_v36, 4  ;;  %v2541_v43 = vrot.slane %v2539_v38, 7 }
  0x63   : > { %1921 = vrot.lane.b32.xlu1 %v1913_v46, %s18965_s21  ;;  %377 = vst.msk [vmem:[#allocation2 + $0x58] sm:$0xf] %vm23572_vm15, %v23600_v8  ;;  %378 = vst.msk [vmem:[#allocation2 + $0x5c] sm:$0xf] %vm23572_vm15, %v23600_v8  ;;  %v2296_v26 = vor.u32 %v2295_v14, %v2292_v13  ;;  %v2416_v45 = vrot.slane %v2415_v35, 4  ;;  %v2542_v24 = vshll.u32 %v16024_v30, 16  ;;  %v2536_v47 = vor.u32 %v2534_v42, %v2533_v40 }
  0x64   : > { %379 = vst.msk [vmem:[#allocation2 + $0x60] sm:$0xf] %vm23572_vm15, %v23600_v8  ;;  %380 = vst.msk [vmem:[#allocation2 + $0x64] sm:$0xf] %vm23572_vm15, %v23600_v8  ;;  %v2537_v48 = vrot.slane %v2533_v40, 4  ;;  %v2546_v52 = vrot.slane %v2541_v43, 4 }
  0x65   : > { %1923 = vrot.lane.b32.xlu0 %v1918_v51, %s18965_s21  ;;  %381 = vst.msk [vmem:[#allocation2 + $0x68] sm:$0xf] %vm23572_vm15, %v23600_v8  ;;  %382 = vst.msk [vmem:[#allocation2 + $0x6c] sm:$0xf] %vm23572_vm15, %v23600_v8  ;;  %v2298_v33 = vrot.slane %v2296_v26, 4  ;;  %v2297_v39 = vsel %vm19191_vm12, %v2288_v32, %v2296_v26  ;;  %v2421_v46 = vsel %vm19204_vm13, %v2416_v45, %v2420_v29  ;;  %v19649_v55 = vsel %vm23577_vm1, %v15231_v54, 0 }
  0x66   : > { %383 = vst.msk [vmem:[#allocation2 + $0x70] sm:$0xf] %vm23572_vm15, %v23600_v8  ;;  %384 = vst.msk [vmem:[#allocation2 + $0x74] sm:$0xf] %vm23572_vm15, %v23600_v8  ;;  %v2544_v49 = vor.u32 %v2542_v24, %v2541_v43  ;;  %16907 = vmatpush3.bf16.msra.mxu0 %v19649_v55  ;;  %v2563_v57 = vld [vmem:[#allocation2] sm:$0xf] }
  0x67   : > { %2043 = vrot.lane.b32.xlu1 %v2032_v53, %s18965_s21  ;;  %385 = vst.msk [vmem:[#allocation2 + $0x78] sm:$0xf] %vm23572_vm15, %v23600_v8  ;;  %386 = vst.msk [vmem:[#allocation2 + $0x7c] sm:$0xf] %vm23572_vm15, %v23600_v8  ;;  %v2892_v53 = vsel %vm23577_vm1, %v15118_v0, 0  ;;  %18652 = vmatprep.subr.msk.bf16.mxu0 %vm23577_vm1, %v19655_v56  ;;  %vm576_vm0 = vcmask 25600  }
  0x68   : > { %387 = vst.msk [vmem:[#allocation2 + $0x80] sm:$0xf] %vm23572_vm15, %v23600_v8  ;;  %388 = vst.msk [vmem:[#allocation2 + $0x84] sm:$0xf] %vm23572_vm15, %v23600_v8  ;;  %v2545_v51 = vsel %vm19232_vm14, %v2537_v48, %v2544_v49  ;;  %16755 = vmatpush3.bf16.msra.mxu1 %v2892_v53  ;;  %v2564_v3 = vld [vmem:[#allocation2 + $0x4] sm:$0xf] }
  0x69   : > { %389 = vst.msk [vmem:[#allocation2 + $0x88] sm:$0xf] %vm23572_vm15, %v23600_v8  ;;  %390 = vst.msk [vmem:[#allocation2 + $0x8c] sm:$0xf] %vm23572_vm15, %v23600_v8  ;;  %2047 = vrot.lane.b32.xlu0 %v2042_v59, %s18965_s21  ;;  %18647 = vmatprep.subr.msk.bf16.mxu1 %vm23577_vm1, %v19662_v58  ;;  %v19680_v6 = vcombine.low %v2563_v57, %v2564_v3  ;;  %vm850_vm10 = vcmask 27651   ;;  %v23712_v49 = vmov 0 }
  0x6a   : > { %391 = vst.msk [vmem:[#allocation2 + $0x90] sm:$0xf] %vm23572_vm15, %v23600_v8  ;;  %392 = vst.msk [vmem:[#allocation2 + $0x94] sm:$0xf] %vm23572_vm15, %v23600_v8  ;;  %vm23581_vm5 = vsmask.f32 7946 }
  0x6b   : > { %393 = vst.msk [vmem:[#allocation2 + $0x98] sm:$0xf] %vm23572_vm15, %v23600_v8  ;;  %394 = vst.msk [vmem:[#allocation2 + $0x9c] sm:$0xf] %vm23572_vm15, %v23600_v8  ;;  %2171 = vrot.lane.b32.xlu1 %v19346_v4, %s18965_s21  ;;  %v2697_v10 = vshll.u32 %v19680_v6, 16  ;;  %v2695_v22 = vshrl.u32 %v19680_v6, 16 }
  0x6c   : > { %397 = vst.msk [vmem:[#allocation3] sm:$0xf] %vm23572_vm15, %v23600_v8  ;;  %398 = vst.msk [vmem:[#allocation3 + $0x4] sm:$0xf] %vm23572_vm15, %v23600_v8  ;;  %v571_v38 = vld [vmem:[#allocation2 + $0x8] sm:$0xe] }
  0x6d   : > { %399 = vst.msk [vmem:[#allocation3 + $0x8] sm:$0xf] %vm23572_vm15, %v23600_v8  ;;  %400 = vst.msk [vmem:[#allocation3 + $0xc] sm:$0xf] %vm23572_vm15, %v23600_v8  ;;  %2045 = vrot.lane.b32.xlu0 %v2041_v5, %s18965_s21  ;;  %v2699_v23 = vrot.slane %v2697_v10, 1  ;;  %vm23728_vm8 = vcmask 1043456  }
  0x6e   : > { %401 = vst.msk [vmem:[#allocation3 + $0x10] sm:$0xf] %vm23572_vm15, %v23600_v8  ;;  %402 = vst.msk [vmem:[#allocation3 + $0x14] sm:$0xf] %vm23572_vm15, %v23600_v8 }
  0x6f   : > { %403 = vst.msk [vmem:[#allocation3 + $0x18] sm:$0xf] %vm23572_vm15, %v23600_v8  ;;  %404 = vst.msk [vmem:[#allocation3 + $0x1c] sm:$0xf] %vm23572_vm15, %v23600_v8  ;;  %2175 = vrot.lane.b32.xlu1 %v2170_v15, %s18965_s21 }
  0x70   : > { %405 = vst.msk [vmem:[#allocation3 + $0x20] sm:$0xf] %vm23572_vm15, %v23600_v8  ;;  %406 = vst.msk [vmem:[#allocation3 + $0x24] sm:$0xf] %vm23572_vm15, %v23600_v8 }
  0x71   : > { %407 = vst.msk [vmem:[#allocation3 + $0x28] sm:$0xf] %vm23572_vm15, %v23600_v8  ;;  %408 = vst.msk [vmem:[#allocation3 + $0x2c] sm:$0xf] %vm23572_vm15, %v23600_v8  ;;  %2299 = vrot.lane.b32.xlu0 %v2287_v25, %s18965_s21 }
  0x72   : > { %409 = vst.msk [vmem:[#allocation3 + $0x30] sm:$0xf] %vm23572_vm15, %v23600_v8  ;;  %410 = vst.msk [vmem:[#allocation3 + $0x34] sm:$0xf] %vm23572_vm15, %v23600_v8 }
  0x73   : > { %411 = vst.msk [vmem:[#allocation3 + $0x38] sm:$0xf] %vm23572_vm15, %v23600_v8  ;;  %412 = vst.msk [vmem:[#allocation3 + $0x3c] sm:$0xf] %vm23572_vm15, %v23600_v8  ;;  %2173 = vrot.lane.b32.xlu1 %v2169_v31, %s18965_s21 }
  0x74   : > { %413 = vst.msk [vmem:[#allocation3 + $0x40] sm:$0xf] %vm23572_vm15, %v23600_v8  ;;  %414 = vst.msk [vmem:[#allocation3 + $0x44] sm:$0xf] %vm23572_vm15, %v23600_v8 }
  0x75   : > { %415 = vst.msk [vmem:[#allocation3 + $0x48] sm:$0xf] %vm23572_vm15, %v23600_v8  ;;  %416 = vst.msk [vmem:[#allocation3 + $0x4c] sm:$0xf] %vm23572_vm15, %v23600_v8  ;;  %2303 = vrot.lane.b32.xlu0 %v2298_v33, %s18965_s21 }
  0x76   : > { %417 = vst.msk [vmem:[#allocation3 + $0x50] sm:$0xf] %vm23572_vm15, %v23600_v8  ;;  %418 = vst.msk [vmem:[#allocation3 + $0x54] sm:$0xf] %vm23572_vm15, %v23600_v8 }
  0x77   : > { %419 = vst.msk [vmem:[#allocation3 + $0x58] sm:$0xf] %vm23572_vm15, %v23600_v8  ;;  %420 = vst.msk [vmem:[#allocation3 + $0x5c] sm:$0xf] %vm23572_vm15, %v23600_v8  ;;  %2427 = vrot.lane.b32.xlu1 %v2411_v50, %s18965_s21 }
  0x78   : > { %421 = vst.msk [vmem:[#allocation3 + $0x60] sm:$0xf] %vm23572_vm15, %v23600_v8  ;;  %422 = vst.msk [vmem:[#allocation3 + $0x64] sm:$0xf] %vm23572_vm15, %v23600_v8 }
  0x79   : > { %423 = vst.msk [vmem:[#allocation3 + $0x68] sm:$0xf] %vm23572_vm15, %v23600_v8  ;;  %424 = vst.msk [vmem:[#allocation3 + $0x6c] sm:$0xf] %vm23572_vm15, %v23600_v8  ;;  %2301 = vrot.lane.b32.xlu0 %v2297_v39, %s18965_s21 }
  0x7a   : > { %425 = vst.msk [vmem:[#allocation3 + $0x70] sm:$0xf] %vm23572_vm15, %v23600_v8  ;;  %426 = vst.msk [vmem:[#allocation3 + $0x74] sm:$0xf] %vm23572_vm15, %v23600_v8 }
  0x7b   : > { %427 = vst.msk [vmem:[#allocation3 + $0x78] sm:$0xf] %vm23572_vm15, %v23600_v8  ;;  %428 = vst.msk [vmem:[#allocation3 + $0x7c] sm:$0xf] %vm23572_vm15, %v23600_v8  ;;  %2431 = vrot.lane.b32.xlu1 %v2426_v44, %s18965_s21  ;;  %v19698_v44 = vor.u32 %v2699_v23, %v2695_v22 }
  0x7c   : > { %429 = vst.msk [vmem:[#allocation3 + $0x80] sm:$0xf] %vm23572_vm15, %v23600_v8  ;;  %430 = vst.msk [vmem:[#allocation3 + $0x84] sm:$0xf] %vm23572_vm15, %v23600_v8 }
  0x7d   : > { %431 = vst.msk [vmem:[#allocation3 + $0x88] sm:$0xf] %vm23572_vm15, %v23600_v8  ;;  %432 = vst.msk [vmem:[#allocation3 + $0x8c] sm:$0xf] %vm23572_vm15, %v23600_v8  ;;  %2429 = vrot.lane.b32.xlu0 %v2421_v46, %s18965_s21 }
  0x7e   : > { %433 = vst.msk [vmem:[#allocation3 + $0x90] sm:$0xf] %vm23572_vm15, %v23600_v8  ;;  %434 = vst.msk [vmem:[#allocation3 + $0x94] sm:$0xf] %vm23572_vm15, %v23600_v8 }
  0x7f   : > { %435 = vst.msk [vmem:[#allocation3 + $0x98] sm:$0xf] %vm23572_vm15, %v23600_v8  ;;  %436 = vst.msk [vmem:[#allocation3 + $0x9c] sm:$0xf] %vm23572_vm15, %v23600_v8  ;;  %2547 = vrot.lane.b32.xlu1 %v2536_v47, %s18965_s21 }
  0x80   : > { %438 = vst.msk [vmem:[#allocation4] sm:$0xf] %vm23572_vm15, %v23600_v8  ;;  %439 = vst.msk [vmem:[#allocation4 + $0x4] sm:$0xf] %vm23572_vm15, %v23600_v8 }
  0x81   : > { %440 = vst.msk [vmem:[#allocation4 + $0x8] sm:$0xf] %vm23572_vm15, %v23600_v8  ;;  %441 = vst.msk [vmem:[#allocation4 + $0xc] sm:$0xf] %vm23572_vm15, %v23600_v8  ;;  %2549 = vrot.lane.b32.xlu0 %v2545_v51, %s18965_s21  ;;  %v578_v51 = vld [vmem:[#allocation2 + $0x10] sm:$0x3] }
  0x82   : > { %442 = vst.msk [vmem:[#allocation4 + $0x10] sm:$0xf] %vm23572_vm15, %v23600_v8  ;;  %443 = vst.msk [vmem:[#allocation4 + $0x14] sm:$0xf] %vm23572_vm15, %v23600_v8 }
  0x83   : > { %444 = vst.msk [vmem:[#allocation4 + $0x18] sm:$0xf] %vm23572_vm15, %v23600_v8  ;;  %445 = vst.msk [vmem:[#allocation4 + $0x1c] sm:$0xf] %vm23572_vm15, %v23600_v8  ;;  %2551 = vrot.lane.b32.xlu1 %v2546_v52, %s18965_s21 }
  0x84   : > { %446 = vst.msk [vmem:[#allocation4 + $0x20] sm:$0xf] %vm23572_vm15, %v23600_v8  ;;  %447 = vst.msk [vmem:[#allocation4 + $0x24] sm:$0xf] %vm23572_vm15, %v23600_v8 }
  0x85   : > { %448 = vst.msk [vmem:[#allocation4 + $0x28] sm:$0xf] %vm23572_vm15, %v23600_v8  ;;  %449 = vst.msk [vmem:[#allocation4 + $0x2c] sm:$0xf] %vm23572_vm15, %v23600_v8 }
  0x86   : > { %450 = vst.msk [vmem:[#allocation4 + $0x30] sm:$0xf] %vm23572_vm15, %v23600_v8  ;;  %451 = vst.msk [vmem:[#allocation4 + $0x34] sm:$0xf] %vm23572_vm15, %v23600_v8 }
  0x87   : > { %452 = vst.msk [vmem:[#allocation4 + $0x38] sm:$0xf] %vm23572_vm15, %v23600_v8  ;;  %453 = vst.msk [vmem:[#allocation4 + $0x3c] sm:$0xf] %vm23572_vm15, %v23600_v8 }
  0x88   : > { %454 = vst.msk [vmem:[#allocation4 + $0x40] sm:$0xf] %vm23572_vm15, %v23600_v8  ;;  %455 = vst.msk [vmem:[#allocation4 + $0x44] sm:$0xf] %vm23572_vm15, %v23600_v8 }
  0x89   : > { %456 = vst.msk [vmem:[#allocation4 + $0x48] sm:$0xf] %vm23572_vm15, %v23600_v8  ;;  %457 = vst.msk [vmem:[#allocation4 + $0x4c] sm:$0xf] %vm23572_vm15, %v23600_v8 }
  0x8a   : > { %458 = vst.msk [vmem:[#allocation4 + $0x50] sm:$0xf] %vm23572_vm15, %v23600_v8  ;;  %459 = vst.msk [vmem:[#allocation4 + $0x54] sm:$0xf] %vm23572_vm15, %v23600_v8 }
  0x8b   : > { %460 = vst.msk [vmem:[#allocation4 + $0x58] sm:$0xf] %vm23572_vm15, %v23600_v8  ;;  %461 = vst.msk [vmem:[#allocation4 + $0x5c] sm:$0xf] %vm23572_vm15, %v23600_v8 }
  0x8c   : > { %462 = vst.msk [vmem:[#allocation4 + $0x60] sm:$0xf] %vm23572_vm15, %v23600_v8  ;;  %463 = vst.msk [vmem:[#allocation4 + $0x64] sm:$0xf] %vm23572_vm15, %v23600_v8 }
  0x8d   : > { %464 = vst.msk [vmem:[#allocation4 + $0x68] sm:$0xf] %vm23572_vm15, %v23600_v8  ;;  %465 = vst.msk [vmem:[#allocation4 + $0x6c] sm:$0xf] %vm23572_vm15, %v23600_v8 }
  0x8e   : > { %466 = vst.msk [vmem:[#allocation4 + $0x70] sm:$0xf] %vm23572_vm15, %v23600_v8  ;;  %467 = vst.msk [vmem:[#allocation4 + $0x74] sm:$0xf] %vm23572_vm15, %v23600_v8 }
  0x8f   : > { %468 = vst.msk [vmem:[#allocation4 + $0x78] sm:$0xf] %vm23572_vm15, %v23600_v8  ;;  %469 = vst.msk [vmem:[#allocation4 + $0x7c] sm:$0xf] %vm23572_vm15, %v23600_v8 }
  0x90   : > { %470 = vst.msk [vmem:[#allocation4 + $0x80] sm:$0xf] %vm23572_vm15, %v23600_v8  ;;  %471 = vst.msk [vmem:[#allocation4 + $0x84] sm:$0xf] %vm23572_vm15, %v23600_v8 }
  0x91   : > { %472 = vst.msk [vmem:[#allocation4 + $0x88] sm:$0xf] %vm23572_vm15, %v23600_v8  ;;  %473 = vst.msk [vmem:[#allocation4 + $0x8c] sm:$0xf] %vm23572_vm15, %v23600_v8 }
  0x92   : > { %474 = vst.msk [vmem:[#allocation4 + $0x90] sm:$0xf] %vm23572_vm15, %v23600_v8  ;;  %475 = vst.msk [vmem:[#allocation4 + $0x94] sm:$0xf] %vm23572_vm15, %v23600_v8 }
  0x93   : > { %476 = vst.msk [vmem:[#allocation4 + $0x98] sm:$0xf] %vm23572_vm15, %v23600_v8  ;;  %477 = vst.msk [vmem:[#allocation4 + $0x9c] sm:$0xf] %vm23572_vm15, %v23600_v8  ;;  %vm23579_vm15 = vsmask.f32 7950 }
  0x94   : > { %23708 = vst [vmem:[#allocation6_spill] sm:$0xff] %v19649_v55  ;;  %23709 = vst [vmem:[#allocation7_spill] sm:$0xff] %v19680_v6 }
  0x95   : > { %v19666_v59 = vpop.permute.xlu0 %889  ;;  %vm19704_vm6 = vmand %vm576_vm0, %vm23578_vm3  ;;  %vm23716_vm3 = vcmask 1043456  }
  0x96   : > { %v23713_v49 = vsel %vm19704_vm6, 4294967295, %v23712_v49  ;;  %vm19717_vm0 = vmand %vm850_vm10, %vm23579_vm15  ;;  %vm23717_vm10 = vsmask.f32 2304  ;;  %vm23718_vm15 = vcmask 26624  }
  0x97   : > { %vm19731_vm1 = vmand %vm23718_vm15, %vm23717_vm10  ;;  %vm23724_vm15 = vsmask.f32 7942  ;;  %vm23725_vm10 = vcmask 60449  }
  0x99   : > { %v19668_v60 = vpop.permute.xlu1 %749 }
  0x9a   : > { %v19670_v61 = vpop.permute.xlu0 %608 }
  0x9d   : > { %v19672_v62 = vpop.permute.xlu1 %1024 }
  0x9f   : > { %v19674_v1 = vpop.permute.xlu0 %612 }
  0xa1   : > { %v19676_v2 = vpop.permute.xlu1 %753 }
  0xa3   : > { %v19678_v4 = vpop.permute.xlu0 %893 }
  0xa5   : > { %v19682_v7 = vpop.permute.xlu1 %610 }
  0xa7   : > { %v19685_v13 = vpop.permute.xlu0 %751 }
  0xa9   : > { %v19687_v20 = vpop.permute.xlu1 %891 }
  0xab   : > { %v19690_v35 = vpop.permute.xlu0 %1028 }
  0xad   : > { %v19700_v48 = vpop.permute.xlu1 %1155 }
  0xec   : > { %v530_v5 = vpop.f32.mrb[0].mxu0 }
  0xed   : > { %v15961_v11 = vpack.c.bf16 %v530_v5, %v530_v5  ;;  %v16662_v12 = vpop.f32.mrb[1].mxu0 }
  0xee   : > { %v533_v14 = vpop.f32.mrb[2].mxu0 }
  0xef   : > { %v547_v15 = vshrl.u32 %v15961_v11, 16  ;;  %v550_v16 = vshll.u32 %v15961_v11, 16  ;;  %v15962_v17 = vpack.c.bf16 %v533_v14, %v533_v14  ;;  %v16663_v19 = vpop.f32.mrb[3].mxu0 }
  0xf0   : > { %v672_v21 = vpop.f32.mrb[0].mxu1 }
  0xf1   : > { %v549_v25 = vrot.slane %v547_v15, 6  ;;  %v552_v26 = vrot.slane %v550_v16, 7  ;;  %v556_v27 = vshrl.u32 %v15962_v17, 16  ;;  %v559_v28 = vshll.u32 %v15962_v17, 16  ;;  %v16668_v29 = vpop.f32.mrb[1].mxu1 }
  0xf2   : > { %v15965_v37 = vpack.c.bf16 %v672_v21, %v672_v21  ;;  %v675_v30 = vpop.f32.mrb[2].mxu1  ;;  %v719_v15 = vld [vmem:[#allocation2 + $0x18] sm:$0x7]  ;;  %v19723_v29 = vpop.permute.xlu0 %1026 }
  0xf3   : > { %v553_v31 = vor.u32 %v552_v26, %v549_v25  ;;  %v558_v50 = vrot.slane %v556_v27, 6  ;;  %v561_v32 = vrot.slane %v559_v28, 7  ;;  %v15966_v33 = vpack.c.bf16 %v675_v30, %v675_v30  ;;  %v16669_v34 = vpop.f32.mrb[3].mxu1  ;;  %v853_v26 = vld [vmem:[#allocation2 + $0x18] sm:$0x8] }
  0xf4   : > { %v689_v39 = vshrl.u32 %v15965_v37, 16  ;;  %v692_v40 = vshll.u32 %v15965_v37, 16  ;;  %v812_v42 = vpop.f32.mrb[4].mxu0  ;;  %v23714_v25 = vmov 0  ;;  %v713_v37 = vld [vmem:[#allocation2 + $0x10] sm:$0xc] }
  0xf5   : > { %v554_v45 = vrot.slane %v553_v31, 4  ;;  %v562_v43 = vor.u32 %v561_v32, %v558_v50  ;;  %v698_v24 = vshrl.u32 %v15966_v33, 16  ;;  %v701_v46 = vshll.u32 %v15966_v33, 16  ;;  %v16674_v47 = vpop.f32.mrb[5].mxu0 }
  0xf6   : > { %v691_v52 = vrot.slane %v689_v39, 5  ;;  %v694_v0 = vrot.slane %v692_v40, 6  ;;  %v15969_v53 = vpack.c.bf16 %v812_v42, %v812_v42  ;;  %v815_v54 = vpop.f32.mrb[6].mxu0  ;;  %v572_v57 = vsel %vm19694_vm2, %v553_v31, %v571_v38 }
  0xf7   : > { %v564_v3 = vrot.slane %v562_v43, 4  ;;  %v700_v5 = vrot.slane %v698_v24, 5  ;;  %v703_v10 = vrot.slane %v701_v46, 6  ;;  %v563_v11 = vsel %vm19175_vm11, %v554_v45, %v562_v43  ;;  %v16675_v12 = vpop.f32.mrb[7].mxu0  ;;  %573 = vst [vmem:[#allocation2 + $0x8] sm:$0xe] %v572_v57 }
  0xf8   : > { %v695_v14 = vor.u32 %v694_v0, %v691_v52  ;;  %v829_v16 = vshll.u32 %v15969_v53, 16  ;;  %v832_v17 = vshrl.u32 %v15969_v53, 16  ;;  %575 = vst.msk [vmem:[#allocation2 + $0xc] sm:$0xf] %vm23587_vm4, %v563_v11  ;;  %v15970_v19 = vpack.c.bf16 %v815_v54, %v815_v54  ;;  %v952_v21 = vpop.f32.mrb[4].mxu1 }
  0xf9   : > { %v579_v22 = vsel %vm19704_vm6, %v564_v3, %v578_v51  ;;  %v704_v23 = vor.u32 %v703_v10, %v700_v5  ;;  %v23715_v25 = vsel %vm19717_vm0, 4294967295, %v23714_v25  ;;  %623 = vst.msk [vmem:[#allocation2 + $0xc] sm:$0xf] %vm23582_vm7, %v19682_v7  ;;  %v15973_v27 = vpack.c.bf16 %v952_v21, %v952_v21  ;;  %v16680_v28 = vpop.f32.mrb[5].mxu1  ;;  %v859_v21 = vld [vmem:[#allocation2 + $0x20] sm:$0xf] }
  0xfa   : > { %v19727_v30 = vsel %vm23716_vm3, %v19655_v56, 0  ;;  %580 = vst [vmem:[#allocation2 + $0x10] sm:$0x3] %v579_v22  ;;  %v696_v31 = vrot.slane %v695_v14, 4  ;;  %v23719_v50 = vmov 0  ;;  %v831_v32 = vrot.slane %v829_v16, 5  ;;  %v19735_v56 = vpop.permute.xlu1 %1159  ;;  %v19772_v28 = vpop.permute.xlu0 %1283 }
  0xfb   : > { %v23720_v50 = vsel %vm19731_vm1, 4294967295, %v23719_v50  ;;  %v834_v7 = vrot.slane %v832_v17, 4  ;;  %v838_v33 = vshll.u32 %v15970_v19, 16  ;;  %v955_v34 = vpop.f32.mrb[6].mxu1  ;;  %v706_v38 = vrot.slane %v704_v23, 4 }
  0xfc   : > { %v842_v39 = vshrl.u32 %v15970_v19, 16  ;;  %v969_v40 = vshrl.u32 %v15973_v27, 16  ;;  %v972_v42 = vshll.u32 %v15973_v27, 16  ;;  %v16681_v45 = vpop.f32.mrb[7].mxu1  ;;  %vm23721_vm3 = vcmask 27650   ;;  %v1086_v52 = vpop.f32.mrb[8].mxu0 }
  0xfd   : > { %vm19739_vm9 = vmand %vm23721_vm3, %vm23581_vm5  ;;  %v835_v24 = vor.u32 %v834_v7, %v831_v32  ;;  %v854_v46 = vsel %vm19717_vm0, %v831_v32, %v853_v26  ;;  %v705_v47 = vsel %vm19191_vm12, %v696_v31, %v704_v23  ;;  %v840_v51 = vrot.slane %v838_v33, 5  ;;  %v16686_v3 = vpop.f32.mrb[9].mxu0 }
  0xfe   : > { %v720_v0 = vsel %vm19731_vm1, %v706_v38, %v719_v15  ;;  %855 = vst [vmem:[#allocation2 + $0x18] sm:$0x8] %v854_v46  ;;  %716 = vst.msk [vmem:[#allocation2 + $0x14] sm:$0xf] %vm23587_vm4, %v705_v47  ;;  %v844_v53 = vrot.slane %v842_v39, 4  ;;  %v971_v54 = vrot.slane %v969_v40, 7  ;;  %v15974_v57 = vpack.c.bf16 %v955_v34, %v955_v34  ;;  %v19786_v45 = vpop.permute.xlu1 %1157 }
  0xff   : > { %721 = vst [vmem:[#allocation2 + $0x18] sm:$0x7] %v720_v0  ;;  %v836_v5 = vrot.slane %v835_v24, 4  ;;  %763 = vst.msk [vmem:[#allocation2 + $0x14] sm:$0xf] %vm23582_vm7, %v19685_v13  ;;  %v15977_v10 = vpack.c.bf16 %v1086_v52, %v1086_v52  ;;  %v1089_v15 = vpop.f32.mrb[10].mxu0  ;;  %v714_v16 = vsel %vm19739_vm9, %v695_v14, %v713_v37 }
 0x100   : > { %vm19754_vm3 = vmand %vm23725_vm10, %vm23724_vm15  ;;  %v619_v12 = vld [vmem:[#allocation2 + $0x8] sm:$0xe]  ;;  %v19762_v17 = vsel %vm23728_vm8, %v19662_v58, 0  ;;  %v845_v19 = vor.u32 %v844_v53, %v840_v51  ;;  %v19764_v22 = vor.u32 %v972_v42, %v971_v54  ;;  %v975_v13 = vrot.slane %v971_v54, 4  ;;  %v16687_v26 = vpop.f32.mrb[11].mxu0  ;;  %v1214_v7 = vpop.f32.mrb[8].mxu1 }
 0x101   : > { %v977_v23 = vshrl.u32 %v15974_v57, 16  ;;  %vm23729_vm15 = vsmask.f32 1280  ;;  %vm23730_vm10 = vcmask 58400   ;;  %v23731_v27 = vmov 0  ;;  %v16692_v42 = vpop.f32.mrb[9].mxu1 }
 0x102   : > { %vm19768_vm5 = vmand %vm23730_vm10, %vm23729_vm15  ;;  %715 = vst [vmem:[#allocation2 + $0x10] sm:$0xc] %v714_v16  ;;  %vm23733_vm7 = vsmask.f32 3328  ;;  %v841_v14 = vsel %vm19204_vm13, %v836_v5, %v840_v51  ;;  %v980_v37 = vshll.u32 %v15974_v57, 16  ;;  %v1100_v31 = vshrl.u32 %v15977_v10, 16 }
 0x103   : > { %v23732_v27 = vsel %vm19768_vm5, 4294967295, %v23731_v27  ;;  %vm19776_vm8 = vmand %vm23587_vm4, %vm23733_vm7  ;;  %v1103_v32 = vshll.u32 %v15977_v10, 16  ;;  %v846_v33 = vrot.slane %v845_v19, 4  ;;  %856 = vst.msk [vmem:[#allocation2 + $0x1c] sm:$0xf] %vm23587_vm4, %v841_v14  ;;  %v979_v34 = vrot.slane %v977_v23, 7 }
 0x104   : > { %v620_v38 = vsel %vm19754_vm3, %v19670_v61, %v619_v12  ;;  %v15978_v39 = vpack.c.bf16 %v1089_v15, %v1089_v15  ;;  %v626_v40 = vld [vmem:[#allocation2 + $0x10] sm:$0x3]  ;;  %vm23736_vm7 = vcmask 60448   ;;  %vm23737_vm10 = vsmask.f32 256  ;;  %v1217_v0 = vpop.f32.mrb[10].mxu1 }
 0x105   : > { %903 = vst.msk [vmem:[#allocation2 + $0x1c] sm:$0xf] %vm23736_vm7, %v19687_v20  ;;  %vm23738_vm13 = vcmask 24576   ;;  %v23739_v24 = vmov 0  ;;  %v996_v46 = vld [vmem:[#allocation2 + $0x2c] sm:$0x1]  ;;  %v15981_v52 = vpack.c.bf16 %v1214_v7, %v1214_v7  ;;  %v627_v61 = vsel %vm19768_vm5, %v19674_v1, %v626_v40 }
 0x106   : > { %vm19792_vm12 = vmand %vm23738_vm13, %vm23737_vm10  ;;  %v1102_v47 = vrot.slane %v1100_v31, 6  ;;  %v1105_v51 = vrot.slane %v1103_v32, 7  ;;  %621 = vst [vmem:[#allocation2 + $0x8] sm:$0xe] %v620_v38  ;;  %v860_v53 = vsel %vm19776_vm8, %v846_v33, %v859_v21  ;;  %v982_v20 = vor.u32 %v980_v37, %v979_v34  ;;  %v1121_v57 = vld [vmem:[#allocation2 + $0x2c] sm:$0xe]  ;;  %v19817_v32 = vpop.permute.xlu0 %1287 }
 0x107   : > { %v23740_v24 = vsel %vm19792_vm12, 4294967295, %v23739_v24  ;;  %v984_v54 = vrot.slane %v979_v34, 4  ;;  %v1109_v3 = vshrl.u32 %v15978_v39, 16  ;;  %628 = vst [vmem:[#allocation2 + $0x10] sm:$0x3] %v627_v61  ;;  %v16693_v5 = vpop.f32.mrb[11].mxu1  ;;  %v15982_v14 = vpack.c.bf16 %v1217_v0, %v1217_v0  ;;  %v19827_v0 = vpop.permute.xlu1 %1411 }
 0x108   : > { %861 = vst [vmem:[#allocation2 + $0x20] sm:$0xf] %v860_v53  ;;  %v1106_v10 = vor.u32 %v1105_v51, %v1102_v47  ;;  %v1112_v12 = vshll.u32 %v15978_v39, 16  ;;  %v1228_v15 = vshrl.u32 %v15981_v52, 16  ;;  %v1231_v16 = vshll.u32 %v15981_v52, 16  ;;  %v1342_v1 = vpop.f32.mrb[12].mxu0 }
 0x109   : > { %vm23741_vm13 = vsmask.f32 7946  ;;  %vm23742_vm7 = vcmask 60450   ;;  %v23743_v19 = vmov 0  ;;  %v997_v21 = vsel %vm19792_vm12, %v984_v54, %v996_v46  ;;  %v16698_v37 = vpop.f32.mrb[13].mxu0 }
 0x10a   : > { %vm19803_vm10 = vmand %vm23742_vm7, %vm23741_vm13  ;;  %v983_v23 = vsel %vm19232_vm14, %v975_v13, %v982_v20  ;;  %v1111_v26 = vrot.slane %v1109_v3, 6  ;;  %vm23745_vm15 = vsmask.f32 2304  ;;  %vm23746_vm4 = vcmask 59424   ;;  %v766_v7 = vld [vmem:[#allocation2 + $0x18] sm:$0x7] }
 0x10b   : > { %v23744_v19 = vsel %vm19803_vm10, 4294967295, %v23743_v19  ;;  %vm19813_vm5 = vmand %vm23746_vm4, %vm23745_vm15  ;;  %v23747_v31 = vmov 0  ;;  %998 = vst [vmem:[#allocation2 + $0x2c] sm:$0x1] %v997_v21  ;;  %v1107_v33 = vrot.slane %v1106_v10, 4  ;;  %v1122_v34 = vsel %vm19694_vm2, %v1106_v10, %v1121_v57  ;;  %v1345_v40 = vpop.f32.mrb[14].mxu0 }
 0x10c   : > { %v23748_v31 = vsel %vm19813_vm5, 4294967295, %v23747_v31  ;;  %vm23749_vm13 = vcmask 27648   ;;  %v1114_v13 = vrot.slane %v1112_v12, 7  ;;  %v1230_v38 = vrot.slane %v1228_v15, 5  ;;  %v760_v39 = vld [vmem:[#allocation2 + $0x10] sm:$0xc] }
 0x10d   : > { %993 = vst.msk [vmem:[#allocation2 + $0x28] sm:$0xf] %vm23749_vm13, %v983_v23  ;;  %1123 = vst [vmem:[#allocation2 + $0x2c] sm:$0xe] %v1122_v34  ;;  %vm23750_vm4 = vcmask 60448   ;;  %v1233_v42 = vrot.slane %v1231_v16, 6  ;;  %v761_v47 = vsel %vm19803_vm10, %v19668_v60, %v760_v39  ;;  %v15985_v54 = vpack.c.bf16 %v1342_v1, %v1342_v1 }
 0x10e   : > { %1037 = vst.msk [vmem:[#allocation2 + $0x28] sm:$0xf] %vm23750_vm4, %v19723_v29  ;;  %v1125_v46 = vld [vmem:[#allocation2 + $0x34] sm:$0x3]  ;;  %v1237_v51 = vshrl.u32 %v15982_v14, 16  ;;  %v1240_v52 = vshll.u32 %v15982_v14, 16  ;;  %v1115_v53 = vor.u32 %v1114_v13, %v1111_v26  ;;  %v767_v57 = vsel %vm19813_vm5, %v19676_v2, %v766_v7  ;;  %vm23751_vm7 = vmmov %vm23749_vm13 }
 0x10f   : > { %v16699_v61 = vpop.f32.mrb[15].mxu0  ;;  %v1249_v20 = vld [vmem:[#allocation2 + $0x34] sm:$0xc]  ;;  %762 = vst [vmem:[#allocation2 + $0x10] sm:$0xc] %v761_v47  ;;  %v15986_v29 = vpack.c.bf16 %v1345_v40, %v1345_v40  ;;  %v1470_v3 = vpop.f32.mrb[12].mxu1  ;;  %v1234_v5 = vor.u32 %v1233_v42, %v1230_v38 }
 0x110   : > { %v1239_v10 = vrot.slane %v1237_v51, 5  ;;  %v1242_v12 = vrot.slane %v1240_v52, 6  ;;  %v1377_v15 = vld [vmem:[#allocation2 + $0x3c] sm:$0x8]  ;;  %768 = vst [vmem:[#allocation2 + $0x18] sm:$0x7] %v767_v57  ;;  %v15989_v60 = vpack.c.bf16 %v1470_v3, %v1470_v3  ;;  %v1116_v26 = vsel %vm19175_vm11, %v1107_v33, %v1115_v53  ;;  %v1286_v40 = vpop.permute.xlu0 %1285  ;;  %v19847_v3 = vpop.permute.xlu1 %1415 }
 0x111   : > { %v16704_v16 = vpop.f32.mrb[13].mxu1  ;;  %v1117_v21 = vrot.slane %v1115_v53, 4  ;;  %v1356_v23 = vshll.u32 %v15985_v54, 16  ;;  %v1359_v14 = vshrl.u32 %v15985_v54, 16  ;;  %v1253_v1 = vld [vmem:[#allocation2 + $0x3c] sm:$0x7]  ;;  %v1250_v2 = vsel %vm19739_vm9, %v1234_v5, %v1249_v20 }
 0x112   : > { %v1473_v37 = vpop.f32.mrb[14].mxu1  ;;  %v1235_v34 = vrot.slane %v1234_v5, 4  ;;  %v1243_v7 = vor.u32 %v1242_v12, %v1239_v10  ;;  %1124 = vst.msk [vmem:[#allocation2 + $0x30] sm:$0xf] %vm23751_vm7, %v1116_v26  ;;  %v1365_v13 = vshll.u32 %v15986_v29, 16  ;;  %vm23753_vm4 = vcmask 60451  }
 0x113   : > { %vm23752_vm13 = vsmask.f32 7950  ;;  %v900_v39 = vld [vmem:[#allocation2 + $0x18] sm:$0x8]  ;;  %v16705_v33 = vpop.f32.mrb[15].mxu1  ;;  %v1126_v42 = vsel %vm19704_vm6, %v1117_v21, %v1125_v46  ;;  %v1358_v47 = vrot.slane %v1356_v23, 5 }
 0x114   : > { %vm19839_vm14 = vmand %vm23753_vm4, %vm23752_vm13  ;;  %1251 = vst [vmem:[#allocation2 + $0x34] sm:$0xc] %v1250_v2  ;;  %v1361_v51 = vrot.slane %v1359_v14, 4  ;;  %vm23756_vm15 = vcmask 60448   ;;  %v1369_v52 = vshrl.u32 %v15986_v29, 16  ;;  %v1594_v61 = vpop.f32.mrb[16].mxu0  ;;  %vm23761_vm4 = vnez %v23703_v9 }
 0x115   : > { %1167 = vst.msk [vmem:[#allocation2 + $0x30] sm:$0xf] %vm23756_vm15, %v19786_v45  ;;  %1127 = vst [vmem:[#allocation2 + $0x34] sm:$0x3] %v1126_v42  ;;  %v1245_v53 = vrot.slane %v1243_v7, 4  ;;  %v1367_v20 = vrot.slane %v1365_v13, 5  ;;  %v1378_v46 = vsel %vm19717_vm0, %v1358_v47, %v1377_v15  ;;  %v901_v45 = vsel %vm19839_vm14, %v19666_v59, %v900_v39 }
 0x116   : > { %v1484_v54 = vshrl.u32 %v15989_v60, 16  ;;  %v1487_v57 = vshll.u32 %v15989_v60, 16  ;;  %v16710_v5 = vpop.f32.mrb[17].mxu0  ;;  %v1164_v10 = vld [vmem:[#allocation2 + $0x2c] sm:$0xe]  ;;  %v1362_v12 = vor.u32 %v1361_v51, %v1358_v47  ;;  %v1371_v16 = vrot.slane %v1369_v52, 4 }
 0x117   : > { %vm23757_vm15 = vsmask.f32 3328  ;;  %vm23758_vm7 = vcmask 60448   ;;  %v906_v60 = vld [vmem:[#allocation2 + $0x20] sm:$0xf]  ;;  %v1597_v21 = vpop.f32.mrb[18].mxu0  ;;  %v1165_v23 = vsel %vm19754_vm3, %v19700_v48, %v1164_v10  ;;  %v1254_v15 = vsel %vm19731_vm1, %v1245_v53, %v1253_v1 }
 0x118   : > { %vm19856_vm13 = vmand %vm23758_vm7, %vm23757_vm15  ;;  %1379 = vst [vmem:[#allocation2 + $0x3c] sm:$0x8] %v1378_v46  ;;  %v19865_v14 = vrot.slane %v1484_v54, 7  ;;  %v1244_v59 = vsel %vm23761_vm4, %v1235_v34, %v1243_v7  ;;  %v1381_v26 = vld [vmem:[#allocation2 + $0x44] sm:$0xf]  ;;  %v16711_v2 = vpop.f32.mrb[19].mxu0  ;;  %v1372_v39 = vor.u32 %v1371_v16, %v1367_v20  ;;  %v15990_v48 = vpack.c.bf16 %v1473_v37, %v1473_v37  ;;  %v1414_v7 = vpop.permute.xlu0 %1413 }
 0x119   : > { %902 = vst [vmem:[#allocation2 + $0x18] sm:$0x8] %v901_v45  ;;  %1166 = vst [vmem:[#allocation2 + $0x2c] sm:$0xe] %v1165_v23  ;;  %v1363_v13 = vrot.slane %v1362_v12, 4  ;;  %vm23762_vm7 = vcmask 27648   ;;  %v15993_v33 = vpack.c.bf16 %v1594_v61, %v1594_v61  ;;  %v907_v34 = vsel %vm19856_vm13, %v19678_v4, %v906_v60  ;;  %v19884_v60 = vpop.permute.xlu1 %1535 }
 0x11a   : > { %1255 = vst [vmem:[#allocation2 + $0x3c] sm:$0x7] %v1254_v15  ;;  %1252 = vst.msk [vmem:[#allocation2 + $0x38] sm:$0xf] %vm23762_vm7, %v1244_v59  ;;  %v1722_v42 = vpop.f32.mrb[16].mxu1  ;;  %v19871_v1 = vor.u32 %v1487_v57, %v19865_v14  ;;  %v1490_v47 = vrot.slane %v19865_v14, 4  ;;  %v15994_v51 = vpack.c.bf16 %v1597_v21, %v1597_v21  ;;  %vm23765_vm15 = vnez %v23732_v27 }
 0x11b   : > { %vm23763_vm1 = vcmask 60448   ;;  %v16716_v52 = vpop.f32.mrb[17].mxu1  ;;  %v1373_v53 = vrot.slane %v1372_v39, 4  ;;  %v1492_v54 = vshrl.u32 %v15990_v48, 16  ;;  %v1495_v5 = vshll.u32 %v15990_v48, 16  ;;  %v19878_v61 = vld [vmem:[#allocation2 + $0x8] sm:$0xff]  }
 0x11c   : > { %1295 = vst.msk [vmem:[#allocation2 + $0x38] sm:$0xf] %vm23763_vm1, %v1286_v40  ;;  %v1608_v37 = vshrl.u32 %v15993_v33, 16  ;;  %908 = vst [vmem:[#allocation2 + $0x20] sm:$0xf] %v907_v34  ;;  %v19880_v57 = vpop.f32.mrb[18].mxu1  ;;  %vm23764_vm1 = vnez %v23705_v18 }
 0x11d   : > { %v1292_v10 = vld [vmem:[#allocation2 + $0x34] sm:$0xc]  ;;  %v1507_v12 = vld [vmem:[#allocation2 + $0x50] sm:$0x1]  ;;  %v1611_v46 = vshll.u32 %v15993_v33, 16  ;;  %v1368_v40 = vsel %vm23764_vm1, %v1363_v13, %v1367_v20  ;;  %v1617_v16 = vshrl.u32 %v15994_v51, 16  ;;  %v1382_v48 = vsel %vm19776_vm8, %v1373_v53, %v1381_v26 }
 0x11e   : > { %v1620_v4 = vshll.u32 %v15994_v51, 16  ;;  %v990_v45 = vld [vmem:[#allocation2 + $0x24] sm:$0xf]  ;;  %v16717_v21 = vpop.f32.mrb[19].mxu1  ;;  %v1168_v23 = vld [vmem:[#allocation2 + $0x34] sm:$0x3]  ;;  %v1293_v15 = vsel %vm19803_vm10, %v19772_v28, %v1292_v10  ;;  %vm23768_vm10 = vmmov %vm23762_vm7 }
 0x11f   : > { %v1494_v59 = vrot.slane %v1492_v54, 7  ;;  %v1610_v2 = vrot.slane %v1608_v37, 6  ;;  %v1629_v39 = vld [vmem:[#allocation2 + $0x50] sm:$0xe]  ;;  %1380 = vst.msk [vmem:[#allocation2 + $0x40] sm:$0xf] %vm23762_vm7, %v1368_v40  ;;  %v1169_v13 = vsel %vm23765_vm15, %v19735_v56, %v1168_v23  ;;  %v15997_v21 = vpack.c.bf16 %v1722_v42, %v1722_v42  ;;  %v1538_v23 = vpop.permute.xlu0 %1537 }
 0x120   : > { %v1850_v20 = vpop.f32.mrb[20].mxu0  ;;  %1294 = vst [vmem:[#allocation2 + $0x34] sm:$0xc] %v1293_v15  ;;  %v1613_v33 = vrot.slane %v1611_v46, 7  ;;  %1383 = vst [vmem:[#allocation2 + $0x44] sm:$0xf] %v1382_v48 }
 0x121   : > { %vm23766_vm1 = vcmask 60448   ;;  %v1619_v34 = vrot.slane %v1617_v16, 6  ;;  %v1622_v28 = vrot.slane %v1620_v4, 7  ;;  %vm23767_vm4 = vsmask.f32 7938  ;;  %v16722_v52 = vpop.f32.mrb[21].mxu0 }
 0x122   : > { %1423 = vst.msk [vmem:[#allocation2 + $0x40] sm:$0xf] %vm23766_vm1, %v1414_v7  ;;  %vm19898_vm6 = vmand %vm23768_vm10, %vm23767_vm4  ;;  %v23769_v51 = vmov 0  ;;  %v1503_v26 = vld [vmem:[#allocation2 + $0x48] sm:$0xf]  ;;  %v1497_v54 = vor.u32 %v1495_v5, %v1494_v59  ;;  %v1499_v56 = vrot.slane %v1494_v59, 4  ;;  %v19909_v16 = vor.u32 %v1613_v33, %v1610_v2  ;;  %v19934_v52 = vpop.permute.xlu1 %1539 }
 0x123   : > { %v23770_v51 = vsel %vm19898_vm6, 4294967295, %v23769_v51  ;;  %1170 = vst [vmem:[#allocation2 + $0x34] sm:$0x3] %v1169_v13  ;;  %v1420_v53 = vld [vmem:[#allocation2 + $0x3c] sm:$0x8]  ;;  %v2702_v37 = vshll.u32 %v19878_v61, 16  ;;  %v19911_v4 = vor.u32 %v1622_v28, %v1619_v34  ;;  %v991_v42 = vsel %vm19898_vm6, %v19764_v22, %v990_v45 }
 0x124   : > { %23771 = vst [vmem:[#allocation8_spill] sm:$0xff] %v23770_v51  ;;  %v2706_v10 = vshrl.u32 %v19878_v61, 16  ;;  %v19904_v7 = vpop.f32.mrb[22].mxu0  ;;  %v1296_v46 = vld [vmem:[#allocation2 + $0x3c] sm:$0x7]  ;;  %v1421_v40 = vsel %vm19839_vm14, %v19827_v0, %v1420_v53  ;;  %v19913_v15 = vld [vmem:[#allocation2 + $0x10] sm:$0xff]   ;;  %v1508_v0 = vsel %vm19792_vm12, %v1499_v56, %v1507_v12  ;;  %vm23775_vm1 = vnez %v23707_v41 }
 0x125   : > { %v4036_v5 = vld [vmem:[#allocation2 + $0x8] sm:$0xe]  ;;  %v19915_v59 = vld [vmem:[#allocation2 + $0xc] sm:$0xf]  ;;  %v16723_v48 = vpop.f32.mrb[23].mxu0  ;;  %v1297_v61 = vsel %vm19813_vm5, %v19817_v32, %v1296_v46  ;;  %v2704_v2 = vrot.slane %v2702_v37, 1  ;;  %v1630_v32 = vsel %vm19694_vm2, %v19909_v16, %v1629_v39  ;;  %v1504_v37 = vsel %vm19898_vm6, %v19871_v1, %v1503_v26 }
 0x126   : > { %23772 = vst [vmem:[#allocation9_spill] sm:$0xff] %v19915_v59  ;;  %1422 = vst [vmem:[#allocation2 + $0x3c] sm:$0x8] %v1421_v40  ;;  %v19925_v13 = vld [vmem:[#allocation2 + $0x10] sm:$0xff]   ;;  %v19927_v33 = vpop.f32.mrb[20].mxu1  ;;  %v1736_v12 = vshrl.u32 %v15997_v21, 16  ;;  %v1498_v48 = vsel %vm23775_vm1, %v1490_v47, %v1497_v54  ;;  %v16001_v26 = vpack.c.bf16 %v1850_v20, %v1850_v20 }
 0x127   : > { %1298 = vst [vmem:[#allocation2 + $0x3c] sm:$0x7] %v1297_v61  ;;  %1509 = vst [vmem:[#allocation2 + $0x50] sm:$0x1] %v1508_v0  ;;  %v16728_v53 = vpop.f32.mrb[21].mxu1  ;;  %v2708_v45 = vor.u32 %v2706_v10, %v2704_v2  ;;  %v1739_v56 = vshll.u32 %v15997_v21, 16  ;;  %v15232_v0 = vcombine.low %v4036_v5, %v19915_v59 }
 0x128   : > { %992 = vst [vmem:[#allocation2 + $0x24] sm:$0xf] %v991_v42  ;;  %1631 = vst [vmem:[#allocation2 + $0x50] sm:$0xe] %v1630_v32  ;;  %vm23773_vm10 = vsmask.f32 7424 }
 0x129   : > { %v2705_v22 = vsel %vm23773_vm10, %v19698_v44, %v2704_v2  ;;  %v19941_v46 = vpop.f32.mrb[22].mxu1  ;;  %vm23774_vm4 = vcmask 64512   ;;  %v1738_v39 = vrot.slane %v1736_v12, 5  ;;  %v1757_v40 = vld [vmem:[#allocation2 + $0x58] sm:$0xc]  ;;  %v15998_v44 = vpack.c.bf16 %v19880_v57, %v19880_v57  ;;  %vm23776_vm10 = vmmov %vm23762_vm7  ;;  %v19954_v42 = vpop.f32.mrb[24].mxu0 }
 0x12a   : > { %16756 = vmatprep.mubr.msk.bf16.mxu1 %vm23774_vm4, %v2705_v22  ;;  %1505 = vst [vmem:[#allocation2 + $0x48] sm:$0xf] %v1504_v37  ;;  %v2710_v10 = vshll.u32 %v19913_v15, 16  ;;  %v16729_v21 = vpop.f32.mrb[23].mxu1  ;;  %v1424_v61 = vld [vmem:[#allocation2 + $0x44] sm:$0xf]  ;;  %v1664_v12 = vpop.permute.xlu0 %1663 }
 0x12b   : > { %v1741_v1 = vrot.slane %v1739_v56, 6  ;;  %1506 = vst.msk [vmem:[#allocation2 + $0x4c] sm:$0xf] %vm23776_vm10, %v1498_v48  ;;  %v4178_v2 = vshrl.u32 %v19925_v13, 16  ;;  %v1425_v14 = vsel %vm19856_vm13, %v19847_v3, %v1424_v61  ;;  %vm23777_vm4 = vcmask 60448   ;;  %v16734_v37 = vpop.f32.mrb[25].mxu0 }
 0x12c   : > { %1547 = vst.msk [vmem:[#allocation2 + $0x4c] sm:$0xf] %vm23777_vm4, %v1538_v23  ;;  %v1745_v47 = vshrl.u32 %v15998_v44, 16  ;;  %v1748_v57 = vshll.u32 %v15998_v44, 16  ;;  %v19960_v54 = vrot.slane %v2710_v10, 1  ;;  %vm23779_vm1 = vmmov %vm23777_vm4  ;;  %v1864_v23 = vshll.u32 %v16001_v26, 16 }
 0x12d   : > { %v1885_v32 = vld [vmem:[#allocation2 + $0x60] sm:$0x8]  ;;  %v15174_v20 = vld [vmem:[%s23565_s3 + $0x8] sm:$0xf]  ;;  %1426 = vst [vmem:[#allocation2 + $0x44] sm:$0xf] %v1425_v14  ;;  %v19965_v5 = vor.u32 %v1741_v1, %v1738_v39  ;;  %v19977_v39 = vpop.permute.xlu1 %1665 }
 0x12e   : > { %vm23778_vm10 = vsmask.f32 7938  ;;  %v1867_v53 = vshrl.u32 %v16001_v26, 16  ;;  %v4170_v22 = vshrl.u32 %v15232_v0, 16  ;;  %v1040_v56 = vld [vmem:[#allocation2 + $0x2c] sm:$0x1] }
 0x12f   : > { %vm19969_vm5 = vmand %vm23779_vm1, %vm23778_vm10  ;;  %v1747_v48 = vrot.slane %v1745_v47, 5  ;;  %v1750_v44 = vrot.slane %v1748_v57, 6  ;;  %vm23782_vm4 = vsmask.f32 7424  ;;  %v4173_v21 = vshll.u32 %v15232_v0, 16  ;;  %v19975_v61 = vld [vmem:[#allocation2 + $0x18] sm:$0xff]  }
 0x130   : > { %v2713_v10 = vsel %vm23782_vm4, %v2708_v45, %v19960_v54  ;;  %v19979_v1 = vpop.f32.mrb[26].mxu0  ;;  %v1758_v26 = vsel %vm19739_vm9, %v19965_v5, %v1757_v40  ;;  %v1034_v8 = vld [vmem:[#allocation2 + $0x24] sm:$0xf]  ;;  %vm23783_vm1 = vcmask 64512   ;;  %v1866_v47 = vrot.slane %v1864_v23, 5  ;;  %v19992_v0 = vpop.f32.mrb[24].mxu1 }
 0x131   : > { %16757 = vmatmul.mubr.msk.bf16.vlgmr.msra.gmra.mrb[32].mxu1 %vm23783_vm1, %v2713_v10  ;;  %v1869_v57 = vrot.slane %v1867_v53, 4  ;;  %vm23784_vm10 = vsmask.f32 256  ;;  %vm23785_vm4 = vcmask 57376   ;;  %1759 = vst [vmem:[#allocation2 + $0x58] sm:$0xc] %v1758_v26  ;;  %v1035_v37 = vsel %vm19969_vm5, %v19672_v62, %v1034_v8 }
 0x132   : > { %vm19988_vm7 = vmand %vm23785_vm4, %vm23784_vm10  ;;  %v19997_v14 = vor.u32 %v1750_v44, %v1747_v48  ;;  %v4172_v40 = vrot.slane %v4170_v22, 1  ;;  %v4175_v28 = vrot.slane %v4173_v21, 2  ;;  %v1548_v10 = vld [vmem:[#allocation2 + $0x50] sm:$0x1]  ;;  %v1672_v23 = vld [vmem:[#allocation2 + $0x50] sm:$0xe]  ;;  %16793 = vmatpush3.bf16.msra.mxu1 %v19762_v17  ;;  %v1886_v55 = vsel %vm19717_vm0, %v1866_v47, %v1885_v32 }
 0x133   : > { %1036 = vst [vmem:[#allocation2 + $0x24] sm:$0xf] %v1035_v37  ;;  %v1544_v53 = vld [vmem:[#allocation2 + $0x48] sm:$0xf]  ;;  %v1870_v34 = vor.u32 %v1869_v57, %v1866_v47  ;;  %v4180_v6 = vrot.slane %v4178_v2, 1  ;;  %v4181_v26 = vshll.u32 %v19925_v13, 16  ;;  %v1041_v32 = vsel %vm19988_vm7, %v19690_v35, %v1040_v56  ;;  %v20013_v2 = vpop.permute.xlu0 %1667  ;;  %v1792_v57 = vpop.permute.xlu1 %1791 }
 0x134   : > { %v20003_v59 = vld [vmem:[#allocation2 + $0x18] sm:$0xff]   ;;  %v16740_v8 = vpop.f32.mrb[25].mxu1  ;;  %vm23788_vm1 = vcmask 1043456   ;;  %v1545_v62 = vsel %vm19969_vm5, %v19884_v60, %v1544_v53  ;;  %1887 = vst [vmem:[#allocation2 + $0x60] sm:$0x8] %v1886_v55  ;;  %v4176_v22 = vor.u32 %v4175_v28, %v4172_v40  ;;  %v1549_v60 = vsel %vm19988_vm7, %v19934_v52, %v1548_v10  ;;  %v16735_v28 = vpop.f32.mrb[27].mxu0 }
 0x135   : > { %18648 = vmatprep.subr.msk.bf16.mxu1 %vm23788_vm1, %v15174_v20  ;;  %v20015_v48 = vpop.f32.mrb[26].mxu1  ;;  %1546 = vst [vmem:[#allocation2 + $0x48] sm:$0xf] %v1545_v62  ;;  %v20017_v44 = vrot.slane %v1870_v34, 4  ;;  %v4183_v20 = vrot.slane %v4181_v26, 2  ;;  %v1673_v55 = vsel %vm19754_vm3, %v1664_v12, %v1672_v23  ;;  %v16002_v35 = vpack.c.bf16 %v19904_v7, %v19904_v7  ;;  %v20030_v37 = vpop.f32.mrb[28].mxu0 }
 0x136   : > { %1042 = vst [vmem:[#allocation2 + $0x2c] sm:$0x1] %v1041_v32  ;;  %1550 = vst [vmem:[#allocation2 + $0x50] sm:$0x1] %v1549_v60  ;;  %v2714_v56 = vshrl.u32 %v19913_v15, 16  ;;  %v2718_v34 = vshll.u32 %v19975_v61, 16  ;;  %v16005_v21 = vpack.c.bf16 %v19927_v33, %v19927_v33 }
 0x137   : > { %1674 = vst [vmem:[#allocation2 + $0x50] sm:$0xe] %v1673_v55  ;;  %v1633_v47 = vld [vmem:[#allocation2 + $0x58] sm:$0x3]  ;;  %v4184_v52 = vor.u32 %v4183_v20, %v4180_v6  ;;  %v4187_v12 = vshrl.u32 %v20003_v59, 16  ;;  %v4190_v40 = vshll.u32 %v20003_v59, 16 }
 0x138   : > { %v23789_v10 = vrot.slane %v19909_v16, 4  ;;  %v16746_v15 = vpop.f32.mrb[29].mxu0  ;;  %v1873_v23 = vshll.u32 %v16002_v35, 16  ;;  %v1877_v53 = vshrl.u32 %v16002_v35, 16  ;;  %v2716_v33 = vor.u32 %v2714_v56, %v19960_v54  ;;  %v1800_v16 = vld [vmem:[#allocation2 + $0x58] sm:$0xc] }
 0x139   : > { %v2720_v26 = vrot.slane %v2718_v34, 1  ;;  %vm23790_vm10 = vcmask 27648   ;;  %v20041_v8 = vpop.f32.mrb[30].mxu0  ;;  %vm23791_vm4 = vsmask.f32 6400  ;;  %v1992_v62 = vshrl.u32 %v16005_v21, 16 }
 0x13a   : > { %v1624_v7 = vsel %vm19175_vm11, %v23789_v10, %v19911_v4  ;;  %v4185_v6 = vsel %vm23791_vm4, %v4176_v22, %v4184_v52  ;;  %v1995_v32 = vshll.u32 %v16005_v21, 16  ;;  %v4189_v20 = vrot.slane %v4187_v12, 1  ;;  %v16741_v60 = vpop.f32.mrb[27].mxu1  ;;  %v2011_v35 = vld [vmem:[#allocation2 + $0x6c] sm:$0xf]  ;;  %v18694_v34 = vld [vmem:[#allocation2 + $0x20] sm:$0xff]   ;;  %v1794_v10 = vpop.permute.xlu0 %1793 }
 0x13b   : > { %1632 = vst.msk [vmem:[#allocation2 + $0x54] sm:$0xf] %vm23790_vm10, %v1624_v7  ;;  %vm23792_vm1 = vcmask 60448   ;;  %vm23793_vm11 = vcmask 64512   ;;  %v20047_v55 = vrot.slane %v1873_v23, 5  ;;  %v1879_v54 = vrot.slane %v1877_v53, 4 }
 0x13c   : > { %1675 = vst.msk [vmem:[#allocation2 + $0x54] sm:$0xf] %vm23792_vm1, %v19977_v39  ;;  %16908 = vmatprep.mubr.msk.bf16.mxu0 %vm23793_vm11, %v4185_v6  ;;  %vm23794_vm0 = vsmask.f32 7424  ;;  %v4192_v56 = vrot.slane %v4190_v40, 2  ;;  %vm23795_vm10 = vmmov %vm23793_vm11  ;;  %v20051_v22 = vrot.slane %v1992_v62, 7  ;;  %vm23797_vm4 = vnez %v23713_v49 }
 0x13d   : > { %v2721_v28 = vsel %vm23794_vm0, %v2716_v33, %v2720_v26  ;;  %v23796_v21 = vrot.slane %v19911_v4, 4  ;;  %v2722_v12 = vshrl.u32 %v19975_v61, 16  ;;  %v20058_v7 = vld [vmem:[#allocation2 + $0x20] sm:$0xff]   ;;  %vm23799_vm11 = vnez %v23744_v19  ;;  %v16747_v23 = vpop.f32.mrb[31].mxu0  ;;  %v20068_v6 = vld [vmem:[#allocation2 + $0x28] sm:$0xff]   ;;  %v20070_v61 = vpop.permute.xlu1 %1795 }
 0x13e   : > { %16760 = vmatprep.mubr.msk.bf16.mxu1 %vm23795_vm10, %v2721_v28  ;;  %23798 = vst [vmem:[#allocation10_spill] sm:$0xff] %v20058_v7  ;;  %v1801_v15 = vsel %vm23799_vm11, %v1792_v57, %v1800_v16  ;;  %v1880_v40 = vor.u32 %v1879_v54, %v20047_v55  ;;  %v4193_v53 = vor.u32 %v4192_v56, %v4189_v20  ;;  %v2726_v33 = vshll.u32 %v18694_v34, 16  ;;  %v20076_v60 = vld [vmem:[#allocation2 + $0x28] sm:$0xff]  }
 0x13f   : > { %v1634_v39 = vsel %vm23797_vm4, %v23796_v21, %v1633_v47  ;;  %1802 = vst [vmem:[#allocation2 + $0x58] sm:$0xc] %v1801_v15  ;;  %v23800_v4 = vrot.slane %v19965_v5, 4  ;;  %vm23801_vm0 = vnez %v23703_v9  ;;  %v1997_v62 = vor.u32 %v1995_v32, %v20051_v22  ;;  %23803 = vst [vmem:[#allocation11_spill] sm:$0xff] %v20076_v60  ;;  %v20081_v5 = vld [vmem:[%s23565_s3 + $0x18] sm:$0xf] }
 0x140   : > { %1635 = vst [vmem:[#allocation2 + $0x58] sm:$0x3] %v1634_v39  ;;  %v2724_v16 = vor.u32 %v2722_v12, %v2720_v26  ;;  %v4196_v20 = vshrl.u32 %v20058_v7, 16  ;;  %vm23802_vm1 = vcmask 27648   ;;  %v20083_v54 = vrot.slane %v1880_v40, 4  ;;  %v20092_v15 = vpop.f32.mrb[28].mxu1 }
 0x141   : > { %v1752_v47 = vsel %vm23801_vm0, %v23800_v4, %v19997_v14  ;;  %vm23804_vm10 = vsmask.f32 6400  ;;  %v2728_v56 = vrot.slane %v2726_v33, 1  ;;  %v4199_v32 = vshll.u32 %v20058_v7, 16  ;;  %v1761_v40 = vld [vmem:[#allocation2 + $0x60] sm:$0x7]  ;;  %v1920_v33 = vpop.permute.xlu0 %1919 }
 0x142   : > { %1760 = vst.msk [vmem:[#allocation2 + $0x5c] sm:$0xf] %vm23802_vm1, %v1752_v47  ;;  %v4194_v28 = vsel %vm23804_vm10, %v4184_v52, %v4193_v53  ;;  %vm23805_vm0 = vcmask 60448   ;;  %v2012_v26 = vsel %vm19898_vm6, %v1997_v62, %v2011_v35  ;;  %vm23806_vm1 = vcmask 64512   ;;  %v1928_v4 = vld [vmem:[#allocation2 + $0x60] sm:$0x8] }
 0x143   : > { %1803 = vst.msk [vmem:[#allocation2 + $0x5c] sm:$0xf] %vm23805_vm0, %v1794_v10  ;;  %16909 = vmatmul.mubr.msk.bf16.vlgmr.msra.gmra.mrb[32].mxu0 %vm23806_vm1, %v4194_v28  ;;  %v4198_v21 = vrot.slane %v4196_v20, 1  ;;  %v2730_v39 = vshrl.u32 %v18694_v34, 16  ;;  %v2734_v12 = vshll.u32 %v20068_v6, 16  ;;  %v4201_v23 = vrot.slane %v4199_v32, 2  ;;  %vm23808_vm0 = vmmov %vm23806_vm1 }
 0x144   : > { %2013 = vst [vmem:[#allocation2 + $0x6c] sm:$0xf] %v2012_v26  ;;  %16945 = vmatpush3.bf16.msra.mxu0 %v19727_v30  ;;  %vm23807_vm10 = vsmask.f32 7424  ;;  %v16006_v10 = vpack.c.bf16 %v19941_v46, %v19941_v46  ;;  %v16009_v35 = vpack.c.bf16 %v19954_v42, %v19954_v42  ;;  %v4205_v62 = vshrl.u32 %v20076_v60, 16  ;;  %v20103_v20 = vld [vmem:[#allocation2 + $0x30] sm:$0xff]   ;;  %v20109_v26 = vpop.permute.xlu1 %1921 }
 0x145   : > { %v2729_v52 = vsel %vm23807_vm10, %v2724_v16, %v2728_v56  ;;  %v2732_v34 = vor.u32 %v2730_v39, %v2728_v56  ;;  %v2736_v47 = vrot.slane %v2734_v12, 1  ;;  %v4208_v30 = vshll.u32 %v20076_v60, 16  ;;  %v20107_v32 = vld [vmem:[#allocation2 + $0x30] sm:$0xff]  }
 0x146   : > { %16761 = vmatmul.mubr.msk.bf16.gmra.mrb[36].mxu1 %vm23808_vm0, %v2729_v52  ;;  %vm23809_vm1 = vcmask 1043456   ;;  %v4202_v46 = vor.u32 %v4201_v23, %v4198_v21  ;;  %v2000_v16 = vshrl.u32 %v16006_v10, 16  ;;  %v2003_v28 = vshll.u32 %v16006_v10, 16  ;;  %v16752_v52 = vpop.f32.mrb[29].mxu1  ;;  %v2015_v12 = vld [vmem:[#allocation2 + $0x74] sm:$0x1] }
 0x147   : > { %18653 = vmatprep.subr.msk.bf16.mxu0 %vm23809_vm1, %v20081_v5  ;;  %v2116_v42 = vshrl.u32 %v16009_v35, 16  ;;  %v1676_v56 = vld [vmem:[#allocation2 + $0x58] sm:$0x3]  ;;  %v2737_v39 = vsel %vm23807_vm10, %v2732_v34, %v2736_v47  ;;  %v2119_v57 = vshll.u32 %v16009_v35, 16  ;;  %v4207_v17 = vrot.slane %v4205_v62, 1  ;;  %v20112_v51 = vpop.f32.mrb[30].mxu1 }
 0x148   : > { %v4210_v60 = vrot.slane %v4208_v30, 2  ;;  %v1677_v21 = vsel %vm23765_vm15, %v20013_v2, %v1676_v56  ;;  %vm23810_vm0 = vsmask.f32 6400  ;;  %vm23811_vm1 = vcmask 64512   ;;  %v2137_v52 = vld [vmem:[#allocation2 + $0x74] sm:$0xe] }
 0x149   : > { %v4203_v23 = vsel %vm23810_vm0, %v4193_v53, %v4202_v46  ;;  %16764 = vmatprep.mubr.msk.bf16.mxu1 %vm23811_vm1, %v2737_v39  ;;  %v2002_v10 = vrot.slane %v2000_v16, 7  ;;  %v2118_v7 = vrot.slane %v2116_v42, 6  ;;  %1678 = vst [vmem:[#allocation2 + $0x58] sm:$0x3] %v1677_v21  ;;  %vm23812_vm6 = vmmov %vm23811_vm1  ;;  %v2121_v34 = vrot.slane %v2119_v57, 7  ;;  %v16753_v53 = vpop.f32.mrb[31].mxu1  ;;  %v20146_v21 = vpop.permute.xlu1 %2043 }
 0x14a   : > { %16912 = vmatprep.mubr.msk.bf16.mxu0 %vm23812_vm6, %v4203_v23  ;;  %v20120_v35 = vor.u32 %v4210_v60, %v4207_v17  ;;  %v23813_v62 = vrot.slane %v19997_v14, 4  ;;  %vm23814_vm10 = vnez %v23720_v50  ;;  %v1929_v2 = vsel %vm19839_vm14, %v1920_v33, %v1928_v4  ;;  %v20132_v17 = vpop.permute.xlu0 %1923  ;;  %vm23815_vm6 = vmmov %vm23810_vm0  ;;  %v1889_v4 = vld [vmem:[#allocation2 + $0x68] sm:$0xf]  ;;  %v2265_v53 = vld [vmem:[#allocation2 + $0x7c] sm:$0xc] }
 0x14b   : > { %v20128_v56 = vor.u32 %v2003_v28, %v2002_v10  ;;  %v2007_v16 = vrot.slane %v2002_v10, 4  ;;  %1930 = vst [vmem:[#allocation2 + $0x60] sm:$0x8] %v1929_v2  ;;  %v2738_v42 = vshrl.u32 %v20068_v6, 16  ;;  %v2742_v57 = vshll.u32 %v20103_v20, 16  ;;  %vm23816_vm0 = vmmov %vm23811_vm1  ;;  %v20152_v10 = vld [vmem:[#allocation2 + $0x38] sm:$0xff]  }
 0x14c   : > { %v1762_v30 = vsel %vm23814_vm10, %v23813_v62, %v1761_v40  ;;  %v20134_v60 = vor.u32 %v2121_v34, %v2118_v7  ;;  %v4212_v14 = vsel %vm23815_vm6, %v4202_v46, %v20120_v35  ;;  %v16010_v40 = vpack.c.bf16 %v19979_v1, %v19979_v1  ;;  %vm23818_vm6 = vmmov %vm23816_vm0 }
 0x14d   : > { %1763 = vst [vmem:[#allocation2 + $0x60] sm:$0x7] %v1762_v30  ;;  %v16013_v33 = vpack.c.bf16 %v19992_v0, %v19992_v0  ;;  %v2016_v28 = vsel %vm19792_vm12, %v2007_v16, %v2015_v12  ;;  %16913 = vmatmul.mubr.msk.bf16.gmra.mrb[36].mxu0 %vm23816_vm0, %v4212_v14  ;;  %v2740_v6 = vor.u32 %v2738_v42, %v2736_v47  ;;  %v2744_v39 = vrot.slane %v2742_v57, 1 }
 0x14e   : > { %v4214_v7 = vshrl.u32 %v20107_v32, 16  ;;  %2017 = vst [vmem:[#allocation2 + $0x74] sm:$0x1] %v2016_v28  ;;  %v2138_v1 = vsel %vm19694_vm2, %v20134_v60, %v2137_v52  ;;  %v2125_v0 = vshrl.u32 %v16010_v40, 16  ;;  %v2128_v23 = vshll.u32 %v16010_v40, 16  ;;  %v20167_v40 = vld [vmem:[#allocation2 + $0x38] sm:$0xff]  }
 0x14f   : > { %2139 = vst [vmem:[#allocation2 + $0x74] sm:$0xe] %v2138_v1  ;;  %vm23817_vm1 = vsmask.f32 7424  ;;  %v2244_v47 = vshrl.u32 %v16013_v33, 16  ;;  %v2247_v34 = vshll.u32 %v16013_v33, 16  ;;  %vm23819_vm2 = vnez %v23705_v18  ;;  %v2048_v33 = vpop.permute.xlu0 %2047 }
 0x150   : > { %v2745_v12 = vsel %vm23817_vm1, %v2740_v6, %v2744_v39  ;;  %v4216_v62 = vrot.slane %v4214_v7, 1  ;;  %v2127_v30 = vrot.slane %v2125_v0, 6  ;;  %v2130_v2 = vrot.slane %v2128_v23, 7  ;;  %v2052_v1 = vld [vmem:[#allocation2 + $0x6c] sm:$0xf] }
 0x151   : > { %16765 = vmatmul.mubr.msk.bf16.gmra.mrb[40].mxu1 %vm23818_vm6, %v2745_v12  ;;  %v4217_v16 = vshll.u32 %v20107_v32, 16  ;;  %v1876_v36 = vsel %vm23819_vm2, %v20017_v44, %v20047_v55  ;;  %v2246_v52 = vrot.slane %v2244_v47, 5  ;;  %v2249_v42 = vrot.slane %v2247_v34, 6  ;;  %v2172_v12 = vpop.permute.xlu1 %2171 }
 0x152   : > { %vm23820_vm0 = vcmask 27648   ;;  %v1890_v57 = vsel %vm19776_vm8, %v20083_v54, %v1889_v4  ;;  %v16014_v14 = vpack.c.bf16 %v20015_v48, %v20015_v48  ;;  %v20169_v6 = vor.u32 %v2130_v2, %v2127_v30  ;;  %v20175_v54 = vld [vmem:[#allocation2 + $0x40] sm:$0xff]  }
 0x153   : > { %1888 = vst.msk [vmem:[#allocation2 + $0x64] sm:$0xf] %vm23820_vm0, %v1876_v36  ;;  %v4219_v7 = vrot.slane %v4217_v16, 2  ;;  %vm23821_vm1 = vcmask 60448   ;;  %1891 = vst [vmem:[#allocation2 + $0x68] sm:$0xf] %v1890_v57  ;;  %vm23822_vm6 = vnez %v23748_v31  ;;  %v20180_v4 = vor.u32 %v2249_v42, %v2246_v52 }
 0x154   : > { %v1804_v28 = vld [vmem:[#allocation2 + $0x60] sm:$0x7]  ;;  %1931 = vst.msk [vmem:[#allocation2 + $0x64] sm:$0xf] %vm23821_vm1, %v20109_v26  ;;  %v2746_v44 = vshrl.u32 %v20103_v20, 16  ;;  %v2750_v55 = vshll.u32 %v20152_v10, 16  ;;  %v2053_v43 = vsel %vm19969_vm5, %v20146_v21, %v2052_v1  ;;  %v16018_v11 = vpack.c.bf16 %v20041_v8, %v20041_v8 }
 0x155   : > { %v1805_v48 = vsel %vm23822_vm6, %v20070_v61, %v1804_v28  ;;  %v2253_v0 = vshrl.u32 %v16014_v14, 16  ;;  %v2256_v23 = vshll.u32 %v16014_v14, 16  ;;  %v4220_v47 = vor.u32 %v4219_v7, %v4216_v62  ;;  %v2056_v61 = vld [vmem:[#allocation2 + $0x74] sm:$0x1]  ;;  %v20187_v52 = vld [vmem:[#allocation2 + $0x48] sm:$0xff]   ;;  %v20204_v28 = vld [vmem:[#allocation2 + $0x40] sm:$0xff]  }
 0x156   : > { %1806 = vst [vmem:[#allocation2 + $0x60] sm:$0x7] %v1805_v48  ;;  %v2748_v34 = vor.u32 %v2746_v44, %v2744_v39  ;;  %v2752_v20 = vrot.slane %v2750_v55, 1  ;;  %v2266_v2 = vsel %vm19739_vm9, %v20180_v4, %v2265_v53  ;;  %vm23823_vm0 = vsmask.f32 6400  ;;  %v2046_v44 = vpop.permute.xlu0 %2045  ;;  %v20224_v26 = vld [vmem:[#allocation2 + $0x50] sm:$0xff]  }
 0x157   : > { %v2255_v16 = vrot.slane %v2253_v0, 5  ;;  %v2258_v36 = vrot.slane %v2256_v23, 6  ;;  %2267 = vst [vmem:[#allocation2 + $0x7c] sm:$0xc] %v2266_v2  ;;  %v4221_v42 = vsel %vm23823_vm0, %v20120_v35, %v4220_v47  ;;  %vm23824_vm1 = vsmask.f32 7424 }
 0x158   : > { %v2753_v57 = vsel %vm23824_vm1, %v2748_v34, %v2752_v20  ;;  %v4223_v39 = vshrl.u32 %v20167_v40, 16  ;;  %v4226_v62 = vshll.u32 %v20167_v40, 16  ;;  %vm23825_vm12 = vcmask 64512   ;;  %v2180_v7 = vld [vmem:[#allocation2 + $0x74] sm:$0xe] }
 0x159   : > { %16916 = vmatprep.mubr.msk.bf16.mxu0 %vm23825_vm12, %v4221_v42  ;;  %v20195_v14 = vor.u32 %v2258_v36, %v2255_v16  ;;  %vm23826_vm9 = vmmov %vm23825_vm12  ;;  %v2057_v53 = vsel %vm19988_vm7, %v2048_v33, %v2056_v61  ;;  %v2754_v35 = vshrl.u32 %v20152_v10, 16  ;;  %2054 = vst [vmem:[#allocation2 + $0x6c] sm:$0xf] %v2053_v43  ;;  %v16017_v0 = vpack.c.bf16 %v20030_v37, %v20030_v37  ;;  %v2393_v1 = vld [vmem:[#allocation2 + $0x84] sm:$0x8]  ;;  %v20212_v16 = vld [vmem:[#allocation2 + $0x48] sm:$0xff]   ;;  %v20214_v36 = vpop.permute.xlu1 %2175 }
 0x15a   : > { %16768 = vmatprep.mubr.msk.bf16.mxu1 %vm23826_vm9, %v2753_v57  ;;  %v4225_v55 = vrot.slane %v4223_v39, 1  ;;  %v4228_v48 = vrot.slane %v4226_v62, 2  ;;  %2058 = vst [vmem:[#allocation2 + $0x74] sm:$0x1] %v2057_v53  ;;  %v2758_v23 = vshll.u32 %v20175_v54, 16  ;;  %v2762_v10 = vshrl.u32 %v20175_v54, 16  ;;  %vm23827_vm12 = vmmov %vm23823_vm0 }
 0x15b   : > { %v1932_v34 = vld [vmem:[#allocation2 + $0x68] sm:$0xf]  ;;  %v2756_v33 = vor.u32 %v2754_v35, %v2752_v20  ;;  %v2766_v2 = vshll.u32 %v20187_v52, 16  ;;  %v2372_v42 = vshll.u32 %v16017_v0, 16  ;;  %v2375_v57 = vshrl.u32 %v16017_v0, 16  ;;  %vm23828_vm0 = vmmov %vm23826_vm9 }
 0x15c   : > { %v1933_v61 = vsel %vm19856_vm13, %v20132_v17, %v1932_v34  ;;  %v4229_v37 = vor.u32 %v4228_v48, %v4225_v55  ;;  %v2760_v39 = vrot.slane %v2758_v23, 1  ;;  %v4232_v20 = vshrl.u32 %v20204_v28, 16  ;;  %v2141_v53 = vld [vmem:[#allocation2 + $0x7c] sm:$0x3]  ;;  %v2300_v23 = vpop.permute.xlu0 %2299 }
 0x15d   : > { %1934 = vst [vmem:[#allocation2 + $0x68] sm:$0xf] %v1933_v61  ;;  %v2768_v62 = vrot.slane %v2766_v2, 1  ;;  %v4235_v43 = vshll.u32 %v20204_v28, 16  ;;  %v2374_v30 = vrot.slane %v2372_v42, 5  ;;  %v2377_v21 = vrot.slane %v2375_v57, 4 }
 0x15e   : > { %v4230_v35 = vsel %vm23827_vm12, %v4220_v47, %v4229_v37  ;;  %v2181_v46 = vsel %vm19754_vm3, %v2172_v12, %v2180_v7  ;;  %v2761_v17 = vsel %vm23824_vm1, %v2756_v33, %v2760_v39  ;;  %v2764_v55 = vor.u32 %v2762_v10, %v2760_v39  ;;  %v2308_v34 = vld [vmem:[#allocation2 + $0x7c] sm:$0xc]  ;;  %v20228_v2 = vld [vmem:[#allocation2 + $0x50] sm:$0xff]   ;;  %vm23830_vm12 = vmmov %vm23828_vm0  ;;  %v2174_v10 = vpop.permute.xlu1 %2173 }
 0x15f   : > { %16917 = vmatmul.mubr.msk.bf16.gmra.mrb[40].mxu0 %vm23828_vm0, %v4230_v35  ;;  %v4234_v48 = vrot.slane %v4232_v20, 1  ;;  %v4237_v0 = vrot.slane %v4235_v43, 2  ;;  %2182 = vst [vmem:[#allocation2 + $0x74] sm:$0xe] %v2181_v46  ;;  %vm23829_vm9 = vnez %v23715_v25  ;;  %16769 = vmatmul.mubr.msk.bf16.gmra.mrb[44].mxu1 %vm23830_vm12, %v2761_v17  ;;  %v23831_v12 = vrot.slane %v20051_v22, 4  ;;  %vm23833_vm0 = vmmov %vm23824_vm1  ;;  %v20250_v57 = vld [vmem:[#allocation2 + $0x58] sm:$0xff]  }
 0x160   : > { %v2394_v47 = vsel %vm23829_vm9, %v2374_v30, %v2393_v1  ;;  %vm23832_vm3 = vnez %v23707_v41  ;;  %v2769_v46 = vsel %vm23833_vm0, %v2764_v55, %v2768_v62  ;;  %vm23834_vm1 = vcmask 27648   ;;  %vm23835_vm9 = vmmov %vm23830_vm12 }
 0x161   : > { %v2006_v7 = vsel %vm23832_vm3, %v23831_v12, %v20128_v56  ;;  %2395 = vst [vmem:[#allocation2 + $0x84] sm:$0x8] %v2394_v47  ;;  %v4238_v33 = vor.u32 %v4237_v0, %v4234_v48  ;;  %v4241_v25 = vshrl.u32 %v20212_v16, 16  ;;  %v4244_v1 = vshll.u32 %v20212_v16, 16  ;;  %16772 = vmatprep.mubr.msk.bf16.mxu1 %vm23835_vm9, %v2769_v46  ;;  %v20262_v0 = vpop.permute.xlu0 %2303  ;;  %v20264_v47 = vld [vmem:[#allocation2 + $0x58] sm:$0xff]  }
 0x162   : > { %2014 = vst.msk [vmem:[#allocation2 + $0x70] sm:$0xf] %vm23834_vm1, %v2006_v7  ;;  %v2378_v61 = vor.u32 %v2377_v21, %v2374_v30  ;;  %v2381_v8 = vshll.u32 %v16018_v11, 16  ;;  %v2385_v42 = vshrl.u32 %v16018_v11, 16  ;;  %vm23836_vm12 = vcmask 60448   ;;  %vm23839_vm1 = vmmov %vm23835_vm9 }
 0x163   : > { %2055 = vst.msk [vmem:[#allocation2 + $0x70] sm:$0xf] %vm23836_vm12, %v2046_v44  ;;  %v23837_v22 = vrot.slane %v20169_v6, 4  ;;  %vm23838_vm0 = vsmask.f32 6400  ;;  %v4243_v20 = vrot.slane %v4241_v25, 1  ;;  %v2309_v49 = vsel %vm23799_vm11, %v2300_v23, %v2308_v34  ;;  %vm23843_vm12 = vmmov %vm23839_vm1 }
 0x164   : > { %v4239_v39 = vsel %vm23838_vm0, %v4229_v37, %v4238_v33  ;;  %v4246_v43 = vrot.slane %v4244_v1, 2  ;;  %v4250_v30 = vshrl.u32 %v20224_v26, 16  ;;  %v2269_v21 = vld [vmem:[#allocation2 + $0x84] sm:$0x7]  ;;  %v20255_v35 = vrot.slane %v2381_v8, 5  ;;  %vm23840_vm11 = vmmov %vm23838_vm0 }
 0x165   : > { %v2142_v56 = vsel %vm23797_vm4, %v23837_v22, %v2141_v53  ;;  %16920 = vmatprep.mubr.msk.bf16.mxu0 %vm23839_vm1, %v4239_v39  ;;  %v2387_v44 = vrot.slane %v2385_v42, 4  ;;  %v4253_v17 = vshll.u32 %v20224_v26, 16  ;;  %2310 = vst [vmem:[#allocation2 + $0x7c] sm:$0xc] %v2309_v49  ;;  %v2770_v37 = vshrl.u32 %v20187_v52, 16  ;;  %v2428_v42 = vpop.permute.xlu1 %2427  ;;  %v20275_v22 = vld [vmem:[#allocation2 + $0x60] sm:$0xff]  }
 0x166   : > { %2143 = vst [vmem:[#allocation2 + $0x7c] sm:$0x3] %v2142_v56  ;;  %v4247_v53 = vor.u32 %v4246_v43, %v4243_v20  ;;  %v4252_v55 = vrot.slane %v4250_v30, 1  ;;  %v2774_v48 = vshll.u32 %v20228_v2, 16  ;;  %v4605_v11 = vld [vmem:[#allocation2 + $0x8] sm:$0xc]  ;;  %vm23842_vm9 = vnez %v23700_v63 }
 0x167   : > { %vm23636_vm4 = vcmask 1045504   ;;  %v2388_v12 = vor.u32 %v2387_v44, %v20255_v35  ;;  %v4255_v7 = vrot.slane %v4253_v17, 2  ;;  %v2778_v46 = vshrl.u32 %v20228_v2, 16  ;;  %v20287_v44 = vld [vmem:[#allocation2 + $0x68] sm:$0xff]  }
 0x168   : > { %v2782_v19 = vshll.u32 %v20250_v57, 16  ;;  %v4248_v23 = vsel %vm23840_vm11, %v4238_v33, %v4247_v53  ;;  %v2772_v34 = vor.u32 %v2770_v37, %v2768_v62  ;;  %v2776_v25 = vrot.slane %v2774_v48, 1  ;;  %v2436_v43 = vld [vmem:[#allocation2 + $0x84] sm:$0x8]  ;;  %v2397_v17 = vld [vmem:[#allocation2 + $0x8c] sm:$0xf] }
 0x169   : > { %v23841_v1 = vrot.slane %v20134_v60, 4  ;;  %v2379_v56 = vrot.slane %v2378_v61, 4  ;;  %16921 = vmatmul.mubr.msk.bf16.gmra.mrb[44].mxu0 %vm23843_vm12, %v4248_v23  ;;  %v4256_v39 = vor.u32 %v4255_v7, %v4252_v55  ;;  %vm23844_vm0 = vcmask 27648  }
 0x16a   : > { %v2784_v20 = vrot.slane %v2782_v19, 1  ;;  %v23845_v33 = vrot.slane %v20195_v14, 4  ;;  %vm23846_vm1 = vsmask.f32 7424  ;;  %v2780_v30 = vor.u32 %v2778_v46, %v2776_v25  ;;  %v2302_v19 = vpop.permute.xlu0 %2301 }
 0x16b   : > { %v2132_v8 = vsel %vm23842_vm9, %v23841_v1, %v20169_v6  ;;  %v2777_v60 = vsel %vm23846_vm1, %v2772_v34, %v2776_v25  ;;  %vm23847_vm11 = vcmask 60448   ;;  %v4259_v6 = vshrl.u32 %v20264_v47, 16  ;;  %v20315_v1 = vld [vmem:[#allocation2 + $0x70] sm:$0xff]  }
 0x16c   : > { %2140 = vst.msk [vmem:[#allocation2 + $0x78] sm:$0xf] %vm23844_vm0, %v2132_v8  ;;  %v2270_v62 = vsel %vm23814_vm10, %v23845_v33, %v2269_v21  ;;  %v4262_v61 = vshll.u32 %v20264_v47, 16  ;;  %v2389_v49 = vrot.slane %v2388_v12, 4  ;;  %vm23848_vm12 = vsmask.f32 6400 }
 0x16d   : > { %2183 = vst.msk [vmem:[#allocation2 + $0x78] sm:$0xf] %vm23847_vm11, %v2174_v10  ;;  %2271 = vst [vmem:[#allocation2 + $0x84] sm:$0x7] %v2270_v62  ;;  %v2184_v55 = vld [vmem:[#allocation2 + $0x7c] sm:$0x3]  ;;  %v4257_v37 = vsel %vm23848_vm12, %v4247_v53, %v4256_v39  ;;  %v2437_v50 = vsel %vm19839_vm14, %v2428_v42, %v2436_v43  ;;  %v2785_v7 = vsel %vm23846_vm1, %v2780_v30, %v2784_v20  ;;  %vm23854_vm14 = vnez %v23703_v9 }
 0x16e   : > { %vm23849_vm0 = vcmask 64512   ;;  %v23850_v21 = vld [vmem:[#allocation9_spill] sm:$0xff]  ;;  %v2185_v10 = vsel %vm23765_vm15, %v20214_v36, %v2184_v55  ;;  %v4261_v46 = vrot.slane %v4259_v6, 1  ;;  %v4264_v12 = vrot.slane %v4262_v61, 2  ;;  %2438 = vst [vmem:[#allocation2 + $0x84] sm:$0x8] %v2437_v50  ;;  %v2430_v43 = vpop.permute.xlu0 %2429 }
 0x16f   : > { %16773 = vmatmul.mubr.msk.bf16.gmra.mrb[48].mxu1 %vm23849_vm0, %v2777_v60  ;;  %v15270_v48 = vcombine.low %v4605_v11, %v23850_v21  ;;  %vm23851_vm10 = vmmov %vm23849_vm0  ;;  %2186 = vst [vmem:[#allocation2 + $0x7c] sm:$0x3] %v2185_v10  ;;  %v4613_v38 = vrot.slane %v19925_v13, 2  ;;  %v23853_v53 = vrot.slane %v20180_v4, 4  ;;  %v2786_v36 = vshrl.u32 %v20250_v57, 16  ;;  %v2432_v21 = vpop.permute.xlu1 %2431 }
 0x170   : > { %16924 = vmatprep.mubr.msk.bf16.mxu0 %vm23851_vm10, %v4257_v37  ;;  %vm23852_vm11 = vmmov %vm23849_vm0  ;;  %v2790_v11 = vshll.u32 %v20275_v22, 16  ;;  %v20308_v23 = vor.u32 %v4264_v12, %v4261_v46  ;;  %vm23856_vm15 = vcmask 27648   ;;  %v16021_v34 = vpack.c.bf16 %v20092_v15, %v20092_v15  ;;  %v23867_v12 = vld [vmem:[#allocation8_spill] sm:$0xff] }
 0x171   : > { %16776 = vmatprep.mubr.msk.bf16.mxu1 %vm23852_vm11, %v2785_v7  ;;  %v2260_v27 = vsel %vm23854_vm14, %v23853_v53, %v20195_v14  ;;  %v2794_v25 = vshrl.u32 %v20275_v22, 16  ;;  %v2798_v13 = vshll.u32 %v20287_v44, 16  ;;  %v4612_v4 = vrot.slane %v15270_v48, 2  ;;  %vm23860_vm11 = vmmov %vm23856_vm15  ;;  %v23866_v48 = vld [vmem:[#allocation10_spill] sm:$0xff] }
 0x172   : > { %23855 = vst [vmem:[#allocation9_spill] sm:$0xff] %v20308_v23  ;;  %2268 = vst.msk [vmem:[#allocation2 + $0x80] sm:$0xf] %vm23856_vm15, %v2260_v27  ;;  %vm23857_vm12 = vcmask 60448   ;;  %v2788_v9 = vor.u32 %v2786_v36, %v2784_v20  ;;  %v2792_v14 = vrot.slane %v2790_v11, 1  ;;  %v2398_v8 = vsel %vm19776_vm8, %v2389_v49, %v2397_v17 }
 0x173   : > { %2311 = vst.msk [vmem:[#allocation2 + $0x80] sm:$0xf] %vm23857_vm12, %v2302_v19  ;;  %vm23858_vm0 = vsmask.f32 6400  ;;  %v2496_v33 = vshrl.u32 %v16021_v34, 16  ;;  %v2499_v62 = vshll.u32 %v16021_v34, 16  ;;  %v4614_v30 = vsel %vm23636_vm4, %v4612_v4, %v4613_v38  ;;  %vm23859_vm8 = vmmov %vm23851_vm10 }
 0x174   : > { %v4266_v42 = vsel %vm23858_vm0, %v4256_v39, %v20308_v23  ;;  %v2800_v15 = vrot.slane %v2798_v13, 1  ;;  %2399 = vst [vmem:[#allocation2 + $0x8c] sm:$0xf] %v2398_v8  ;;  %v2312_v60 = vld [vmem:[#allocation2 + $0x84] sm:$0x7]  ;;  %v2796_v6 = vor.u32 %v2794_v25, %v2792_v14  ;;  %v2384_v20 = vsel %vm23819_vm2, %v2379_v56, %v20255_v35  ;;  %vm23861_vm14 = vmmov %vm23859_vm8 }
 0x175   : > { %16925 = vmatmul.mubr.msk.bf16.gmra.mrb[48].mxu0 %vm23851_vm10, %v4266_v42  ;;  %v2313_v58 = vsel %vm23822_vm6, %v20262_v0, %v2312_v60  ;;  %v2793_v39 = vsel %vm23846_vm1, %v2788_v9, %v2792_v14  ;;  %v2498_v61 = vrot.slane %v2496_v33, 7  ;;  %v2515_v17 = vld [vmem:[#allocation2 + $0x90] sm:$0xf]  ;;  %2396 = vst.msk [vmem:[#allocation2 + $0x88] sm:$0xf] %vm23860_vm11, %v2384_v20  ;;  %v2802_v49 = vshrl.u32 %v20287_v44, 16  ;;  %vm23862_vm15 = vmmov %vm23846_vm1 }
 0x176   : > { %16946 = vmatprep.mubr.msk.bf16.mxu0 %vm23859_vm8, %v4614_v30  ;;  %2314 = vst [vmem:[#allocation2 + $0x84] sm:$0x7] %v2313_v58  ;;  %v2801_v18 = vsel %vm23862_vm15, %v2796_v6, %v2800_v15  ;;  %v4615_v35 = vrot.slane %v20003_v59, 2  ;;  %vm23863_vm2 = vmmov %vm23857_vm12  ;;  %v2806_v31 = vshll.u32 %v20315_v1, 16  ;;  %v16022_v0 = vpack.c.bf16 %v20112_v51, %v20112_v51  ;;  %v20344_v50 = vld [vmem:[#allocation2 + $0x78] sm:$0xff]  }
 0x177   : > { %16777 = vmatmul.mubr.msk.bf16.gmra.mrb[52].mxu1 %vm23861_vm14, %v2793_v39  ;;  %2439 = vst.msk [vmem:[#allocation2 + $0x88] sm:$0xf] %vm23863_vm2, %v2430_v43  ;;  %v2501_v56 = vor.u32 %v2499_v62, %v2498_v61  ;;  %vm23864_vm6 = vmmov %vm23859_vm8  ;;  %vm23865_vm12 = vcmask 1043456   ;;  %v2804_v37 = vor.u32 %v2802_v49, %v2800_v15  ;;  %v4617_v10 = vrot.slane %v23866_v48, 2  ;;  %v2519_v53 = vld [vmem:[#allocation2 + $0x98] sm:$0x1]  ;;  %v2550_v15 = vpop.permute.xlu0 %2549  ;;  %v2548_v39 = vpop.permute.xlu1 %2547 }
 0x178   : > { %16780 = vmatprep.mubr.msk.bf16.mxu1 %vm23864_vm6, %v2801_v18  ;;  %v5143_v55 = vsel %vm23865_vm12, %v20081_v5, 0  ;;  %v2808_v59 = vrot.slane %v2806_v31, 1  ;;  %v2504_v7 = vshrl.u32 %v16022_v0, 16  ;;  %v2507_v46 = vshll.u32 %v16022_v0, 16  ;;  %vm23869_vm10 = vmmov %vm23846_vm1  ;;  %v23875_v30 = vld [vmem:[#allocation11_spill] sm:$0xff] }
 0x179   : > { %vm23868_vm0 = vnez %v23867_v12  ;;  %v2810_v51 = vshrl.u32 %v20315_v1, 16  ;;  %v2814_v27 = vshll.u32 %v20344_v50, 16  ;;  %v2502_v36 = vrot.slane %v2498_v61, 4  ;;  %vm23870_vm8 = vmmov %vm23864_vm6 }
 0x17a   : > { %v2516_v19 = vsel %vm23868_vm0, %v2501_v56, %v2515_v17  ;;  %v4616_v11 = vsel %vm23636_vm4, %v4613_v38, %v4615_v35  ;;  %v2809_v34 = vsel %vm23869_vm10, %v2804_v37, %v2808_v59  ;;  %v2506_v25 = vrot.slane %v2504_v7, 7  ;;  %v20361_v38 = vld [vmem:[%s23565_s3 + $0x1c] sm:$0xf]  ;;  %vm23871_vm1 = vmmov %vm23864_vm6 }
 0x17b   : > { %2517 = vst [vmem:[#allocation2 + $0x90] sm:$0xf] %v2516_v19  ;;  %v2440_v5 = vld [vmem:[#allocation2 + $0x8c] sm:$0xf]  ;;  %v2812_v4 = vor.u32 %v2810_v51, %v2808_v59  ;;  %v2816_v9 = vrot.slane %v2814_v27, 1  ;;  %v2818_v14 = vshrl.u32 %v20344_v50, 16  ;;  %v4618_v8 = vsel %vm23636_vm4, %v4615_v35, %v4617_v10  ;;  %vm23873_vm11 = vmmov %vm23871_vm1 }
 0x17c   : > { %v2441_v13 = vsel %vm19856_vm13, %v2432_v21, %v2440_v5  ;;  %v2509_v42 = vor.u32 %v2507_v46, %v2506_v25  ;;  %v2511_v33 = vrot.slane %v2506_v25, 4  ;;  %vm23872_vm13 = vmmov %vm23869_vm10  ;;  %vm23874_vm14 = vnez %v23740_v24  ;;  %v4919_v51 = vld [vmem:[#allocation2 + $0x10] sm:$0xc] }
 0x17d   : > { %2442 = vst [vmem:[#allocation2 + $0x8c] sm:$0xf] %v2441_v13  ;;  %16947 = vmatmul.mubr.msk.bf16.vlgmr.msra.gmra.mrb[32].mxu0 %vm23870_vm8, %v4616_v11  ;;  %v2817_v29 = vsel %vm23872_vm13, %v2812_v4, %v2816_v9  ;;  %v20365_v62 = vld [vmem:[#allocation2 + $0x80] sm:$0xff]   ;;  %v4619_v6 = vrot.slane %v23875_v30, 2  ;;  %vm23876_vm15 = vmmov %vm23871_vm1  ;;  %v2820_v20 = vor.u32 %v2818_v14, %v2816_v9  ;;  %vm23877_vm2 = vcmask 27648   ;;  %v20416_v11 = vld [vmem:[#allocation2 + $0x18] sm:$0xff]  }
 0x17e   : > { %16950 = vmatprep.mubr.msk.bf16.mxu0 %vm23871_vm1, %v4618_v8  ;;  %16983 = vmatpush3.bf16.msra.mxu0 %v5143_v55  ;;  %v2520_v43 = vsel %vm23874_vm14, %v2511_v33, %v2519_v53  ;;  %v2510_v60 = vsel %vm23832_vm3, %v2502_v36, %v2509_v42  ;;  %v2822_v58 = vshll.u32 %v20365_v62, 16  ;;  %vm23878_vm6 = vmmov %vm23865_vm12  ;;  %v4621_v24 = vrot.slane %v20107_v32, 2  ;;  %v20380_v17 = vld [vmem:[#allocation2 + $0x88] sm:$0xf]  ;;  %v2552_v55 = vpop.permute.xlu1 %2551  ;;  %v20411_v36 = vld [vmem:[#allocation2 + $0x14] sm:$0xf] }
 0x17f   : > { %16781 = vmatmul.mubr.msk.bf16.gmra.mrb[56].mxu1 %vm23873_vm11, %v2809_v34  ;;  %2521 = vst [vmem:[#allocation2 + $0x98] sm:$0x1] %v2520_v43  ;;  %2518 = vst.msk [vmem:[#allocation2 + $0x94] sm:$0xf] %vm23877_vm2, %v2510_v60  ;;  %18654 = vmatprep.subr.msk.bf16.mxu0 %vm23878_vm6, %v20361_v38  ;;  %vm23879_vm12 = vcmask 60448   ;;  %v2826_v49 = vshrl.u32 %v20365_v62, 16  ;;  %v4620_v35 = vsel %vm23636_vm4, %v4617_v10, %v4619_v6  ;;  %v20414_v5 = vcombine.low %v4919_v51, %v20411_v36 }
 0x180   : > { %16784 = vmatprep.mubr.msk.bf16.mxu1 %vm23876_vm15, %v2817_v29  ;;  %2559 = vst.msk [vmem:[#allocation2 + $0x94] sm:$0xf] %vm23879_vm12, %v2550_v15  ;;  %v2824_v41 = vrot.slane %v2822_v58, 1  ;;  %vm23880_vm3 = vmmov %vm23869_vm10  ;;  %v4622_v32 = vsel %vm23636_vm4, %v4619_v6, %v4621_v24  ;;  %v4623_v37 = vrot.slane %v20167_v40, 2  ;;  %v4625_v46 = vrot.slane %v20204_v28, 2  ;;  %v23889_v28 = vld [vmem:[#allocation7_spill] sm:$0xff] }
 0x181   : > { %vm23881_vm0 = vmmov %vm23871_vm1  ;;  %v4627_v45 = vrot.slane %v20212_v16, 2  ;;  %v4629_v27 = vrot.slane %v20224_v26, 2  ;;  %v20421_v13 = vld [vmem:[#allocation2 + $0x60] sm:$0xff]   ;;  %v18919_v16 = vld [vmem:[%s23565_s3 + $0x8] sm:$0xf]  ;;  %v5366_v8 = vshrl.u32 %v20414_v5, 16 }
 0x182   : > { %v2556_v61 = vld [vmem:[#allocation2 + $0x90] sm:$0xf]  ;;  %v2825_v31 = vsel %vm23880_vm3, %v2820_v20, %v2824_v41  ;;  %vm23882_vm10 = vmmov %vm23881_vm0  ;;  %v2828_v3 = vor.u32 %v2826_v49, %v2824_v41  ;;  %v4624_v40 = vsel %vm23636_vm4, %v4621_v24, %v4623_v37  ;;  %v4626_v53 = vsel %vm23636_vm4, %v4623_v37, %v4625_v46  ;;  %23892 = vst [vmem:[#allocation10_spill] sm:$0xff] %v20421_v13  ;;  %v20428_v4 = vld [vmem:[#allocation2 + $0x20] sm:$0xff]  }
 0x183   : > { %v2557_v18 = vsel %vm19969_vm5, %v2548_v39, %v2556_v61  ;;  %vm23883_vm8 = vmmov %vm23881_vm0  ;;  %v4628_v34 = vsel %vm23636_vm4, %v4625_v46, %v4627_v45  ;;  %v4630_v25 = vsel %vm23636_vm4, %v4627_v45, %v4629_v27  ;;  %v20430_v9 = vld [vmem:[#allocation2 + $0x28] sm:$0xff]   ;;  %v4631_v33 = vrot.slane %v20264_v47, 2  ;;  %v20450_v43 = vld [vmem:[#allocation2 + $0x10] sm:$0xff]  }
 0x184   : > { %2558 = vst [vmem:[#allocation2 + $0x90] sm:$0xf] %v2557_v18  ;;  %v2600_v0 = vld [vmem:[#allocation2 + $0x8c] sm:$0xf]  ;;  %vm23884_vm5 = vmmov %vm23880_vm3  ;;  %vm23631_vm3 = vcmask 58368   ;;  %v23895_v29 = vmov 0  }
 0x185   : > { %16951 = vmatmul.mubr.msk.bf16.gmra.mrb[36].mxu0 %vm23881_vm0, %v4620_v35  ;;  %v20390_v56 = vcombine.low %v20380_v17, %v2600_v0  ;;  %vm23885_vm1 = vmmov %vm23881_vm0  ;;  %v20435_v14 = vld [vmem:[%s23565_s3 + $0xc] sm:$0xf]  ;;  %396 = vst.msk [vmem:[#allocation2 + $0xa0] sm:$0x3] %vm23631_vm3, %v23895_v29  ;;  %v5369_v15 = vshll.u32 %v20414_v5, 16  ;;  %v5374_v60 = vshrl.u32 %v20416_v11, 16  ;;  %v4632_v49 = vsel %vm23636_vm4, %v4629_v27, %v4631_v33 }
 0x186   : > { %16954 = vmatprep.mubr.msk.bf16.mxu0 %vm23882_vm10, %v4622_v32  ;;  %v2560_v10 = vld [vmem:[#allocation2 + $0x98] sm:$0x1]  ;;  %vm23886_vm13 = vmmov %vm23881_vm0  ;;  %v20438_v42 = vld [vmem:[#allocation2 + $0x8] sm:$0xff]   ;;  %437 = vst.msk [vmem:[#allocation3 + $0xa0] sm:$0x3] %vm23631_vm3, %v23895_v29  ;;  %v4633_v47 = vrot.slane %v20421_v13, 2 }
 0x187   : > { %16785 = vmatmul.mubr.msk.bf16.gmra.mrb[60].mxu1 %vm23883_vm8, %v2825_v31  ;;  %v2830_v21 = vshll.u32 %v20390_v56, 16  ;;  %v2834_v48 = vshrl.u32 %v20390_v56, 16  ;;  %v2561_v59 = vsel %vm19988_vm7, %v2552_v55, %v2560_v10  ;;  %vm23887_vm11 = vmmov %vm23881_vm0  ;;  %478 = vst.msk [vmem:[#allocation4 + $0xa0] sm:$0x3] %vm23631_vm3, %v23895_v29  ;;  %v20456_v30 = vld [vmem:[#allocation2 + $0x30] sm:$0xff]   ;;  %v5368_v6 = vrot.slane %v5366_v8, 2 }
 0x188   : > { %2562 = vst [vmem:[#allocation2 + $0x98] sm:$0x1] %v2561_v59  ;;  %vm23888_vm14 = vmmov %vm23881_vm0  ;;  %v5371_v20 = vrot.slane %v5369_v15, 3  ;;  %v5377_v58 = vshll.u32 %v20416_v11, 16  ;;  %v5376_v39 = vrot.slane %v5374_v60, 2  ;;  %v5383_v24 = vshrl.u32 %v20428_v4, 16 }
 0x189   : > { %v2832_v7 = vrot.slane %v2830_v21, 1  ;;  %vm23890_vm7 = vmmov %vm23881_vm0  ;;  %v5386_v41 = vshll.u32 %v20428_v4, 16  ;;  %v5392_v61 = vshrl.u32 %v20430_v9, 16  ;;  %v20465_v18 = vld [vmem:[#allocation2 + $0x68] sm:$0xff]   ;;  %v5395_v55 = vshll.u32 %v20430_v9, 16  ;;  %v20472_v21 = vld [vmem:[#allocation2 + $0x38] sm:$0xff]  }
 0x18a   : > { %vm23891_vm15 = vmmov %vm23881_vm0  ;;  %23898 = vst [vmem:[#allocation8_spill] sm:$0xff] %v20465_v18  ;;  %v5379_v35 = vrot.slane %v5377_v58, 3  ;;  %v5385_v31 = vrot.slane %v5383_v24, 2  ;;  %v4634_v37 = vsel %vm23636_vm4, %v4631_v33, %v4633_v47  ;;  %v20475_v46 = vld [vmem:[#allocation2 + $0x18] sm:$0xff]   ;;  %v20487_v51 = vld [vmem:[#allocation2 + $0x20] sm:$0xff]   ;;  %v4635_v45 = vrot.slane %v20465_v18, 2 }
 0x18b   : > { %v2833_v12 = vsel %vm23884_vm5, %v2828_v3, %v2832_v7  ;;  %v2836_v19 = vor.u32 %v2834_v48, %v2832_v7  ;;  %vm23893_vm2 = vmmov %vm23878_vm6  ;;  %vm23635_vm6 = vsmask.f32 5376  ;;  %v5388_v0 = vrot.slane %v5386_v41, 3  ;;  %v20470_v3 = vld [vmem:[#allocation2 + $0x70] sm:$0xff]   ;;  %v20508_v24 = vld [vmem:[#allocation2 + $0x58] sm:$0xff]  }
 0x18c   : > { %16788 = vmatprep.mubr.msk.bf16.mxu1 %vm23885_vm1, %v2833_v12  ;;  %v3388_v26 = vsel %vm23893_vm2, %v18919_v16, 0  ;;  %vm23894_vm12 = vmmov %vm23881_vm0  ;;  %v5394_v32 = vrot.slane %v5392_v61, 2  ;;  %23900 = vst [vmem:[#allocation11_spill] sm:$0xff] %v20470_v3  ;;  %v5372_v48 = vor.u32 %v5371_v20, %v5368_v6  ;;  %v5380_v10 = vor.u32 %v5379_v35, %v5376_v39  ;;  %v20479_v12 = vld [vmem:[#allocation2 + $0x40] sm:$0xff]   ;;  %v20502_v15 = vld [vmem:[#allocation2 + $0x50] sm:$0xff]  }
 0x18d   : > { %16955 = vmatmul.mubr.msk.bf16.gmra.mrb[40].mxu0 %vm23886_vm13, %v4624_v40  ;;  %vm23896_vm10 = vmmov %vm23881_vm0  ;;  %v5389_v59 = vor.u32 %v5388_v0, %v5385_v31  ;;  %v5397_v7 = vrot.slane %v5395_v55, 3  ;;  %v5413_v8 = vshll.u32 %v20472_v21, 16  ;;  %v5419_v20 = vshrl.u32 %v20479_v12, 16  ;;  %v20506_v39 = vld [vmem:[#allocation2 + $0x78] sm:$0xff]   ;;  %v20514_v31 = vld [vmem:[#allocation2 + $0x80] sm:$0xff]  }
 0x18e   : > { %16958 = vmatprep.mubr.msk.bf16.mxu0 %vm23887_vm11, %v4626_v53  ;;  %vm23897_vm8 = vmmov %vm23893_vm2  ;;  %v20484_v40 = vsel %vm23635_vm6, %v5372_v48, %v5380_v10  ;;  %v5401_v53 = vshrl.u32 %v20456_v30, 16  ;;  %v4636_v58 = vsel %vm23636_vm4, %v4633_v47, %v4635_v45  ;;  %23904 = vst [vmem:[#allocation7_spill] sm:$0xff] %v20506_v39  ;;  %v5422_v61 = vshll.u32 %v20479_v12, 16  ;;  %v20552_v23 = vld [vmem:[#allocation2 + $0x88] sm:$0xff]  }
 0x18f   : > { %16789 = vmatmul.mubr.msk.bf16.gmra.mrb[64].mxu1 %vm23888_vm14, %v2836_v19  ;;  %vm23899_vm5 = vmmov %vm23881_vm0  ;;  %v20481_v19 = vld [vmem:[#allocation2 + $0x48] sm:$0xff]   ;;  %v5398_v27 = vor.u32 %v5397_v7, %v5394_v32  ;;  %v5415_v6 = vrot.slane %v5413_v8, 3  ;;  %23906 = vst [vmem:[#allocation12_spill] sm:$0xff] %v20514_v31  ;;  %v5421_v32 = vrot.slane %v5419_v20, 2 }
 0x190   : > { %16794 = vmatprep.mubr.msk.bf16.mxu1 %vm23890_vm7, %v23889_v28  ;;  %vm23901_vm1 = vmmov %vm23881_vm0  ;;  %v20493_v28 = vsel %vm23635_vm6, %v5380_v10, %v5389_v59  ;;  %v5403_v16 = vrot.slane %v5401_v53, 2  ;;  %v5431_v55 = vshll.u32 %v20481_v19, 16  ;;  %v20521_v10 = vld [vmem:[#allocation2 + $0x28] sm:$0xff]   ;;  %23913 = vst [vmem:[#allocation16_spill] sm:$0xff] %v20552_v23 }
 0x191   : > { %vm23902_vm13 = vmmov %vm23881_vm0  ;;  %v20500_v33 = vsel %vm23635_vm6, %v5389_v59, %v5398_v27  ;;  %v20525_v59 = vld [vmem:[#allocation2 + $0x60] sm:$0xff]  }
 0x192   : > { %vm23903_vm11 = vmmov %vm23881_vm0  ;;  %v5433_v53 = vrot.slane %v5431_v55, 3  ;;  %v20545_v55 = vld [vmem:[#allocation2 + $0x70] sm:$0xff]  }
 0x193   : > { %vm23905_vm14 = vmmov %vm23881_vm0 }
 0x194   : > { %vm23907_vm7 = vmmov %vm23881_vm0 }
 0x195   : > { %16959 = vmatmul.mubr.msk.bf16.gmra.mrb[44].mxu0 %vm23891_vm15, %v4628_v34  ;;  %v5404_v34 = vshll.u32 %v20456_v30, 16  ;;  %vm23908_vm15 = vmmov %vm23881_vm0 }
 0x196   : > { %16962 = vmatprep.mubr.msk.bf16.mxu0 %vm23894_vm12, %v4630_v25  ;;  %v4637_v25 = vrot.slane %v20470_v3, 2  ;;  %vm23910_vm2 = vmmov %vm23881_vm0 }
 0x197   : > { %16795 = vmatmul.mubr.msk.bf16.vlgmr.msra.gmra.mrb[32].mxu1 %vm23881_vm0, %v20438_v42  ;;  %v5406_v29 = vrot.slane %v5404_v34, 3  ;;  %v5440_v34 = vshll.u32 %v20502_v15, 16  ;;  %vm23914_vm12 = vmmov %vm23881_vm0 }
 0x198   : > { %16798 = vmatprep.mubr.msk.bf16.mxu1 %vm23896_vm10, %v20450_v43  ;;  %16831 = vmatpush3.bf16.msra.mxu1 %v3388_v26  ;;  %v5410_v26 = vshrl.u32 %v20472_v21, 16  ;;  %v4638_v35 = vsel %vm23636_vm4, %v4635_v45, %v4637_v25  ;;  %v5437_v45 = vshrl.u32 %v20502_v15, 16  ;;  %vm23918_vm10 = vmmov %vm23881_vm0 }
 0x199   : > { %18649 = vmatprep.subr.msk.bf16.mxu1 %vm23897_vm8, %v20435_v14  ;;  %v5407_v41 = vor.u32 %v5406_v29, %v5403_v16  ;;  %v20532_v16 = vld [vmem:[#allocation2 + $0x30] sm:$0xff]   ;;  %v5446_v29 = vshrl.u32 %v20508_v24, 16  ;;  %vm23919_vm8 = vmmov %vm23881_vm0 }
 0x19a   : > { %v5412_v60 = vrot.slane %v5410_v26, 2  ;;  %v20537_v26 = vld [vmem:[#allocation2 + $0x68] sm:$0xff]  }
 0x19b   : > { %v20519_v47 = vsel %vm23635_vm6, %v5398_v27, %v5407_v41  ;;  %v4639_v27 = vrot.slane %v20506_v39, 2 }
 0x19c   : > { %v5416_v0 = vor.u32 %v5415_v6, %v5412_v60  ;;  %v5449_v60 = vshll.u32 %v20508_v24, 16  ;;  %v4641_v6 = vrot.slane %v20514_v31, 2 }
 0x19d   : > { %16963 = vmatmul.mubr.msk.bf16.gmra.mrb[48].mxu0 %vm23899_vm5, %v4632_v49  ;;  %v5428_v49 = vshrl.u32 %v20481_v19, 16  ;;  %v4640_v39 = vsel %vm23636_vm4, %v4637_v25, %v4639_v27  ;;  %v5467_v25 = vshll.u32 %v20537_v26, 16  ;;  %vm23923_vm5 = vmmov %vm23881_vm0 }
 0x19e   : > { %16966 = vmatprep.mubr.msk.bf16.mxu0 %vm23901_vm1, %v4634_v37  ;;  %v5424_v37 = vrot.slane %v5422_v61, 3  ;;  %v20528_v7 = vsel %vm23635_vm6, %v5407_v41, %v5416_v0  ;;  %v5442_v41 = vrot.slane %v5440_v34, 3  ;;  %v4642_v34 = vsel %vm23636_vm4, %v4639_v27, %v4641_v6  ;;  %vm23925_vm1 = vmmov %vm23881_vm0 }
 0x19f   : > { %16799 = vmatmul.mubr.msk.bf16.gmra.mrb[36].mxu1 %vm23902_vm13, %v20475_v46  ;;  %v5430_v48 = vrot.slane %v5428_v49, 2  ;;  %23909 = vst [vmem:[#allocation13_spill] sm:$0xff] %v20528_v7  ;;  %v5448_v49 = vrot.slane %v5446_v29, 2  ;;  %v5469_v27 = vrot.slane %v5467_v25, 3  ;;  %vm23927_vm13 = vmmov %vm23881_vm0 }
 0x1a0   : > { %16802 = vmatprep.mubr.msk.bf16.mxu1 %vm23903_vm11, %v20487_v51  ;;  %v5425_v8 = vor.u32 %v5424_v37, %v5421_v32  ;;  %v5455_v37 = vshrl.u32 %v20525_v59, 16  ;;  %v20596_v7 = vld [vmem:[#allocation2 + $0x98] ss:$0 sps:$4 sm:$0x11]   ;;  %vm23928_vm11 = vmmov %vm23881_vm0 }
 0x1a1   : > { %v5434_v20 = vor.u32 %v5433_v53, %v5430_v48  ;;  %v20554_v48 = vld [vmem:[#allocation2 + $0x78] sm:$0xff]   ;;  %23922 = vst [vmem:[#allocation22_spill] sm:$0xff] %v20596_v7 }
 0x1a2   : > { %v20543_v61 = vsel %vm23635_vm6, %v5416_v0, %v5425_v8  ;;  %v5458_v0 = vshll.u32 %v20525_v59, 16  ;;  %v5485_v31 = vshll.u32 %v20554_v48, 16 }
 0x1a3   : > { %23911 = vst [vmem:[#allocation14_spill] sm:$0xff] %v20543_v61  ;;  %v20548_v63 = vsel %vm23635_vm6, %v5425_v8, %v5434_v20  ;;  %v20560_v8 = vld [vmem:[#allocation2 + $0x90] sm:$0xff]  }
 0x1a4   : > { %23912 = vst [vmem:[#allocation15_spill] sm:$0xff] %v20548_v63  ;;  %23915 = vst [vmem:[#allocation17_spill] sm:$0xff] %v20560_v8  ;;  %v4645_v3 = vrot.slane %v20560_v8, 2  ;;  %v5487_v63 = vrot.slane %v5485_v31, 3 }
 0x1a5   : > { %16967 = vmatmul.mubr.msk.bf16.gmra.mrb[52].mxu0 %vm23905_vm14, %v4636_v58  ;;  %v5439_v58 = vrot.slane %v5437_v45, 2  ;;  %v5464_v45 = vshrl.u32 %v20537_v26, 16  ;;  %vm23633_vm14 = vcmask 1044480  }
 0x1a6   : > { %16970 = vmatprep.mubr.msk.bf16.mxu0 %vm23907_vm7, %v4638_v35  ;;  %v5451_v35 = vrot.slane %v5449_v60, 3  ;;  %v5457_v60 = vrot.slane %v5455_v37, 2  ;;  %v5476_v37 = vshll.u32 %v20545_v55, 16  ;;  %vm23929_vm7 = vmmov %vm23881_vm0 }
 0x1a7   : > { %16803 = vmatmul.mubr.msk.bf16.gmra.mrb[40].mxu1 %vm23908_vm15, %v20521_v10  ;;  %v5443_v32 = vor.u32 %v5442_v41, %v5439_v58  ;;  %v5460_v41 = vrot.slane %v5458_v0, 3  ;;  %vm23930_vm15 = vmmov %vm23881_vm0 }
 0x1a8   : > { %16806 = vmatprep.mubr.msk.bf16.mxu1 %vm23910_vm2, %v20532_v16  ;;  %v5452_v53 = vor.u32 %v5451_v35, %v5448_v49  ;;  %v5466_v49 = vrot.slane %v5464_v45, 2  ;;  %v20570_v35 = vld [vmem:[#allocation2 + $0x38] sm:$0xff]   ;;  %v5482_v45 = vshrl.u32 %v20554_v48, 16  ;;  %v5478_v13 = vrot.slane %v5476_v37, 3  ;;  %vm23931_vm2 = vmmov %vm23881_vm0 }
 0x1a9   : > { %v20563_v29 = vsel %vm23635_vm6, %v5434_v20, %v5443_v32  ;;  %v5473_v20 = vshrl.u32 %v20545_v55, 16  ;;  %v5461_v0 = vor.u32 %v5460_v41, %v5457_v60 }
 0x1aa   : > { %23916 = vst [vmem:[#allocation18_spill] sm:$0xff] %v20563_v29  ;;  %v20568_v58 = vsel %vm23635_vm6, %v5443_v32, %v5452_v53  ;;  %v4643_v32 = vrot.slane %v20552_v23, 2  ;;  %v5470_v18 = vor.u32 %v5469_v27, %v5466_v49  ;;  %v5484_v29 = vrot.slane %v5482_v45, 2  ;;  %v20598_v49 = vld [vmem:[#allocation2 + $0x98] sm:$0xff]   ;;  %v5805_v45 = vld [vmem:[#allocation2 + $0x10] sm:$0x8] }
 0x1ab   : > { %23917 = vst [vmem:[#allocation19_spill] sm:$0xff] %v20568_v58  ;;  %v5475_v25 = vrot.slane %v5473_v20, 2  ;;  %v20587_v58 = vsel %vm23635_vm6, %v5452_v53, %v5461_v0 }
 0x1ac   : > { %23920 = vst [vmem:[#allocation20_spill] sm:$0xff] %v20587_v58  ;;  %v20592_v23 = vsel %vm23635_vm6, %v5461_v0, %v5470_v18  ;;  %v4644_v61 = vsel %vm23636_vm4, %v4641_v6, %v4643_v32  ;;  %v5488_v27 = vor.u32 %v5487_v63, %v5484_v29  ;;  %v4646_v31 = vsel %vm23636_vm4, %v4643_v32, %v4645_v3 }
 0x1ad   : > { %16971 = vmatmul.mubr.msk.bf16.gmra.mrb[56].mxu0 %vm23914_vm12, %v4640_v39  ;;  %v20574_v39 = vld [vmem:[#allocation2 + $0x80] sm:$0xff]   ;;  %23921 = vst [vmem:[#allocation21_spill] sm:$0xff] %v20592_v23  ;;  %v5479_v60 = vor.u32 %v5478_v13, %v5475_v25  ;;  %v5051_v58 = vrot.slane %v20414_v5, 2  ;;  %vm23932_vm12 = vmmov %vm23881_vm0 }
 0x1ae   : > { %16974 = vmatprep.mubr.msk.bf16.mxu0 %vm23881_vm0, %v4642_v34  ;;  %v20581_v34 = vld [vmem:[#allocation2 + $0x88] sm:$0xff]   ;;  %v5491_v41 = vshrl.u32 %v20574_v39, 16  ;;  %v5494_v53 = vshll.u32 %v20574_v39, 16  ;;  %vm23933_vm0 = vcmask 1043456  }
 0x1af   : > { %16807 = vmatmul.mubr.msk.bf16.gmra.mrb[44].mxu1 %vm23918_vm10, %v20570_v35  ;;  %v5500_v20 = vshrl.u32 %v20581_v34, 16  ;;  %v20605_v37 = vsel %vm23635_vm6, %v5470_v18, %v5479_v60  ;;  %v5503_v0 = vshll.u32 %v20581_v34, 16  ;;  %v20610_v6 = vsel %vm23635_vm6, %v5479_v60, %v5488_v27  ;;  %vm23934_vm10 = vmmov %vm23925_vm1 }
 0x1b0   : > { %16810 = vmatprep.mubr.msk.bf16.mxu1 %vm23919_vm8, %v20175_v54  ;;  %v20589_v54 = vld [vmem:[#allocation2 + $0x90] sm:$0xff]   ;;  %23924 = vst [vmem:[#allocation23_spill] sm:$0xff] %v20605_v37  ;;  %v5493_v13 = vrot.slane %v5491_v41, 2  ;;  %23926 = vst [vmem:[#allocation24_spill] sm:$0xff] %v20610_v6  ;;  %v5496_v63 = vrot.slane %v5494_v53, 3  ;;  %v4647_v41 = vrot.slane %v20596_v7, 2  ;;  %v15348_v6 = vcombine.low %v5805_v45, %v20411_v36 }
 0x1b1   : > { %v5502_v29 = vrot.slane %v5500_v20, 2  ;;  %v5505_v32 = vrot.slane %v5503_v0, 3  ;;  %v5509_v18 = vshrl.u32 %v20589_v54, 16  ;;  %v5512_v25 = vshll.u32 %v20589_v54, 16  ;;  %vm23935_vm8 = vmmov %vm23925_vm1 }
 0x1b2   : > { %v5497_v60 = vor.u32 %v5496_v63, %v5493_v13  ;;  %v5518_v53 = vshrl.u32 %v20598_v49, 16  ;;  %v5521_v20 = vshll.u32 %v20598_v49, 16  ;;  %v4648_v63 = vsel %vm23636_vm4, %v4645_v3, %v4647_v41  ;;  %v20674_v41 = vld [vmem:[%s23565_s3 + $0x20] sm:$0xf] }
 0x1b3   : > { %v5511_v8 = vrot.slane %v5509_v18, 2  ;;  %v5813_v45 = vrot.slane %v20416_v11, 3  ;;  %v5815_v3 = vrot.slane %v20428_v4, 3  ;;  %v5590_v18 = vsel %vm23933_vm0, %v20361_v38, 0 }
 0x1b4   : > { %v20624_v0 = vsel %vm23635_vm6, %v5488_v27, %v5497_v60  ;;  %v5520_v37 = vrot.slane %v5518_v53, 2  ;;  %v5523_v23 = vrot.slane %v5521_v20, 3 }
 0x1b5   : > { %16975 = vmatmul.mubr.msk.bf16.gmra.mrb[60].mxu0 %vm23923_vm5, %v4644_v61  ;;  %v5052_v61 = vrot.slane %v20416_v11, 2  ;;  %v5054_v11 = vrot.slane %v20428_v4, 2  ;;  %v5825_v4 = vrot.slane %v20481_v19, 3  ;;  %vm23936_vm5 = vmmov %vm23925_vm1 }
 0x1b6   : > { %16978 = vmatprep.mubr.msk.bf16.mxu0 %vm23925_vm1, %v4646_v31  ;;  %v5506_v31 = vor.u32 %v5505_v32, %v5502_v29  ;;  %v20631_v7 = vor.u32 %v5523_v23, %v5520_v37  ;;  %v5812_v29 = vrot.slane %v15348_v6, 3  ;;  %v20656_v37 = vsel %vm23633_vm14, %v5813_v45, %v5815_v3  ;;  %vm23937_vm1 = vmmov %vm23933_vm0 }
 0x1b7   : > { %16811 = vmatmul.mubr.msk.bf16.gmra.mrb[48].mxu1 %vm23927_vm13, %v20187_v52  ;;  %v5514_v52 = vrot.slane %v5512_v25, 3  ;;  %v5053_v36 = vsel %vm23636_vm4, %v5051_v58, %v5052_v61  ;;  %v5056_v58 = vrot.slane %v20430_v9, 2  ;;  %v5821_v32 = vrot.slane %v20472_v21, 3  ;;  %vm23938_vm13 = vmmov %vm23931_vm2 }
 0x1b8   : > { %16814 = vmatprep.mubr.msk.bf16.mxu1 %vm23928_vm11, %v20228_v2  ;;  %v20628_v2 = vsel %vm23635_vm6, %v5497_v60, %v5506_v31  ;;  %v20647_v23 = vsel %vm23633_vm14, %v5812_v29, %v5813_v45  ;;  %v5060_v29 = vrot.slane %v20472_v21, 2  ;;  %vm23939_vm11 = vmmov %vm23931_vm2 }
 0x1b9   : > { %v5515_v13 = vor.u32 %v5514_v52, %v5511_v8  ;;  %v5817_v8 = vrot.slane %v20430_v9, 3  ;;  %v5055_v9 = vsel %vm23636_vm4, %v5052_v61, %v5054_v11  ;;  %v5057_v38 = vsel %vm23636_vm4, %v5054_v11, %v5056_v58  ;;  %vm23942_vm0 = vmmov %vm23931_vm2 }
 0x1ba   : > { %v5827_v61 = vrot.slane %v20502_v15, 3 }
 0x1bb   : > { %v20636_v27 = vsel %vm23635_vm6, %v5506_v31, %v5515_v13  ;;  %v20642_v5 = vsel %vm23635_vm6, %v5515_v13, %v20631_v7  ;;  %v20659_v6 = vsel %vm23633_vm14, %v5815_v3, %v5817_v8  ;;  %v5829_v31 = vrot.slane %v20508_v24, 3 }
 0x1bc   : > { %v20695_v52 = vsel %vm23633_vm14, %v5825_v4, %v5827_v61  ;;  %v5058_v13 = vrot.slane %v20456_v30, 2 }
 0x1bd   : > { %16979 = vmatmul.mubr.msk.bf16.gmra.mrb[64].mxu0 %vm23929_vm7, %v4648_v63  ;;  %v20701_v63 = vsel %vm23633_vm14, %v5827_v61, %v5829_v31  ;;  %vm23940_vm7 = vmmov %vm23931_vm2  ;;  %v5841_v61 = vrot.slane %v20581_v34, 3 }
 0x1be   : > { %16984 = vmatprep.mubr.msk.bf16.mxu0 %vm23930_vm15, %v5053_v36  ;;  %v5831_v36 = vrot.slane %v20525_v59, 3  ;;  %v5061_v11 = vsel %vm23636_vm4, %v5058_v13, %v5060_v29  ;;  %vm23941_vm15 = vmmov %vm23931_vm2 }
 0x1bf   : > { %16815 = vmatmul.mubr.msk.bf16.gmra.mrb[52].mxu1 %vm23931_vm2, %v20250_v57  ;;  %v5819_v57 = vrot.slane %v20456_v30, 3  ;;  %v5835_v30 = vrot.slane %v20545_v55, 3 }
 0x1c0   : > { %16818 = vmatprep.mubr.msk.bf16.mxu1 %vm23932_vm12, %v20275_v22  ;;  %v5823_v22 = vrot.slane %v20479_v12, 3  ;;  %v20707_v45 = vsel %vm23633_vm14, %v5829_v31, %v5831_v36  ;;  %v2598_v31 = vld [vmem:[#allocation2 + $0x8c] sm:$0x7]  ;;  %vm23634_vm12 = vcmask 1046528  }
 0x1c1   : > { %v20666_v25 = vsel %vm23633_vm14, %v5817_v8, %v5819_v57  ;;  %v20677_v60 = vsel %vm23633_vm14, %v5819_v57, %v5821_v32  ;;  %v5059_v8 = vsel %vm23636_vm4, %v5056_v58, %v5058_v13  ;;  %v5837_v57 = vrot.slane %v20554_v48, 3 }
 0x1c2   : > { %v20682_v53 = vsel %vm23633_vm14, %v5821_v32, %v5823_v22  ;;  %v20685_v20 = vsel %vm23633_vm14, %v5823_v22, %v5825_v4  ;;  %v18927_v32 = vld [vmem:[#allocation2 + $0x4] sm:$0xf]  ;;  %v5062_v22 = vrot.slane %v20479_v12, 2  ;;  %v20729_v4 = vld [vmem:[#allocation2 + $0xa0] ss:$0 sps:$4 sm:$0x33]  }
 0x1c3   : > { %v20724_v58 = vsel %vm23633_vm14, %v5835_v30, %v5837_v57  ;;  %v5845_v12 = vrot.slane %v20598_v49, 3 }
 0x1c5   : > { %16985 = vmatmul.mubr.msk.bf16.vlgmr.msra.gmra.mrb[32].mxu0 %vm23934_vm10, %v5055_v9  ;;  %v5839_v9 = vrot.slane %v20574_v39, 3  ;;  %vm23943_vm10 = vmmov %vm23942_vm0 }
 0x1c6   : > { %16988 = vmatprep.mubr.msk.bf16.mxu0 %vm23935_vm8, %v5057_v38  ;;  %17021 = vmatpush3.bf16.msra.mxu0 %v5590_v18  ;;  %v5064_v38 = vrot.slane %v20481_v19, 2  ;;  %vm23944_vm8 = vmmov %vm23942_vm0 }
 0x1c7   : > { %16819 = vmatmul.mubr.msk.bf16.gmra.mrb[56].mxu1 %vm23936_vm5, %v20287_v44  ;;  %18655 = vmatprep.subr.msk.bf16.mxu0 %vm23937_vm1, %v20674_v41  ;;  %v5833_v44 = vrot.slane %v20537_v26, 3  ;;  %v20735_v13 = vsel %vm23633_vm14, %v5837_v57, %v5839_v9  ;;  %vm23945_vm5 = vmmov %vm23942_vm0 }
 0x1c8   : > { %16822 = vmatprep.mubr.msk.bf16.mxu1 %vm23938_vm13, %v20315_v1  ;;  %v3291_v1 = vld [vmem:[#allocation2] sm:$0xe]  ;;  %v5065_v57 = vsel %vm23636_vm4, %v5062_v22, %v5064_v38  ;;  %vm23946_vm1 = vmmov %vm23942_vm0  ;;  %vm23947_vm13 = vcmask 1043456  }
 0x1c9   : > { %v20710_v3 = vsel %vm23633_vm14, %v5831_v36, %v5833_v44  ;;  %v20719_v21 = vsel %vm23633_vm14, %v5833_v44, %v5835_v30  ;;  %v15175_v18 = vcombine.low %v3291_v1, %v18927_v32  ;;  %v5843_v36 = vrot.slane %v20589_v54, 3 }
 0x1ca   : > { %v20740_v1 = vsel %vm23633_vm14, %v5839_v9, %v5841_v61  ;;  %v5063_v30 = vsel %vm23636_vm4, %v5060_v29, %v5062_v22  ;;  %v15155_v32 = vcombine.low %v20380_v17, %v2598_v31  ;;  %v5066_v9 = vrot.slane %v20502_v15, 2 }
 0x1cb   : > { %v3298_v44 = vrot.slane %v15175_v18, 1  ;;  %v20745_v19 = vsel %vm23633_vm14, %v5841_v61, %v5843_v36  ;;  %v5068_v22 = vrot.slane %v20508_v24, 2  ;;  %v3301_v17 = vrot.slane %v20450_v43, 1  ;;  %v18928_v24 = vld [vmem:[%s23565_s3 + $0x10] sm:$0xf] }
 0x1cc   : > { %v3303_v61 = vrot.slane %v20475_v46, 1  ;;  %v5067_v31 = vsel %vm23636_vm4, %v5064_v38, %v5066_v9  ;;  %v5070_v43 = vrot.slane %v20525_v59, 2  ;;  %v5072_v46 = vrot.slane %v20537_v26, 2 }
 0x1cd   : > { %16989 = vmatmul.mubr.msk.bf16.gmra.mrb[36].mxu0 %vm23939_vm11, %v5059_v8  ;;  %v3299_v8 = vrot.slane %v20438_v42, 1  ;;  %v20752_v42 = vsel %vm23633_vm14, %v5843_v36, %v5845_v12  ;;  %v5069_v36 = vsel %vm23636_vm4, %v5066_v9, %v5068_v22  ;;  %vm23948_vm11 = vmmov %vm23942_vm0  ;;  %v3307_v38 = vrot.slane %v20521_v10, 1 }
 0x1ce   : > { %16992 = vmatprep.mubr.msk.bf16.mxu0 %vm23940_vm7, %v5061_v11  ;;  %v5847_v11 = vrot.slane %v20729_v4, 3  ;;  %vm23949_vm7 = vmmov %vm23942_vm0  ;;  %v3304_v15 = vsel %vm23634_vm12, %v3301_v17, %v3303_v61  ;;  %v5076_v10 = vrot.slane %v20554_v48, 2  ;;  %v5080_v48 = vrot.slane %v20581_v34, 2 }
 0x1cf   : > { %16823 = vmatmul.mubr.msk.bf16.gmra.mrb[60].mxu1 %vm23941_vm15, %v20344_v50  ;;  %v3300_v29 = vsel %vm23634_vm12, %v3298_v44, %v3299_v8  ;;  %v3302_v44 = vsel %vm23634_vm12, %v3299_v8, %v3301_v17  ;;  %vm23950_vm15 = vmmov %vm23942_vm0  ;;  %v5071_v8 = vsel %vm23636_vm4, %v5068_v22, %v5070_v43  ;;  %v18930_v17 = vld [vmem:[#allocation2 + $0x48] sm:$0xff]   ;;  %v5082_v34 = vrot.slane %v20589_v54, 2 }
 0x1d0   : > { %16826 = vmatprep.mubr.msk.bf16.mxu1 %vm23931_vm2, %v20365_v62  ;;  %v20756_v18 = vsel %vm23633_vm14, %v5845_v12, %v5847_v11  ;;  %v3821_v12 = vsel %vm23947_vm13, %v20435_v14, 0  ;;  %vm23951_vm2 = vmmov %vm23947_vm13  ;;  %v3305_v14 = vrot.slane %v20487_v51, 1  ;;  %v5074_v51 = vrot.slane %v20545_v55, 2 }
 0x1d1   : > { %v3309_v11 = vrot.slane %v20532_v16, 1  ;;  %vm23956_vm13 = vmmov %vm23942_vm0  ;;  %v5078_v16 = vrot.slane %v20574_v39, 2 }
 0x1d2   : > { %v3306_v59 = vsel %vm23634_vm12, %v3303_v61, %v3305_v14  ;;  %v3308_v26 = vsel %vm23634_vm12, %v3305_v14, %v3307_v38  ;;  %v3315_v61 = vrot.slane %v18930_v17, 1  ;;  %v5083_v14 = vsel %vm23636_vm4, %v5080_v48, %v5082_v34  ;;  %v18744_v17 = vld [vmem:[#allocation2 + $0x8] sm:$0xfe]  }
 0x1d3   : > { %v3310_v9 = vsel %vm23634_vm12, %v3307_v38, %v3309_v11  ;;  %v18743_v38 = vld [vmem:[#allocation2 + $0xa0] ss:$0 sps:$4 sm:$0x11]  }
 0x1d5   : > { %16993 = vmatmul.mubr.msk.bf16.gmra.mrb[40].mxu0 %vm23942_vm0, %v5063_v30  ;;  %v5073_v30 = vsel %vm23636_vm4, %v5070_v43, %v5072_v46 }
 0x1d6   : > { %16996 = vmatprep.mubr.msk.bf16.mxu0 %vm23943_vm10, %v5065_v57  ;;  %vm23952_vm10 = vmmov %vm23942_vm0  ;;  %v3311_v57 = vrot.slane %v20570_v35, 1  ;;  %v18929_v35 = vld [vmem:[#allocation2 + $0x40] sm:$0xff]  }
 0x1d7   : > { %16827 = vmatmul.mubr.msk.bf16.gmra.mrb[64].mxu1 %vm23944_vm8, %v15155_v32  ;;  %vm23953_vm8 = vmmov %vm23942_vm0  ;;  %v5075_v32 = vsel %vm23636_vm4, %v5072_v46, %v5074_v51  ;;  %v3313_v22 = vrot.slane %v18929_v35, 1  ;;  %v18932_v46 = vld [vmem:[#allocation2 + $0x58] sm:$0xff]   ;;  %v3329_v35 = vrot.slane %v20365_v62, 1 }
 0x1d8   : > { %16832 = vmatprep.mubr.msk.bf16.mxu1 %vm23945_vm5, %v3300_v29  ;;  %vm23954_vm5 = vmmov %vm23942_vm0  ;;  %v5077_v29 = vsel %vm23636_vm4, %v5074_v51, %v5076_v10  ;;  %v3312_v55 = vsel %vm23634_vm12, %v3309_v11, %v3311_v57  ;;  %v18934_v51 = vld [vmem:[#allocation2 + $0x68] sm:$0xff]   ;;  %v23979_v62 = vld [vmem:[#allocation14_spill] sm:$0xff] }
 0x1d9   : > { %v3316_v39 = vsel %vm23634_vm12, %v3313_v22, %v3315_v61 }
 0x1dd   : > { %16997 = vmatmul.mubr.msk.bf16.gmra.mrb[44].mxu0 %vm23946_vm1, %v5067_v31  ;;  %vm23955_vm1 = vmmov %vm23942_vm0  ;;  %v5079_v31 = vsel %vm23636_vm4, %v5076_v10, %v5078_v16  ;;  %v3323_v10 = vrot.slane %v18934_v51, 1 }
 0x1de   : > { %17000 = vmatprep.mubr.msk.bf16.mxu0 %vm23948_vm11, %v5069_v36  ;;  %vm23957_vm11 = vmmov %vm23942_vm0  ;;  %v5081_v36 = vsel %vm23636_vm4, %v5078_v16, %v5080_v48  ;;  %v3327_v16 = vrot.slane %v20344_v50, 1  ;;  %v23975_v50 = vld [vmem:[#allocation13_spill] sm:$0xff] }
 0x1df   : > { %16833 = vmatmul.mubr.msk.bf16.vlgmr.msra.gmra.mrb[32].mxu1 %vm23949_vm7, %v3302_v44  ;;  %vm23958_vm7 = vmmov %vm23942_vm0  ;;  %v5084_v44 = vrot.slane %v20598_v49, 2  ;;  %v5086_v49 = vrot.slane %v18743_v38, 2  ;;  %v23991_v38 = vld [vmem:[#allocation6_spill] sm:$0xff] }
 0x1e0   : > { %16836 = vmatprep.mubr.msk.bf16.mxu1 %vm23950_vm15, %v3304_v15  ;;  %16869 = vmatpush3.bf16.msra.mxu1 %v3821_v12  ;;  %vm23959_vm15 = vmmov %vm23942_vm0  ;;  %v3314_v12 = vsel %vm23634_vm12, %v3311_v57, %v3313_v22  ;;  %v18931_v15 = vld [vmem:[#allocation2 + $0x50] sm:$0xff]  }
 0x1e1   : > { %18651 = vmatprep.subr.msk.bf16.mxu1 %vm23951_vm2, %v18928_v24  ;;  %vm23960_vm2 = vmmov %vm23942_vm0  ;;  %v3317_v43 = vrot.slane %v18931_v15, 1  ;;  %v3319_v24 = vrot.slane %v18932_v46, 1  ;;  %v5087_v11 = vsel %vm23636_vm4, %v5084_v44, %v5086_v49  ;;  %v18745_v22 = vld [vmem:[#allocation2 + $0x10] sm:$0xff]   ;;  %v23987_v15 = vld [vmem:[#allocation19_spill] sm:$0xff] }
 0x1e2   : > { %v18748_v46 = vld [vmem:[#allocation2 + $0x28] sm:$0xff]  }
 0x1e3   : > { %v3320_v54 = vsel %vm23634_vm12, %v3317_v43, %v3319_v24  ;;  %v23994_v49 = vld [vmem:[#allocation21_spill] sm:$0xff] }
 0x1e5   : > { %17001 = vmatmul.mubr.msk.bf16.gmra.mrb[48].mxu0 %vm23942_vm0, %v5071_v8  ;;  %v5085_v8 = vsel %vm23636_vm4, %v5082_v34, %v5084_v44  ;;  %v23985_v44 = vld [vmem:[#allocation18_spill] sm:$0xff]  ;;  %vm24130_vm4 = vcmask 1043456  }
 0x1e6   : > { %17004 = vmatprep.mubr.msk.bf16.mxu0 %vm23952_vm10, %v5073_v30  ;;  %vm23961_vm10 = vmmov %vm23942_vm0  ;;  %v3318_v30 = vsel %vm23634_vm12, %v3315_v61, %v3317_v43  ;;  %v3732_v61 = vrot.slane %v18745_v22, 1  ;;  %v5527_v22 = vshrl.u32 %v20729_v4, 16 }
 0x1e7   : > { %16837 = vmatmul.mubr.msk.bf16.gmra.mrb[36].mxu1 %vm23953_vm8, %v3306_v59  ;;  %vm23962_vm8 = vmmov %vm23942_vm0  ;;  %v18933_v59 = vld [vmem:[#allocation2 + $0x60] sm:$0xff]  }
 0x1e8   : > { %16840 = vmatprep.mubr.msk.bf16.mxu1 %vm23954_vm5, %v3308_v26  ;;  %vm23963_vm5 = vmmov %vm23942_vm0  ;;  %v3321_v26 = vrot.slane %v18933_v59, 1 }
 0x1ea   : > { %v3322_v57 = vsel %vm23634_vm12, %v3319_v24, %v3321_v26 }
 0x1ed   : > { %17005 = vmatmul.mubr.msk.bf16.gmra.mrb[52].mxu0 %vm23955_vm1, %v5075_v32  ;;  %vm23964_vm1 = vmmov %vm23942_vm0  ;;  %v3324_v32 = vsel %vm23634_vm12, %v3321_v26, %v3323_v10  ;;  %v18750_v26 = vld [vmem:[#allocation2 + $0x38] sm:$0xff]  }
 0x1ee   : > { %17008 = vmatprep.mubr.msk.bf16.mxu0 %vm23956_vm13, %v5077_v29  ;;  %vm23965_vm13 = vmmov %vm23942_vm0  ;;  %v18935_v29 = vld [vmem:[#allocation2 + $0x70] sm:$0xff]  }
 0x1ef   : > { %16841 = vmatmul.mubr.msk.bf16.gmra.mrb[40].mxu1 %vm23957_vm11, %v3310_v9  ;;  %vm23966_vm11 = vmmov %vm23942_vm0  ;;  %v3325_v9 = vrot.slane %v18935_v29, 1  ;;  %v23999_v29 = vld [vmem:[#allocation24_spill] sm:$0xff] }
 0x1f0   : > { %16844 = vmatprep.mubr.msk.bf16.mxu1 %vm23958_vm7, %v3312_v55  ;;  %vm23967_vm7 = vmmov %vm23942_vm0 }
 0x1f1   : > { %v3328_v48 = vsel %vm23634_vm12, %v3325_v9, %v3327_v16 }
 0x1f5   : > { %17009 = vmatmul.mubr.msk.bf16.gmra.mrb[56].mxu0 %vm23959_vm15, %v5079_v31  ;;  %vm23968_vm15 = vmmov %vm23942_vm0  ;;  %v23981_v31 = vld [vmem:[#allocation15_spill] sm:$0xff] }
 0x1f6   : > { %17012 = vmatprep.mubr.msk.bf16.mxu0 %vm23960_vm2, %v5081_v36  ;;  %vm23969_vm2 = vmmov %vm23942_vm0 }
 0x1f7   : > { %16845 = vmatmul.mubr.msk.bf16.gmra.mrb[44].mxu1 %vm23942_vm0, %v3314_v12  ;;  %vm23970_vm0 = vcmask 1043456   ;;  %v18747_v12 = vld [vmem:[#allocation2 + $0x20] sm:$0xff]  }
 0x1f8   : > { %16848 = vmatprep.mubr.msk.bf16.mxu1 %vm23961_vm10, %v3316_v39  ;;  %v5904_v55 = vsel %vm23970_vm0, %v20674_v41, 0  ;;  %vm23971_vm10 = vmmov %vm23964_vm1  ;;  %v3331_v41 = vrot.slane %v20390_v56, 1  ;;  %v3731_v56 = vrot.slane %v18744_v17, 1  ;;  %v3736_v34 = vrot.slane %v18747_v12, 1 }
 0x1f9   : > { %vm23982_vm0 = vmmov %vm23964_vm1  ;;  %v5530_v17 = vshll.u32 %v20729_v4, 16 }
 0x1fa   : > { %v3733_v36 = vsel %vm23634_vm12, %v3731_v56, %v3732_v61 }
 0x1fb   : > { %v5532_v56 = vrot.slane %v5530_v17, 3 }
 0x1fd   : > { %17013 = vmatmul.mubr.msk.bf16.gmra.mrb[60].mxu0 %vm23962_vm8, %v5083_v14  ;;  %vm23972_vm8 = vmmov %vm23964_vm1  ;;  %v18749_v14 = vld [vmem:[#allocation2 + $0x30] sm:$0xff]  }
 0x1fe   : > { %17016 = vmatprep.mubr.msk.bf16.mxu0 %vm23963_vm5, %v5085_v8  ;;  %vm23973_vm5 = vmmov %vm23964_vm1  ;;  %v3738_v8 = vrot.slane %v18748_v46, 1 }
 0x1ff   : > { %16849 = vmatmul.mubr.msk.bf16.gmra.mrb[48].mxu1 %vm23964_vm1, %v3318_v30  ;;  %v3740_v30 = vrot.slane %v18749_v14, 1  ;;  %v18762_v14 = vld [vmem:[#allocation2 + $0x90] sm:$0xff]  }
 0x200   : > { %16852 = vmatprep.mubr.msk.bf16.mxu1 %vm23965_vm13, %v3320_v54  ;;  %vm23974_vm13 = vmmov %vm23964_vm1  ;;  %v23992_v54 = vld [vmem:[#allocation20_spill] sm:$0xff]  ;;  %v3739_v59 = vsel %vm23634_vm12, %v3736_v34, %v3738_v8 }
 0x201   : > { %v3741_v51 = vsel %vm23634_vm12, %v3738_v8, %v3740_v30  ;;  %v3764_v8 = vrot.slane %v18762_v14, 1 }
 0x205   : > { %17017 = vmatmul.mubr.msk.bf16.gmra.mrb[64].mxu0 %vm23966_vm11, %v5087_v11  ;;  %vm23976_vm11 = vmmov %vm23964_vm1  ;;  %v3742_v11 = vrot.slane %v18750_v26, 1 }
 0x206   : > { %17022 = vmatprep.mubr.msk.bf16.mxu0 %vm23967_vm7, %v20484_v40  ;;  %v3326_v40 = vsel %vm23634_vm12, %v3323_v10, %v3325_v9  ;;  %vm23977_vm7 = vmmov %vm23964_vm1  ;;  %v18751_v10 = vld [vmem:[#allocation2 + $0x40] sm:$0xff]  }
 0x207   : > { %16853 = vmatmul.mubr.msk.bf16.gmra.mrb[52].mxu1 %vm23968_vm15, %v3322_v57  ;;  %vm23978_vm15 = vmmov %vm23964_vm1  ;;  %v3744_v57 = vrot.slane %v18751_v10, 1  ;;  %v3743_v9 = vsel %vm23634_vm12, %v3740_v30, %v3742_v11  ;;  %v24017_v30 = vld [vmem:[#allocation10_spill] sm:$0xff] }
 0x208   : > { %16856 = vmatprep.mubr.msk.bf16.mxu1 %vm23969_vm2, %v3324_v32  ;;  %vm23980_vm2 = vmmov %vm23964_vm1  ;;  %v23997_v32 = vld [vmem:[#allocation23_spill] sm:$0xff] }
 0x20d   : > { %17023 = vmatmul.mubr.msk.bf16.vlgmr.msra.gmra.mrb[32].mxu0 %vm23971_vm10, %v20493_v28  ;;  %v3330_v28 = vsel %vm23634_vm12, %v3327_v16, %v3329_v35  ;;  %vm23983_vm10 = vmmov %vm23982_vm0  ;;  %v3745_v16 = vsel %vm23634_vm12, %v3742_v11, %v3744_v57 }
 0x20e   : > { %17026 = vmatprep.mubr.msk.bf16.mxu0 %vm23972_vm8, %v20500_v33  ;;  %17059 = vmatpush3.bf16.msra.mxu0 %v5904_v55  ;;  %v3332_v33 = vsel %vm23634_vm12, %v3329_v35, %v3331_v41  ;;  %vm23984_vm8 = vmmov %vm23982_vm0  ;;  %v18752_v55 = vld [vmem:[#allocation2 + $0x48] sm:$0xff]  }
 0x20f   : > { %16857 = vmatmul.mubr.msk.bf16.gmra.mrb[56].mxu1 %vm23973_vm5, %v3326_v40  ;;  %vm23986_vm5 = vmmov %vm23982_vm0  ;;  %v18753_v40 = vld [vmem:[#allocation2 + $0x50] sm:$0xff]  }
 0x210   : > { %16860 = vmatprep.mubr.msk.bf16.mxu1 %vm23964_vm1, %v3328_v48  ;;  %vm23988_vm1 = vmmov %vm23982_vm0  ;;  %v3746_v48 = vrot.slane %v18752_v55, 1  ;;  %v3748_v35 = vrot.slane %v18753_v40, 1  ;;  %v24027_v55 = vld [vmem:[#allocation9_spill] sm:$0xff] }
 0x215   : > { %17027 = vmatmul.mubr.msk.bf16.gmra.mrb[36].mxu0 %vm23974_vm13, %v20519_v47  ;;  %v18746_v47 = vld [vmem:[#allocation2 + $0x18] sm:$0xff]   ;;  %vm23989_vm13 = vmmov %vm23982_vm0 }
 0x216   : > { %17030 = vmatprep.mubr.msk.bf16.mxu0 %vm23976_vm11, %v23975_v50  ;;  %v3734_v39 = vrot.slane %v18746_v47, 1  ;;  %vm23990_vm11 = vmmov %vm23982_vm0  ;;  %v18754_v50 = vld [vmem:[#allocation2 + $0x58] sm:$0xff]  }
 0x217   : > { %16861 = vmatmul.mubr.msk.bf16.gmra.mrb[60].mxu1 %vm23977_vm7, %v3330_v28  ;;  %vm23993_vm7 = vmmov %vm23982_vm0  ;;  %v3749_v28 = vsel %vm23634_vm12, %v3746_v48, %v3748_v35 }
 0x218   : > { %16864 = vmatprep.mubr.msk.bf16.mxu1 %vm23978_vm15, %v3332_v33  ;;  %v3735_v43 = vsel %vm23634_vm12, %v3732_v61, %v3734_v39  ;;  %v3737_v24 = vsel %vm23634_vm12, %v3734_v39, %v3736_v34  ;;  %vm23995_vm15 = vmmov %vm23982_vm0  ;;  %v18755_v33 = vld [vmem:[#allocation2 + $0x60] sm:$0xff]   ;;  %v3750_v61 = vrot.slane %v18754_v50, 1 }
 0x21d   : > { %17031 = vmatmul.mubr.msk.bf16.gmra.mrb[40].mxu0 %vm23980_vm2, %v23979_v62  ;;  %vm23996_vm2 = vmmov %vm23982_vm0  ;;  %v3752_v62 = vrot.slane %v18755_v33, 1  ;;  %v24031_v33 = vld [vmem:[#allocation12_spill] sm:$0xff] }
 0x21e   : > { %17034 = vmatprep.mubr.msk.bf16.mxu0 %vm23982_vm0, %v23981_v31  ;;  %v18757_v31 = vld [vmem:[#allocation2 + $0x68] sm:$0xff]  }
 0x21f   : > { %16865 = vmatmul.mubr.msk.bf16.gmra.mrb[64].mxu1 %vm23983_vm10, %v3331_v41  ;;  %vm23998_vm10 = vmmov %vm23982_vm0  ;;  %v3747_v41 = vsel %vm23634_vm12, %v3744_v57, %v3746_v48  ;;  %v3753_v47 = vsel %vm23634_vm12, %v3750_v61, %v3752_v62  ;;  %v3754_v12 = vrot.slane %v18757_v31, 1 }
 0x220   : > { %16870 = vmatprep.mubr.msk.bf16.mxu1 %vm23984_vm8, %v3733_v36  ;;  %vm24000_vm8 = vmmov %vm23982_vm0  ;;  %v18758_v36 = vld [vmem:[#allocation2 + $0x70] sm:$0xff]  }
 0x221   : > { %v3756_v39 = vrot.slane %v18758_v36, 1 }
 0x225   : > { %17035 = vmatmul.mubr.msk.bf16.gmra.mrb[44].mxu0 %vm23986_vm5, %v23985_v44  ;;  %vm24001_vm5 = vmmov %vm23982_vm0  ;;  %v3757_v44 = vsel %vm23634_vm12, %v3754_v12, %v3756_v39 }
 0x226   : > { %17038 = vmatprep.mubr.msk.bf16.mxu0 %vm23988_vm1, %v23987_v15  ;;  %vm24002_vm1 = vmmov %vm23982_vm0  ;;  %v18760_v15 = vld [vmem:[#allocation2 + $0x80] sm:$0xff]  }
 0x227   : > { %16871 = vmatmul.mubr.msk.bf16.vlgmr.msra.gmra.mrb[32].mxu1 %vm23989_vm13, %v3735_v43  ;;  %vm24003_vm13 = vmmov %vm23982_vm0  ;;  %v3760_v46 = vrot.slane %v18760_v15, 1 }
 0x228   : > { %16874 = vmatprep.mubr.msk.bf16.mxu1 %vm23990_vm11, %v3737_v24  ;;  %17781 = vmatpush3.bf16.msra.mxu1 %v23991_v38  ;;  %vm24004_vm11 = vmmov %vm23982_vm0 }
 0x22d   : > { %17039 = vmatmul.mubr.msk.bf16.gmra.mrb[48].mxu0 %vm23993_vm7, %v23992_v54  ;;  %vm24005_vm7 = vmmov %vm23982_vm0  ;;  %v4268_v54 = vshrl.u32 %v24017_v30, 16 }
 0x22e   : > { %17042 = vmatprep.mubr.msk.bf16.mxu0 %vm23995_vm15, %v23994_v49  ;;  %vm24006_vm15 = vmmov %vm23982_vm0  ;;  %v4271_v49 = vshll.u32 %v24017_v30, 16 }
 0x22f   : > { %16875 = vmatmul.mubr.msk.bf16.gmra.mrb[36].mxu1 %vm23996_vm2, %v3739_v59  ;;  %vm24007_vm2 = vmmov %vm23982_vm0  ;;  %v4270_v59 = vrot.slane %v4268_v54, 1 }
 0x230   : > { %16878 = vmatprep.mubr.msk.bf16.mxu1 %vm23982_vm0, %v3741_v51  ;;  %v4273_v26 = vrot.slane %v4271_v49, 2  ;;  %v24022_v51 = vld [vmem:[#allocation8_spill] sm:$0xff] }
 0x231   : > { %v4277_v10 = vshrl.u32 %v24022_v51, 16  ;;  %v4280_v11 = vshll.u32 %v24022_v51, 16 }
 0x232   : > { %v4274_v57 = vor.u32 %v4273_v26, %v4270_v59 }
 0x235   : > { %17043 = vmatmul.mubr.msk.bf16.gmra.mrb[52].mxu0 %vm23998_vm10, %v23997_v32  ;;  %vm24008_vm10 = vmmov %vm23982_vm0  ;;  %v24023_v32 = vld [vmem:[#allocation11_spill] sm:$0xff] }
 0x236   : > { %17046 = vmatprep.mubr.msk.bf16.mxu0 %vm24000_vm8, %v23999_v29  ;;  %vm24009_vm8 = vmmov %vm23982_vm0  ;;  %v4289_v29 = vshll.u32 %v24023_v32, 16 }
 0x237   : > { %16879 = vmatmul.mubr.msk.bf16.gmra.mrb[40].mxu1 %vm24001_vm5, %v3743_v9  ;;  %vm24010_vm5 = vmmov %vm23982_vm0  ;;  %v4282_v9 = vrot.slane %v4280_v11, 2 }
 0x238   : > { %16882 = vmatprep.mubr.msk.bf16.mxu1 %vm24002_vm1, %v3745_v16  ;;  %vm24011_vm1 = vmmov %vm23982_vm0  ;;  %v4291_v48 = vrot.slane %v4289_v29, 2 }
 0x23d   : > { %17047 = vmatmul.mubr.msk.bf16.gmra.mrb[56].mxu0 %vm24003_vm13, %v20624_v0  ;;  %v5529_v0 = vrot.slane %v5527_v22, 2  ;;  %vm24012_vm13 = vmmov %vm23982_vm0  ;;  %v4304_v22 = vshrl.u32 %v24031_v33, 16 }
 0x23e   : > { %17050 = vmatprep.mubr.msk.bf16.mxu0 %vm24004_vm11, %v20628_v2  ;;  %v3751_v2 = vsel %vm23634_vm12, %v3748_v35, %v3750_v61  ;;  %vm24013_vm11 = vmmov %vm23982_vm0 }
 0x23f   : > { %16883 = vmatmul.mubr.msk.bf16.gmra.mrb[44].mxu1 %vm24005_vm7, %v3747_v41  ;;  %v5533_v4 = vor.u32 %v5532_v56, %v5529_v0  ;;  %vm24014_vm7 = vmmov %vm23982_vm0  ;;  %v24030_v41 = vld [vmem:[#allocation7_spill] sm:$0xff]  ;;  %v4306_v56 = vrot.slane %v4304_v22, 1 }
 0x240   : > { %16886 = vmatprep.mubr.msk.bf16.mxu1 %vm24006_vm15, %v3749_v28  ;;  %vm24015_vm15 = vmmov %vm23982_vm0  ;;  %v4295_v50 = vshrl.u32 %v24030_v41, 16  ;;  %v4298_v28 = vshll.u32 %v24030_v41, 16 }
 0x241   : > { %v5534_v34 = vsel %vm23635_vm6, %v20631_v7, %v5533_v4 }
 0x242   : > { %v4297_v61 = vrot.slane %v4295_v50, 1 }
 0x245   : > { %17051 = vmatmul.mubr.msk.bf16.gmra.mrb[60].mxu0 %vm24007_vm2, %v20636_v27  ;;  %v3755_v27 = vsel %vm23634_vm12, %v3752_v62, %v3754_v12  ;;  %vm24016_vm2 = vmmov %vm23982_vm0  ;;  %v4300_v62 = vrot.slane %v4298_v28, 2  ;;  %v24038_v12 = vld [vmem:[#allocation17_spill] sm:$0xff] }
 0x246   : > { %17054 = vmatprep.mubr.msk.bf16.mxu0 %vm23982_vm0, %v20642_v5  ;;  %v18759_v5 = vld [vmem:[#allocation2 + $0x78] sm:$0xff]  }
 0x247   : > { %16887 = vmatmul.mubr.msk.bf16.gmra.mrb[48].mxu1 %vm24008_vm10, %v3751_v2  ;;  %v3758_v43 = vrot.slane %v18759_v5, 1  ;;  %vm24018_vm10 = vmmov %vm23982_vm0  ;;  %v4301_v31 = vor.u32 %v4300_v62, %v4297_v61 }
 0x248   : > { %16890 = vmatprep.mubr.msk.bf16.mxu1 %vm24009_vm8, %v3753_v47  ;;  %vm24019_vm8 = vmmov %vm23982_vm0  ;;  %v24037_v47 = vld [vmem:[#allocation16_spill] sm:$0xff] }
 0x249   : > { %v3759_v7 = vsel %vm23634_vm12, %v3756_v39, %v3758_v43  ;;  %v3761_v24 = vsel %vm23634_vm12, %v3758_v43, %v3760_v46  ;;  %v4313_v36 = vshrl.u32 %v24037_v47, 16  ;;  %v4325_v39 = vshll.u32 %v24038_v12, 16 }
 0x24b   : > { %v4327_v43 = vrot.slane %v4325_v39, 2 }
 0x24d   : > { %17055 = vmatmul.mubr.msk.bf16.gmra.mrb[64].mxu0 %vm24010_vm5, %v5534_v34  ;;  %vm24020_vm5 = vmmov %vm23982_vm0 }
 0x24e   : > { %17060 = vmatprep.mubr.msk.bf16.mxu0 %vm24011_vm1, %v20647_v23  ;;  %v18761_v23 = vld [vmem:[#allocation2 + $0x88] sm:$0xff]   ;;  %vm24021_vm1 = vmmov %vm23982_vm0 }
 0x24f   : > { %16891 = vmatmul.mubr.msk.bf16.gmra.mrb[52].mxu1 %vm24012_vm13, %v3755_v27  ;;  %v3762_v38 = vrot.slane %v18761_v23, 1  ;;  %vm24024_vm13 = vmmov %vm23982_vm0  ;;  %v4315_v27 = vrot.slane %v4313_v36, 1 }
 0x250   : > { %16894 = vmatprep.mubr.msk.bf16.mxu1 %vm24013_vm11, %v3757_v44  ;;  %vm24025_vm11 = vmmov %vm23982_vm0 }
 0x255   : > { %17061 = vmatmul.mubr.msk.bf16.vlgmr.msra.gmra.mrb[32].mxu0 %vm24014_vm7, %v20656_v37  ;;  %v3763_v37 = vsel %vm23634_vm12, %v3760_v46, %v3762_v38  ;;  %vm24026_vm7 = vmmov %vm23982_vm0 }
 0x256   : > { %17064 = vmatprep.mubr.msk.bf16.mxu0 %vm24015_vm15, %v20659_v6  ;;  %v3765_v6 = vsel %vm23634_vm12, %v3762_v38, %v3764_v8  ;;  %vm24028_vm15 = vsmask.f32 6400 }
 0x257   : > { %16895 = vmatmul.mubr.msk.bf16.gmra.mrb[56].mxu1 %vm24016_vm2, %v3759_v7  ;;  %v4275_v16 = vsel %vm24028_vm15, %v24027_v55, %v4274_v57  ;;  %vm24029_vm2 = vmmov %vm23982_vm0  ;;  %v6934_v55 = vld [vmem:[#allocation3 + $0x4] sm:$0xf] }
 0x258   : > { %16898 = vmatprep.mubr.msk.bf16.mxu1 %vm23982_vm0, %v3761_v24 }
 0x25d   : > { %17065 = vmatmul.mubr.msk.bf16.gmra.mrb[36].mxu0 %vm24018_vm10, %v20666_v25  ;;  %v4286_v25 = vshrl.u32 %v24023_v32, 16  ;;  %vm24032_vm10 = vmmov %vm23982_vm0 }
 0x25e   : > { %17068 = vmatprep.mubr.msk.bf16.mxu0 %vm24019_vm8, %v20677_v60  ;;  %v4279_v60 = vrot.slane %v4277_v10, 1  ;;  %vm24033_vm8 = vmmov %vm24028_vm15 }
 0x25f   : > { %16899 = vmatmul.mubr.msk.bf16.gmra.mrb[60].mxu1 %vm24020_vm5, %v3763_v37  ;;  %v4288_v40 = vrot.slane %v4286_v25, 1  ;;  %vm24034_vm5 = vmmov %vm23982_vm0 }
 0x260   : > { %16902 = vmatprep.mubr.msk.bf16.mxu1 %vm24021_vm1, %v3765_v6  ;;  %v4283_v35 = vor.u32 %v4282_v9, %v4279_v60  ;;  %vm24035_vm1 = vmmov %vm24033_vm8  ;;  %v6933_v9 = vld [vmem:[#allocation3] sm:$0xf] }
 0x261   : > { %vm24041_vm15 = vmmov %vm24035_vm1 }
 0x262   : > { %v4284_v17 = vsel %vm24033_vm8, %v4274_v57, %v4283_v35 }
 0x265   : > { %17069 = vmatmul.mubr.msk.bf16.gmra.mrb[40].mxu0 %vm24024_vm13, %v20682_v53  ;;  %v4292_v53 = vor.u32 %v4291_v48, %v4288_v40  ;;  %vm24036_vm13 = vmmov %vm23982_vm0  ;;  %v21028_v48 = vld [vmem:[%s23566_s4] ss:$0 sm:$0xff] }
 0x266   : > { %17072 = vmatprep.mubr.msk.bf16.mxu0 %vm24025_vm11, %v20685_v20  ;;  %v4307_v20 = vshll.u32 %v24031_v33, 16  ;;  %vm24039_vm11 = vmmov %vm23982_vm0 }
 0x267   : > { %16903 = vmatmul.mubr.msk.bf16.gmra.mrb[64].mxu1 %vm24026_vm7, %v3764_v8  ;;  %v4293_v0 = vsel %vm24035_vm1, %v4283_v35, %v4292_v53  ;;  %vm24040_vm7 = vmmov %vm23982_vm0  ;;  %v4302_v34 = vsel %vm24041_vm15, %v4292_v53, %v4301_v31 }
 0x268   : > { %16928 = vmatprep.mubr.msk.bf16.mxu1 %vm24029_vm2, %v4275_v16  ;;  %v4309_v2 = vrot.slane %v4307_v20, 2  ;;  %vm24042_vm2 = vmmov %vm23982_vm0  ;;  %v21023_v16 = vcombine.low %v6933_v9, %v6934_v55  ;;  %v6228_v55 = vld [vmem:[#allocation3 + $0x8] sm:$0xe] }
 0x269   : > { %vm24045_vm8 = vmmov %vm24042_vm2 }
 0x26a   : > { %v4310_v4 = vor.u32 %v4309_v2, %v4306_v56  ;;  %vm24052_vm15 = vmmov %vm24042_vm2  ;;  %24060 = vst [vmem:[#allocation13_spill] sm:$0xff] %v21023_v16  ;;  %v7066_v35 = vshll.u32 %v21023_v16, 16  ;;  %v7064_v62 = vshrl.u32 %v21023_v16, 16 }
 0x26d   : > { %17073 = vmatmul.mubr.msk.bf16.gmra.mrb[44].mxu0 %vm23982_vm0, %v20695_v52  ;;  %v4316_v52 = vshll.u32 %v24037_v47, 16  ;;  %vm24043_vm0 = vmmov %vm24035_vm1 }
 0x26e   : > { %17076 = vmatprep.mubr.msk.bf16.mxu0 %vm24032_vm10, %v20701_v63  ;;  %v4322_v63 = vshrl.u32 %v24038_v12, 16  ;;  %v4311_v44 = vsel %vm24043_vm0, %v4301_v31, %v4310_v4  ;;  %vm24044_vm10 = vmmov %vm24042_vm2 }
 0x26f   : > { %16929 = vmatmul.mubr.msk.bf16.vlgmr.msra.gmra.mrb[52].mxu1 %vm24034_vm5, %v4284_v17  ;;  %v4318_v5 = vrot.slane %v4316_v52, 2  ;;  %vm24046_vm5 = vmmov %vm24042_vm2 }
 0x270   : > { %16932 = vmatprep.mubr.msk.bf16.mxu1 %vm24036_vm13, %v4293_v0  ;;  %v4324_v15 = vrot.slane %v4322_v63, 1  ;;  %vm24047_vm1 = vmmov %vm24043_vm0  ;;  %v7068_v0 = vrot.slane %v7066_v35, 1 }
 0x271   : > { %v4319_v46 = vor.u32 %v4318_v5, %v4315_v27  ;;  %vm24049_vm13 = vmmov %vm24042_vm2 }
 0x272   : > { %v4328_v7 = vor.u32 %v4327_v43, %v4324_v15  ;;  %v21036_v39 = vor.u32 %v7068_v0, %v7064_v62 }
 0x275   : > { %17077 = vmatmul.mubr.msk.bf16.gmra.mrb[48].mxu0 %vm24039_vm11, %v20707_v45  ;;  %v4320_v45 = vsel %vm24047_vm1, %v4310_v4, %v4319_v46  ;;  %vm24050_vm11 = vmmov %vm24043_vm0 }
 0x276   : > { %17080 = vmatprep.mubr.msk.bf16.mxu0 %vm24040_vm7, %v20710_v3  ;;  %v24048_v3 = vld [vmem:[#allocation22_spill] sm:$0xff]  ;;  %v4329_v24 = vsel %vm24050_vm11, %v4319_v46, %v4328_v7  ;;  %vm24051_vm7 = vmmov %vm24042_vm2 }
 0x277   : > { %16933 = vmatmul.mubr.msk.bf16.gmra.mrb[56].mxu1 %vm24042_vm2, %v4302_v34  ;;  %v4331_v23 = vshll.u32 %v24048_v3, 16  ;;  %vm24056_vm1 = vmmov %vm24042_vm2 }
 0x278   : > { %16936 = vmatprep.mubr.msk.bf16.mxu1 %vm24044_vm10, %v4311_v44  ;;  %vm24053_vm10 = vmmov %vm24042_vm2 }
 0x279   : > { %v4333_v14 = vrot.slane %v4331_v23, 2 }
 0x27d   : > { %17081 = vmatmul.mubr.msk.bf16.gmra.mrb[52].mxu0 %vm24045_vm8, %v20719_v21  ;;  %v4334_v21 = vsel %vm24043_vm0, %v4328_v7, %v4333_v14  ;;  %vm24054_vm8 = vmmov %vm24042_vm2 }
 0x27e   : > { %17084 = vmatprep.mubr.msk.bf16.mxu0 %vm24046_vm5, %v20724_v58  ;;  %vm24055_vm5 = vmmov %vm24042_vm2  ;;  %v15412_v58 = vld [vmem:[%s23567_s5 + $0x4] sm:$0xf] }
 0x27f   : > { %16937 = vmatmul.mubr.msk.bf16.gmra.mrb[60].mxu1 %vm24049_vm13, %v4320_v45  ;;  %vm24057_vm13 = vcmask 1043456  }
 0x280   : > { %16940 = vmatprep.mubr.msk.bf16.mxu1 %vm24051_vm7, %v4329_v24  ;;  %18656 = vmatprep.subr.msk.bf16.mxu1 %vm24057_vm13, %v15412_v58  ;;  %vm24058_vm11 = vmmov %vm24057_vm13  ;;  %vm24066_vm13 = vsmask.f32 7942 }
 0x281   : > { %vm24059_vm7 = vmmov %vm24058_vm11 }
 0x282   : > { %vm24061_vm0 = vmmov %vm24059_vm7 }
 0x285   : > { %17085 = vmatmul.mubr.msk.bf16.gmra.mrb[56].mxu0 %vm24052_vm15, %v20735_v13  ;;  %v7261_v13 = vsel %vm24058_vm11, %v15412_v58, 0  ;;  %vm6226_vm15 = vcmask 60417  }
 0x286   : > { %17088 = vmatprep.mubr.msk.bf16.mxu0 %vm24042_vm2, %v20740_v1  ;;  %17097 = vmatpush3.bf16.msra.mxu1 %v7261_v13  ;;  %v6969_v1 = vld [vmem:[%s23567_s5] sm:$0xf]  ;;  %vm6278_vm2 = vcmask 60418   ;;  %vm21049_vm11 = vmand %vm6226_vm15, %vm24066_vm13 }
 0x287   : > { %16941 = vmatmul.mubr.msk.bf16.gmra.mrb[64].mxu1 %vm24053_vm10, %v4334_v21  ;;  %18657 = vmatprep.subr.msk.bf16.mxu1 %vm24059_vm7, %v6969_v1  ;;  %v21039_v34 = vsel %vm24061_vm0, %v6969_v1, 0  ;;  %vm6330_vm10 = vcmask 60419   ;;  %v24063_v1 = vmov 0  ;;  %vm24071_vm7 = vsmask.f32 1280 }
 0x288   : > { %vm21067_vm15 = vmand %vm23631_vm3, %vm24071_vm7 }
 0x28d   : > { %17089 = vmatmul.mubr.msk.bf16.gmra.mrb[60].mxu0 %vm24054_vm8, %v20745_v19  ;;  %vm24062_vm8 = vsmask.f32 7946 }
 0x28e   : > { %17092 = vmatprep.mubr.msk.bf16.mxu0 %vm24055_vm5, %v20752_v42  ;;  %vm21043_vm5 = vmand %vm6278_vm2, %vm24062_vm8  ;;  %vm24075_vm2 = vcmask 60416   ;;  %vm24077_vm8 = vsmask.f32 7950 }
 0x28f   : > { %v24064_v1 = vsel %vm21043_vm5, 4294967295, %v24063_v1  ;;  %vm24076_vm0 = vmmov %vm24075_vm2 }
 0x290   : > { %24065 = vst [vmem:[#allocation14_spill] sm:$0xff] %v24064_v1  ;;  %vm21084_vm13 = vmand %vm6330_vm10, %vm24077_vm8  ;;  %vm24081_vm10 = vsmask.f32 2304 }
 0x295   : > { %17093 = vmatmul.mubr.msk.bf16.gmra.mrb[64].mxu0 %vm24056_vm1, %v20756_v18  ;;  %vm6284_vm1 = vcmask 59392  }
 0x296   : > { %vm21095_vm7 = vmand %vm6284_vm1, %vm24081_vm10  ;;  %vm24085_vm1 = vsmask.f32 7938  ;;  %vm24089_vm10 = vsmask.f32 3328 }
 0x297   : > { %vm21119_vm8 = vmand %vm24076_vm0, %vm24085_vm1 }
 0x298   : > { %vm24090_vm1 = vmmov %vm24076_vm0 }
 0x299   : > { %vm24094_vm3 = vmmov %vm24090_vm1 }
 0x2fa   : > { %v16872_v19 = vpop.f32.mrb[32].mxu1 }
 0x2fb   : > { %v3857_v42 = vpop.f32.mrb[33].mxu1 }
 0x2fc   : > { %v16873_v38 = vpop.f32.mrb[34].mxu1 }
 0x2fd   : > { %v3860_v8 = vpop.f32.mrb[35].mxu1 }
 0x302   : > { %v16876_v18 = vpop.f32.mrb[36].mxu1 }
 0x303   : > { %v3873_v30 = vpop.f32.mrb[37].mxu1 }
 0x304   : > { %v20995_v54 = vpop.f32.mrb[38].mxu1 }
 0x305   : > { %v20997_v49 = vpop.f32.mrb[39].mxu1 }
 0x30a   : > { %v20999_v37 = vpop.f32.mrb[40].mxu1 }
 0x30b   : > { %v21001_v6 = vpop.f32.mrb[41].mxu1 }
 0x30c   : > { %v21003_v59 = vpop.f32.mrb[42].mxu1 }
 0x30d   : > { %v21005_v26 = vpop.f32.mrb[43].mxu1 }
 0x312   : > { %v21007_v51 = vpop.f32.mrb[44].mxu1 }
 0x313   : > { %v21009_v10 = vpop.f32.mrb[45].mxu1 }
 0x314   : > { %v21011_v11 = vpop.f32.mrb[46].mxu1 }
 0x315   : > { %v21013_v57 = vpop.f32.mrb[47].mxu1 }
 0x31a   : > { %v21015_v32 = vpop.f32.mrb[48].mxu1 }
 0x31b   : > { %v21017_v25 = vpop.f32.mrb[49].mxu1 }
 0x31c   : > { %v21019_v29 = vpop.f32.mrb[50].mxu1 }
 0x31d   : > { %v21021_v60 = vpop.f32.mrb[51].mxu1 }
 0x328   : > { %v17062_v40 = vpop.f32.mrb[32].mxu0 }
 0x329   : > { %v17782_v41 = vadd.f32 %v17062_v40, %v16872_v19  ;;  %v5940_v50 = vpop.f32.mrb[33].mxu0  ;;  %v6280_v19 = vld [vmem:[#allocation3 + $0x10] sm:$0xc] }
 0x32a   : > { %v17783_v28 = vadd.f32 %v5940_v50, %v3857_v42  ;;  %v17063_v53 = vpop.f32.mrb[34].mxu0 }
 0x32b   : > { %v6128_v33 = vadd.f32 %v17782_v41, %v21028_v48  ;;  %v17784_v22 = vadd.f32 %v17063_v53, %v16873_v38  ;;  %v5943_v20 = vpop.f32.mrb[35].mxu0 }
 0x32c   : > { %v6126_v17 = vadd.f32 %v17783_v28, %v21028_v48  ;;  %v17785_v61 = vadd.f32 %v5943_v20, %v3860_v8 }
 0x32d   : > { %v6164_v56 = vmax.f32 %v6128_v33, 0.0  ;;  %v6129_v2 = vadd.f32 %v17784_v22, %v21028_v48 }
 0x32e   : > { %v6162_v31 = vmax.f32 %v6126_v17, 0.0  ;;  %v6127_v47 = vadd.f32 %v17785_v61, %v21028_v48 }
 0x32f   : > { %v16027_v36 = vpack.c.bf16 %v6164_v56, %v6164_v56  ;;  %v6165_v52 = vmax.f32 %v6129_v2, 0.0 }
 0x330   : > { %v16025_v4 = vpack.c.bf16 %v6162_v31, %v6162_v31  ;;  %v6163_v12 = vmax.f32 %v6127_v47, 0.0  ;;  %v17066_v63 = vpop.f32.mrb[36].mxu0 }
 0x331   : > { %v6248_v27 = vshrl.u32 %v16027_v36, 16  ;;  %v6251_v5 = vshll.u32 %v16027_v36, 16  ;;  %v16028_v44 = vpack.c.bf16 %v6165_v52, %v6165_v52  ;;  %v17786_v15 = vadd.f32 %v17066_v63, %v16876_v18  ;;  %v5956_v43 = vpop.f32.mrb[37].mxu0 }
 0x332   : > { %v6205_v46 = vshrl.u32 %v16025_v4, 16  ;;  %v6208_v7 = vshll.u32 %v16025_v4, 16  ;;  %v16026_v45 = vpack.c.bf16 %v6163_v12, %v6163_v12  ;;  %v17787_v3 = vadd.f32 %v5956_v43, %v3873_v30  ;;  %v17067_v23 = vpop.f32.mrb[38].mxu0  ;;  %v6234_v12 = vld [vmem:[#allocation3 + $0x10] sm:$0x3] }
 0x333   : > { %v6250_v24 = vrot.slane %v6248_v27, 6  ;;  %v6253_v14 = vrot.slane %v6251_v5, 7  ;;  %v6257_v21 = vshrl.u32 %v16028_v44, 16  ;;  %v6260_v58 = vshll.u32 %v16028_v44, 16  ;;  %v5959_v13 = vpop.f32.mrb[39].mxu0 }
 0x334   : > { %v6207_v42 = vrot.slane %v6205_v46, 6  ;;  %v6210_v38 = vrot.slane %v6208_v7, 7  ;;  %v6214_v8 = vshrl.u32 %v16026_v45, 16  ;;  %v6217_v18 = vshll.u32 %v16026_v45, 16 }
 0x335   : > { %v24067_v30 = vmov 0  ;;  %v6254_v9 = vor.u32 %v6253_v14, %v6250_v24  ;;  %v6259_v40 = vrot.slane %v6257_v21, 6  ;;  %v6262_v35 = vrot.slane %v6260_v58, 7 }
 0x336   : > { %v24068_v30 = vsel %vm21049_vm11, 4294967295, %v24067_v30  ;;  %v6132_v41 = vadd.f32 %v17786_v15, %v21028_v48  ;;  %v6211_v50 = vor.u32 %v6210_v38, %v6207_v42  ;;  %v6216_v28 = vrot.slane %v6214_v8, 6  ;;  %v6332_v38 = vld [vmem:[#allocation3 + $0x18] sm:$0x8] }
 0x337   : > { %24069 = vst [vmem:[#allocation15_spill] sm:$0xff] %v24068_v30  ;;  %v6219_v53 = vrot.slane %v6217_v18, 7  ;;  %v6130_v33 = vadd.f32 %v17787_v3, %v21028_v48  ;;  %v6255_v22 = vrot.slane %v6254_v9, 4  ;;  %v6281_v20 = vsel %vm21043_vm5, %v6254_v9, %v6280_v19 }
 0x338   : > { %v21057_v17 = vor.u32 %v6262_v35, %v6259_v40  ;;  %v6168_v61 = vmax.f32 %v6132_v41, 0.0  ;;  %6282 = vst [vmem:[#allocation3 + $0x10] sm:$0xc] %v6281_v20  ;;  %v6212_v62 = vrot.slane %v6211_v50, 4  ;;  %v6229_v0 = vsel %vm21049_vm11, %v6211_v50, %v6228_v55  ;;  %v17070_v31 = vpop.f32.mrb[40].mxu0 }
 0x339   : > { %v6220_v56 = vor.u32 %v6219_v53, %v6216_v28  ;;  %v6166_v2 = vmax.f32 %v6130_v33, 0.0  ;;  %6230 = vst [vmem:[#allocation3 + $0x8] sm:$0xe] %v6229_v0  ;;  %v24072_v4 = vmov 0  ;;  %v17788_v27 = vadd.f32 %v17067_v23, %v20995_v54  ;;  %v5972_v5 = vpop.f32.mrb[41].mxu0 }
 0x33a   : > { %v6264_v36 = vsel %vm23842_vm9, %v6255_v22, %v21057_v17  ;;  %v6265_v52 = vrot.slane %v21057_v17, 4  ;;  %v24073_v4 = vsel %vm21067_vm15, 4294967295, %v24072_v4  ;;  %v16032_v63 = vpack.c.bf16 %v6168_v61, %v6168_v61  ;;  %v17071_v7 = vpop.f32.mrb[42].mxu0  ;;  %v6286_v41 = vld [vmem:[#allocation3 + $0x18] sm:$0x7] }
 0x33b   : > { %24074 = vst [vmem:[#allocation18_spill] sm:$0xff] %v24073_v4  ;;  %6283 = vst.msk [vmem:[#allocation3 + $0x14] sm:$0xf] %vm24075_vm2, %v6264_v36  ;;  %v6221_v44 = vsel %vm23842_vm9, %v6212_v62, %v6220_v56  ;;  %v6222_v15 = vrot.slane %v6220_v56, 4  ;;  %v16029_v43 = vpack.c.bf16 %v6166_v2, %v6166_v2  ;;  %v17789_v46 = vadd.f32 %v5959_v13, %v20997_v49  ;;  %v5975_v54 = vpop.f32.mrb[43].mxu0 }
 0x33c   : > { %6231 = vst.msk [vmem:[#allocation3 + $0xc] sm:$0xf] %vm24076_vm0, %v6221_v44  ;;  %v6319_v45 = vshrl.u32 %v16032_v63, 16  ;;  %v6322_v3 = vshll.u32 %v16032_v63, 16  ;;  %v6133_v24 = vadd.f32 %v17788_v27, %v21028_v48  ;;  %v17790_v14 = vadd.f32 %v17070_v31, %v20999_v37  ;;  %vm21133_vm0 = vmand %vm24090_vm1, %vm24089_vm10 }
 0x33d   : > { %v6235_v23 = vsel %vm21067_vm15, %v6222_v15, %v6234_v12  ;;  %v6267_v21 = vshrl.u32 %v16029_v43, 16  ;;  %v6270_v58 = vshll.u32 %v16029_v43, 16  ;;  %v6131_v19 = vadd.f32 %v17789_v46, %v21028_v48  ;;  %v6384_v46 = vld [vmem:[#allocation3 + $0x24] sm:$0xf] }
 0x33e   : > { %v24078_v49 = vmov 0  ;;  %6236 = vst [vmem:[#allocation3 + $0x10] sm:$0x3] %v6235_v23  ;;  %v6321_v13 = vrot.slane %v6319_v45, 6  ;;  %v6324_v42 = vrot.slane %v6322_v3, 7  ;;  %v6169_v8 = vmax.f32 %v6133_v24, 0.0 }
 0x33f   : > { %v24079_v49 = vsel %vm21084_vm13, 4294967295, %v24078_v49  ;;  %v6136_v37 = vadd.f32 %v17790_v14, %v21028_v48  ;;  %v6269_v18 = vrot.slane %v6267_v21, 6  ;;  %v6272_v9 = vrot.slane %v6270_v58, 7 }
 0x340   : > { %24080 = vst [vmem:[#allocation19_spill] sm:$0xff] %v24079_v49  ;;  %v6167_v55 = vmax.f32 %v6131_v19, 0.0  ;;  %v17791_v40 = vadd.f32 %v5972_v5, %v21001_v6  ;;  %v21090_v35 = vor.u32 %v6324_v42, %v6321_v13  ;;  %v16034_v50 = vpack.c.bf16 %v6169_v8, %v6169_v8  ;;  %v17074_v61 = vpop.f32.mrb[44].mxu0 }
 0x341   : > { %v6172_v28 = vmax.f32 %v6136_v37, 0.0  ;;  %v17792_v53 = vadd.f32 %v17071_v7, %v21003_v59  ;;  %v24082_v33 = vmov 0  ;;  %v6273_v22 = vor.u32 %v6272_v9, %v6269_v18  ;;  %v5988_v2 = vpop.f32.mrb[45].mxu0 }
 0x342   : > { %v24083_v33 = vsel %vm21095_vm7, 4294967295, %v24082_v33  ;;  %v6333_v20 = vsel %vm21084_vm13, %v6272_v9, %v6332_v38  ;;  %v16031_v17 = vpack.c.bf16 %v6167_v55, %v6167_v55  ;;  %v6134_v6 = vadd.f32 %v17791_v40, %v21028_v48  ;;  %v21105_v27 = vpop.f32.mrb[52].mxu1  ;;  %v21107_v5 = vpop.f32.mrb[46].mxu0 }
 0x343   : > { %24084 = vst [vmem:[#allocation6_spill] sm:$0xff] %v24083_v33  ;;  %vm6388_vm2 = vcmask 57344   ;;  %v6359_v62 = vrot.slane %v21090_v35, 4  ;;  %6334 = vst [vmem:[#allocation3 + $0x18] sm:$0x8] %v6333_v20  ;;  %v6361_v0 = vshrl.u32 %v16034_v50, 16  ;;  %v16037_v56 = vpack.c.bf16 %v6172_v28, %v6172_v28 }
 0x344   : > { %v6364_v59 = vshll.u32 %v16034_v50, 16  ;;  %v6274_v31 = vsel %vm23842_vm9, %v6265_v52, %v6273_v22  ;;  %v6307_v36 = vrot.slane %v6273_v22, 4  ;;  %v6309_v12 = vshrl.u32 %v16031_v17, 16  ;;  %v21111_v45 = vpop.f32.mrb[53].mxu1  ;;  %v21113_v3 = vpop.f32.mrb[47].mxu0 }
 0x345   : > { %v6312_v63 = vshll.u32 %v16031_v17, 16  ;;  %v6287_v44 = vsel %vm21095_vm7, %v6274_v31, %v6286_v41  ;;  %v6363_v15 = vrot.slane %v6361_v0, 6  ;;  %v6409_v7 = vshrl.u32 %v16037_v56, 16  ;;  %v21115_v21 = vpop.f32.mrb[54].mxu1  ;;  %v6338_v22 = vld [vmem:[#allocation3 + $0x20] sm:$0xf] }
 0x346   : > { %v6366_v43 = vrot.slane %v6364_v59, 7  ;;  %6288 = vst [vmem:[#allocation3 + $0x18] sm:$0x7] %v6287_v44  ;;  %v6311_v52 = vrot.slane %v6309_v12, 6  ;;  %v6412_v14 = vshll.u32 %v16037_v56, 16  ;;  %v6170_v23 = vmax.f32 %v6134_v6, 0.0 }
 0x347   : > { %v6314_v24 = vrot.slane %v6312_v63, 7  ;;  %v24086_v58 = vmov 0  ;;  %v6411_v13 = vrot.slane %v6409_v7, 6  ;;  %v6137_v42 = vadd.f32 %v17792_v53, %v21028_v48  ;;  %v21125_v8 = vpop.f32.mrb[55].mxu1  ;;  %v6425_v6 = vld [vmem:[#allocation3 + $0x34] sm:$0x3] }
 0x348   : > { %v24087_v58 = vsel %vm21119_vm8, 4294967295, %v24086_v58  ;;  %v6367_v19 = vor.u32 %v6366_v43, %v6363_v15  ;;  %v17793_v38 = vadd.f32 %v5975_v54, %v21005_v26  ;;  %v6414_v18 = vrot.slane %v6412_v14, 7  ;;  %v21143_v17 = vpop.f32.mrb[48].mxu0  ;;  %v6390_v12 = vld [vmem:[#allocation3 + $0x2c] sm:$0x1] }
 0x349   : > { %24088 = vst [vmem:[#allocation20_spill] sm:$0xff] %v24087_v58  ;;  %v6315_v37 = vor.u32 %v6314_v24, %v6311_v52  ;;  %v16035_v9 = vpack.c.bf16 %v6170_v23, %v6170_v23  ;;  %v17794_v55 = vadd.f32 %v17074_v61, %v21007_v51  ;;  %v6173_v50 = vmax.f32 %v6137_v42, 0.0  ;;  %v21146_v56 = vpop.f32.mrb[49].mxu0 }
 0x34a   : > { %v6368_v40 = vsel %vm23842_vm9, %v6359_v62, %v6367_v19  ;;  %v6369_v41 = vrot.slane %v6367_v19, 4  ;;  %v6135_v28 = vadd.f32 %v17793_v38, %v21028_v48  ;;  %v24091_v53 = vmov 0  ;;  %v21154_v15 = vpop.f32.mrb[56].mxu1  ;;  %v21156_v43 = vpop.f32.mrb[50].mxu0 }
 0x34b   : > { %v24092_v53 = vsel %vm21133_vm0, 4294967295, %v24091_v53  ;;  %v6385_v26 = vsel %vm21119_vm8, %v6368_v40, %v6384_v46  ;;  %v6316_v54 = vsel %vm23842_vm9, %v6307_v36, %v6315_v37  ;;  %v6317_v51 = vrot.slane %v6315_v37, 4  ;;  %v21160_v14 = vpop.f32.mrb[57].mxu1 }
 0x34c   : > { %24093 = vst [vmem:[#allocation21_spill] sm:$0xff] %v24092_v53  ;;  %v21141_v20 = vor.u32 %v6414_v18, %v6411_v13  ;;  %6386 = vst [vmem:[#allocation3 + $0x24] sm:$0xf] %v6385_v26  ;;  %v6371_v61 = vshrl.u32 %v16035_v9, 16  ;;  %v6374_v62 = vshll.u32 %v16035_v9, 16  ;;  %v16038_v0 = vpack.c.bf16 %v6173_v50, %v6173_v50  ;;  %v21172_v42 = vpop.f32.mrb[58].mxu1 }
 0x34d   : > { %6335 = vst.msk [vmem:[#allocation3 + $0x1c] sm:$0xf] %vm24094_vm3, %v6316_v54  ;;  %v6171_v59 = vmax.f32 %v6135_v28, 0.0  ;;  %v6326_v31 = vsel %vm23842_vm9, %v6317_v51, %v21090_v35  ;;  %v6140_v63 = vadd.f32 %v17794_v55, %v21028_v48  ;;  %v17795_v44 = vadd.f32 %v5988_v2, %v21009_v10  ;;  %v21162_v35 = vpop.f32.mrb[51].mxu0  ;;  %v21175_v55 = vpop.f32.mrb[59].mxu1 }
 0x34e   : > { %v6417_v36 = vrot.slane %v21141_v20, 4  ;;  %v6339_v46 = vsel %vm21133_vm0, %v6326_v31, %v6338_v22  ;;  %v6373_v7 = vrot.slane %v6371_v61, 6  ;;  %v6376_v52 = vrot.slane %v6374_v62, 7  ;;  %v6469_v22 = vld [vmem:[#allocation3 + $0x34] sm:$0xc] }
 0x34f   : > { %v6439_v24 = vshrl.u32 %v16038_v0, 16  ;;  %vm24095_vm3 = vsmask.f32 256  ;;  %v24096_v23 = vmov 0  ;;  %6340 = vst [vmem:[#allocation3 + $0x20] sm:$0xf] %v6339_v46  ;;  %v16036_v19 = vpack.c.bf16 %v6171_v59, %v6171_v59 }
 0x350   : > { %vm21166_vm10 = vmand %vm6388_vm2, %vm24095_vm3  ;;  %v6426_v10 = vsel %vm21067_vm15, %v6417_v36, %v6425_v6  ;;  %v6442_v2 = vshll.u32 %v16038_v0, 16  ;;  %v6176_v13 = vmax.f32 %v6140_v63, 0.0  ;;  %v6377_v38 = vor.u32 %v6376_v52, %v6373_v7  ;;  %v21184_v36 = vpop.f32.mrb[52].mxu0  ;;  %v6421_v63 = vld [vmem:[#allocation3 + $0x2c] sm:$0xe] }
 0x351   : > { %v24097_v23 = vsel %vm21166_vm10, 4294967295, %v24096_v23  ;;  %6427 = vst [vmem:[#allocation3 + $0x34] sm:$0x3] %v6426_v10  ;;  %v6379_v37 = vrot.slane %v6373_v7, 4  ;;  %v6441_v18 = vrot.slane %v6439_v24, 6  ;;  %v6138_v9 = vadd.f32 %v17795_v44, %v21028_v48  ;;  %vm24099_vm2 = vmmov %vm24090_vm1  ;;  %v21189_v7 = vpop.f32.mrb[53].mxu0 }
 0x352   : > { %24098 = vst [vmem:[#allocation23_spill] sm:$0xff] %v24097_v23  ;;  %v6444_v40 = vrot.slane %v6442_v2, 7  ;;  %v6400_v50 = vshrl.u32 %v16036_v19, 16  ;;  %v6403_v28 = vshll.u32 %v16036_v19, 16  ;;  %v16042_v26 = vpack.c.bf16 %v6176_v13, %v6176_v13  ;;  %v21193_v10 = vpop.f32.mrb[60].mxu1  ;;  %v21195_v2 = vpop.f32.mrb[54].mxu0  ;;  %vm24100_vm3 = vmmov %vm24090_vm1 }
 0x353   : > { %v6378_v54 = vsel %vm23842_vm9, %v6369_v41, %v6377_v38  ;;  %v6391_v51 = vsel %vm21166_vm10, %v6379_v37, %v6390_v12  ;;  %v6174_v6 = vmax.f32 %v6138_v9, 0.0  ;;  %v17796_v61 = vadd.f32 %v21107_v5, %v21011_v11  ;;  %v7660_v53 = vld [vmem:[#allocation3] sm:$0xe] }
 0x354   : > { %6387 = vst.msk [vmem:[#allocation3 + $0x28] sm:$0xf] %vm24099_vm2, %v6378_v54  ;;  %6392 = vst [vmem:[#allocation3 + $0x2c] sm:$0x1] %v6391_v51  ;;  %v6445_v62 = vor.u32 %v6444_v40, %v6441_v18  ;;  %v6402_v0 = vrot.slane %v6400_v50, 6  ;;  %v6405_v59 = vrot.slane %v6403_v28, 7  ;;  %v17797_v12 = vadd.f32 %v21113_v3, %v21013_v57 }
 0x355   : > { %v6496_v31 = vshrl.u32 %v16042_v26, 16  ;;  %v6499_v44 = vshll.u32 %v16042_v26, 16  ;;  %v16039_v41 = vpack.c.bf16 %v6174_v6, %v6174_v6  ;;  %v6141_v46 = vadd.f32 %v17796_v61, %v21028_v48  ;;  %v21197_v18 = vpop.f32.mrb[61].mxu1  ;;  %v21199_v57 = vpop.f32.mrb[55].mxu0 }
 0x356   : > { %v6446_v11 = vrot.slane %v6445_v62, 4  ;;  %v6470_v5 = vsel %vm21043_vm5, %v6445_v62, %v6469_v22  ;;  %v6406_v52 = vor.u32 %v6405_v59, %v6402_v0  ;;  %v6139_v40 = vadd.f32 %v17797_v12, %v21028_v48  ;;  %v21206_v28 = vpop.f32.mrb[62].mxu1  ;;  %v21698_v49 = vld [vmem:[#allocation3 + $0x20] sm:$0xff]  }
 0x357   : > { %v6498_v24 = vrot.slane %v6496_v31, 6  ;;  %6471 = vst [vmem:[#allocation3 + $0x34] sm:$0xc] %v6470_v5  ;;  %v6501_v19 = vrot.slane %v6499_v44, 7  ;;  %v6448_v13 = vshrl.u32 %v16039_v41, 16  ;;  %v6451_v38 = vshll.u32 %v16039_v41, 16 }
 0x358   : > { %v6177_v37 = vmax.f32 %v6141_v46, 0.0  ;;  %v6407_v3 = vrot.slane %v6406_v52, 4  ;;  %v6422_v9 = vsel %vm21049_vm11, %v6406_v52, %v6421_v63  ;;  %v17798_v50 = vadd.f32 %v21143_v17, %v21015_v32  ;;  %v21210_v6 = vpop.f32.mrb[63].mxu1  ;;  %v21220_v44 = vld [vmem:[#allocation3 + $0x8] sm:$0xff]   ;;  %v21225_v5 = vpop.f32.mrb[56].mxu0 }
 0x359   : > { %6423 = vst [vmem:[#allocation3 + $0x2c] sm:$0xe] %v6422_v9  ;;  %v21208_v26 = vor.u32 %v6501_v19, %v6498_v24  ;;  %v6450_v54 = vrot.slane %v6448_v13, 6  ;;  %v6453_v51 = vrot.slane %v6451_v38, 7  ;;  %v6175_v62 = vmax.f32 %v6139_v40, 0.0  ;;  %v21229_v38 = vpop.f32.mrb[57].mxu0 }
 0x35a   : > { %v16043_v22 = vpack.c.bf16 %v6177_v37, %v6177_v37  ;;  %v6416_v61 = vsel %vm23842_vm9, %v6407_v3, %v21141_v20  ;;  %v6144_v0 = vadd.f32 %v17798_v50, %v21028_v48  ;;  %v17799_v32 = vadd.f32 %v21146_v56, %v21017_v25  ;;  %v6521_v19 = vld [vmem:[#allocation3 + $0x44] sm:$0xf]  ;;  %v6517_v13 = vld [vmem:[#allocation3 + $0x3c] sm:$0x8]  ;;  %v21232_v50 = vpop.f32.mrb[64].mxu1 }
 0x35b   : > { %6424 = vst.msk [vmem:[#allocation3 + $0x30] sm:$0xf] %vm24090_vm1, %v6416_v61  ;;  %v6504_v17 = vrot.slane %v21208_v26, 4  ;;  %v6454_v59 = vor.u32 %v6453_v51, %v6450_v54  ;;  %v16040_v41 = vpack.c.bf16 %v6175_v62, %v6175_v62  ;;  %v17800_v20 = vadd.f32 %v21156_v43, %v21019_v29  ;;  %v21234_v29 = vpop.f32.mrb[58].mxu0 }
 0x35c   : > { %v6506_v31 = vshrl.u32 %v16043_v22, 16  ;;  %v6509_v63 = vshll.u32 %v16043_v22, 16  ;;  %v6180_v46 = vmax.f32 %v6144_v0, 0.0  ;;  %v6142_v12 = vadd.f32 %v17799_v32, %v21028_v48  ;;  %v21239_v22 = vpop.f32.mrb[65].mxu1  ;;  %v21241_v61 = vpop.f32.mrb[59].mxu0 }
 0x35d   : > { %v6455_v25 = vsel %vm23842_vm9, %v6446_v11, %v6454_v59  ;;  %v6456_v56 = vrot.slane %v6454_v59, 4  ;;  %v6458_v37 = vshrl.u32 %v16040_v41, 16  ;;  %v6461_v3 = vshll.u32 %v16040_v41, 16  ;;  %v6473_v32 = vld [vmem:[#allocation3 + $0x3c] sm:$0x7] }
 0x35e   : > { %v6508_v52 = vrot.slane %v6506_v31, 6  ;;  %v6511_v24 = vrot.slane %v6509_v63, 7  ;;  %6472 = vst.msk [vmem:[#allocation3 + $0x38] sm:$0xf] %vm24100_vm3, %v6455_v25  ;;  %v16047_v9 = vpack.c.bf16 %v6180_v46, %v6180_v46  ;;  %v6178_v40 = vmax.f32 %v6142_v12, 0.0 }
 0x35f   : > { %v6145_v11 = vadd.f32 %v17800_v20, %v21028_v48  ;;  %v7071_v54 = vshll.u32 %v21220_v44, 16  ;;  %v7075_v51 = vshrl.u32 %v21220_v44, 16  ;;  %v6460_v62 = vrot.slane %v6458_v37, 6  ;;  %v21245_v20 = vpop.f32.mrb[66].mxu1  ;;  %v6601_v37 = vld [vmem:[#allocation3 + $0x50] sm:$0xe] }
 0x360   : > { %v6512_v43 = vor.u32 %v6511_v24, %v6508_v52  ;;  %v6463_v0 = vrot.slane %v6461_v3, 7  ;;  %v6580_v59 = vshrl.u32 %v16047_v9, 16  ;;  %v6583_v31 = vshll.u32 %v16047_v9, 16  ;;  %24101 = vst [vmem:[#allocation24_spill] sm:$0xff] %v21245_v20  ;;  %v21251_v3 = vpop.f32.mrb[67].mxu1 }
 0x361   : > { %v16045_v46 = vpack.c.bf16 %v6178_v40, %v6178_v40  ;;  %v6181_v12 = vmax.f32 %v6145_v11, 0.0  ;;  %v7073_v20 = vrot.slane %v7071_v54, 1  ;;  %vm24102_vm2 = vsmask.f32 7424 }
 0x362   : > { %v6513_v63 = vsel %vm23842_vm9, %v6504_v17, %v6512_v43  ;;  %v6542_v41 = vrot.slane %v6512_v43, 4  ;;  %v6464_v25 = vor.u32 %v6463_v0, %v6460_v62  ;;  %v6518_v52 = vsel %vm21084_vm13, %v6463_v0, %v6517_v13  ;;  %v21257_v62 = vld [vmem:[#allocation3 + $0x10] sm:$0xff]   ;;  %v21259_v13 = vpop.f32.mrb[60].mxu0 }
 0x363   : > { %v6522_v44 = vsel %vm21133_vm0, %v6513_v63, %v6521_v19  ;;  %v6582_v24 = vrot.slane %v6580_v59, 6  ;;  %6519 = vst [vmem:[#allocation3 + $0x3c] sm:$0x8] %v6518_v52  ;;  %v6585_v9 = vrot.slane %v6583_v31, 7  ;;  %v6544_v17 = vshrl.u32 %v16045_v46, 16  ;;  %v21704_v4 = vld [vmem:[#allocation3 + $0x30] sm:$0xff]  }
 0x364   : > { %6523 = vst [vmem:[#allocation3 + $0x44] sm:$0xf] %v6522_v44  ;;  %v6547_v43 = vshll.u32 %v16045_v46, 16  ;;  %v16048_v40 = vpack.c.bf16 %v6181_v12, %v6181_v12  ;;  %v6465_v11 = vsel %vm23842_vm9, %v6456_v56, %v6464_v25  ;;  %v6494_v16 = vrot.slane %v6464_v25, 4  ;;  %v6566_v46 = vld [vmem:[#allocation3 + $0x48] sm:$0xf] }
 0x365   : > { %v17801_v19 = vadd.f32 %v21162_v35, %v21021_v60  ;;  %v6474_v0 = vsel %vm21095_vm7, %v6465_v11, %v6473_v32  ;;  %v6586_v59 = vor.u32 %v6585_v9, %v6582_v24  ;;  %v6546_v31 = vrot.slane %v6544_v17, 6  ;;  %v21263_v12 = vpop.f32.mrb[61].mxu0 }
 0x366   : > { %v6549_v63 = vrot.slane %v6547_v43, 7  ;;  %6475 = vst [vmem:[#allocation3 + $0x3c] sm:$0x7] %v6474_v0  ;;  %v6503_v56 = vsel %vm23842_vm9, %v6494_v16, %v21208_v26  ;;  %v6589_v54 = vshrl.u32 %v16048_v40, 16  ;;  %v6592_v60 = vshll.u32 %v16048_v40, 16  ;;  %v21270_v44 = vpop.f32.mrb[62].mxu0 }
 0x367   : > { %v7074_v35 = vsel %vm24102_vm2, %v21036_v39, %v7073_v20  ;;  %6520 = vst.msk [vmem:[#allocation3 + $0x40] sm:$0xf] %vm24090_vm1, %v6503_v56  ;;  %v6587_v32 = vrot.slane %v6586_v59, 4  ;;  %v6602_v25 = vsel %vm21049_vm11, %v6586_v59, %v6601_v37  ;;  %v7077_v24 = vor.u32 %v7075_v51, %v7073_v20  ;;  %v21278_v9 = vpop.f32.mrb[63].mxu0  ;;  %v21290_v40 = vld [vmem:[#allocation3 + $0x18] sm:$0xff]  }
 0x368   : > { %v21275_v52 = vor.u32 %v6549_v63, %v6546_v31  ;;  %vm24103_vm3 = vcmask 64512   ;;  %6603 = vst [vmem:[#allocation3 + $0x50] sm:$0xe] %v6602_v25  ;;  %v6591_v16 = vrot.slane %v6589_v54, 6  ;;  %v6594_v26 = vrot.slane %v6592_v60, 7  ;;  %v21302_v54 = vpop.f32.mrb[64].mxu0 }
 0x369   : > { %17098 = vmatprep.mubr.msk.bf16.mxu1 %vm24103_vm3, %v7074_v35  ;;  %v6143_v39 = vadd.f32 %v17801_v19, %v21028_v48  ;;  %v7079_v17 = vshll.u32 %v21257_v62, 16  ;;  %v17802_v51 = vadd.f32 %v21184_v36, %v21105_v27  ;;  %v17803_v20 = vadd.f32 %v21189_v7, %v21111_v45  ;;  %v6605_v31 = vld [vmem:[#allocation3 + $0x58] sm:$0x3]  ;;  %v21307_v60 = vld [vmem:[%s23567_s5 + $0x8] sm:$0xf]  ;;  %v21312_v25 = vpop.f32.mrb[65].mxu0 }
 0x36a   : > { %v6551_v43 = vsel %vm23842_vm9, %v6542_v41, %v21275_v52  ;;  %v6552_v37 = vrot.slane %v21275_v52, 4  ;;  %v6595_v19 = vor.u32 %v6594_v26, %v6591_v16  ;;  %v17804_v27 = vadd.f32 %v21195_v2, %v21115_v21 }
 0x36b   : > { %v6567_v11 = vsel %vm21119_vm8, %v6551_v43, %v6566_v46  ;;  %v6179_v0 = vmax.f32 %v6143_v39, 0.0  ;;  %v7081_v59 = vrot.slane %v7079_v17, 1  ;;  %v6148_v41 = vadd.f32 %v17802_v51, %v21028_v48  ;;  %v6570_v17 = vld [vmem:[#allocation3 + $0x50] sm:$0x1] }
 0x36c   : > { %6568 = vst [vmem:[#allocation3 + $0x48] sm:$0xf] %v6567_v11  ;;  %v6146_v63 = vadd.f32 %v17803_v20, %v21028_v48  ;;  %v7083_v36 = vshrl.u32 %v21257_v62, 16  ;;  %v6596_v45 = vsel %vm23842_vm9, %v6587_v32, %v6595_v19  ;;  %v6597_v7 = vrot.slane %v6595_v19, 4  ;;  %v21320_v19 = vpop.f32.mrb[66].mxu0 }
 0x36d   : > { %v16046_v56 = vpack.c.bf16 %v6179_v0, %v6179_v0  ;;  %v7082_v46 = vsel %vm24102_vm2, %v7077_v24, %v7081_v59  ;;  %6604 = vst.msk [vmem:[#allocation3 + $0x54] sm:$0xf] %vm24090_vm1, %v6596_v45  ;;  %v6184_v21 = vmax.f32 %v6148_v41, 0.0  ;;  %v6149_v35 = vadd.f32 %v17804_v27, %v21028_v48 }
 0x36e   : > { %17099 = vmatmul.mubr.msk.bf16.vlgmr.msra.gmra.mrb[68].mxu1 %vm24103_vm3, %v7082_v46  ;;  %v6182_v2 = vmax.f32 %v6146_v63, 0.0  ;;  %v7085_v32 = vor.u32 %v7083_v36, %v7081_v59  ;;  %v6606_v24 = vsel %vm21067_vm15, %v6597_v7, %v6605_v31  ;;  %v7087_v39 = vshll.u32 %v21290_v40, 16  ;;  %v6697_v31 = vld [vmem:[#allocation3 + $0x60] sm:$0x8]  ;;  %v21325_v63 = vpop.f32.mrb[67].mxu0 }
 0x36f   : > { %v6554_v16 = vshrl.u32 %v16046_v56, 16  ;;  %v6557_v26 = vshll.u32 %v16046_v56, 16  ;;  %17135 = vmatpush3.bf16.msra.mxu1 %v21039_v34  ;;  %6607 = vst [vmem:[#allocation3 + $0x58] sm:$0x3] %v6606_v24  ;;  %v16051_v43 = vpack.c.bf16 %v6184_v21, %v6184_v21  ;;  %v6185_v20 = vmax.f32 %v6149_v35, 0.0 }
 0x370   : > { %v16049_v51 = vpack.c.bf16 %v6182_v2, %v6182_v2  ;;  %v17805_v11 = vadd.f32 %v21199_v57, %v21125_v8  ;;  %vm24104_vm2 = vcmask 1043456   ;;  %v7089_v41 = vrot.slane %v7087_v39, 1  ;;  %v6649_v8 = vld [vmem:[#allocation3 + $0x58] sm:$0xc]  ;;  %v21328_v2 = vld [vmem:[#allocation3 + $0x20] sm:$0xff]   ;;  %v21331_v39 = vld [vmem:[#allocation3 + $0x28] sm:$0xff]  }
 0x371   : > { %18658 = vmatprep.subr.msk.bf16.mxu1 %vm24104_vm2, %v21307_v60  ;;  %v6556_v0 = vrot.slane %v6554_v16, 6  ;;  %v6559_v59 = vrot.slane %v6557_v26, 7  ;;  %v7091_v34 = vshrl.u32 %v21290_v40, 16  ;;  %v6638_v27 = vshrl.u32 %v16051_v43, 16 }
 0x372   : > { %v6641_v36 = vshll.u32 %v16051_v43, 16  ;;  %v6619_v45 = vshrl.u32 %v16049_v51, 16  ;;  %v6622_v7 = vshll.u32 %v16049_v51, 16  ;;  %v16053_v57 = vpack.c.bf16 %v6185_v20, %v6185_v20 }
 0x373   : > { %v6560_v56 = vor.u32 %v6559_v59, %v6556_v0  ;;  %v6562_v46 = vrot.slane %v6556_v0, 4  ;;  %vm24105_vm1 = vsmask.f32 7424  ;;  %v6640_v35 = vrot.slane %v6638_v27, 6 }
 0x374   : > { %v7090_v21 = vsel %vm24105_vm1, %v7085_v32, %v7089_v41  ;;  %v6643_v24 = vrot.slane %v6641_v36, 7  ;;  %v6621_v16 = vrot.slane %v6619_v45, 6  ;;  %v6624_v26 = vrot.slane %v6622_v7, 7 }
 0x375   : > { %17102 = vmatprep.mubr.msk.bf16.mxu1 %vm24103_vm3, %v7090_v21  ;;  %v6561_v43 = vsel %vm23842_vm9, %v6552_v37, %v6560_v56  ;;  %v6571_v51 = vsel %vm21166_vm10, %v6562_v46, %v6570_v17  ;;  %v6676_v20 = vshrl.u32 %v16053_v57, 16  ;;  %v6679_v32 = vshll.u32 %v16053_v57, 16 }
 0x376   : > { %vm24106_vm2 = vcmask 60416   ;;  %6572 = vst [vmem:[#allocation3 + $0x50] sm:$0x1] %v6571_v51  ;;  %v21340_v0 = vor.u32 %v6643_v24, %v6640_v35  ;;  %v6698_v59 = vsel %vm21084_vm13, %v6643_v24, %v6697_v31  ;;  %v6625_v27 = vor.u32 %v6624_v26, %v6621_v16 }
 0x377   : > { %6569 = vst.msk [vmem:[#allocation3 + $0x4c] sm:$0xf] %vm24106_vm2, %v6561_v43  ;;  %v6147_v36 = vadd.f32 %v17805_v11, %v21028_v48  ;;  %6699 = vst [vmem:[#allocation3 + $0x60] sm:$0x8] %v6698_v59  ;;  %v6678_v52 = vrot.slane %v6676_v20, 6  ;;  %v6681_v45 = vrot.slane %v6679_v32, 7  ;;  %v7093_v37 = vor.u32 %v7091_v34, %v7089_v41 }
 0x378   : > { %v7095_v7 = vshll.u32 %v21328_v2, 16  ;;  %v6674_v17 = vrot.slane %v21340_v0, 4  ;;  %v6626_v56 = vrot.slane %v6625_v27, 4  ;;  %v6650_v46 = vsel %vm21043_vm5, %v6625_v27, %v6649_v8  ;;  %vm24107_vm3 = vmmov %vm24106_vm2 }
 0x379   : > { %v6183_v57 = vmax.f32 %v6147_v36, 0.0  ;;  %6651 = vst [vmem:[#allocation3 + $0x58] sm:$0xc] %v6650_v46  ;;  %v21349_v21 = vor.u32 %v6681_v45, %v6678_v52  ;;  %v17806_v11 = vadd.f32 %v21225_v5, %v21154_v15  ;;  %v17807_v35 = vadd.f32 %v21229_v38, %v21160_v14  ;;  %v21365_v5 = vld [vmem:[#allocation3 + $0x30] sm:$0xff]  }
 0x37a   : > { %v7097_v31 = vrot.slane %v7095_v7, 1  ;;  %v17808_v34 = vadd.f32 %v21234_v29, %v21172_v42  ;;  %v7099_v24 = vshrl.u32 %v21328_v2, 16  ;;  %v7103_v16 = vshll.u32 %v21331_v39, 16 }
 0x37b   : > { %v16050_v41 = vpack.c.bf16 %v6183_v57, %v6183_v57  ;;  %v6683_v8 = vsel %vm23842_vm9, %v6674_v17, %v21349_v21  ;;  %v6684_v26 = vrot.slane %v21349_v21, 4  ;;  %v6152_v15 = vadd.f32 %v17806_v11, %v21028_v48  ;;  %v6653_v11 = vld [vmem:[#allocation3 + $0x60] sm:$0x7] }
 0x37c   : > { %v7098_v43 = vsel %vm24105_vm1, %v7093_v37, %v7097_v31  ;;  %6700 = vst.msk [vmem:[#allocation3 + $0x64] sm:$0xf] %vm24107_vm3, %v6683_v8  ;;  %vm24108_vm2 = vcmask 64512   ;;  %v6150_v38 = vadd.f32 %v17807_v35, %v21028_v48  ;;  %v6153_v29 = vadd.f32 %v17808_v34, %v21028_v48 }
 0x37d   : > { %v6628_v14 = vshrl.u32 %v16050_v41, 16  ;;  %v6631_v42 = vshll.u32 %v16050_v41, 16  ;;  %17103 = vmatmul.mubr.msk.bf16.gmra.mrb[72].mxu1 %vm24108_vm2, %v7098_v43  ;;  %v6188_v51 = vmax.f32 %v6152_v15, 0.0  ;;  %v7101_v20 = vor.u32 %v7099_v24, %v7097_v31  ;;  %vm24109_vm3 = vmmov %vm24108_vm2  ;;  %v6750_v43 = vld [vmem:[#allocation3 + $0x74] sm:$0x1] }
 0x37e   : > { %v7105_v32 = vrot.slane %v7103_v16, 1  ;;  %v17809_v59 = vadd.f32 %v21241_v61, %v21175_v55  ;;  %v6186_v52 = vmax.f32 %v6150_v38, 0.0  ;;  %v6189_v45 = vmax.f32 %v6153_v29, 0.0 }
 0x37f   : > { %v6630_v27 = vrot.slane %v6628_v14, 6  ;;  %v6633_v36 = vrot.slane %v6631_v42, 7  ;;  %v16057_v37 = vpack.c.bf16 %v6188_v51, %v6188_v51  ;;  %v7107_v46 = vshrl.u32 %v21331_v39, 16 }
 0x380   : > { %v7106_v7 = vsel %vm24105_vm1, %v7101_v20, %v7105_v32  ;;  %v6151_v17 = vadd.f32 %v17809_v59, %v21028_v48  ;;  %v16054_v35 = vpack.c.bf16 %v6186_v52, %v6186_v52  ;;  %v16058_v41 = vpack.c.bf16 %v6189_v45, %v6189_v45 }
 0x381   : > { %v6634_v57 = vor.u32 %v6633_v36, %v6630_v27  ;;  %17106 = vmatprep.mubr.msk.bf16.mxu1 %vm24109_vm3, %v7106_v7  ;;  %v7111_v31 = vshll.u32 %v21365_v5, 16  ;;  %v6734_v55 = vshrl.u32 %v16057_v37, 16  ;;  %v6737_v61 = vshll.u32 %v16057_v37, 16  ;;  %v6781_v37 = vld [vmem:[#allocation3 + $0x74] sm:$0xe] }
 0x382   : > { %v6187_v34 = vmax.f32 %v6151_v17, 0.0  ;;  %v7109_v24 = vor.u32 %v7107_v46, %v7105_v32  ;;  %v6686_v48 = vshrl.u32 %v16054_v35, 16  ;;  %v6689_v15 = vshll.u32 %v16054_v35, 16  ;;  %v6701_v32 = vld [vmem:[#allocation3 + $0x68] sm:$0xf] }
 0x383   : > { %v6635_v16 = vsel %vm23842_vm9, %v6626_v56, %v6634_v57  ;;  %v6636_v8 = vrot.slane %v6634_v57, 4  ;;  %vm24110_vm2 = vcmask 60416   ;;  %v6736_v14 = vrot.slane %v6734_v55, 6 }
 0x384   : > { %6652 = vst.msk [vmem:[#allocation3 + $0x5c] sm:$0xf] %vm24110_vm2, %v6635_v16  ;;  %v6739_v42 = vrot.slane %v6737_v61, 7  ;;  %v6760_v38 = vshrl.u32 %v16058_v41, 16  ;;  %v6763_v29 = vshll.u32 %v16058_v41, 16  ;;  %v6688_v20 = vrot.slane %v6686_v48, 6 }
 0x385   : > { %v6645_v51 = vsel %vm23842_vm9, %v6636_v8, %v21340_v0  ;;  %v6691_v59 = vrot.slane %v6689_v15, 7  ;;  %v16056_v27 = vpack.c.bf16 %v6187_v34, %v6187_v34  ;;  %v6742_v52 = vrot.slane %v6736_v14, 4  ;;  %v21398_v8 = vld [vmem:[#allocation3 + $0x38] sm:$0xff]   ;;  %v6746_v15 = vld [vmem:[#allocation3 + $0x6c] sm:$0xf] }
 0x386   : > { %v6654_v56 = vsel %vm21095_vm7, %v6645_v51, %v6653_v11  ;;  %v6740_v36 = vor.u32 %v6739_v42, %v6736_v14  ;;  %v6762_v45 = vrot.slane %v6760_v38, 6  ;;  %v6765_v17 = vrot.slane %v6763_v29, 7 }
 0x387   : > { %6655 = vst [vmem:[#allocation3 + $0x60] sm:$0x7] %v6654_v56  ;;  %v6692_v7 = vor.u32 %v6691_v59, %v6688_v20  ;;  %v6724_v46 = vshrl.u32 %v16056_v27, 16  ;;  %v6727_v57 = vshll.u32 %v16056_v27, 16  ;;  %v6751_v35 = vsel %vm21166_vm10, %v6742_v52, %v6750_v43  ;;  %v21426_v56 = vld [vmem:[#allocation3 + $0x40] sm:$0xff]  }
 0x388   : > { %v7113_v0 = vrot.slane %v7111_v31, 1  ;;  %v17810_v41 = vadd.f32 %v21259_v13, %v21193_v10  ;;  %v17811_v55 = vadd.f32 %v21263_v12, %v21197_v18  ;;  %6752 = vst [vmem:[#allocation3 + $0x74] sm:$0x1] %v6751_v35  ;;  %v21396_v34 = vor.u32 %v6765_v17, %v6762_v45  ;;  %v21406_v18 = vld [vmem:[%s23566_s4] ss:$0 sm:$0xff] }
 0x389   : > { %v6693_v11 = vsel %vm23842_vm9, %v6684_v26, %v6692_v7  ;;  %v6722_v61 = vrot.slane %v6692_v7, 4  ;;  %v6726_v16 = vrot.slane %v6724_v46, 6  ;;  %v6729_v43 = vrot.slane %v6727_v57, 7 }
 0x38a   : > { %v6702_v31 = vsel %vm21133_vm0, %v6693_v11, %v6701_v32  ;;  %v7114_v10 = vsel %vm24105_vm1, %v7109_v24, %v7113_v0  ;;  %v6156_v13 = vadd.f32 %v21406_v18, %v17810_v41  ;;  %v6767_v12 = vrot.slane %v21396_v34, 4 }
 0x38b   : > { %6703 = vst [vmem:[#allocation3 + $0x68] sm:$0xf] %v6702_v31  ;;  %v6782_v21 = vsel %vm21049_vm11, %v21396_v34, %v6781_v37  ;;  %17107 = vmatmul.mubr.msk.bf16.gmra.mrb[76].mxu1 %vm24109_vm3, %v7114_v10  ;;  %v6154_v26 = vadd.f32 %v21406_v18, %v17811_v55  ;;  %v17812_v24 = vadd.f32 %v21270_v44, %v21206_v28  ;;  %v7115_v38 = vshrl.u32 %v21365_v5, 16  ;;  %v6877_v34 = vld [vmem:[#allocation3 + $0x84] sm:$0x8] }
 0x38c   : > { %6783 = vst [vmem:[#allocation3 + $0x74] sm:$0xe] %v6782_v21  ;;  %v6730_v48 = vor.u32 %v6729_v43, %v6726_v16  ;;  %v6192_v14 = vmax.f32 %v6156_v13, 0.0  ;;  %v17813_v42 = vadd.f32 %v21278_v9, %v21210_v6  ;;  %v7119_v20 = vshll.u32 %v21398_v8, 16  ;;  %v6785_v21 = vld [vmem:[#allocation3 + $0x7c] sm:$0x3] }
 0x38d   : > { %v6190_v29 = vmax.f32 %v6154_v26, 0.0  ;;  %v6157_v51 = vadd.f32 %v21406_v18, %v17812_v24  ;;  %v7123_v59 = vshrl.u32 %v21398_v8, 16  ;;  %v7117_v45 = vor.u32 %v7115_v38, %v7113_v0  ;;  %v6833_v38 = vld [vmem:[#allocation3 + $0x84] sm:$0x7] }
 0x38e   : > { %v6731_v32 = vsel %vm23842_vm9, %v6722_v61, %v6730_v48  ;;  %v6732_v28 = vrot.slane %v6730_v48, 4  ;;  %v16061_v44 = vpack.c.bf16 %v6192_v14, %v6192_v14  ;;  %v6155_v27 = vadd.f32 %v21406_v18, %v17813_v42 }
 0x38f   : > { %v6747_v6 = vsel %vm21119_vm8, %v6731_v32, %v6746_v15  ;;  %v16059_v9 = vpack.c.bf16 %v6190_v29, %v6190_v29  ;;  %v6193_v52 = vmax.f32 %v6157_v51, 0.0  ;;  %v7121_v55 = vrot.slane %v7119_v20, 1  ;;  %v6829_v29 = vld [vmem:[#allocation3 + $0x7c] sm:$0xc] }
 0x390   : > { %v6741_v37 = vsel %vm23842_vm9, %v6732_v28, %v6740_v36  ;;  %6748 = vst [vmem:[#allocation3 + $0x6c] sm:$0xf] %v6747_v6  ;;  %v6808_v7 = vshrl.u32 %v16061_v44, 16  ;;  %v6811_v17 = vshll.u32 %v16061_v44, 16  ;;  %v6191_v46 = vmax.f32 %v6155_v27, 0.0 }
 0x391   : > { %6749 = vst.msk [vmem:[#allocation3 + $0x70] sm:$0xf] %vm24110_vm2, %v6741_v37  ;;  %v6769_v57 = vshrl.u32 %v16059_v9, 16  ;;  %v6772_v35 = vshll.u32 %v16059_v9, 16  ;;  %v16062_v41 = vpack.c.bf16 %v6193_v52, %v6193_v52  ;;  %v7127_v31 = vshll.u32 %v21426_v56, 16 }
 0x392   : > { %v6810_v11 = vrot.slane %v6808_v7, 6  ;;  %v6813_v61 = vrot.slane %v6811_v17, 7  ;;  %v16060_v16 = vpack.c.bf16 %v6191_v46, %v6191_v46  ;;  %v7122_v48 = vsel %vm24105_vm1, %v7117_v45, %v7121_v55  ;;  %v21442_v45 = vld [vmem:[#allocation3 + $0x48] sm:$0xff]  }
 0x393   : > { %v6771_v0 = vrot.slane %v6769_v57, 6  ;;  %v6774_v43 = vrot.slane %v6772_v35, 7  ;;  %v6818_v10 = vshrl.u32 %v16062_v41, 16  ;;  %v6821_v36 = vshll.u32 %v16062_v41, 16  ;;  %17110 = vmatprep.mubr.msk.bf16.mxu1 %vm24109_vm3, %v7122_v48  ;;  %v24111_v35 = vld [vmem:[#allocation24_spill] sm:$0xff] }
 0x394   : > { %v6814_v13 = vor.u32 %v6813_v61, %v6810_v11  ;;  %v6799_v26 = vshrl.u32 %v16060_v16, 16  ;;  %v6802_v24 = vshll.u32 %v16060_v16, 16  ;;  %v7125_v51 = vor.u32 %v7123_v59, %v7121_v55  ;;  %v21464_v55 = vld [vmem:[#allocation3 + $0x50] sm:$0xff]  }
 0x395   : > { %v6775_v15 = vor.u32 %v6774_v43, %v6771_v0  ;;  %v6820_v14 = vrot.slane %v6818_v10, 6  ;;  %v6823_v42 = vrot.slane %v6821_v36, 7  ;;  %v7129_v44 = vrot.slane %v7127_v31, 1 }
 0x396   : > { %v6816_v20 = vrot.slane %v6814_v13, 4  ;;  %v6801_v32 = vrot.slane %v6799_v26, 6  ;;  %v6804_v28 = vrot.slane %v6802_v24, 7  ;;  %v17814_v7 = vadd.f32 %v21302_v54, %v21232_v50 }
 0x397   : > { %v6776_v27 = vsel %vm23842_vm9, %v6767_v12, %v6775_v15  ;;  %v6777_v6 = vrot.slane %v6775_v15, 4  ;;  %v21438_v9 = vor.u32 %v6823_v42, %v6820_v14  ;;  %v6878_v52 = vsel %vm21084_vm13, %v6823_v42, %v6877_v34 }
 0x398   : > { %6784 = vst.msk [vmem:[#allocation3 + $0x78] sm:$0xf] %vm24110_vm2, %v6776_v27  ;;  %6879 = vst [vmem:[#allocation3 + $0x84] sm:$0x8] %v6878_v52  ;;  %v6805_v37 = vor.u32 %v6804_v28, %v6801_v32  ;;  %v7130_v59 = vsel %vm24105_vm1, %v7125_v51, %v7129_v44  ;;  %v17815_v12 = vadd.f32 %v21312_v25, %v21239_v22  ;;  %v7135_v34 = vshll.u32 %v21442_v45, 16 }
 0x399   : > { %v6786_v17 = vsel %vm21067_vm15, %v6777_v6, %v6785_v21  ;;  %v6825_v46 = vsel %vm23842_vm9, %v6816_v20, %v21438_v9  ;;  %v6854_v57 = vrot.slane %v21438_v9, 4  ;;  %17111 = vmatmul.mubr.msk.bf16.gmra.mrb[80].mxu1 %vm24109_vm3, %v7130_v59  ;;  %v17816_v41 = vadd.f32 %v21320_v19, %v24111_v35  ;;  %v6926_v9 = vld [vmem:[#allocation3 + $0x90] sm:$0xf] }
 0x39a   : > { %6787 = vst [vmem:[#allocation3 + $0x7c] sm:$0x3] %v6786_v17  ;;  %v6834_v50 = vsel %vm21095_vm7, %v6825_v46, %v6833_v38  ;;  %v6806_v54 = vrot.slane %v6805_v37, 4  ;;  %v6830_v22 = vsel %vm21043_vm5, %v6805_v37, %v6829_v29  ;;  %v6160_v25 = vadd.f32 %v21406_v18, %v17814_v7  ;;  %v6930_v37 = vld [vmem:[#allocation3 + $0x98] sm:$0x1] }
 0x39b   : > { %6835 = vst [vmem:[#allocation3 + $0x84] sm:$0x7] %v6834_v50  ;;  %6831 = vst [vmem:[#allocation3 + $0x7c] sm:$0xc] %v6830_v22  ;;  %v6158_v11 = vadd.f32 %v21406_v18, %v17815_v12  ;;  %v6161_v61 = vadd.f32 %v21406_v18, %v17816_v41  ;;  %v7131_v19 = vshrl.u32 %v21426_v56, 16  ;;  %v17817_v0 = vadd.f32 %v21325_v63, %v21251_v3  ;;  %v21484_v12 = vld [vmem:[#allocation3 + $0x60] sm:$0xff]  }
 0x39c   : > { %v6815_v16 = vsel %vm23842_vm9, %v6806_v54, %v6814_v13  ;;  %v6196_v31 = vmax.f32 %v6160_v25, 0.0  ;;  %v7139_v43 = vshrl.u32 %v21442_v45, 16  ;;  %v7137_v26 = vrot.slane %v7135_v34, 1 }
 0x39d   : > { %6832 = vst.msk [vmem:[#allocation3 + $0x80] sm:$0xf] %vm24110_vm2, %v6815_v16  ;;  %v6194_v10 = vmax.f32 %v6158_v11, 0.0  ;;  %v6197_v36 = vmax.f32 %v6161_v61, 0.0  ;;  %v7133_v21 = vor.u32 %v7131_v19, %v7129_v44  ;;  %v6159_v48 = vadd.f32 %v21406_v18, %v17817_v0  ;;  %v21481_v18 = vld [vmem:[#allocation3 + $0x58] sm:$0xff]   ;;  %vm24112_vm2 = vmmov %vm24105_vm1  ;;  %v21487_v11 = vld [vmem:[#allocation3 + $0x68] sm:$0xff]  }
 0x39e   : > { %v16067_v24 = vpack.c.bf16 %v6196_v31, %v6196_v31  ;;  %v7143_v15 = vshll.u32 %v21464_v55, 16  ;;  %v7147_v14 = vshrl.u32 %v21464_v55, 16  ;;  %v7141_v3 = vor.u32 %v7139_v43, %v7137_v26  ;;  %v21489_v61 = vld [vmem:[#allocation3 + $0x70] sm:$0xff]  }
 0x39f   : > { %v16064_v13 = vpack.c.bf16 %v6194_v10, %v6194_v10  ;;  %v16068_v42 = vpack.c.bf16 %v6197_v36, %v6197_v36  ;;  %v7138_v38 = vsel %vm24105_vm1, %v7133_v21, %v7137_v26  ;;  %v6195_v51 = vmax.f32 %v6159_v48, 0.0  ;;  %vm24113_vm1 = vmmov %vm24109_vm3  ;;  %v6881_v36 = vld [vmem:[#allocation3 + $0x8c] sm:$0xf] }
 0x3a0   : > { %v6904_v63 = vshrl.u32 %v16067_v24, 16  ;;  %v6907_v29 = vshll.u32 %v16067_v24, 16  ;;  %17114 = vmatprep.mubr.msk.bf16.mxu1 %vm24109_vm3, %v7138_v38  ;;  %v7145_v20 = vrot.slane %v7143_v15, 1  ;;  %v7151_v31 = vshll.u32 %v21481_v18, 16 }
 0x3a1   : > { %v6856_v32 = vshrl.u32 %v16064_v13, 16  ;;  %v6859_v28 = vshll.u32 %v16064_v13, 16  ;;  %v6914_v44 = vshrl.u32 %v16068_v42, 16  ;;  %v6917_v27 = vshll.u32 %v16068_v42, 16 }
 0x3a2   : > { %v6906_v6 = vrot.slane %v6904_v63, 6  ;;  %v6909_v52 = vrot.slane %v6907_v29, 7  ;;  %v16065_v59 = vpack.c.bf16 %v6195_v51, %v6195_v51  ;;  %v7146_v7 = vsel %vm24112_vm2, %v7141_v3, %v7145_v20 }
 0x3a3   : > { %v6858_v17 = vrot.slane %v6856_v32, 6  ;;  %v6861_v46 = vrot.slane %v6859_v28, 7  ;;  %v6916_v35 = vrot.slane %v6914_v44, 6  ;;  %v6919_v41 = vrot.slane %v6917_v27, 7  ;;  %17115 = vmatmul.mubr.msk.bf16.gmra.mrb[84].mxu1 %vm24113_vm1, %v7146_v7 }
 0x3a4   : > { %v6910_v50 = vor.u32 %v6909_v52, %v6906_v6  ;;  %v6866_v54 = vshrl.u32 %v16065_v59, 16  ;;  %v6869_v22 = vshll.u32 %v16065_v59, 16  ;;  %v7149_v25 = vor.u32 %v7147_v14, %v7145_v20  ;;  %v21499_v14 = vld [vmem:[#allocation3 + $0x78] sm:$0xff]  }
 0x3a5   : > { %v6862_v19 = vor.u32 %v6861_v46, %v6858_v17  ;;  %v6920_v34 = vor.u32 %v6919_v41, %v6916_v35  ;;  %v6922_v16 = vrot.slane %v6916_v35, 4  ;;  %v7155_v21 = vshrl.u32 %v21481_v18, 16  ;;  %v21523_v35 = vld [vmem:[#allocation3 + $0x80] sm:$0xff]  }
 0x3a6   : > { %v6912_v0 = vrot.slane %v6910_v50, 4  ;;  %v6868_v43 = vrot.slane %v6866_v54, 6  ;;  %v6871_v10 = vrot.slane %v6869_v22, 7  ;;  %v7153_v15 = vrot.slane %v7151_v31, 1 }
 0x3a7   : > { %v6863_v26 = vsel %vm23842_vm9, %v6854_v57, %v6862_v19  ;;  %v6864_v24 = vrot.slane %v6862_v19, 4  ;;  %v6931_v48 = vsel %vm21166_vm10, %v6922_v16, %v6930_v37  ;;  %vm24114_vm3 = vcmask 60416  }
 0x3a8   : > { %6880 = vst.msk [vmem:[#allocation3 + $0x88] sm:$0xf] %vm24114_vm3, %v6863_v26  ;;  %v6921_v13 = vsel %vm23842_vm9, %v6912_v0, %v6920_v34  ;;  %6932 = vst [vmem:[#allocation3 + $0x98] sm:$0x1] %v6931_v48  ;;  %v6872_v42 = vor.u32 %v6871_v10, %v6868_v43  ;;  %v7159_v38 = vshll.u32 %v21484_v12, 16  ;;  %v7157_v3 = vor.u32 %v7155_v21, %v7153_v15 }
 0x3a9   : > { %vm24115_vm2 = vmmov %vm24114_vm3  ;;  %vm24116_vm1 = vsmask.f32 7424  ;;  %v7163_v63 = vshrl.u32 %v21484_v12, 16  ;;  %v7167_v29 = vshll.u32 %v21487_v11, 16  ;;  %vm24117_vm3 = vcmask 64512  }
 0x3aa   : > { %6929 = vst.msk [vmem:[#allocation3 + $0x94] sm:$0xf] %vm24115_vm2, %v6921_v13  ;;  %v7154_v57 = vsel %vm24116_vm1, %v7149_v25, %v7153_v15  ;;  %v6873_v51 = vsel %vm23842_vm9, %v6864_v24, %v6872_v42  ;;  %v6902_v20 = vrot.slane %v6872_v42, 4  ;;  %v7161_v32 = vrot.slane %v7159_v38, 1  ;;  %vm24118_vm2 = vmmov %vm24116_vm1 }
 0x3ab   : > { %17118 = vmatprep.mubr.msk.bf16.mxu1 %vm24117_vm3, %v7154_v57  ;;  %v7175_v28 = vshll.u32 %v21489_v61, 16  ;;  %v6882_v44 = vsel %vm21133_vm0, %v6873_v51, %v6881_v36  ;;  %v7169_v27 = vrot.slane %v7167_v29, 1  ;;  %v7183_v6 = vshll.u32 %v21499_v14, 16  ;;  %vm24119_vm1 = vmmov %vm24117_vm3  ;;  %v24128_v57 = vld [vmem:[#allocation13_spill] sm:$0xff]  ;;  %v21570_v51 = vld [vmem:[#allocation3 + $0x10] sm:$0xff]  }
 0x3ac   : > { %6883 = vst [vmem:[#allocation3 + $0x8c] sm:$0xf] %v6882_v44  ;;  %v6911_v52 = vsel %vm23842_vm9, %v6902_v20, %v6910_v50  ;;  %v7162_v37 = vsel %vm24118_vm2, %v7157_v3, %v7161_v32  ;;  %v7165_v59 = vor.u32 %v7163_v63, %v7161_v32  ;;  %v7171_v7 = vshrl.u32 %v21487_v11, 16  ;;  %vm24120_vm3 = vmmov %vm24118_vm2  ;;  %v21554_v63 = vld [vmem:[%s23567_s5 + $0xc] sm:$0xf]  ;;  %v21572_v20 = vld [vmem:[#allocation3 + $0x18] sm:$0xff]  }
 0x3ad   : > { %v6927_v17 = vsel %vm21119_vm8, %v6911_v52, %v6926_v9  ;;  %17119 = vmatmul.mubr.msk.bf16.gmra.mrb[88].mxu1 %vm24119_vm1, %v7162_v37  ;;  %v7177_v46 = vrot.slane %v7175_v28, 1  ;;  %vm24121_vm14 = vmmov %vm24119_vm1  ;;  %v7179_v50 = vshrl.u32 %v21489_v61, 16  ;;  %v7185_v22 = vrot.slane %v7183_v6, 1  ;;  %v21556_v29 = vld [vmem:[#allocation3 + $0x8] sm:$0xff]   ;;  %v21574_v32 = vld [vmem:[#allocation3 + $0x20] sm:$0xff]  }
 0x3ae   : > { %6928 = vst [vmem:[#allocation3 + $0x90] sm:$0xf] %v6927_v17  ;;  %v7170_v41 = vsel %vm24120_vm3, %v7165_v59, %v7169_v27  ;;  %v7173_v54 = vor.u32 %v7171_v7, %v7169_v27  ;;  %v7191_v19 = vshll.u32 %v21523_v35, 16  ;;  %vm24122_vm12 = vmmov %vm24118_vm2  ;;  %v7187_v43 = vshrl.u32 %v21499_v14, 16  ;;  %v8972_v28 = vld [vmem:[#allocation3 + $0x8] sm:$0xc] }
 0x3af   : > { %17122 = vmatprep.mubr.msk.bf16.mxu1 %vm24121_vm14, %v7170_v41  ;;  %v7181_v25 = vor.u32 %v7179_v50, %v7177_v46  ;;  %v21531_v31 = vld [vmem:[#allocation3 + $0x88] sm:$0xf]  ;;  %vm24123_vm14 = vmmov %vm24119_vm1  ;;  %v7195_v24 = vshrl.u32 %v21523_v35, 16  ;;  %v7756_v3 = vsel %vm24130_vm4, %v21307_v60, 0  ;;  %v21568_v60 = vld [vmem:[#allocation3 + $0xc] sm:$0xf] }
 0x3b0   : > { %v7178_v34 = vsel %vm24118_vm2, %v7173_v54, %v7177_v46  ;;  %v7193_v36 = vrot.slane %v7191_v19, 1  ;;  %v7189_v21 = vor.u32 %v7187_v43, %v7185_v22  ;;  %vm24125_vm3 = vmmov %vm24118_vm2  ;;  %v21580_v44 = vld [vmem:[#allocation3 + $0x30] sm:$0xff]   ;;  %v15564_v27 = vcombine.low %v8972_v28, %v21568_v60  ;;  %v21590_v52 = vld [vmem:[#allocation3 + $0x48] sm:$0xff]  }
 0x3b1   : > { %v7186_v16 = vsel %vm24122_vm12, %v7181_v25, %v7185_v22  ;;  %vm24124_vm12 = vmmov %vm24118_vm2  ;;  %v8979_v6 = vrot.slane %v21570_v51, 2  ;;  %v21592_v37 = vld [vmem:[#allocation3 + $0x50] sm:$0xff]   ;;  %v8981_v7 = vrot.slane %v21572_v20, 2  ;;  %v8983_v17 = vrot.slane %v21574_v32, 2  ;;  %v21598_v46 = vld [vmem:[#allocation3 + $0x60] sm:$0xff]  }
 0x3b2   : > { %v7197_v15 = vor.u32 %v7195_v24, %v7193_v36  ;;  %v7194_v13 = vsel %vm24124_vm12, %v7189_v21, %v7193_v36  ;;  %vm24126_vm2 = vmmov %vm24119_vm1  ;;  %24137 = vst [vmem:[#allocation10_spill] sm:$0xff] %v21592_v37  ;;  %v8978_v59 = vrot.slane %v15564_v27, 2  ;;  %v21602_v41 = vld [vmem:[#allocation3 + $0x70] sm:$0xff]   ;;  %v8987_v50 = vrot.slane %v21580_v44, 2  ;;  %v21607_v25 = vld [vmem:[#allocation3 + $0x78] sm:$0xff]  }
 0x3b3   : > { %v6970_v0 = vld [vmem:[#allocation3 + $0x8c] sm:$0xf]  ;;  %vm24127_vm6 = vmmov %vm24119_vm1  ;;  %24139 = vst [vmem:[#allocation11_spill] sm:$0xff] %v21598_v46  ;;  %v21609_v19 = vld [vmem:[#allocation3 + $0x80] sm:$0xff]   ;;  %v9003_v28 = vrot.slane %v21602_v41, 2 }
 0x3b4   : > { %v21535_v10 = vcombine.low %v21531_v31, %v6970_v0  ;;  %vm24132_vm12 = vmmov %vm24119_vm1  ;;  %24141 = vst [vmem:[#allocation7_spill] sm:$0xff] %v21602_v41  ;;  %v21621_v36 = vld [vmem:[#allocation3 + $0x88] sm:$0xff]  }
 0x3b5   : > { %17123 = vmatmul.mubr.msk.bf16.gmra.mrb[92].mxu1 %vm24119_vm1, %v7178_v34  ;;  %24142 = vst [vmem:[#allocation12_spill] sm:$0xff] %v21607_v25  ;;  %24143 = vst [vmem:[#allocation16_spill] sm:$0xff] %v21609_v19  ;;  %v21629_v24 = vld [vmem:[#allocation3 + $0x90] sm:$0xff]  }
 0x3b6   : > { %17126 = vmatprep.mubr.msk.bf16.mxu1 %vm24123_vm14, %v7186_v16  ;;  %v7199_v26 = vshll.u32 %v21535_v10, 16  ;;  %v7203_v38 = vshrl.u32 %v21535_v10, 16  ;;  %vm24129_vm14 = vmmov %vm24119_vm1  ;;  %24150 = vst [vmem:[#allocation13_spill] sm:$0xff] %v21621_v36 }
 0x3b7   : > { %24155 = vst [vmem:[#allocation27_spill] sm:$0xff] %v21629_v24 }
 0x3b8   : > { %v7201_v48 = vrot.slane %v7199_v26, 1 }
 0x3ba   : > { %v7202_v42 = vsel %vm24125_vm3, %v7197_v15, %v7201_v48  ;;  %v7205_v9 = vor.u32 %v7203_v38, %v7201_v48  ;;  %vm24133_vm3 = vmmov %vm24130_vm4  ;;  %v21631_v48 = vld [vmem:[#allocation3 + $0x98] ss:$0 sps:$4 sm:$0x11]   ;;  %v8995_v38 = vrot.slane %v21592_v37, 2 }
 0x3bb   : > { %vm24135_vm4 = vmmov %vm24119_vm1  ;;  %24156 = vst [vmem:[#allocation28_spill] sm:$0xff] %v21631_v48  ;;  %v9013_v23 = vrot.slane %v21631_v48, 2 }
 0x3bd   : > { %17127 = vmatmul.mubr.msk.bf16.gmra.mrb[96].mxu1 %vm24126_vm2, %v7194_v13  ;;  %vm24134_vm2 = vmmov %vm24119_vm1 }
 0x3be   : > { %17130 = vmatprep.mubr.msk.bf16.mxu1 %vm24127_vm6, %v7202_v42  ;;  %vm24131_vm6 = vmmov %vm24119_vm1  ;;  %v8993_v42 = vrot.slane %v21590_v52, 2 }
 0x3c5   : > { %17131 = vmatmul.mubr.msk.bf16.gmra.mrb[100].mxu1 %vm24119_vm1, %v7205_v9 }
 0x3c6   : > { %17136 = vmatprep.mubr.msk.bf16.mxu1 %vm24129_vm14, %v24128_v57  ;;  %vm24136_vm14 = vmmov %vm24119_vm1  ;;  %v8999_v57 = vrot.slane %v21598_v46, 2 }
 0x3cd   : > { %17137 = vmatmul.mubr.msk.bf16.vlgmr.msra.gmra.mrb[68].mxu1 %vm24131_vm6, %v21556_v29  ;;  %vm24144_vm6 = vcmask 1045504  }
 0x3ce   : > { %17140 = vmatprep.mubr.msk.bf16.mxu1 %vm24132_vm12, %v21257_v62  ;;  %17173 = vmatpush3.bf16.msra.mxu1 %v7756_v3  ;;  %v21578_v62 = vld [vmem:[#allocation3 + $0x28] sm:$0xff]   ;;  %v21612_v34 = vsel %vm24144_vm6, %v8978_v59, %v8979_v6  ;;  %vm24146_vm12 = vmmov %vm24144_vm6  ;;  %v9005_v59 = vrot.slane %v21607_v25, 2 }
 0x3cf   : > { %18659 = vmatprep.subr.msk.bf16.mxu1 %vm24133_vm3, %v21554_v63  ;;  %v8985_v54 = vrot.slane %v21578_v62, 2  ;;  %24145 = vst [vmem:[#allocation17_spill] sm:$0xff] %v21612_v34  ;;  %v21615_v16 = vsel %vm24146_vm12, %v8979_v6, %v8981_v7  ;;  %vm24148_vm3 = vmmov %vm24144_vm6  ;;  %vm24161_vm6 = vcmask 64512  }
 0x3d0   : > { %24147 = vst [vmem:[#allocation22_spill] sm:$0xff] %v21615_v16  ;;  %v21618_v0 = vsel %vm24148_vm3, %v8981_v7, %v8983_v17  ;;  %vm24162_vm12 = vmmov %vm24161_vm6 }
 0x3d1   : > { %24149 = vst [vmem:[#allocation24_spill] sm:$0xff] %v21618_v0  ;;  %v21732_v0 = vld [vmem:[#allocation3 + $0x50] sm:$0xff]  }
 0x3d5   : > { %17141 = vmatmul.mubr.msk.bf16.gmra.mrb[72].mxu1 %vm24134_vm2, %v21290_v40  ;;  %v21582_v40 = vld [vmem:[#allocation3 + $0x38] sm:$0xff]   ;;  %vm24151_vm2 = vmmov %vm24148_vm3 }
 0x3d6   : > { %17144 = vmatprep.mubr.msk.bf16.mxu1 %vm24135_vm4, %v21328_v2  ;;  %v21586_v2 = vld [vmem:[#allocation3 + $0x40] sm:$0xff]   ;;  %v8989_v22 = vrot.slane %v21582_v40, 2  ;;  %v21624_v21 = vsel %vm24151_vm2, %v8983_v17, %v8985_v54  ;;  %vm24153_vm4 = vmmov %vm24151_vm2 }
 0x3d7   : > { %v8991_v43 = vrot.slane %v21586_v2, 2  ;;  %24152 = vst [vmem:[#allocation25_spill] sm:$0xff] %v21624_v21  ;;  %v21627_v26 = vsel %vm24153_vm4, %v8985_v54, %v8987_v50 }
 0x3d8   : > { %24154 = vst [vmem:[#allocation26_spill] sm:$0xff] %v21627_v26 }
 0x3dd   : > { %17145 = vmatmul.mubr.msk.bf16.gmra.mrb[76].mxu1 %vm24119_vm1, %v21331_v39  ;;  %v21594_v39 = vld [vmem:[#allocation3 + $0x58] sm:$0xff]   ;;  %vm24157_vm1 = vmmov %vm24151_vm2 }
 0x3de   : > { %17148 = vmatprep.mubr.msk.bf16.mxu1 %vm24136_vm14, %v21365_v5  ;;  %24138 = vst [vmem:[#allocation8_spill] sm:$0xff] %v21594_v39  ;;  %v21600_v5 = vld [vmem:[#allocation3 + $0x68] sm:$0xff]   ;;  %v21634_v15 = vsel %vm24157_vm1, %v8987_v50, %v8989_v22  ;;  %vm24159_vm14 = vmmov %vm24157_vm1  ;;  %v8997_v9 = vrot.slane %v21594_v39, 2 }
 0x3df   : > { %24140 = vst [vmem:[#allocation9_spill] sm:$0xff] %v21600_v5  ;;  %24158 = vst [vmem:[#allocation29_spill] sm:$0xff] %v21634_v15  ;;  %v21637_v13 = vsel %vm24159_vm14, %v8989_v22, %v8991_v43  ;;  %v9001_v3 = vrot.slane %v21600_v5, 2 }
 0x3e0   : > { %24160 = vst [vmem:[#allocation30_spill] sm:$0xff] %v21637_v13  ;;  %vm24163_vm3 = vmmov %vm24157_vm1  ;;  %v21661_v17 = vsel %vm24157_vm1, %v8997_v9, %v8999_v57  ;;  %v9769_v13 = vshll.u32 %v21704_v4, 16 }
 0x3e1   : > { %v21650_v27 = vsel %vm24163_vm3, %v8991_v43, %v8993_v42  ;;  %vm24165_vm2 = vmmov %vm24157_vm1  ;;  %24169 = vst [vmem:[#allocation34_spill] sm:$0xff] %v21661_v17  ;;  %v9766_v17 = vshrl.u32 %v21704_v4, 16 }
 0x3e2   : > { %24164 = vst [vmem:[#allocation31_spill] sm:$0xff] %v21650_v27  ;;  %v21653_v6 = vsel %vm24165_vm2, %v8993_v42, %v8995_v38  ;;  %vm24167_vm4 = vmmov %vm24157_vm1  ;;  %v9009_v42 = vrot.slane %v21621_v36, 2 }
 0x3e3   : > { %24166 = vst [vmem:[#allocation32_spill] sm:$0xff] %v21653_v6  ;;  %v21658_v7 = vsel %vm24167_vm4, %v8995_v38, %v8997_v9  ;;  %vm24170_vm14 = vmmov %vm24157_vm1  ;;  %v9011_v38 = vrot.slane %v21629_v24, 2  ;;  %v9768_v26 = vrot.slane %v9766_v17, 2 }
 0x3e4   : > { %24168 = vst [vmem:[#allocation33_spill] sm:$0xff] %v21658_v7  ;;  %v21664_v54 = vsel %vm24170_vm14, %v8999_v57, %v9001_v3  ;;  %vm24176_vm3 = vmmov %vm24157_vm1  ;;  %vm24183_vm14 = vcmask 64512  }
 0x3e5   : > { %17149 = vmatmul.mubr.msk.bf16.gmra.mrb[80].mxu1 %vm24161_vm6, %v21398_v8  ;;  %v9007_v8 = vrot.slane %v21609_v19, 2  ;;  %24171 = vst [vmem:[#allocation35_spill] sm:$0xff] %v21664_v54  ;;  %vm24172_vm6 = vmmov %vm24157_vm1 }
 0x3e6   : > { %17152 = vmatprep.mubr.msk.bf16.mxu1 %vm24162_vm12, %v21426_v56  ;;  %v21667_v50 = vsel %vm24172_vm6, %v9001_v3, %v9003_v28  ;;  %vm24174_vm12 = vmmov %vm24157_vm1  ;;  %v21685_v3 = vsel %vm24157_vm1, %v9011_v38, %v9013_v23  ;;  %v21700_v23 = vld [vmem:[#allocation3 + $0x8c] sm:$0x7] }
 0x3e7   : > { %24173 = vst [vmem:[#allocation36_spill] sm:$0xff] %v21667_v50  ;;  %v21670_v22 = vsel %vm24174_vm12, %v9003_v28, %v9005_v59  ;;  %v21673_v43 = vsel %vm24176_vm3, %v9005_v59, %v9007_v8  ;;  %vm24178_vm2 = vmmov %vm24157_vm1  ;;  %v21687_v28 = vld [vmem:[#allocation3 + $0x14] sm:$0xf]  ;;  %v9285_v59 = vld [vmem:[#allocation3 + $0x10] sm:$0xc] }
 0x3e8   : > { %24175 = vst [vmem:[#allocation37_spill] sm:$0xff] %v21670_v22  ;;  %24177 = vst [vmem:[#allocation38_spill] sm:$0xff] %v21673_v43  ;;  %v21679_v9 = vsel %vm24178_vm2, %v9007_v8, %v9009_v42  ;;  %v21694_v58 = vcombine.low %v9285_v59, %v21687_v28  ;;  %v18938_v8 = vld [vmem:[#allocation3 + $0x4] sm:$0xf]  ;;  %v9748_v43 = vshrl.u32 %v21698_v49, 16 }
 0x3e9   : > { %24179 = vst [vmem:[#allocation39_spill] sm:$0xff] %v21679_v9  ;;  %vm24180_vm4 = vmmov %vm24157_vm1  ;;  %v15469_v33 = vcombine.low %v7660_v53, %v18938_v8  ;;  %vm24188_vm2 = vsmask.f32 5376 }
 0x3ea   : > { %v21682_v57 = vsel %vm24180_vm4, %v9009_v42, %v9011_v38  ;;  %24182 = vst [vmem:[#allocation41_spill] sm:$0xff] %v21685_v3  ;;  %vm24184_vm6 = vmmov %vm24183_vm14  ;;  %v21696_v42 = vld [vmem:[#allocation3 + $0x18] sm:$0xff]   ;;  %v21702_v38 = vld [vmem:[#allocation3 + $0x28] sm:$0xff]   ;;  %v9731_v47 = vshrl.u32 %v21694_v58, 16  ;;  %v9734_v59 = vshll.u32 %v21694_v58, 16 }
 0x3eb   : > { %24181 = vst [vmem:[#allocation40_spill] sm:$0xff] %v21682_v57  ;;  %24185 = vst [vmem:[#allocation42_spill] sm:$0xff] %v21694_v58  ;;  %v21707_v30 = vrot.slane %v15469_v33, 1  ;;  %v9739_v53 = vshrl.u32 %v21696_v42, 16  ;;  %v21714_v3 = vld [vmem:[#allocation3 + $0x38] sm:$0xff]   ;;  %v9742_v9 = vshll.u32 %v21696_v42, 16 }
 0x3ec   : > { %v9733_v57 = vrot.slane %v9731_v47, 2  ;;  %vm24186_vm12 = vmmov %vm24184_vm6  ;;  %v21720_v33 = vld [vmem:[#allocation3 + $0x40] sm:$0xff]   ;;  %v9736_v1 = vrot.slane %v9734_v59, 3  ;;  %v9751_v58 = vshll.u32 %v21698_v49, 16  ;;  %v9757_v50 = vshrl.u32 %v21702_v38, 16  ;;  %v21729_v59 = vld [vmem:[#allocation3 + $0x48] sm:$0xff]  }
 0x3ed   : > { %17153 = vmatmul.mubr.msk.bf16.gmra.mrb[84].mxu1 %vm24183_vm14, %v21442_v45  ;;  %v9741_v22 = vrot.slane %v9739_v53, 2  ;;  %vm24187_vm3 = vmmov %vm24184_vm6  ;;  %v9744_v8 = vrot.slane %v9742_v9, 3  ;;  %v9750_v47 = vrot.slane %v9748_v43, 2  ;;  %v9760_v54 = vshll.u32 %v21702_v38, 16 }
 0x3ee   : > { %17156 = vmatprep.mubr.msk.bf16.mxu1 %vm24184_vm6, %v21464_v55  ;;  %v9737_v7 = vor.u32 %v9736_v1, %v9733_v57  ;;  %v9753_v6 = vrot.slane %v9751_v58, 3  ;;  %v9759_v27 = vrot.slane %v9757_v50, 2  ;;  %v9775_v21 = vshrl.u32 %v21714_v3, 16  ;;  %v21736_v1 = vld [vmem:[#allocation3 + $0x58] sm:$0xff]   ;;  %vm24190_vm4 = vmmov %vm24188_vm2 }
 0x3ef   : > { %v9745_v53 = vor.u32 %v9744_v8, %v9741_v22  ;;  %v9762_v15 = vrot.slane %v9760_v54, 3  ;;  %v9771_v43 = vrot.slane %v9769_v13, 3  ;;  %v9778_v16 = vshll.u32 %v21714_v3, 16  ;;  %v21745_v13 = vld [vmem:[#allocation3 + $0x60] sm:$0xff]   ;;  %vm24192_vm1 = vmmov %vm24188_vm2 }
 0x3f0   : > { %v9754_v9 = vor.u32 %v9753_v6, %v9750_v47  ;;  %v9784_v34 = vshrl.u32 %v21720_v33, 16  ;;  %v9777_v57 = vrot.slane %v9775_v21, 2  ;;  %v9787_v54 = vshll.u32 %v21720_v33, 16  ;;  %vm24194_vm14 = vmmov %vm24187_vm3  ;;  %v21754_v21 = vld [vmem:[#allocation3 + $0x68] sm:$0xff]  }
 0x3f1   : > { %v21739_v58 = vsel %vm24188_vm2, %v9737_v7, %v9745_v53  ;;  %v9763_v50 = vor.u32 %v9762_v15, %v9759_v27  ;;  %v9772_v22 = vor.u32 %v9771_v43, %v9768_v26  ;;  %v9780_v8 = vrot.slane %v9778_v16, 3  ;;  %vm24195_vm6 = vmmov %vm24192_vm1  ;;  %v21763_v27 = vld [vmem:[#allocation3 + $0x70] sm:$0xff]  }
 0x3f2   : > { %24189 = vst [vmem:[#allocation43_spill] sm:$0xff] %v21739_v58  ;;  %v21743_v17 = vsel %vm24190_vm4, %v9745_v53, %v9754_v9  ;;  %v9786_v6 = vrot.slane %v9784_v34, 2  ;;  %v9789_v48 = vrot.slane %v9787_v54, 3  ;;  %v9793_v24 = vshrl.u32 %v21729_v59, 16  ;;  %vm24200_vm2 = vmmov %vm24192_vm1 }
 0x3f3   : > { %24191 = vst [vmem:[#allocation44_spill] sm:$0xff] %v21743_v17  ;;  %v21748_v47 = vsel %vm24192_vm1, %v9754_v9, %v9763_v50  ;;  %v9796_v7 = vshll.u32 %v21729_v59, 16  ;;  %v21757_v15 = vsel %vm24195_vm6, %v9763_v50, %v9772_v22  ;;  %v9781_v16 = vor.u32 %v9780_v8, %v9777_v57  ;;  %v21770_v8 = vld [vmem:[#allocation3 + $0x78] sm:$0xff]   ;;  %vm24202_vm4 = vmmov %vm24192_vm1 }
 0x3f4   : > { %24193 = vst [vmem:[#allocation45_spill] sm:$0xff] %v21748_v47  ;;  %24196 = vst [vmem:[#allocation46_spill] sm:$0xff] %v21757_v15  ;;  %v9802_v34 = vshrl.u32 %v21732_v0, 16  ;;  %v9805_v26 = vshll.u32 %v21732_v0, 16  ;;  %v9790_v53 = vor.u32 %v9789_v48, %v9786_v6  ;;  %v9795_v9 = vrot.slane %v9793_v24, 2  ;;  %v21776_v24 = vld [vmem:[#allocation3 + $0x80] sm:$0xff]  }
 0x3f5   : > { %17157 = vmatmul.mubr.msk.bf16.gmra.mrb[88].mxu1 %vm24186_vm12, %v21481_v18  ;;  %vm24197_vm12 = vmmov %vm24187_vm3  ;;  %v9798_v43 = vrot.slane %v9796_v7, 3  ;;  %v9811_v54 = vshrl.u32 %v21736_v1, 16  ;;  %v9814_v57 = vshll.u32 %v21736_v1, 16  ;;  %v9820_v48 = vshrl.u32 %v21745_v13, 16 }
 0x3f6   : > { %17160 = vmatprep.mubr.msk.bf16.mxu1 %vm24187_vm3, %v21484_v12  ;;  %vm24198_vm3 = vmmov %vm24192_vm1  ;;  %v9804_v50 = vrot.slane %v9802_v34, 2  ;;  %v9807_v15 = vrot.slane %v9805_v26, 3  ;;  %v21773_v17 = vsel %vm24200_vm2, %v9781_v16, %v9790_v53  ;;  %v9829_v34 = vshrl.u32 %v21754_v21, 16 }
 0x3f7   : > { %v21767_v47 = vsel %vm24198_vm3, %v9772_v22, %v9781_v16  ;;  %24201 = vst [vmem:[#allocation48_spill] sm:$0xff] %v21773_v17  ;;  %v9799_v58 = vor.u32 %v9798_v43, %v9795_v9  ;;  %v9813_v36 = vrot.slane %v9811_v54, 2  ;;  %v9816_v7 = vrot.slane %v9814_v57, 3  ;;  %v21785_v9 = vld [vmem:[#allocation3 + $0x88] sm:$0xff]   ;;  %vm24206_vm6 = vmmov %vm24192_vm1 }
 0x3f8   : > { %24199 = vst [vmem:[#allocation47_spill] sm:$0xff] %v21767_v47  ;;  %v9808_v6 = vor.u32 %v9807_v15, %v9804_v50  ;;  %v9823_v22 = vshll.u32 %v21745_v13, 16  ;;  %v9822_v47 = vrot.slane %v9820_v48, 2  ;;  %v9832_v19 = vshll.u32 %v21754_v21, 16  ;;  %v21794_v48 = vld [vmem:[#allocation3 + $0x90] sm:$0xff]   ;;  %vm24208_vm3 = vmmov %vm24192_vm1 }
 0x3f9   : > { %v21781_v26 = vsel %vm24202_vm4, %v9790_v53, %v9799_v58  ;;  %v9838_v16 = vshrl.u32 %v21763_v27, 16  ;;  %v9817_v54 = vor.u32 %v9816_v7, %v9813_v36  ;;  %v9831_v50 = vrot.slane %v9829_v34, 2  ;;  %vm24210_vm2 = vmmov %vm24192_vm1 }
 0x3fa   : > { %24203 = vst [vmem:[#allocation49_spill] sm:$0xff] %v21781_v26  ;;  %v21788_v43 = vsel %vm24192_vm1, %v9799_v58, %v9808_v6  ;;  %v9825_v15 = vrot.slane %v9823_v22, 3  ;;  %v9834_v57 = vrot.slane %v9832_v19, 3  ;;  %v9841_v25 = vshll.u32 %v21763_v27, 16  ;;  %v21803_v19 = vld [vmem:[#allocation3 + $0x98] sm:$0xff]   ;;  %vm24212_vm4 = vmmov %vm24192_vm1 }
 0x3fb   : > { %24204 = vst [vmem:[#allocation50_spill] sm:$0xff] %v21788_v43  ;;  %v9840_v17 = vrot.slane %v9838_v16, 2  ;;  %v9847_v53 = vshrl.u32 %v21770_v8, 16  ;;  %v21797_v26 = vsel %vm24206_vm6, %v9808_v6, %v9817_v54  ;;  %v9850_v58 = vshll.u32 %v21770_v8, 16  ;;  %vm24215_vm6 = vmmov %vm24197_vm12 }
 0x3fc   : > { %24207 = vst [vmem:[#allocation51_spill] sm:$0xff] %v21797_v26  ;;  %v9826_v41 = vor.u32 %v9825_v15, %v9822_v47  ;;  %v9856_v36 = vshrl.u32 %v21776_v24, 16  ;;  %v9835_v7 = vor.u32 %v9834_v57, %v9831_v50  ;;  %v9843_v22 = vrot.slane %v9841_v25, 3 }
 0x3fd   : > { %17161 = vmatmul.mubr.msk.bf16.gmra.mrb[92].mxu1 %vm24194_vm14, %v21487_v11  ;;  %vm24205_vm14 = vmmov %vm24197_vm12  ;;  %v9849_v34 = vrot.slane %v9847_v53, 2  ;;  %v9859_v16 = vshll.u32 %v21776_v24, 16  ;;  %v9852_v6 = vrot.slane %v9850_v58, 3  ;;  %v9865_v47 = vshrl.u32 %v21785_v9, 16 }
 0x3fe   : > { %17164 = vmatprep.mubr.msk.bf16.mxu1 %vm24197_vm12, %v21489_v61  ;;  %v21807_v43 = vsel %vm24208_vm3, %v9817_v54, %v9826_v41  ;;  %v9858_v26 = vrot.slane %v9856_v36, 2  ;;  %v21811_v15 = vsel %vm24210_vm2, %v9826_v41, %v9835_v7  ;;  %v9844_v5 = vor.u32 %v9843_v22, %v9840_v17  ;;  %vm24218_vm3 = vmmov %vm24215_vm6 }
 0x3ff   : > { %24209 = vst [vmem:[#allocation52_spill] sm:$0xff] %v21807_v43  ;;  %24211 = vst [vmem:[#allocation53_spill] sm:$0xff] %v21811_v15  ;;  %v9861_v46 = vrot.slane %v9859_v16, 3  ;;  %v9868_v39 = vshll.u32 %v21785_v9, 16  ;;  %v9853_v37 = vor.u32 %v9852_v6, %v9849_v34  ;;  %v9867_v50 = vrot.slane %v9865_v47, 2  ;;  %v18939_v34 = vld [vmem:[#allocation3 + $0x10] sm:$0xff]  }
 0x400   : > { %v9874_v25 = vshrl.u32 %v21794_v48, 16  ;;  %v9877_v57 = vshll.u32 %v21794_v48, 16  ;;  %v21817_v54 = vsel %vm24212_vm4, %v9835_v7, %v9844_v5  ;;  %v9883_v36 = vshrl.u32 %v21803_v19, 16  ;;  %v10170_v7 = vld [vmem:[#allocation3 + $0x10] sm:$0x8]  ;;  %vm24219_vm2 = vmmov %vm24192_vm1 }
 0x401   : > { %v9862_v53 = vor.u32 %v9861_v46, %v9858_v26  ;;  %v9870_v58 = vrot.slane %v9868_v39, 3  ;;  %v21821_v41 = vsel %vm24192_vm1, %v9844_v5, %v9853_v37  ;;  %v9886_v16 = vshll.u32 %v21803_v19, 16 }
 0x402   : > { %v9876_v17 = vrot.slane %v9874_v25, 2  ;;  %v9879_v22 = vrot.slane %v9877_v57, 3  ;;  %v7669_v6 = vrot.slane %v18939_v34, 1  ;;  %v9885_v43 = vrot.slane %v9883_v36, 2 }
 0x403   : > { %v9871_v15 = vor.u32 %v9870_v58, %v9867_v50  ;;  %v24214_v39 = vcombine.low %v21531_v31, %v21700_v23  ;;  %v24216_v46 = vrot.slane %v21556_v29, 1  ;;  %v9888_v25 = vrot.slane %v9886_v16, 3 }
 0x404   : > { %v9880_v26 = vor.u32 %v9879_v22, %v9876_v17  ;;  %v15642_v57 = vcombine.low %v10170_v7, %v21687_v28  ;;  %v10177_v31 = vrot.slane %v21696_v42, 3  ;;  %v10179_v23 = vrot.slane %v21698_v49, 3 }
 0x405   : > { %17165 = vmatmul.mubr.msk.bf16.gmra.mrb[96].mxu1 %vm24205_vm14, %v21499_v14  ;;  %vm24213_vm14 = vmmov %vm24192_vm1  ;;  %v21838_v58 = vsel %vm24219_vm2, %v9862_v53, %v9871_v15  ;;  %vm24220_vm4 = vcmask 1043456   ;;  %v21847_v17 = vor.u32 %v9888_v25, %v9885_v43  ;;  %v10181_v16 = vrot.slane %v21702_v38, 3 }
 0x406   : > { %17168 = vmatprep.mubr.msk.bf16.mxu1 %vm24197_vm12, %v21523_v35  ;;  %v21825_v47 = vsel %vm24213_vm14, %v9853_v37, %v9862_v53  ;;  %vm24217_vm12 = vcmask 1046528   ;;  %v18940_v37 = vld [vmem:[#allocation3 + $0x18] sm:$0xff]   ;;  %v8189_v36 = vsel %vm24220_vm4, %v21554_v63, 0  ;;  %v10176_v28 = vrot.slane %v15642_v57, 3 }
 0x407   : > { %v7668_v5 = vsel %vm24217_vm12, %v21707_v30, %v24216_v46  ;;  %v7671_v50 = vrot.slane %v18940_v37, 1  ;;  %v21845_v30 = vsel %vm24192_vm1, %v9871_v15, %v9880_v26  ;;  %vm24221_vm14 = vcmask 1044480  }
 0x408   : > { %v21850_v22 = vsel %vm24221_vm14, %v10177_v31, %v10179_v23  ;;  %v10183_v53 = vrot.slane %v21704_v4, 3  ;;  %v10185_v34 = vrot.slane %v21714_v3, 3  ;;  %v24222_v7 = vmov %v24216_v46 }
 0x409   : > { %v10187_v15 = vrot.slane %v21720_v33, 3  ;;  %v10189_v29 = vrot.slane %v21729_v59, 3 }
 0x40d   : > { %17169 = vmatmul.mubr.msk.bf16.gmra.mrb[100].mxu1 %vm24215_vm6, %v24214_v39  ;;  %vm24223_vm6 = vmmov %vm24217_vm12 }
 0x40e   : > { %17174 = vmatprep.mubr.msk.bf16.mxu1 %vm24218_vm3, %v7668_v5  ;;  %v7670_v39 = vsel %vm24223_vm6, %v24222_v7, %v7669_v6  ;;  %vm24224_vm12 = vmmov %vm24192_vm1  ;;  %v10199_v7 = vrot.slane %v21763_v27, 3 }
 0x40f   : > { %v21860_v63 = vsel %vm24224_vm12, %v9880_v26, %v21847_v17  ;;  %vm24225_vm3 = vmmov %vm24221_vm14  ;;  %v21877_v26 = vld [vmem:[#allocation3 + $0xa0] ss:$0 sps:$4 sm:$0x33]  }
 0x410   : > { %v21863_v43 = vsel %vm24225_vm3, %v10176_v28, %v10177_v31  ;;  %vm24226_vm2 = vmmov %vm24225_vm3  ;;  %v10191_v31 = vrot.slane %v21732_v0, 3  ;;  %v21887_v28 = vld [vmem:[%s23567_s5 + $0x10] sm:$0xf]  ;;  %vm24236_vm3 = vcmask 64512  }
 0x411   : > { %v21867_v46 = vsel %vm24226_vm2, %v10179_v23, %v10181_v16  ;;  %vm24227_vm4 = vmmov %vm24226_vm2  ;;  %v10193_v23 = vrot.slane %v21736_v1, 3 }
 0x412   : > { %v21870_v5 = vsel %vm24227_vm4, %v10181_v16, %v10183_v53  ;;  %vm24229_vm1 = vmmov %vm24226_vm2 }
 0x413   : > { %24228 = vst [vmem:[#allocation54_spill] sm:$0xff] %v21870_v5  ;;  %v21873_v25 = vsel %vm24229_vm1, %v10183_v53, %v10185_v34  ;;  %vm24231_vm14 = vmmov %vm24223_vm6  ;;  %v10195_v53 = vrot.slane %v21745_v13, 3  ;;  %v10203_v5 = vrot.slane %v21776_v24, 3 }
 0x414   : > { %24230 = vst [vmem:[#allocation55_spill] sm:$0xff] %v21873_v25  ;;  %v7672_v57 = vsel %vm24231_vm14, %v7669_v6, %v7671_v50  ;;  %vm24232_vm6 = vmmov %vm24229_vm1  ;;  %v10197_v6 = vrot.slane %v21754_v21, 3  ;;  %v10201_v25 = vrot.slane %v21770_v8, 3 }
 0x415   : > { %v21880_v37 = vsel %vm24232_vm6, %v10185_v34, %v10187_v15  ;;  %vm24234_vm12 = vmmov %vm24229_vm1  ;;  %17175 = vmatmul.mubr.msk.bf16.vlgmr.msra.gmra.mrb[68].mxu1 %vm24236_vm3, %v7670_v39 }
 0x416   : > { %24233 = vst [vmem:[#allocation56_spill] sm:$0xff] %v21880_v37  ;;  %v21890_v16 = vsel %vm24234_vm12, %v10187_v15, %v10189_v29  ;;  %vm24237_vm2 = vmmov %vm24229_vm1  ;;  %17211 = vmatpush3.bf16.msra.mxu1 %v8189_v36  ;;  %v10207_v36 = vrot.slane %v21794_v48, 3 }
 0x417   : > { %24235 = vst [vmem:[#allocation57_spill] sm:$0xff] %v21890_v16  ;;  %v21897_v34 = vsel %vm24237_vm2, %v10189_v29, %v10191_v31  ;;  %vm24239_vm4 = vmmov %vm24229_vm1  ;;  %v10205_v29 = vrot.slane %v21785_v9, 3 }
 0x418   : > { %24238 = vst [vmem:[#allocation58_spill] sm:$0xff] %v21897_v34  ;;  %v21900_v37 = vsel %vm24239_vm4, %v10191_v31, %v10193_v23  ;;  %vm24241_vm1 = vmmov %vm24236_vm3  ;;  %vm24248_vm3 = vcmask 1043456   ;;  %v21918_v31 = vsel %vm24237_vm2, %v10199_v7, %v10201_v25 }
 0x419   : > { %24240 = vst [vmem:[#allocation59_spill] sm:$0xff] %v21900_v37  ;;  %17178 = vmatprep.mubr.msk.bf16.mxu1 %vm24241_vm1, %v7672_v57  ;;  %vm24242_vm14 = vmmov %vm24237_vm2  ;;  %18660 = vmatprep.subr.msk.bf16.mxu1 %vm24248_vm3, %v21887_v28  ;;  %vm24257_vm3 = vcmask 1046528  }
 0x41a   : > { %v21906_v15 = vsel %vm24242_vm14, %v10193_v23, %v10195_v53  ;;  %vm24244_vm6 = vmmov %vm24237_vm2  ;;  %24249 = vst [vmem:[#allocation63_spill] sm:$0xff] %v21918_v31  ;;  %v10209_v23 = vrot.slane %v21803_v19, 3 }
 0x41b   : > { %24243 = vst [vmem:[#allocation60_spill] sm:$0xff] %v21906_v15  ;;  %v21909_v16 = vsel %vm24244_vm6, %v10195_v53, %v10197_v6  ;;  %vm24246_vm12 = vmmov %vm24237_vm2  ;;  %v18941_v53 = vld [vmem:[#allocation3 + $0x20] sm:$0xff]   ;;  %v18942_v15 = vld [vmem:[#allocation3 + $0x28] sm:$0xff]  }
 0x41c   : > { %24245 = vst [vmem:[#allocation61_spill] sm:$0xff] %v21909_v16  ;;  %v21912_v39 = vsel %vm24246_vm12, %v10197_v6, %v10199_v7  ;;  %vm24250_vm4 = vmmov %vm24237_vm2  ;;  %v7673_v16 = vrot.slane %v18941_v53, 1  ;;  %v7675_v37 = vrot.slane %v18942_v15, 1  ;;  %v18943_v53 = vld [vmem:[#allocation3 + $0x30] sm:$0xff]   ;;  %v18944_v15 = vld [vmem:[#allocation3 + $0x38] sm:$0xff]  }
 0x41d   : > { %24247 = vst [vmem:[#allocation62_spill] sm:$0xff] %v21912_v39  ;;  %v21921_v57 = vsel %vm24250_vm4, %v10201_v25, %v10203_v5  ;;  %vm24252_vm1 = vmmov %vm24237_vm2  ;;  %v10211_v39 = vrot.slane %v21877_v26, 3  ;;  %vm24258_vm2 = vcmask 64512   ;;  %v7679_v31 = vrot.slane %v18944_v15, 1 }
 0x41e   : > { %24251 = vst [vmem:[#allocation64_spill] sm:$0xff] %v21921_v57  ;;  %v21926_v6 = vsel %vm24252_vm1, %v10203_v5, %v10205_v29  ;;  %vm24254_vm14 = vmmov %vm24252_vm1  ;;  %v7674_v57 = vsel %vm24257_vm3, %v7671_v50, %v7673_v16  ;;  %v7681_v50 = vrot.slane %v21426_v56, 1 }
 0x41f   : > { %24253 = vst [vmem:[#allocation65_spill] sm:$0xff] %v21926_v6  ;;  %v21930_v34 = vsel %vm24254_vm14, %v10205_v29, %v10207_v36  ;;  %vm24255_vm6 = vmmov %vm24252_vm1  ;;  %17179 = vmatmul.mubr.msk.bf16.gmra.mrb[72].mxu1 %vm24258_vm2, %v7674_v57  ;;  %v7677_v6 = vrot.slane %v18943_v53, 1  ;;  %v7695_v53 = vrot.slane %v21499_v14, 1  ;;  %v18782_v14 = vld [vmem:[#allocation3 + $0x8] sm:$0xfe]  }
 0x420   : > { %v21933_v7 = vsel %vm24255_vm6, %v10207_v36, %v10209_v23  ;;  %vm24256_vm12 = vmmov %vm24252_vm1 }
 0x421   : > { %v21936_v25 = vsel %vm24256_vm12, %v10209_v23, %v10211_v39  ;;  %vm24259_vm4 = vmmov %vm24257_vm3  ;;  %v7683_v39 = vrot.slane %v21442_v45, 1  ;;  %v7687_v23 = vrot.slane %v21481_v18, 1  ;;  %v7689_v45 = vrot.slane %v21484_v12, 1 }
 0x422   : > { %v7676_v5 = vsel %vm24259_vm4, %v7673_v16, %v7675_v37  ;;  %vm24260_vm1 = vmmov %vm24258_vm2  ;;  %v7682_v16 = vsel %vm24257_vm3, %v7679_v31, %v7681_v50  ;;  %v7693_v18 = vrot.slane %v21489_v61, 1 }
 0x423   : > { %17182 = vmatprep.mubr.msk.bf16.mxu1 %vm24260_vm1, %v7676_v5  ;;  %vm24261_vm14 = vmmov %vm24257_vm3  ;;  %v7690_v5 = vsel %vm24257_vm3, %v7687_v23, %v7689_v45 }
 0x424   : > { %v7678_v29 = vsel %vm24261_vm14, %v7675_v37, %v7677_v6  ;;  %vm24262_vm10 = vmmov %vm24260_vm1  ;;  %v7685_v37 = vrot.slane %v21464_v55, 1 }
 0x425   : > { %vm24263_vm6 = vmmov %vm24257_vm3 }
 0x426   : > { %v7680_v36 = vsel %vm24263_vm6, %v7677_v6, %v7679_v31  ;;  %vm24264_vm12 = vmmov %vm24260_vm1  ;;  %v7691_v31 = vrot.slane %v21487_v11, 1  ;;  %v7697_v11 = vrot.slane %v21523_v35, 1  ;;  %v18785_v35 = vld [vmem:[#allocation3 + $0x20] sm:$0xff]  }
 0x427   : > { %17183 = vmatmul.mubr.msk.bf16.gmra.mrb[76].mxu1 %vm24262_vm10, %v7678_v29  ;;  %vm24265_vm2 = vmmov %vm24260_vm1  ;;  %v7699_v29 = vrot.slane %v21535_v10, 1 }
 0x428   : > { %17186 = vmatprep.mubr.msk.bf16.mxu1 %vm24264_vm12, %v7680_v36  ;;  %vm24266_vm4 = vmmov %vm24257_vm3  ;;  %v7698_v36 = vsel %vm24257_vm3, %v7695_v53, %v7697_v11 }
 0x429   : > { %v7684_v57 = vsel %vm24266_vm4, %v7681_v50, %v7683_v39  ;;  %vm24267_vm10 = vmmov %vm24257_vm3  ;;  %v18783_v50 = vld [vmem:[#allocation3 + $0x10] sm:$0xff]  }
 0x42a   : > { %v7686_v6 = vsel %vm24267_vm10, %v7683_v39, %v7685_v37  ;;  %vm24268_vm14 = vmmov %vm24260_vm1  ;;  %v8100_v39 = vrot.slane %v18783_v50, 1  ;;  %v18790_v50 = vld [vmem:[#allocation3 + $0x48] sm:$0xff]  }
 0x42b   : > { %vm24269_vm6 = vmmov %vm24257_vm3 }
 0x42c   : > { %v7688_v56 = vsel %vm24269_vm6, %v7685_v37, %v7687_v23  ;;  %vm24270_vm12 = vmmov %vm24260_vm1  ;;  %v8104_v23 = vrot.slane %v18785_v35, 1  ;;  %v18792_v35 = vld [vmem:[#allocation3 + $0x58] sm:$0xff]  }
 0x42d   : > { %vm24272_vm4 = vmmov %vm24257_vm3 }
 0x42e   : > { %v7692_v55 = vsel %vm24272_vm4, %v7689_v45, %v7691_v31  ;;  %vm24273_vm10 = vmmov %vm24257_vm3  ;;  %v18786_v45 = vld [vmem:[#allocation3 + $0x28] sm:$0xff]  }
 0x42f   : > { %17187 = vmatmul.mubr.msk.bf16.gmra.mrb[80].mxu1 %vm24265_vm2, %v7682_v16  ;;  %vm24271_vm2 = vmmov %vm24260_vm1  ;;  %v7694_v15 = vsel %vm24273_vm10, %v7691_v31, %v7693_v18  ;;  %v8099_v16 = vrot.slane %v18782_v14, 1  ;;  %v21985_v31 = vld [vmem:[%s23567_s5 + $0x14] sm:$0xf] }
 0x430   : > { %17190 = vmatprep.mubr.msk.bf16.mxu1 %vm24260_vm1, %v7684_v57  ;;  %vm24275_vm6 = vmmov %vm24257_vm3  ;;  %v18784_v57 = vld [vmem:[#allocation3 + $0x18] sm:$0xff]  }
 0x431   : > { %v7696_v12 = vsel %vm24275_vm6, %v7693_v18, %v7695_v53  ;;  %vm24278_vm4 = vmmov %vm24257_vm3  ;;  %v8102_v10 = vrot.slane %v18784_v57, 1 }
 0x432   : > { %v7700_v61 = vsel %vm24278_vm4, %v7697_v11, %v7699_v29  ;;  %vm24279_vm10 = vmmov %vm24260_vm1  ;;  %v18789_v11 = vld [vmem:[#allocation3 + $0x40] sm:$0xff]  }
 0x433   : > { %vm24281_vm6 = vmmov %vm24260_vm1 }
 0x434   : > { %vm24284_vm4 = vmmov %vm24257_vm3 }
 0x437   : > { %17191 = vmatmul.mubr.msk.bf16.gmra.mrb[84].mxu1 %vm24268_vm14, %v7686_v6  ;;  %vm24274_vm14 = vmmov %vm24260_vm1 }
 0x438   : > { %17194 = vmatprep.mubr.msk.bf16.mxu1 %vm24270_vm12, %v7688_v56  ;;  %vm24276_vm12 = vmmov %vm24260_vm1  ;;  %v8103_v56 = vsel %vm24257_vm3, %v8100_v39, %v8102_v10 }
 0x43f   : > { %17195 = vmatmul.mubr.msk.bf16.gmra.mrb[88].mxu1 %vm24271_vm2, %v7690_v5  ;;  %vm24277_vm2 = vmmov %vm24260_vm1  ;;  %v8105_v5 = vsel %vm24284_vm4, %v8102_v10, %v8104_v23 }
 0x440   : > { %17198 = vmatprep.mubr.msk.bf16.mxu1 %vm24260_vm1, %v7692_v55  ;;  %v18787_v55 = vld [vmem:[#allocation3 + $0x30] sm:$0xff]  }
 0x441   : > { %v8108_v18 = vrot.slane %v18787_v55, 1 }
 0x447   : > { %17199 = vmatmul.mubr.msk.bf16.gmra.mrb[92].mxu1 %vm24274_vm14, %v7694_v15  ;;  %vm24280_vm14 = vmmov %vm24257_vm3  ;;  %v18788_v15 = vld [vmem:[#allocation3 + $0x38] sm:$0xff]  }
 0x448   : > { %17202 = vmatprep.mubr.msk.bf16.mxu1 %vm24276_vm12, %v7696_v12  ;;  %v8101_v37 = vsel %vm24280_vm14, %v8099_v16, %v8100_v39  ;;  %vm24282_vm12 = vcmask 1043456   ;;  %vm24286_vm14 = vmmov %vm24257_vm3  ;;  %v18791_v39 = vld [vmem:[#allocation3 + $0x50] sm:$0xff]   ;;  %v8114_v16 = vrot.slane %v18790_v50, 1 }
 0x449   : > { %v8757_v6 = vsel %vm24282_vm12, %v21887_v28, 0  ;;  %v8106_v28 = vrot.slane %v18786_v45, 1  ;;  %v8116_v57 = vrot.slane %v18791_v39, 1  ;;  %v18799_v39 = vld [vmem:[#allocation3 + $0x90] sm:$0xff]  }
 0x44b   : > { %v8107_v53 = vsel %vm24286_vm14, %v8104_v23, %v8106_v28  ;;  %v18793_v23 = vld [vmem:[#allocation3 + $0x60] sm:$0xff]  }
 0x44f   : > { %17203 = vmatmul.mubr.msk.bf16.gmra.mrb[96].mxu1 %vm24277_vm2, %v7698_v36  ;;  %vm24283_vm2 = vmmov %vm24260_vm1  ;;  %v8112_v36 = vrot.slane %v18789_v11, 1 }
 0x450   : > { %17206 = vmatprep.mubr.msk.bf16.mxu1 %vm24260_vm1, %v7700_v61 }
 0x457   : > { %17207 = vmatmul.mubr.msk.bf16.gmra.mrb[100].mxu1 %vm24279_vm10, %v7699_v29  ;;  %vm24285_vm10 = vmmov %vm24282_vm12  ;;  %v8110_v29 = vrot.slane %v18788_v15, 1 }
 0x458   : > { %17212 = vmatprep.mubr.msk.bf16.mxu1 %vm24281_vm6, %v8101_v37  ;;  %vm24287_vm6 = vmmov %vm24260_vm1 }
 0x459   : > { %vm24288_vm12 = vmmov %vm24257_vm3 }
 0x45a   : > { %v8109_v12 = vsel %vm24288_vm12, %v8106_v28, %v8108_v18  ;;  %vm24289_vm3 = vmmov %vm24260_vm1  ;;  %v18795_v28 = vld [vmem:[#allocation3 + $0x70] sm:$0xff]  }
 0x45f   : > { %17213 = vmatmul.mubr.msk.bf16.vlgmr.msra.gmra.mrb[68].mxu1 %vm24283_vm2, %v8103_v56  ;;  %vm24290_vm2 = vmmov %vm24284_vm4  ;;  %v8120_v56 = vrot.slane %v18793_v23, 1 }
 0x460   : > { %17216 = vmatprep.mubr.msk.bf16.mxu1 %vm24260_vm1, %v8105_v5  ;;  %17249 = vmatpush3.bf16.msra.mxu1 %v8757_v6  ;;  %v8111_v61 = vsel %vm24290_vm2, %v8108_v18, %v8110_v29  ;;  %vm24291_vm4 = vmmov %vm24260_vm1  ;;  %v8118_v6 = vrot.slane %v18792_v35, 1  ;;  %v18794_v5 = vld [vmem:[#allocation3 + $0x68] sm:$0xff]  }
 0x461   : > { %18661 = vmatprep.subr.msk.bf16.mxu1 %vm24285_vm10, %v21985_v31  ;;  %vm24292_vm1 = vmmov %vm24290_vm2  ;;  %v8122_v18 = vrot.slane %v18794_v5, 1 }
 0x462   : > { %v8113_v14 = vsel %vm24292_vm1, %v8110_v29, %v8112_v36  ;;  %vm24293_vm10 = vmmov %vm24289_vm3  ;;  %v8121_v55 = vsel %vm24292_vm1, %v8118_v6, %v8120_v56  ;;  %v18797_v29 = vld [vmem:[#allocation3 + $0x80] sm:$0xff]  }
 0x463   : > { %vm24294_vm14 = vmmov %vm24292_vm1 }
 0x464   : > { %v8115_v37 = vsel %vm24294_vm14, %v8112_v36, %v8114_v16  ;;  %vm24296_vm12 = vmmov %vm24292_vm1 }
 0x465   : > { %v8117_v10 = vsel %vm24296_vm12, %v8114_v16, %v8116_v57  ;;  %vm24297_vm2 = vmmov %vm24292_vm1  ;;  %v8404_v16 = vld [vmem:[#allocation3 + $0x8] sm:$0xe] }
 0x466   : > { %v8119_v45 = vsel %vm24297_vm2, %v8116_v57, %v8118_v6  ;;  %vm24300_vm14 = vmmov %vm24292_vm1 }
 0x467   : > { %17217 = vmatmul.mubr.msk.bf16.gmra.mrb[72].mxu1 %vm24287_vm6, %v8107_v53  ;;  %vm24295_vm6 = vmmov %vm24289_vm3  ;;  %v8124_v53 = vrot.slane %v18795_v28, 1  ;;  %v8123_v15 = vsel %vm24300_vm14, %v8120_v56, %v8122_v18  ;;  %v8545_v56 = vshrl.u32 %v21570_v51, 16 }
 0x468   : > { %17220 = vmatprep.mubr.msk.bf16.mxu1 %vm24289_vm3, %v8109_v12  ;;  %v18796_v12 = vld [vmem:[#allocation3 + $0x78] sm:$0xff]   ;;  %vm24302_vm12 = vmmov %vm24292_vm1 }
 0x469   : > { %v8125_v11 = vsel %vm24302_vm12, %v8122_v18, %v8124_v53  ;;  %v8126_v36 = vrot.slane %v18796_v12, 1  ;;  %vm24303_vm2 = vmmov %vm24292_vm1  ;;  %v8557_v12 = vshll.u32 %v21572_v20, 16 }
 0x46a   : > { %vm24306_vm14 = vmmov %vm24292_vm1 }
 0x46b   : > { %v8127_v50 = vsel %vm24303_vm2, %v8124_v53, %v8126_v36  ;;  %vm24308_vm12 = vmmov %vm24289_vm3  ;;  %v8547_v53 = vrot.slane %v8545_v56, 1 }
 0x46c   : > { %vm24309_vm2 = vmmov %vm24289_vm3 }
 0x46f   : > { %17221 = vmatmul.mubr.msk.bf16.gmra.mrb[76].mxu1 %vm24291_vm4, %v8111_v61  ;;  %vm24298_vm4 = vmmov %vm24289_vm3  ;;  %v8128_v61 = vrot.slane %v18797_v29, 1 }
 0x470   : > { %17224 = vmatprep.mubr.msk.bf16.mxu1 %vm24293_vm10, %v8113_v14  ;;  %vm24299_vm10 = vmmov %vm24289_vm3  ;;  %v18798_v14 = vld [vmem:[#allocation3 + $0x88] sm:$0xff]  }
 0x471   : > { %v8129_v57 = vsel %vm24292_vm1, %v8126_v36, %v8128_v61  ;;  %v8130_v35 = vrot.slane %v18798_v14, 1  ;;  %v8566_v36 = vshll.u32 %v21574_v32, 16 }
 0x473   : > { %v8131_v5 = vsel %vm24306_vm14, %v8128_v61, %v8130_v35 }
 0x477   : > { %17225 = vmatmul.mubr.msk.bf16.gmra.mrb[80].mxu1 %vm24295_vm6, %v8115_v37  ;;  %vm24301_vm6 = vmmov %vm24289_vm3  ;;  %v15526_v37 = vcombine.low %v8404_v16, %v21568_v60  ;;  %v8568_v16 = vrot.slane %v8566_v36, 2 }
 0x478   : > { %17228 = vmatprep.mubr.msk.bf16.mxu1 %vm24289_vm3, %v8117_v10  ;;  %v8132_v10 = vrot.slane %v18799_v39, 1 }
 0x479   : > { %v8537_v23 = vshrl.u32 %v15526_v37, 16  ;;  %v8540_v6 = vshll.u32 %v15526_v37, 16  ;;  %v8572_v37 = vshrl.u32 %v21578_v62, 16 }
 0x47b   : > { %v8539_v28 = vrot.slane %v8537_v23, 1  ;;  %v8542_v18 = vrot.slane %v8540_v6, 2  ;;  %v8581_v23 = vshrl.u32 %v21580_v44, 16  ;;  %v8574_v56 = vrot.slane %v8572_v37, 1 }
 0x47f   : > { %17229 = vmatmul.mubr.msk.bf16.gmra.mrb[84].mxu1 %vm24298_vm4, %v8119_v45  ;;  %vm24304_vm4 = vmmov %vm24289_vm3  ;;  %v8548_v45 = vshll.u32 %v21570_v51, 16  ;;  %v8563_v51 = vshrl.u32 %v21574_v32, 16  ;;  %v8584_v32 = vshll.u32 %v21580_v44, 16 }
 0x480   : > { %17232 = vmatprep.mubr.msk.bf16.mxu1 %vm24299_vm10, %v8121_v55  ;;  %vm24305_vm10 = vmmov %vm24289_vm3 }
 0x481   : > { %v8550_v60 = vrot.slane %v8548_v45, 2  ;;  %v8565_v39 = vrot.slane %v8563_v51, 1 }
 0x483   : > { %v8551_v29 = vor.u32 %v8550_v60, %v8547_v53  ;;  %v8599_v60 = vshrl.u32 %v21586_v2, 16 }
 0x485   : > { %v8601_v36 = vrot.slane %v8599_v60, 1 }
 0x487   : > { %17233 = vmatmul.mubr.msk.bf16.gmra.mrb[88].mxu1 %vm24301_vm6, %v8123_v15  ;;  %vm24307_vm6 = vmmov %vm24292_vm1  ;;  %v8554_v15 = vshrl.u32 %v21572_v20, 16  ;;  %v8575_v20 = vshll.u32 %v21578_v62, 16 }
 0x488   : > { %17236 = vmatprep.mubr.msk.bf16.mxu1 %vm24289_vm3, %v8125_v11  ;;  %v8133_v55 = vsel %vm24307_vm6, %v8130_v35, %v8132_v10  ;;  %v8543_v11 = vor.u32 %v8542_v18, %v8539_v28  ;;  %vm24311_vm1 = vmmov %vm24309_vm2  ;;  %v8569_v35 = vor.u32 %v8568_v16, %v8565_v39  ;;  %v8586_v28 = vrot.slane %v8584_v32, 2  ;;  %v24320_v16 = vld [vmem:[#allocation10_spill] sm:$0xff] }
 0x489   : > { %v8556_v61 = vrot.slane %v8554_v15, 1  ;;  %v8577_v45 = vrot.slane %v8575_v20, 2  ;;  %vm24314_vm6 = vmmov %vm24311_vm1  ;;  %v8593_v18 = vshll.u32 %v21582_v40, 16  ;;  %v8602_v15 = vshll.u32 %v21586_v2, 16 }
 0x48a   : > { %v8617_v2 = vshrl.u32 %v24320_v16, 16 }
 0x48b   : > { %v8578_v44 = vor.u32 %v8577_v45, %v8574_v56  ;;  %v24325_v56 = vld [vmem:[#allocation8_spill] sm:$0xff] }
 0x48c   : > { %v8619_v32 = vrot.slane %v8617_v2, 1  ;;  %v8629_v45 = vshll.u32 %v24325_v56, 16 }
 0x48f   : > { %17237 = vmatmul.mubr.msk.bf16.gmra.mrb[92].mxu1 %vm24304_vm4, %v8127_v50  ;;  %v8559_v50 = vrot.slane %v8557_v12, 2  ;;  %vm24310_vm4 = vsmask.f32 6400 }
 0x490   : > { %17240 = vmatprep.mubr.msk.bf16.mxu1 %vm24305_vm10, %v8129_v57  ;;  %v8552_v14 = vsel %vm24310_vm4, %v8543_v11, %v8551_v29  ;;  %vm24312_vm10 = vcmask 1043456   ;;  %vm24313_vm14 = vmmov %vm24310_vm4  ;;  %v8579_v12 = vsel %vm24310_vm4, %v8569_v35, %v8578_v44 }
 0x491   : > { %v8560_v57 = vor.u32 %v8559_v50, %v8556_v61  ;;  %v9070_v6 = vsel %vm24312_vm10, %v21985_v31, 0  ;;  %v8590_v31 = vshrl.u32 %v21582_v40, 16  ;;  %v8604_v61 = vrot.slane %v8602_v15, 2 }
 0x492   : > { %v8608_v40 = vshrl.u32 %v21590_v52, 16 }
 0x493   : > { %v8592_v11 = vrot.slane %v8590_v31, 1  ;;  %v8605_v39 = vor.u32 %v8604_v61, %v8601_v36 }
 0x494   : > { %v8610_v20 = vrot.slane %v8608_v40, 1 }
 0x497   : > { %17241 = vmatmul.mubr.msk.bf16.gmra.mrb[96].mxu1 %vm24308_vm12, %v8131_v5  ;;  %v22040_v5 = vld [vmem:[%s23567_s5 + $0x18] sm:$0xf]  ;;  %vm24315_vm12 = vmmov %vm24310_vm4 }
 0x498   : > { %17244 = vmatprep.mubr.msk.bf16.mxu1 %vm24289_vm3, %v8133_v55  ;;  %v8570_v62 = vsel %vm24315_vm12, %v8560_v57, %v8569_v35  ;;  %v8583_v55 = vrot.slane %v8581_v23, 1  ;;  %vm24316_vm3 = vmmov %vm24311_vm1 }
 0x499   : > { %vm24322_vm12 = vmmov %vm24311_vm1 }
 0x49a   : > { %v8587_v53 = vor.u32 %v8586_v28, %v8583_v55  ;;  %v24326_v55 = vld [vmem:[#allocation11_spill] sm:$0xff] }
 0x49b   : > { %v8635_v28 = vshrl.u32 %v24326_v55, 16 }
 0x49d   : > { %v8637_v15 = vrot.slane %v8635_v28, 1 }
 0x49f   : > { %17245 = vmatmul.mubr.msk.bf16.gmra.mrb[100].mxu1 %vm24309_vm2, %v8132_v10  ;;  %v8561_v10 = vsel %vm24313_vm14, %v8551_v29, %v8560_v57  ;;  %vm24317_vm2 = vmmov %vm24312_vm10  ;;  %v8595_v29 = vrot.slane %v8593_v18, 2  ;;  %v8620_v57 = vshll.u32 %v24320_v16, 16 }
 0x4a0   : > { %17250 = vmatprep.mubr.msk.bf16.mxu1 %vm24311_vm1, %v8552_v14  ;;  %vm24318_vm10 = vmmov %vm24310_vm4  ;;  %v8611_v14 = vshll.u32 %v21590_v52, 16  ;;  %v8626_v52 = vshrl.u32 %v24325_v56, 16  ;;  %v24336_v56 = vld [vmem:[#allocation16_spill] sm:$0xff] }
 0x4a1   : > { %v8588_v51 = vsel %vm24318_vm10, %v8578_v44, %v8587_v53  ;;  %vm24319_vm14 = vmmov %vm24311_vm1  ;;  %v8596_v50 = vor.u32 %v8595_v29, %v8592_v11  ;;  %v8638_v44 = vshll.u32 %v24326_v55, 16  ;;  %v24330_v29 = vld [vmem:[#allocation9_spill] sm:$0xff] }
 0x4a2   : > { %v8613_v35 = vrot.slane %v8611_v14, 2  ;;  %v8628_v18 = vrot.slane %v8626_v52, 1  ;;  %v8647_v36 = vshll.u32 %v24330_v29, 16  ;;  %v8671_v52 = vshrl.u32 %v24336_v56, 16 }
 0x4a4   : > { %v8649_v2 = vrot.slane %v8647_v36, 2 }
 0x4a7   : > { %17251 = vmatmul.mubr.msk.bf16.vlgmr.msra.gmra.mrb[68].mxu1 %vm24314_vm6, %v8561_v10  ;;  %vm24321_vm6 = vmmov %vm24310_vm4  ;;  %v8614_v10 = vor.u32 %v8613_v35, %v8610_v20 }
 0x4a8   : > { %17254 = vmatprep.mubr.msk.bf16.mxu1 %vm24316_vm3, %v8570_v62  ;;  %17287 = vmatpush3.bf16.msra.mxu1 %v9070_v6  ;;  %v8597_v37 = vsel %vm24321_vm6, %v8587_v53, %v8596_v50  ;;  %vm24323_vm3 = vmmov %vm24310_vm4  ;;  %v8622_v6 = vrot.slane %v8620_v57, 2  ;;  %v8631_v53 = vrot.slane %v8629_v45, 2  ;;  %v8674_v45 = vshll.u32 %v24336_v56, 16 }
 0x4a9   : > { %18662 = vmatprep.subr.msk.bf16.mxu1 %vm24317_vm2, %v22040_v5  ;;  %v8606_v23 = vsel %vm24323_vm3, %v8596_v50, %v8605_v39  ;;  %vm24324_vm2 = vmmov %vm24311_vm1  ;;  %v24331_v50 = vld [vmem:[#allocation7_spill] sm:$0xff] }
 0x4aa   : > { %v8623_v62 = vor.u32 %v8622_v6, %v8619_v32  ;;  %vm24327_vm4 = vmmov %vm24323_vm3  ;;  %v8632_v11 = vor.u32 %v8631_v53, %v8628_v18  ;;  %v8653_v40 = vshrl.u32 %v24331_v50, 16  ;;  %v8656_v14 = vshll.u32 %v24331_v50, 16 }
 0x4ab   : > { %v8615_v31 = vsel %vm24327_vm4, %v8605_v39, %v8614_v10  ;;  %vm24328_vm10 = vmmov %vm24323_vm3  ;;  %v8676_v18 = vrot.slane %v8674_v45, 2  ;;  %v24354_v45 = vld [vmem:[#allocation22_spill] sm:$0xff] }
 0x4ac   : > { %v8624_v60 = vsel %vm24328_vm10, %v8614_v10, %v8623_v62  ;;  %vm24332_vm6 = vmmov %vm24323_vm3  ;;  %v8658_v20 = vrot.slane %v8656_v14, 2 }
 0x4ad   : > { %v8633_v39 = vsel %vm24332_vm6, %v8623_v62, %v8632_v11  ;;  %vm24337_vm4 = vmmov %vm24323_vm3 }
 0x4ae   : > { %vm24338_vm10 = vmmov %vm24323_vm3 }
 0x4af   : > { %17255 = vmatmul.mubr.msk.bf16.gmra.mrb[72].mxu1 %vm24311_vm1, %v8579_v12  ;;  %v8640_v12 = vrot.slane %v8638_v44, 2  ;;  %vm24342_vm6 = vmmov %vm24323_vm3 }
 0x4b0   : > { %17258 = vmatprep.mubr.msk.bf16.mxu1 %vm24319_vm14, %v8588_v51  ;;  %vm24329_vm14 = vmmov %vm24311_vm1  ;;  %v8644_v51 = vshrl.u32 %v24330_v29, 16  ;;  %v24341_v29 = vld [vmem:[#allocation27_spill] sm:$0xff] }
 0x4b1   : > { %v8641_v61 = vor.u32 %v8640_v12, %v8637_v15  ;;  %v8692_v36 = vshll.u32 %v24341_v29, 16 }
 0x4b2   : > { %v8646_v16 = vrot.slane %v8644_v51, 1  ;;  %v8689_v51 = vshrl.u32 %v24341_v29, 16  ;;  %v24379_v29 = vld [vmem:[#allocation38_spill] sm:$0xff] }
 0x4b3   : > { %v8642_v57 = vsel %vm24323_vm3, %v8632_v11, %v8641_v61 }
 0x4b4   : > { %v8650_v35 = vor.u32 %v8649_v2, %v8646_v16  ;;  %v8694_v16 = vrot.slane %v8692_v36, 2  ;;  %v24383_v36 = vld [vmem:[#allocation40_spill] sm:$0xff] }
 0x4b6   : > { %v8651_v62 = vsel %vm24337_vm4, %v8641_v61, %v8650_v35  ;;  %vm24345_vm4 = vmmov %vm24323_vm3 }
 0x4b7   : > { %17259 = vmatmul.mubr.msk.bf16.gmra.mrb[76].mxu1 %vm24322_vm12, %v8597_v37  ;;  %vm24333_vm12 = vmmov %vm24311_vm1  ;;  %v8655_v37 = vrot.slane %v8653_v40, 1 }
 0x4b8   : > { %17262 = vmatprep.mubr.msk.bf16.mxu1 %vm24324_vm2, %v8606_v23  ;;  %vm24334_vm2 = vmmov %vm24311_vm1  ;;  %v24335_v23 = vld [vmem:[#allocation12_spill] sm:$0xff] }
 0x4b9   : > { %v8662_v32 = vshrl.u32 %v24335_v23, 16  ;;  %v8665_v6 = vshll.u32 %v24335_v23, 16  ;;  %v8659_v10 = vor.u32 %v8658_v20, %v8655_v37 }
 0x4bb   : > { %v8664_v55 = vrot.slane %v8662_v32, 1  ;;  %v8667_v28 = vrot.slane %v8665_v6, 2  ;;  %v8660_v44 = vsel %vm24338_vm10, %v8650_v35, %v8659_v10  ;;  %vm24346_vm10 = vmmov %vm24323_vm3  ;;  %v24348_v35 = vld [vmem:[#allocation28_spill] sm:$0xff] }
 0x4bc   : > { %v8698_v23 = vshll.u32 %v24348_v35, 16 }
 0x4bd   : > { %v8668_v53 = vor.u32 %v8667_v28, %v8664_v55  ;;  %v24358_v55 = vld [vmem:[#allocation25_spill] sm:$0xff]  ;;  %v24360_v28 = vld [vmem:[#allocation26_spill] sm:$0xff] }
 0x4be   : > { %v8700_v32 = vrot.slane %v8698_v23, 2 }
 0x4bf   : > { %17263 = vmatmul.mubr.msk.bf16.gmra.mrb[80].mxu1 %vm24311_vm1, %v8615_v31  ;;  %v8673_v31 = vrot.slane %v8671_v52, 1  ;;  %v8669_v61 = vsel %vm24342_vm6, %v8659_v10, %v8668_v53  ;;  %vm24349_vm6 = vmmov %vm24323_vm3  ;;  %v24351_v10 = vld [vmem:[#allocation17_spill] sm:$0xff]  ;;  %v15621_v52 = vld [vmem:[%s23567_s5 + $0x1c] sm:$0xf] }
 0x4c0   : > { %17266 = vmatprep.mubr.msk.bf16.mxu1 %vm24329_vm14, %v8624_v60  ;;  %vm24339_vm14 = vmmov %vm24311_vm1  ;;  %v24340_v60 = vld [vmem:[#allocation13_spill] sm:$0xff] }
 0x4c1   : > { %v8680_v15 = vshrl.u32 %v24340_v60, 16  ;;  %v8683_v12 = vshll.u32 %v24340_v60, 16  ;;  %v8677_v11 = vor.u32 %v8676_v18, %v8673_v31  ;;  %v24366_v31 = vld [vmem:[#allocation31_spill] sm:$0xff]  ;;  %v24368_v18 = vld [vmem:[#allocation32_spill] sm:$0xff]  ;;  %v24371_v60 = vld [vmem:[#allocation34_spill] sm:$0xff] }
 0x4c3   : > { %v8682_v50 = vrot.slane %v8680_v15, 1  ;;  %v8685_v40 = vrot.slane %v8683_v12, 2  ;;  %v8678_v14 = vsel %vm24323_vm3, %v8668_v53, %v8677_v11  ;;  %vm24352_vm3 = vmmov %vm24311_vm1  ;;  %v24370_v53 = vld [vmem:[#allocation33_spill] sm:$0xff]  ;;  %v24373_v15 = vld [vmem:[#allocation35_spill] sm:$0xff] }
 0x4c4   : > { %v24375_v12 = vld [vmem:[#allocation36_spill] sm:$0xff] }
 0x4c5   : > { %v8686_v2 = vor.u32 %v8685_v40, %v8682_v50  ;;  %v24385_v50 = vld [vmem:[#allocation42_spill] sm:$0xff] }
 0x4c6   : > { %v9417_v40 = vrot.slane %v24385_v50, 2  ;;  %v24434_v50 = vld [vmem:[#allocation49_spill] sm:$0xff] }
 0x4c7   : > { %17267 = vmatmul.mubr.msk.bf16.gmra.mrb[84].mxu1 %vm24333_vm12, %v8633_v39  ;;  %vm24343_vm12 = vmmov %vm24311_vm1  ;;  %v8691_v39 = vrot.slane %v8689_v51, 1  ;;  %v8687_v37 = vsel %vm24345_vm4, %v8677_v11, %v8686_v2  ;;  %v24377_v11 = vld [vmem:[#allocation37_spill] sm:$0xff]  ;;  %v24381_v51 = vld [vmem:[#allocation39_spill] sm:$0xff] }
 0x4c8   : > { %17270 = vmatprep.mubr.msk.bf16.mxu1 %vm24334_vm2, %v8642_v57  ;;  %vm24344_vm2 = vmmov %vm24311_vm1 }
 0x4c9   : > { %v8695_v57 = vor.u32 %v8694_v16, %v8691_v39  ;;  %vm24355_vm4 = vmmov %vm24311_vm1  ;;  %v9420_v16 = vrot.slane %v21698_v49, 2  ;;  %v9424_v49 = vrot.slane %v21704_v4, 2 }
 0x4cb   : > { %v8696_v20 = vsel %vm24346_vm10, %v8686_v2, %v8695_v57  ;;  %v8701_v6 = vsel %vm24349_vm6, %v8695_v57, %v8700_v32  ;;  %vm24361_vm6 = vmmov %vm24311_vm1  ;;  %v9422_v2 = vrot.slane %v21702_v38, 2  ;;  %v9426_v38 = vrot.slane %v21714_v3, 2 }
 0x4cc   : > { %v9428_v32 = vrot.slane %v21720_v33, 2  ;;  %v9432_v3 = vrot.slane %v21732_v0, 2 }
 0x4cf   : > { %17271 = vmatmul.mubr.msk.bf16.gmra.mrb[88].mxu1 %vm24311_vm1, %v8651_v62  ;;  %v24356_v62 = vld [vmem:[#allocation24_spill] sm:$0xff] }
 0x4d0   : > { %17274 = vmatprep.mubr.msk.bf16.mxu1 %vm24339_vm14, %v8660_v44  ;;  %vm24347_vm14 = vmmov %vm24311_vm1  ;;  %v24364_v44 = vld [vmem:[#allocation30_spill] sm:$0xff] }
 0x4d7   : > { %17275 = vmatmul.mubr.msk.bf16.gmra.mrb[92].mxu1 %vm24343_vm12, %v8669_v61  ;;  %vm24350_vm12 = vmmov %vm24311_vm1  ;;  %v9418_v61 = vrot.slane %v21696_v42, 2  ;;  %v15641_v42 = vld [vmem:[%s23567_s5 + $0x20] sm:$0xf] }
 0x4d8   : > { %17278 = vmatprep.mubr.msk.bf16.mxu1 %vm24344_vm2, %v8678_v14  ;;  %vm24353_vm2 = vcmask 1043456   ;;  %v24386_v14 = vld [vmem:[#allocation41_spill] sm:$0xff] }
 0x4d9   : > { %v9509_v56 = vsel %vm24353_vm2, %v22040_v5, 0  ;;  %vm24357_vm10 = vmmov %vm24353_vm2  ;;  %v24362_v5 = vld [vmem:[#allocation29_spill] sm:$0xff] }
 0x4da   : > { %vm24367_vm2 = vmmov %vm24311_vm1 }
 0x4df   : > { %17279 = vmatmul.mubr.msk.bf16.gmra.mrb[96].mxu1 %vm24311_vm1, %v8687_v37 }
 0x4e0   : > { %17282 = vmatprep.mubr.msk.bf16.mxu1 %vm24347_vm14, %v8696_v20  ;;  %vm24359_vm14 = vmmov %vm24311_vm1 }
 0x4e7   : > { %17283 = vmatmul.mubr.msk.bf16.gmra.mrb[100].mxu1 %vm24350_vm12, %v8701_v6  ;;  %vm24363_vm12 = vmmov %vm24311_vm1  ;;  %v9430_v6 = vrot.slane %v21729_v59, 2  ;;  %v9436_v59 = vrot.slane %v21745_v13, 2 }
 0x4e8   : > { %17288 = vmatprep.mubr.msk.bf16.mxu1 %vm24352_vm3, %v24351_v10  ;;  %vm24365_vm3 = vmmov %vm24311_vm1 }
 0x4ef   : > { %17289 = vmatmul.mubr.msk.bf16.vlgmr.msra.gmra.mrb[68].mxu1 %vm24355_vm4, %v24354_v45  ;;  %vm24369_vm4 = vmmov %vm24311_vm1  ;;  %v9438_v45 = vrot.slane %v21754_v21, 2  ;;  %v9444_v21 = vrot.slane %v21776_v24, 2 }
 0x4f0   : > { %17292 = vmatprep.mubr.msk.bf16.mxu1 %vm24311_vm1, %v24356_v62  ;;  %17325 = vmatpush3.bf16.msra.mxu1 %v9509_v56  ;;  %v9434_v56 = vrot.slane %v21736_v1, 2  ;;  %v9440_v1 = vrot.slane %v21763_v27, 2 }
 0x4f1   : > { %18663 = vmatprep.subr.msk.bf16.mxu1 %vm24357_vm10, %v15621_v52  ;;  %vm24372_vm10 = vmmov %vm24311_vm1 }
 0x4f7   : > { %17293 = vmatmul.mubr.msk.bf16.gmra.mrb[72].mxu1 %vm24359_vm14, %v24358_v55  ;;  %vm24374_vm14 = vmmov %vm24311_vm1  ;;  %v9442_v55 = vrot.slane %v21770_v8, 2  ;;  %v9448_v8 = vrot.slane %v21794_v48, 2 }
 0x4f8   : > { %17296 = vmatprep.mubr.msk.bf16.mxu1 %vm24361_vm6, %v24360_v28  ;;  %vm24376_vm6 = vmmov %vm24311_vm1 }
 0x4ff   : > { %17297 = vmatmul.mubr.msk.bf16.gmra.mrb[76].mxu1 %vm24363_vm12, %v24362_v5  ;;  %vm24378_vm12 = vmmov %vm24311_vm1  ;;  %v9446_v5 = vrot.slane %v21785_v9, 2 }
 0x500   : > { %17300 = vmatprep.mubr.msk.bf16.mxu1 %vm24365_vm3, %v24364_v44  ;;  %vm24380_vm3 = vmmov %vm24311_vm1 }
 0x507   : > { %17301 = vmatmul.mubr.msk.bf16.gmra.mrb[80].mxu1 %vm24367_vm2, %v24366_v31  ;;  %vm24382_vm2 = vmmov %vm24311_vm1  ;;  %v9450_v31 = vrot.slane %v21803_v19, 2  ;;  %v24423_v19 = vld [vmem:[#allocation44_spill] sm:$0xff] }
 0x508   : > { %17304 = vmatprep.mubr.msk.bf16.mxu1 %vm24369_vm4, %v24368_v18  ;;  %vm24384_vm4 = vmmov %vm24311_vm1 }
 0x50f   : > { %17305 = vmatmul.mubr.msk.bf16.gmra.mrb[84].mxu1 %vm24311_vm1, %v24370_v53  ;;  %v18838_v53 = vld [vmem:[#allocation3 + $0xa0] ss:$0 sps:$4 sm:$0x11]  }
 0x510   : > { %17308 = vmatprep.mubr.msk.bf16.mxu1 %vm24372_vm10, %v24371_v60  ;;  %vm24387_vm10 = vcmask 1045504   ;;  %v9452_v9 = vrot.slane %v18838_v53, 2 }
 0x511   : > { %v9419_v39 = vsel %vm24387_vm10, %v9417_v40, %v9418_v61  ;;  %v24436_v40 = vld [vmem:[#allocation50_spill] sm:$0xff] }
 0x517   : > { %17309 = vmatmul.mubr.msk.bf16.gmra.mrb[88].mxu1 %vm24374_vm14, %v24373_v15  ;;  %vm24388_vm14 = vmmov %vm24311_vm1  ;;  %v24420_v15 = vld [vmem:[#allocation43_spill] sm:$0xff] }
 0x518   : > { %17312 = vmatprep.mubr.msk.bf16.mxu1 %vm24376_vm6, %v24375_v12  ;;  %vm24389_vm6 = vcmask 1043456   ;;  %v24425_v12 = vld [vmem:[#allocation45_spill] sm:$0xff] }
 0x519   : > { %v9955_v57 = vsel %vm24389_vm6, %v15621_v52, 0 }
 0x51f   : > { %17313 = vmatmul.mubr.msk.bf16.gmra.mrb[92].mxu1 %vm24378_vm12, %v24377_v11  ;;  %vm24390_vm12 = vmmov %vm24387_vm10  ;;  %v24427_v11 = vld [vmem:[#allocation46_spill] sm:$0xff] }
 0x520   : > { %17316 = vmatprep.mubr.msk.bf16.mxu1 %vm24380_vm3, %v24379_v29  ;;  %v9421_v37 = vsel %vm24390_vm12, %v9418_v61, %v9420_v16  ;;  %vm24391_vm3 = vmmov %vm24311_vm1  ;;  %v15706_v29 = vld [vmem:[%s23569_s7 + $0x4] sm:$0xf] }
 0x521   : > { %vm24398_vm12 = vmmov %vm24391_vm3  ;;  %v24433_v61 = vld [vmem:[#allocation48_spill] sm:$0xff] }
 0x527   : > { %17317 = vmatmul.mubr.msk.bf16.gmra.mrb[96].mxu1 %vm24382_vm2, %v24381_v51  ;;  %vm24392_vm2 = vmmov %vm24387_vm10  ;;  %v24429_v51 = vld [vmem:[#allocation47_spill] sm:$0xff] }
 0x528   : > { %17320 = vmatprep.mubr.msk.bf16.mxu1 %vm24384_vm4, %v24383_v36  ;;  %v9423_v20 = vsel %vm24392_vm2, %v9420_v16, %v9422_v2  ;;  %vm24393_vm4 = vmmov %vm24311_vm1  ;;  %v24442_v16 = vld [vmem:[#allocation53_spill] sm:$0xff] }
 0x529   : > { %vm24395_vm10 = vmmov %vm24392_vm2 }
 0x52a   : > { %v9425_v35 = vsel %vm24395_vm10, %v9422_v2, %v9424_v49  ;;  %v9892_v2 = vshrl.u32 %v21877_v26, 16 }
 0x52f   : > { %17321 = vmatmul.mubr.msk.bf16.gmra.mrb[100].mxu1 %vm24311_vm1, %v24386_v14  ;;  %vm24394_vm1 = vmmov %vm24389_vm6  ;;  %v24438_v14 = vld [vmem:[#allocation51_spill] sm:$0xff] }
 0x530   : > { %17326 = vmatprep.mubr.msk.bf16.mxu1 %vm24388_vm14, %v9419_v39  ;;  %vm24396_vm14 = vmmov %vm24391_vm3  ;;  %v24440_v39 = vld [vmem:[#allocation52_spill] sm:$0xff] }
 0x531   : > { %vm24397_vm6 = vmmov %vm24392_vm2 }
 0x532   : > { %v9427_v23 = vsel %vm24397_vm6, %v9424_v49, %v9426_v38  ;;  %v24473_v49 = vld [vmem:[#allocation64_spill] sm:$0xff] }
 0x537   : > { %17327 = vmatmul.mubr.msk.bf16.vlgmr.msra.gmra.mrb[68].mxu1 %vm24391_vm3, %v9421_v37  ;;  %vm24399_vm3 = vmmov %vm24392_vm2  ;;  %v9894_v37 = vrot.slane %v9892_v2, 2 }
 0x538   : > { %17330 = vmatprep.mubr.msk.bf16.mxu1 %vm24393_vm4, %v9423_v20  ;;  %17363 = vmatpush3.bf16.msra.mxu1 %v9955_v57  ;;  %v9429_v10 = vsel %vm24399_vm3, %v9426_v38, %v9428_v32  ;;  %vm24400_vm2 = vmmov %vm24393_vm4  ;;  %v9437_v62 = vsel %vm24399_vm3, %v9434_v56, %v9436_v59  ;;  %v9445_v44 = vsel %vm24399_vm3, %v9442_v55, %v9444_v21  ;;  %v9895_v57 = vshll.u32 %v21877_v26, 16  ;;  %v24469_v26 = vld [vmem:[#allocation62_spill] sm:$0xff]  ;;  %v24471_v20 = vld [vmem:[#allocation63_spill] sm:$0xff] }
 0x539   : > { %18664 = vmatprep.subr.msk.bf16.mxu1 %vm24394_vm1, %v15641_v42  ;;  %vm24401_vm4 = vmmov %vm24399_vm3  ;;  %v9453_v60 = vsel %vm24399_vm3, %v9450_v31, %v9452_v9  ;;  %v24474_v38 = vld [vmem:[#allocation65_spill] sm:$0xff] }
 0x53a   : > { %v9431_v4 = vsel %vm24401_vm4, %v9428_v32, %v9430_v6  ;;  %vm24402_vm1 = vmmov %vm24400_vm2  ;;  %v11283_v32 = vld [vmem:[#allocation4 + $0x4] sm:$0xf] }
 0x53b   : > { %vm24403_vm10 = vmmov %vm24399_vm3 }
 0x53c   : > { %v9433_v52 = vsel %vm24403_vm10, %v9430_v6, %v9432_v3  ;;  %vm24405_vm6 = vmmov %vm24399_vm3 }
 0x53d   : > { %v9435_v33 = vsel %vm24405_vm6, %v9432_v3, %v9434_v56  ;;  %vm24408_vm4 = vmmov %vm24399_vm3 }
 0x53e   : > { %v9439_v0 = vsel %vm24408_vm4, %v9436_v59, %v9438_v45  ;;  %vm24409_vm10 = vmmov %vm24399_vm3 }
 0x53f   : > { %17331 = vmatmul.mubr.msk.bf16.gmra.mrb[72].mxu1 %vm24396_vm14, %v9425_v35  ;;  %vm24404_vm14 = vmmov %vm24402_vm1  ;;  %v9441_v28 = vsel %vm24409_vm10, %v9438_v45, %v9440_v1  ;;  %v11318_v35 = vld [vmem:[%s23569_s7] sm:$0xf] }
 0x540   : > { %17334 = vmatprep.mubr.msk.bf16.mxu1 %vm24398_vm12, %v9427_v23  ;;  %vm24406_vm12 = vmmov %vm24402_vm1  ;;  %v11282_v23 = vld [vmem:[#allocation4] sm:$0xf] }
 0x541   : > { %vm24411_vm6 = vmmov %vm24399_vm3  ;;  %v22288_v6 = vcombine.low %v11282_v23, %v11283_v32  ;;  %v10594_v23 = vld [vmem:[#allocation4 + $0x10] sm:$0x3] }
 0x542   : > { %v9443_v13 = vsel %vm24411_vm6, %v9440_v1, %v9442_v55  ;;  %vm24414_vm4 = vmmov %vm24399_vm3 }
 0x543   : > { %v9447_v27 = vsel %vm24414_vm4, %v9444_v21, %v9446_v5  ;;  %vm24415_vm10 = vmmov %vm24399_vm3  ;;  %v11413_v45 = vshrl.u32 %v22288_v6, 16 }
 0x544   : > { %v9449_v18 = vsel %vm24415_vm10, %v9446_v5, %v9448_v8  ;;  %vm24417_vm6 = vmmov %vm24399_vm3 }
 0x545   : > { %v9451_v24 = vsel %vm24417_vm6, %v9448_v8, %v9450_v31  ;;  %vm24421_vm4 = vmmov %vm24402_vm1  ;;  %v10638_v31 = vld [vmem:[#allocation4 + $0x10] sm:$0xc] }
 0x547   : > { %17335 = vmatmul.mubr.msk.bf16.gmra.mrb[76].mxu1 %vm24400_vm2, %v9429_v10  ;;  %vm24407_vm2 = vmmov %vm24402_vm1 }
 0x548   : > { %17338 = vmatprep.mubr.msk.bf16.mxu1 %vm24402_vm1, %v9431_v4 }
 0x54f   : > { %17339 = vmatmul.mubr.msk.bf16.gmra.mrb[80].mxu1 %vm24404_vm14, %v9433_v52  ;;  %vm24410_vm14 = vmmov %vm24402_vm1 }
 0x550   : > { %17342 = vmatprep.mubr.msk.bf16.mxu1 %vm24406_vm12, %v9435_v33  ;;  %vm24412_vm12 = vmmov %vm24402_vm1 }
 0x557   : > { %17343 = vmatmul.mubr.msk.bf16.gmra.mrb[84].mxu1 %vm24407_vm2, %v9437_v62  ;;  %vm24413_vm2 = vmmov %vm24402_vm1 }
 0x558   : > { %17346 = vmatprep.mubr.msk.bf16.mxu1 %vm24402_vm1, %v9439_v0 }
 0x55f   : > { %17347 = vmatmul.mubr.msk.bf16.gmra.mrb[88].mxu1 %vm24410_vm14, %v9441_v28  ;;  %vm24416_vm14 = vmmov %vm24402_vm1 }
 0x560   : > { %17350 = vmatprep.mubr.msk.bf16.mxu1 %vm24412_vm12, %v9443_v13  ;;  %vm24418_vm12 = vmmov %vm24402_vm1 }
 0x567   : > { %17351 = vmatmul.mubr.msk.bf16.gmra.mrb[92].mxu1 %vm24413_vm2, %v9445_v44  ;;  %vm24419_vm2 = vmmov %vm24402_vm1 }
 0x568   : > { %17354 = vmatprep.mubr.msk.bf16.mxu1 %vm24402_vm1, %v9447_v27  ;;  %vm24422_vm1 = vcmask 1043456   ;;  %vm24424_vm0 = vmmov %vm24419_vm2 }
 0x569   : > { %v10268_v48 = vsel %vm24422_vm1, %v15641_v42, 0  ;;  %vm24426_vm10 = vmmov %vm24424_vm0  ;;  %v9897_v42 = vrot.slane %v9895_v57, 3 }
 0x56a   : > { %vm24430_vm6 = vmmov %vm24424_vm0 }
 0x56b   : > { %vm24432_vm3 = vmmov %vm24422_vm1 }
 0x56c   : > { %v11610_v36 = vsel %vm24432_vm3, %v15706_v29, 0  ;;  %vm24446_vm3 = vmmov %vm24424_vm0 }
 0x56f   : > { %17355 = vmatmul.mubr.msk.bf16.gmra.mrb[96].mxu1 %vm24416_vm14, %v9449_v18  ;;  %vm24428_vm14 = vmmov %vm24424_vm0 }
 0x570   : > { %17358 = vmatprep.mubr.msk.bf16.mxu1 %vm24418_vm12, %v9451_v24  ;;  %vm24431_vm12 = vmmov %vm24422_vm1 }
 0x571   : > { %18665 = vmatprep.subr.msk.bf16.mxu0 %vm24431_vm12, %v15706_v29  ;;  %vm24439_vm1 = vmmov %vm24424_vm0 }
 0x572   : > { %17439 = vmatpush3.bf16.msra.mxu0 %v11610_v36  ;;  %vm24445_vm12 = vmmov %vm24424_vm0 }
 0x577   : > { %17359 = vmatmul.mubr.msk.bf16.gmra.mrb[100].mxu1 %vm24419_vm2, %v9453_v60  ;;  %vm24435_vm2 = vmmov %vm24424_vm0 }
 0x578   : > { %17364 = vmatprep.mubr.msk.bf16.mxu1 %vm24421_vm4, %v24420_v15  ;;  %vm24437_vm4 = vmmov %vm24424_vm0 }
 0x57f   : > { %17365 = vmatmul.mubr.msk.bf16.vlgmr.msra.gmra.mrb[68].mxu1 %vm24424_vm0, %v24423_v19 }
 0x580   : > { %17368 = vmatprep.mubr.msk.bf16.mxu1 %vm24426_vm10, %v24425_v12  ;;  %17401 = vmatpush3.bf16.msra.mxu1 %v10268_v48  ;;  %vm24441_vm10 = vmmov %vm24424_vm0 }
 0x587   : > { %17369 = vmatmul.mubr.msk.bf16.gmra.mrb[72].mxu1 %vm24428_vm14, %v24427_v11  ;;  %vm24443_vm14 = vmmov %vm24424_vm0 }
 0x588   : > { %17372 = vmatprep.mubr.msk.bf16.mxu1 %vm24430_vm6, %v24429_v51  ;;  %vm24444_vm6 = vmmov %vm24424_vm0 }
 0x58f   : > { %17373 = vmatmul.mubr.msk.bf16.gmra.mrb[76].mxu1 %vm24424_vm0, %v24433_v61 }
 0x590   : > { %17376 = vmatprep.mubr.msk.bf16.mxu1 %vm24435_vm2, %v24434_v50  ;;  %vm24447_vm2 = vmmov %vm24424_vm0 }
 0x597   : > { %17377 = vmatmul.mubr.msk.bf16.gmra.mrb[80].mxu1 %vm24437_vm4, %v24436_v40  ;;  %vm24448_vm4 = vmmov %vm24424_vm0 }
 0x598   : > { %17380 = vmatprep.mubr.msk.bf16.mxu1 %vm24439_vm1, %v24438_v14  ;;  %vm24449_vm1 = vsmask.f32 5376  ;;  %v10590_v14 = vld [vmem:[#allocation4 + $0x8] sm:$0xe] }
 0x59f   : > { %17381 = vmatmul.mubr.msk.bf16.gmra.mrb[84].mxu1 %vm24441_vm10, %v24440_v39  ;;  %vm24450_vm10 = vmmov %vm24424_vm0 }
 0x5a0   : > { %17384 = vmatprep.mubr.msk.bf16.mxu1 %vm24443_vm14, %v24442_v16  ;;  %vm24451_vm14 = vmmov %vm24424_vm0 }
 0x5a7   : > { %17385 = vmatmul.mubr.msk.bf16.gmra.mrb[88].mxu1 %vm24444_vm6, %v21817_v54  ;;  %v9898_v54 = vor.u32 %v9897_v42, %v9894_v37  ;;  %vm24452_vm6 = vmmov %vm24424_vm0 }
 0x5a8   : > { %17388 = vmatprep.mubr.msk.bf16.mxu1 %vm24445_vm12, %v21821_v41  ;;  %vm24453_vm12 = vmmov %vm24424_vm0 }
 0x5a9   : > { %v9899_v41 = vsel %vm24449_vm1, %v21847_v17, %v9898_v54  ;;  %v24459_v17 = vld [vmem:[#allocation57_spill] sm:$0xff]  ;;  %vm24462_vm1 = vmmov %vm24424_vm0 }
 0x5af   : > { %17389 = vmatmul.mubr.msk.bf16.gmra.mrb[92].mxu1 %vm24446_vm3, %v21825_v47  ;;  %v24454_v47 = vld [vmem:[#allocation54_spill] sm:$0xff]  ;;  %vm24455_vm3 = vmmov %vm24424_vm0 }
 0x5b0   : > { %17392 = vmatprep.mubr.msk.bf16.mxu1 %vm24424_vm0, %v21838_v58  ;;  %v24456_v58 = vld [vmem:[#allocation55_spill] sm:$0xff] }
 0x5b7   : > { %17393 = vmatmul.mubr.msk.bf16.gmra.mrb[96].mxu1 %vm24447_vm2, %v21845_v30  ;;  %v24457_v30 = vld [vmem:[#allocation56_spill] sm:$0xff]  ;;  %vm24458_vm2 = vmmov %vm24424_vm0 }
 0x5b8   : > { %17396 = vmatprep.mubr.msk.bf16.mxu1 %vm24448_vm4, %v21860_v63  ;;  %vm24460_vm4 = vmmov %vm24424_vm0  ;;  %v24461_v63 = vld [vmem:[#allocation58_spill] sm:$0xff] }
 0x5bf   : > { %17397 = vmatmul.mubr.msk.bf16.gmra.mrb[100].mxu1 %vm24450_vm10, %v9899_v41  ;;  %vm24464_vm10 = vmmov %vm24424_vm0 }
 0x5c0   : > { %17402 = vmatprep.mubr.msk.bf16.mxu1 %vm24451_vm14, %v21863_v43  ;;  %v24463_v43 = vld [vmem:[#allocation59_spill] sm:$0xff]  ;;  %vm24466_vm14 = vmmov %vm24424_vm0 }
 0x5c7   : > { %17403 = vmatmul.mubr.msk.bf16.vlgmr.msra.gmra.mrb[68].mxu1 %vm24452_vm6, %v21850_v22  ;;  %v24465_v22 = vld [vmem:[#allocation60_spill] sm:$0xff]  ;;  %vm24468_vm6 = vmmov %vm24424_vm0 }
 0x5c8   : > { %17406 = vmatprep.mubr.msk.bf16.mxu1 %vm24453_vm12, %v21867_v46  ;;  %v24467_v46 = vld [vmem:[#allocation61_spill] sm:$0xff]  ;;  %vm24470_vm12 = vmmov %vm24424_vm0 }
 0x5cf   : > { %17407 = vmatmul.mubr.msk.bf16.gmra.mrb[72].mxu1 %vm24455_vm3, %v24454_v47  ;;  %vm24472_vm3 = vmmov %vm24424_vm0 }
 0x5d0   : > { %17410 = vmatprep.mubr.msk.bf16.mxu1 %vm24424_vm0, %v24456_v58 }
 0x5d7   : > { %17411 = vmatmul.mubr.msk.bf16.gmra.mrb[76].mxu1 %vm24458_vm2, %v24457_v30  ;;  %vm24475_vm2 = vmmov %vm24424_vm0 }
 0x5d8   : > { %17414 = vmatprep.mubr.msk.bf16.mxu1 %vm24460_vm4, %v24459_v17  ;;  %vm24476_vm4 = vmmov %vm24424_vm0 }
 0x5df   : > { %17415 = vmatmul.mubr.msk.bf16.gmra.mrb[80].mxu1 %vm24462_vm1, %v24461_v63  ;;  %vm24477_vm1 = vmmov %vm24424_vm0 }
 0x5e0   : > { %17418 = vmatprep.mubr.msk.bf16.mxu1 %vm24464_vm10, %v24463_v43  ;;  %vm24478_vm10 = vmmov %vm24424_vm0 }
 0x5e7   : > { %17419 = vmatmul.mubr.msk.bf16.gmra.mrb[84].mxu1 %vm24466_vm14, %v24465_v22  ;;  %vm24479_vm14 = vcmask 1043456  }
 0x5e8   : > { %17422 = vmatprep.mubr.msk.bf16.mxu1 %vm24468_vm6, %v24467_v46  ;;  %18666 = vmatprep.subr.msk.bf16.mxu0 %vm24479_vm14, %v11318_v35  ;;  %vm24480_vm6 = vmmov %vm24479_vm14  ;;  %vm24497_vm14 = vsmask.f32 7424 }
 0x5e9   : > { %v22304_v60 = vsel %vm24480_vm6, %v11318_v35, 0  ;;  %vm24498_vm6 = vcmask 64512  }
 0x5ef   : > { %17423 = vmatmul.mubr.msk.bf16.gmra.mrb[88].mxu1 %vm24470_vm12, %v24469_v26  ;;  %vm24484_vm12 = vcmask 60416  }
 0x5f0   : > { %17426 = vmatprep.mubr.msk.bf16.mxu1 %vm24472_vm3, %v24471_v20  ;;  %vm24485_vm3 = vmmov %vm24484_vm12 }
 0x5f7   : > { %17427 = vmatmul.mubr.msk.bf16.gmra.mrb[92].mxu1 %vm24424_vm0, %v24473_v49  ;;  %vm24490_vm0 = vmmov %vm24485_vm3 }
 0x5f8   : > { %17430 = vmatprep.mubr.msk.bf16.mxu1 %vm24475_vm2, %v24474_v38 }
 0x5ff   : > { %17431 = vmatmul.mubr.msk.bf16.gmra.mrb[96].mxu1 %vm24476_vm4, %v21930_v34  ;;  %v22293_v34 = vld [vmem:[%s23568_s6] ss:$0 sm:$0xff] }
 0x600   : > { %17434 = vmatprep.mubr.msk.bf16.mxu1 %vm24477_vm1, %v21933_v7  ;;  %v11415_v7 = vshll.u32 %v22288_v6, 16  ;;  %vm24495_vm1 = vmmov %vm24490_vm0 }
 0x602   : > { %v11417_v62 = vrot.slane %v11415_v7, 1 }
 0x604   : > { %v22301_v8 = vor.u32 %v11417_v62, %v11413_v45 }
 0x607   : > { %17435 = vmatmul.mubr.msk.bf16.gmra.mrb[100].mxu1 %vm24478_vm10, %v21936_v25  ;;  %vm24496_vm10 = vmmov %vm24490_vm0 }
 0x69a   : > { %v17404_v10 = vpop.f32.mrb[68].mxu1 }
 0x69b   : > { %v10492_v25 = vadd.f32 %v17404_v10, %v22293_v34  ;;  %v10304_v4 = vpop.f32.mrb[69].mxu1 }
 0x69c   : > { %v10490_v3 = vadd.f32 %v22293_v34, %v10304_v4  ;;  %v17405_v56 = vpop.f32.mrb[70].mxu1 }
 0x69d   : > { %v10528_v52 = vmax.f32 %v10492_v25, 0.0  ;;  %v10493_v33 = vadd.f32 %v17405_v56, %v22293_v34  ;;  %v10307_v59 = vpop.f32.mrb[71].mxu1 }
 0x69e   : > { %v10526_v0 = vmax.f32 %v10490_v3, 0.0  ;;  %v10491_v1 = vadd.f32 %v22293_v34, %v10307_v59 }
 0x69f   : > { %v16071_v55 = vpack.c.bf16 %v10528_v52, %v10528_v52  ;;  %v10529_v28 = vmax.f32 %v10493_v33, 0.0 }
 0x6a0   : > { %v16069_v13 = vpack.c.bf16 %v10526_v0, %v10526_v0  ;;  %v10527_v21 = vmax.f32 %v10491_v1, 0.0 }
 0x6a1   : > { %v10608_v5 = vshrl.u32 %v16071_v55, 16  ;;  %v10611_v44 = vshll.u32 %v16071_v55, 16  ;;  %v16072_v27 = vpack.c.bf16 %v10529_v28, %v10529_v28 }
 0x6a2   : > { %v10569_v18 = vshrl.u32 %v16069_v13, 16  ;;  %v10572_v53 = vshll.u32 %v16069_v13, 16  ;;  %v16070_v24 = vpack.c.bf16 %v10527_v21, %v10527_v21  ;;  %v17408_v9 = vpop.f32.mrb[72].mxu1 }
 0x6a3   : > { %v10610_v15 = vrot.slane %v10608_v5, 6  ;;  %v10613_v48 = vrot.slane %v10611_v44, 7  ;;  %v10617_v19 = vshrl.u32 %v16072_v27, 16  ;;  %v10620_v12 = vshll.u32 %v16072_v27, 16  ;;  %v10320_v11 = vpop.f32.mrb[73].mxu1 }
 0x6a4   : > { %v10571_v29 = vrot.slane %v10569_v18, 6  ;;  %v10574_v51 = vrot.slane %v10572_v53, 7  ;;  %v10578_v36 = vshrl.u32 %v16070_v24, 16  ;;  %v10581_v61 = vshll.u32 %v16070_v24, 16  ;;  %v17409_v50 = vpop.f32.mrb[74].mxu1 }
 0x6a5   : > { %v10614_v40 = vor.u32 %v10613_v48, %v10610_v15  ;;  %v10619_v39 = vrot.slane %v10617_v19, 6  ;;  %v10622_v16 = vrot.slane %v10620_v12, 7  ;;  %v10496_v2 = vadd.f32 %v17408_v9, %v22293_v34  ;;  %v10323_v57 = vpop.f32.mrb[75].mxu1  ;;  %v10686_v27 = vld [vmem:[#allocation4 + $0x18] sm:$0x8] }
 0x6a6   : > { %v10575_v37 = vor.u32 %v10574_v51, %v10571_v29  ;;  %v10580_v42 = vrot.slane %v10578_v36, 6  ;;  %v10583_v54 = vrot.slane %v10581_v61, 7  ;;  %v10494_v41 = vadd.f32 %v22293_v34, %v10320_v11  ;;  %v10642_v36 = vld [vmem:[#allocation4 + $0x18] sm:$0x7] }
 0x6a7   : > { %v10615_v47 = vrot.slane %v10614_v40, 4  ;;  %v10639_v30 = vsel %vm21043_vm5, %v10614_v40, %v10638_v31  ;;  %v10623_v17 = vor.u32 %v10622_v16, %v10619_v39  ;;  %v10532_v63 = vmax.f32 %v10496_v2, 0.0 }
 0x6a8   : > { %10640 = vst [vmem:[#allocation4 + $0x10] sm:$0xc] %v10639_v30  ;;  %v10576_v43 = vrot.slane %v10575_v37, 4  ;;  %v10591_v46 = vsel %vm21049_vm11, %v10575_v37, %v10590_v14  ;;  %v10584_v26 = vor.u32 %v10583_v54, %v10580_v42  ;;  %v10530_v20 = vmax.f32 %v10494_v41, 0.0 }
 0x6a9   : > { %10592 = vst [vmem:[#allocation4 + $0x8] sm:$0xe] %v10591_v46  ;;  %v10624_v38 = vsel %vm23842_vm9, %v10615_v47, %v10623_v17  ;;  %v10625_v35 = vrot.slane %v10623_v17, 4  ;;  %v16076_v32 = vpack.c.bf16 %v10532_v63, %v10532_v63  ;;  %v10497_v7 = vadd.f32 %v17409_v50, %v22293_v34 }
 0x6aa   : > { %10641 = vst.msk [vmem:[#allocation4 + $0x14] sm:$0xf] %vm24484_vm12, %v10624_v38  ;;  %v10585_v10 = vsel %vm23842_vm9, %v10576_v43, %v10584_v26  ;;  %v10586_v25 = vrot.slane %v10584_v26, 4  ;;  %v16073_v4 = vpack.c.bf16 %v10530_v20, %v10530_v20  ;;  %v10495_v3 = vadd.f32 %v22293_v34, %v10323_v57  ;;  %v17412_v56 = vpop.f32.mrb[76].mxu1  ;;  %v10735_v57 = vld [vmem:[#allocation4 + $0x24] sm:$0xf]  ;;  %vm24499_vm12 = vmmov %vm24490_vm0 }
 0x6ab   : > { %10593 = vst.msk [vmem:[#allocation4 + $0xc] sm:$0xf] %vm24485_vm3, %v10585_v10  ;;  %v10675_v52 = vshrl.u32 %v16076_v32, 16  ;;  %v10678_v33 = vshll.u32 %v16076_v32, 16  ;;  %v10533_v59 = vmax.f32 %v10497_v7, 0.0  ;;  %v10500_v45 = vadd.f32 %v17412_v56, %v22293_v34  ;;  %v10336_v62 = vpop.f32.mrb[77].mxu1  ;;  %vm24500_vm3 = vmmov %vm24490_vm0 }
 0x6ac   : > { %v10595_v1 = vsel %vm21067_vm15, %v10586_v25, %v10594_v23  ;;  %v10627_v55 = vshrl.u32 %v16073_v4, 16  ;;  %v10630_v28 = vshll.u32 %v16073_v4, 16  ;;  %v10531_v13 = vmax.f32 %v10495_v3, 0.0  ;;  %v17413_v21 = vpop.f32.mrb[78].mxu1  ;;  %v10690_v23 = vld [vmem:[#allocation4 + $0x20] sm:$0xf] }
 0x6ad   : > { %10596 = vst [vmem:[#allocation4 + $0x10] sm:$0x3] %v10595_v1  ;;  %v10677_v5 = vrot.slane %v10675_v52, 6  ;;  %v10680_v44 = vrot.slane %v10678_v33, 7  ;;  %v16078_v31 = vpack.c.bf16 %v10533_v59, %v10533_v59  ;;  %v10536_v18 = vmax.f32 %v10500_v45, 0.0  ;;  %v10339_v53 = vpop.f32.mrb[79].mxu1 }
 0x6ae   : > { %v10629_v24 = vrot.slane %v10627_v55, 6  ;;  %v10632_v9 = vrot.slane %v10630_v28, 7  ;;  %v16075_v15 = vpack.c.bf16 %v10531_v13, %v10531_v13  ;;  %v10498_v48 = vadd.f32 %v22293_v34, %v10336_v62 }
 0x6af   : > { %v10681_v19 = vor.u32 %v10680_v44, %v10677_v5  ;;  %v10713_v12 = vshrl.u32 %v16078_v31, 16  ;;  %v10716_v11 = vshll.u32 %v16078_v31, 16  ;;  %v16081_v29 = vpack.c.bf16 %v10536_v18, %v10536_v18  ;;  %v10774_v44 = vld [vmem:[#allocation4 + $0x34] sm:$0x3] }
 0x6b0   : > { %v10633_v51 = vor.u32 %v10632_v9, %v10629_v24  ;;  %v10687_v50 = vsel %vm21084_vm13, %v10632_v9, %v10686_v27  ;;  %v10665_v40 = vshrl.u32 %v16075_v15, 16  ;;  %v10668_v14 = vshll.u32 %v16075_v15, 16  ;;  %v10739_v15 = vld [vmem:[#allocation4 + $0x2c] sm:$0x1] }
 0x6b1   : > { %v10711_v39 = vrot.slane %v10681_v19, 4  ;;  %10688 = vst [vmem:[#allocation4 + $0x18] sm:$0x8] %v10687_v50  ;;  %v10715_v16 = vrot.slane %v10713_v12, 6  ;;  %v10718_v2 = vrot.slane %v10716_v11, 7  ;;  %v10758_v37 = vshrl.u32 %v16081_v29, 16 }
 0x6b2   : > { %v10634_v42 = vsel %vm23842_vm9, %v10625_v35, %v10633_v51  ;;  %v10663_v54 = vrot.slane %v10633_v51, 4  ;;  %v10667_v41 = vrot.slane %v10665_v40, 6  ;;  %v10670_v47 = vrot.slane %v10668_v14, 7  ;;  %v17416_v30 = vpop.f32.mrb[80].mxu1 }
 0x6b3   : > { %v10643_v63 = vsel %vm21095_vm7, %v10634_v42, %v10642_v36  ;;  %v10719_v43 = vor.u32 %v10718_v2, %v10715_v16  ;;  %v10760_v46 = vrot.slane %v10758_v37, 6  ;;  %v10761_v26 = vshll.u32 %v16081_v29, 16  ;;  %v10352_v20 = vpop.f32.mrb[81].mxu1  ;;  %v10818_v42 = vld [vmem:[#allocation4 + $0x34] sm:$0xc] }
 0x6b4   : > { %10644 = vst [vmem:[#allocation4 + $0x18] sm:$0x7] %v10643_v63  ;;  %v10671_v38 = vor.u32 %v10670_v47, %v10667_v41  ;;  %v10534_v32 = vmax.f32 %v10498_v48, 0.0  ;;  %v10501_v7 = vadd.f32 %v17413_v21, %v22293_v34  ;;  %v10499_v10 = vadd.f32 %v22293_v34, %v10339_v53  ;;  %v17417_v35 = vpop.f32.mrb[82].mxu1  ;;  %v24491_v53 = vld [vmem:[#allocation21_spill] sm:$0xff] }
 0x6b5   : > { %v10720_v25 = vsel %vm23842_vm9, %v10711_v39, %v10719_v43  ;;  %v10721_v4 = vrot.slane %v10719_v43, 4  ;;  %v10763_v3 = vrot.slane %v10761_v26, 7  ;;  %v10504_v56 = vadd.f32 %v17416_v30, %v22293_v34  ;;  %v10355_v52 = vpop.f32.mrb[83].mxu1 }
 0x6b6   : > { %v10736_v59 = vsel %vm21119_vm8, %v10720_v25, %v10735_v57  ;;  %v10672_v45 = vsel %vm23842_vm9, %v10663_v54, %v10671_v38  ;;  %v10673_v62 = vrot.slane %v10671_v38, 4  ;;  %v16079_v1 = vpack.c.bf16 %v10534_v32, %v10534_v32  ;;  %v24493_v38 = vld [vmem:[#allocation23_spill] sm:$0xff] }
 0x6b7   : > { %10737 = vst [vmem:[#allocation4 + $0x24] sm:$0xf] %v10736_v59  ;;  %10689 = vst.msk [vmem:[#allocation4 + $0x1c] sm:$0xf] %vm24490_vm0, %v10672_v45  ;;  %v22340_v55 = vor.u32 %v10763_v3, %v10760_v46  ;;  %v10537_v28 = vmax.f32 %v10501_v7, 0.0  ;;  %v10535_v13 = vmax.f32 %v10499_v10, 0.0  ;;  %v10502_v18 = vadd.f32 %v22293_v34, %v10352_v20 }
 0x6b8   : > { %v10540_v21 = vmax.f32 %v10504_v56, 0.0  ;;  %v10682_v5 = vsel %vm23842_vm9, %v10673_v62, %v10681_v19  ;;  %v10723_v27 = vshrl.u32 %v16079_v1, 16  ;;  %v10726_v31 = vshll.u32 %v16079_v1, 16  ;;  %v22348_v19 = vld [vmem:[#allocation4 + $0x8] sm:$0xff]   ;;  %vm24501_vm0 = vmmov %vm24497_vm14 }
 0x6b9   : > { %vm24492_vm2 = vnez %v24491_v53  ;;  %v10766_v9 = vrot.slane %v22340_v55, 4  ;;  %v16082_v48 = vpack.c.bf16 %v10537_v28, %v10537_v28  ;;  %v16080_v12 = vpack.c.bf16 %v10535_v13, %v10535_v13  ;;  %v10770_v7 = vld [vmem:[#allocation4 + $0x2c] sm:$0xe] }
 0x6ba   : > { %v10691_v24 = vsel %vm24492_vm2, %v10682_v5, %v10690_v23  ;;  %v10725_v11 = vrot.slane %v10723_v27, 6  ;;  %v10728_v29 = vrot.slane %v10726_v31, 7  ;;  %v16086_v51 = vpack.c.bf16 %v10540_v21, %v10540_v21  ;;  %v17420_v50 = vpop.f32.mrb[84].mxu1 }
 0x6bb   : > { %10692 = vst [vmem:[#allocation4 + $0x20] sm:$0xf] %v10691_v24  ;;  %v10538_v36 = vmax.f32 %v10502_v18, 0.0  ;;  %v10775_v40 = vsel %vm21067_vm15, %v10766_v9, %v10774_v44  ;;  %v10788_v14 = vshrl.u32 %v16082_v48, 16  ;;  %v10791_v39 = vshll.u32 %v16082_v48, 16  ;;  %v10368_v2 = vpop.f32.mrb[85].mxu1 }
 0x6bc   : > { %v10749_v16 = vshrl.u32 %v16080_v12, 16  ;;  %10776 = vst [vmem:[#allocation4 + $0x34] sm:$0x3] %v10775_v40  ;;  %v10729_v57 = vor.u32 %v10728_v29, %v10725_v11  ;;  %v10731_v37 = vrot.slane %v10725_v11, 4  ;;  %v10752_v54 = vshll.u32 %v16080_v12, 16  ;;  %v22352_v47 = vpop.f32.mrb[86].mxu1 }
 0x6bd   : > { %v10845_v41 = vshrl.u32 %v16086_v51, 16  ;;  %v10790_v30 = vrot.slane %v10788_v14, 6  ;;  %v10793_v63 = vrot.slane %v10791_v39, 7  ;;  %v10848_v46 = vshll.u32 %v16086_v51, 16  ;;  %v22354_v26 = vpop.f32.mrb[87].mxu1 }
 0x6be   : > { %v10751_v43 = vrot.slane %v10749_v16, 6  ;;  %v10730_v20 = vsel %vm23842_vm9, %v10721_v4, %v10729_v57  ;;  %vm24494_vm4 = vnez %v24493_v38  ;;  %v10754_v32 = vrot.slane %v10752_v54, 7  ;;  %v22388_v54 = vld [vmem:[#allocation4 + $0x10] sm:$0xff]  }
 0x6bf   : > { %v10740_v23 = vsel %vm24494_vm4, %v10731_v37, %v10739_v15  ;;  %v10847_v10 = vrot.slane %v10845_v41, 6  ;;  %10738 = vst.msk [vmem:[#allocation4 + $0x28] sm:$0xf] %vm24495_vm1, %v10730_v20  ;;  %v10794_v25 = vor.u32 %v10793_v63, %v10790_v30  ;;  %v10850_v3 = vrot.slane %v10848_v46, 7  ;;  %vm24502_vm1 = vmmov %vm24498_vm6 }
 0x6c0   : > { %10741 = vst [vmem:[#allocation4 + $0x2c] sm:$0x1] %v10740_v23  ;;  %v16083_v56 = vpack.c.bf16 %v10538_v36, %v10538_v36  ;;  %v10505_v59 = vadd.f32 %v17417_v35, %v22293_v34  ;;  %v10755_v45 = vor.u32 %v10754_v32, %v10751_v43  ;;  %v10503_v62 = vadd.f32 %v22293_v34, %v10355_v52  ;;  %v10870_v23 = vld [vmem:[#allocation4 + $0x44] sm:$0xf]  ;;  %v10866_v32 = vld [vmem:[#allocation4 + $0x3c] sm:$0x8] }
 0x6c1   : > { %v10508_v1 = vadd.f32 %v17420_v50, %v22293_v34  ;;  %v11420_v4 = vshll.u32 %v22348_v19, 16  ;;  %v10795_v28 = vrot.slane %v10794_v25, 4  ;;  %v10819_v13 = vsel %vm21043_vm5, %v10794_v25, %v10818_v42 }
 0x6c2   : > { %v22367_v21 = vor.u32 %v10850_v3, %v10847_v10  ;;  %v10797_v5 = vshrl.u32 %v16083_v56, 16  ;;  %10820 = vst [vmem:[#allocation4 + $0x34] sm:$0xc] %v10819_v13  ;;  %v10756_v44 = vrot.slane %v10755_v45, 4  ;;  %v10771_v27 = vsel %vm21049_vm11, %v10755_v45, %v10770_v7  ;;  %v22371_v18 = vpop.f32.mrb[88].mxu1 }
 0x6c3   : > { %v10800_v35 = vshll.u32 %v16083_v56, 16  ;;  %v10541_v31 = vmax.f32 %v10505_v59, 0.0  ;;  %10772 = vst [vmem:[#allocation4 + $0x2c] sm:$0xe] %v10771_v27  ;;  %v10539_v9 = vmax.f32 %v10503_v62, 0.0  ;;  %v10544_v15 = vmax.f32 %v10508_v1, 0.0 }
 0x6c4   : > { %v10853_v52 = vrot.slane %v22367_v21, 4  ;;  %v10799_v24 = vrot.slane %v10797_v5, 6  ;;  %v22374_v48 = vpop.f32.mrb[89].mxu1  ;;  %v10765_v12 = vsel %vm23842_vm9, %v10756_v44, %v22340_v55  ;;  %v11422_v51 = vrot.slane %v11420_v4, 1  ;;  %v10822_v10 = vld [vmem:[#allocation4 + $0x3c] sm:$0x7] }
 0x6c5   : > { %v10802_v11 = vrot.slane %v10800_v35, 7  ;;  %v16087_v29 = vpack.c.bf16 %v10541_v31, %v10541_v31  ;;  %v22379_v36 = vpop.f32.mrb[90].mxu1  ;;  %10773 = vst.msk [vmem:[#allocation4 + $0x30] sm:$0xf] %vm24496_vm10, %v10765_v12  ;;  %v16084_v50 = vpack.c.bf16 %v10539_v9, %v10539_v9  ;;  %v16091_v40 = vpack.c.bf16 %v10544_v15, %v10544_v15  ;;  %v10950_v59 = vld [vmem:[#allocation4 + $0x50] sm:$0xe] }
 0x6c6   : > { %v11424_v14 = vshrl.u32 %v22348_v19, 16  ;;  %v10506_v39 = vadd.f32 %v22293_v34, %v10368_v2  ;;  %v22384_v16 = vpop.f32.mrb[91].mxu1  ;;  %v11423_v55 = vsel %vm24497_vm14, %v22301_v8, %v11422_v51  ;;  %v10509_v1 = vadd.f32 %v22352_v47, %v22293_v34  ;;  %vm24504_vm14 = vmmov %vm24501_vm0 }
 0x6c7   : > { %v10803_v57 = vor.u32 %v10802_v11, %v10799_v24  ;;  %v10855_v37 = vshrl.u32 %v16087_v29, 16  ;;  %v10858_v42 = vshll.u32 %v16087_v29, 16  ;;  %v10807_v41 = vshrl.u32 %v16084_v50, 16  ;;  %17440 = vmatprep.mubr.msk.bf16.mxu0 %vm24498_vm6, %v11423_v55  ;;  %vm24505_vm6 = vmmov %vm24502_vm1 }
 0x6c8   : > { %v10810_v30 = vshll.u32 %v16084_v50, 16  ;;  %v10929_v63 = vshrl.u32 %v16091_v40, 16  ;;  %v10932_v43 = vshll.u32 %v16091_v40, 16  ;;  %v11426_v45 = vor.u32 %v11424_v14, %v11422_v51 }
 0x6c9   : > { %v10804_v19 = vsel %vm23842_vm9, %v10795_v28, %v10803_v57  ;;  %v10805_v2 = vrot.slane %v10803_v57, 4  ;;  %v10857_v46 = vrot.slane %v10855_v37, 6  ;;  %v10860_v20 = vrot.slane %v10858_v42, 7 }
 0x6ca   : > { %10821 = vst.msk [vmem:[#allocation4 + $0x38] sm:$0xf] %vm24499_vm12, %v10804_v19  ;;  %v10809_v7 = vrot.slane %v10807_v41, 6  ;;  %v10812_v8 = vrot.slane %v10810_v30, 7  ;;  %v10931_v25 = vrot.slane %v10929_v63, 6  ;;  %v10934_v3 = vrot.slane %v10932_v43, 7  ;;  %vm24506_vm12 = vmmov %vm24500_vm3 }
 0x6cb   : > { %v10861_v56 = vor.u32 %v10860_v20, %v10857_v46  ;;  %v10542_v62 = vmax.f32 %v10506_v39, 0.0  ;;  %v22396_v4 = vpop.f32.mrb[92].mxu1  ;;  %v11428_v44 = vshll.u32 %v22388_v54, 16  ;;  %v10545_v9 = vmax.f32 %v10509_v1, 0.0  ;;  %v22421_v39 = vld [vmem:[#allocation4 + $0x18] sm:$0xff]  }
 0x6cc   : > { %v10813_v28 = vor.u32 %v10812_v8, %v10809_v7  ;;  %v10867_v13 = vsel %vm21084_vm13, %v10812_v8, %v10866_v32  ;;  %v22400_v5 = vor.u32 %v10934_v3, %v10931_v25  ;;  %v22403_v27 = vpop.f32.mrb[93].mxu1  ;;  %v10507_v55 = vadd.f32 %v22293_v34, %v22354_v26  ;;  %v22431_v41 = vld [vmem:[%s23569_s7 + $0x8] sm:$0xf]  ;;  %v10915_v43 = vld [vmem:[#allocation4 + $0x48] sm:$0xf] }
 0x6cd   : > { %v10862_v35 = vsel %vm23842_vm9, %v10853_v52, %v10861_v56  ;;  %v10891_v31 = vrot.slane %v10861_v56, 4  ;;  %10868 = vst [vmem:[#allocation4 + $0x3c] sm:$0x8] %v10867_v13  ;;  %v16089_v24 = vpack.c.bf16 %v10542_v62, %v10542_v62  ;;  %v22407_v47 = vpop.f32.mrb[94].mxu1  ;;  %v16092_v37 = vpack.c.bf16 %v10545_v9, %v10545_v9  ;;  %v10954_v62 = vld [vmem:[#allocation4 + $0x58] sm:$0x3] }
 0x6ce   : > { %v10871_v15 = vsel %vm24492_vm2, %v10862_v35, %v10870_v23  ;;  %v10814_v12 = vsel %vm23842_vm9, %v10805_v2, %v10813_v28  ;;  %v10843_v11 = vrot.slane %v10813_v28, 4  ;;  %v10936_v29 = vrot.slane %v22400_v5, 4  ;;  %v22414_v51 = vpop.f32.mrb[95].mxu1  ;;  %v11046_v35 = vld [vmem:[#allocation4 + $0x60] sm:$0x8] }
 0x6cf   : > { %10872 = vst [vmem:[#allocation4 + $0x44] sm:$0xf] %v10871_v15  ;;  %v10823_v52 = vsel %vm21095_vm7, %v10814_v12, %v10822_v10  ;;  %v10951_v50 = vsel %vm21049_vm11, %v22400_v5, %v10950_v59  ;;  %v10893_v40 = vshrl.u32 %v16089_v24, 16  ;;  %v10896_v14 = vshll.u32 %v16089_v24, 16 }
 0x6d0   : > { %10824 = vst [vmem:[#allocation4 + $0x3c] sm:$0x7] %v10823_v52  ;;  %v10852_v57 = vsel %vm23842_vm9, %v10843_v11, %v22367_v21  ;;  %10952 = vst [vmem:[#allocation4 + $0x50] sm:$0xe] %v10951_v50  ;;  %v11430_v42 = vrot.slane %v11428_v44, 1  ;;  %v10512_v19 = vadd.f32 %v22371_v18, %v22293_v34  ;;  %v11432_v21 = vshrl.u32 %v22388_v54, 16 }
 0x6d1   : > { %10869 = vst.msk [vmem:[#allocation4 + $0x40] sm:$0xf] %vm24500_vm3, %v10852_v57  ;;  %v10895_v30 = vrot.slane %v10893_v40, 6  ;;  %v10898_v63 = vrot.slane %v10896_v14, 7  ;;  %v10938_v2 = vshrl.u32 %v16092_v37, 16  ;;  %v10941_v46 = vshll.u32 %v16092_v37, 16 }
 0x6d2   : > { %v11431_v20 = vsel %vm24501_vm0, %v11426_v45, %v11430_v42  ;;  %v10543_v26 = vmax.f32 %v10507_v55, 0.0  ;;  %v10548_v32 = vmax.f32 %v10512_v19, 0.0  ;;  %v11434_v7 = vor.u32 %v11432_v21, %v11430_v42  ;;  %v22440_v10 = vpop.f32.mrb[96].mxu1  ;;  %v10919_v14 = vld [vmem:[#allocation4 + $0x50] sm:$0x1]  ;;  %v22468_v19 = vld [vmem:[#allocation4 + $0x20] sm:$0xff]  }
 0x6d3   : > { %v10899_v23 = vor.u32 %v10898_v63, %v10895_v30  ;;  %17441 = vmatmul.mubr.msk.bf16.vlgmr.msra.gmra.mrb[68].mxu0 %vm24502_vm1, %v11431_v20  ;;  %v11436_v8 = vshll.u32 %v22421_v39, 16  ;;  %v10940_v25 = vrot.slane %v10938_v2, 6  ;;  %v10943_v3 = vrot.slane %v10941_v46, 7  ;;  %v22445_v54 = vpop.f32.mrb[97].mxu1 }
 0x6d4   : > { %v16090_v56 = vpack.c.bf16 %v10543_v26, %v10543_v26  ;;  %17477 = vmatpush3.bf16.msra.mxu0 %v22304_v60  ;;  %v10510_v18 = vadd.f32 %v22293_v34, %v22374_v48  ;;  %v16095_v1 = vpack.c.bf16 %v10548_v32, %v10548_v32  ;;  %v22449_v13 = vpop.f32.mrb[98].mxu1  ;;  %vm24503_vm10 = vcmask 1043456   ;;  %v22474_v26 = vld [vmem:[#allocation4 + $0x28] sm:$0xff]  }
 0x6d5   : > { %v10900_v59 = vsel %vm23842_vm9, %v10891_v31, %v10899_v23  ;;  %v10901_v45 = vrot.slane %v10899_v23, 4  ;;  %v11438_v28 = vrot.slane %v11436_v8, 1  ;;  %18667 = vmatprep.subr.msk.bf16.mxu0 %vm24503_vm10, %v22431_v41  ;;  %v10944_v5 = vor.u32 %v10943_v3, %v10940_v25  ;;  %v22455_v24 = vpop.f32.mrb[99].mxu1  ;;  %vm24507_vm10 = vmmov %vm24501_vm0 }
 0x6d6   : > { %v10916_v60 = vsel %vm21119_vm8, %v10900_v59, %v10915_v43  ;;  %v10903_v44 = vshrl.u32 %v16090_v56, 16  ;;  %v10906_v48 = vshll.u32 %v16090_v56, 16  ;;  %v10987_v31 = vshrl.u32 %v16095_v1, 16 }
 0x6d7   : > { %10917 = vst [vmem:[#allocation4 + $0x48] sm:$0xf] %v10916_v60  ;;  %v10990_v9 = vshll.u32 %v16095_v1, 16  ;;  %v11439_v15 = vsel %vm24504_vm14, %v11434_v7, %v11438_v28  ;;  %v10546_v12 = vmax.f32 %v10510_v18, 0.0  ;;  %v10945_v11 = vsel %vm23842_vm9, %v10936_v29, %v10944_v5  ;;  %vm24508_vm14 = vmmov %vm24502_vm1 }
 0x6d8   : > { %v10946_v52 = vrot.slane %v10944_v5, 4  ;;  %v10905_v50 = vrot.slane %v10903_v44, 6  ;;  %v10908_v40 = vrot.slane %v10906_v48, 7  ;;  %17444 = vmatprep.mubr.msk.bf16.mxu0 %vm24505_vm6, %v11439_v15  ;;  %10953 = vst.msk [vmem:[#allocation4 + $0x54] sm:$0xf] %vm24506_vm12, %v10945_v11  ;;  %v10989_v57 = vrot.slane %v10987_v31, 6  ;;  %vm24509_vm6 = vmmov %vm24500_vm3 }
 0x6d9   : > { %v10992_v37 = vrot.slane %v10990_v9, 7  ;;  %v16093_v42 = vpack.c.bf16 %v10546_v12, %v10546_v12  ;;  %v10513_v55 = vadd.f32 %v22379_v36, %v22293_v34  ;;  %v10511_v29 = vadd.f32 %v22293_v34, %v22384_v16  ;;  %vm24510_vm12 = vmmov %vm24500_vm3 }
 0x6da   : > { %v10955_v30 = vsel %vm21067_vm15, %v10946_v52, %v10954_v62  ;;  %v10909_v63 = vor.u32 %v10908_v40, %v10905_v50  ;;  %v10911_v43 = vrot.slane %v10905_v50, 4  ;;  %v22476_v36 = vpop.f32.mrb[100].mxu1  ;;  %v11440_v18 = vshrl.u32 %v22421_v39, 16 }
 0x6db   : > { %10956 = vst [vmem:[#allocation4 + $0x58] sm:$0x3] %v10955_v30  ;;  %v22470_v21 = vor.u32 %v10992_v37, %v10989_v57  ;;  %v11047_v2 = vsel %vm21084_vm13, %v10992_v37, %v11046_v35  ;;  %v10968_v46 = vshrl.u32 %v16093_v42, 16  ;;  %v10971_v20 = vshll.u32 %v16093_v42, 16  ;;  %v22482_v8 = vpop.f32.mrb[101].mxu1 }
 0x6dc   : > { %v10910_v23 = vsel %vm23842_vm9, %v10901_v45, %v10909_v63  ;;  %v10920_v16 = vsel %vm24494_vm4, %v10911_v43, %v10919_v14  ;;  %11048 = vst [vmem:[#allocation4 + $0x60] sm:$0x8] %v11047_v2  ;;  %v10549_v32 = vmax.f32 %v10513_v55, 0.0  ;;  %v10547_v7 = vmax.f32 %v10511_v29, 0.0  ;;  %v22487_v59 = vpop.f32.mrb[102].mxu1 }
 0x6dd   : > { %10918 = vst.msk [vmem:[#allocation4 + $0x4c] sm:$0xf] %vm24500_vm3, %v10910_v23  ;;  %10921 = vst [vmem:[#allocation4 + $0x50] sm:$0x1] %v10920_v16  ;;  %v11023_v25 = vrot.slane %v22470_v21, 4  ;;  %v10970_v3 = vrot.slane %v10968_v46, 6  ;;  %v10516_v5 = vadd.f32 %v22396_v4, %v22293_v34  ;;  %v11442_v35 = vor.u32 %v11440_v18, %v11438_v28 }
 0x6de   : > { %v10973_v56 = vrot.slane %v10971_v20, 7  ;;  %v10998_v45 = vld [vmem:[#allocation4 + $0x58] sm:$0xc]  ;;  %v16097_v62 = vpack.c.bf16 %v10549_v32, %v10549_v32  ;;  %v16094_v1 = vpack.c.bf16 %v10547_v7, %v10547_v7  ;;  %v11444_v60 = vshll.u32 %v22468_v19, 16  ;;  %v22492_v44 = vpop.f32.mrb[103].mxu1  ;;  %v22506_v23 = vld [vmem:[#allocation4 + $0x30] sm:$0xff]   ;;  %vm24511_vm3 = vmmov %vm24501_vm0 }
 0x6df   : > { %v11448_v31 = vshrl.u32 %v22468_v19, 16  ;;  %v11452_v9 = vshll.u32 %v22474_v26, 16  ;;  %v10552_v57 = vmax.f32 %v10516_v5, 0.0  ;;  %v10514_v46 = vadd.f32 %v22293_v34, %v22403_v27  ;;  %v11002_v16 = vld [vmem:[#allocation4 + $0x60] sm:$0x7] }
 0x6e0   : > { %v10974_v48 = vor.u32 %v10973_v56, %v10970_v3  ;;  %v11025_v15 = vshrl.u32 %v16097_v62, 16  ;;  %v11028_v12 = vshll.u32 %v16097_v62, 16  ;;  %v10977_v11 = vshrl.u32 %v16094_v1, 16  ;;  %v11099_v62 = vld [vmem:[#allocation4 + $0x74] sm:$0x1] }
 0x6e1   : > { %v10980_v52 = vshll.u32 %v16094_v1, 16  ;;  %v11446_v14 = vrot.slane %v11444_v60, 1  ;;  %v16101_v30 = vpack.c.bf16 %v10552_v57, %v10552_v57  ;;  %v11454_v43 = vrot.slane %v11452_v9, 1 }
 0x6e2   : > { %v10975_v50 = vrot.slane %v10974_v48, 4  ;;  %v10999_v40 = vsel %vm21043_vm5, %v10974_v48, %v10998_v45  ;;  %v11027_v4 = vrot.slane %v11025_v15, 6  ;;  %v11030_v37 = vrot.slane %v11028_v12, 7 }
 0x6e3   : > { %11000 = vst [vmem:[#allocation4 + $0x58] sm:$0xc] %v10999_v40  ;;  %v10979_v42 = vrot.slane %v10977_v11, 6  ;;  %v10982_v55 = vrot.slane %v10980_v52, 7  ;;  %v11447_v28 = vsel %vm24501_vm0, %v11442_v35, %v11446_v14  ;;  %v11450_v63 = vor.u32 %v11448_v31, %v11446_v14  ;;  %vm24512_vm0 = vmmov %vm24502_vm1 }
 0x6e4   : > { %v22499_v29 = vor.u32 %v11030_v37, %v11027_v4  ;;  %17445 = vmatmul.mubr.msk.bf16.gmra.mrb[72].mxu0 %vm24502_vm1, %v11447_v28  ;;  %v10517_v20 = vadd.f32 %v22407_v47, %v22293_v34  ;;  %v11083_v32 = vshrl.u32 %v16101_v30, 16  ;;  %v11086_v7 = vshll.u32 %v16101_v30, 16  ;;  %vm24514_vm1 = vmmov %vm24511_vm3 }
 0x6e5   : > { %v10983_v2 = vor.u32 %v10982_v55, %v10979_v42  ;;  %v11455_v3 = vsel %vm24507_vm10, %v11450_v63, %v11454_v43  ;;  %v10515_v56 = vadd.f32 %v22293_v34, %v22414_v51  ;;  %v10550_v60 = vmax.f32 %v10514_v46, 0.0  ;;  %v22538_v63 = vld [vmem:[#allocation4 + $0x38] sm:$0xff]   ;;  %v11050_v46 = vld [vmem:[#allocation4 + $0x68] sm:$0xf]  ;;  %vm24515_vm10 = vmmov %vm24512_vm0 }
 0x6e6   : > { %v11032_v18 = vsel %vm23842_vm9, %v11023_v25, %v22499_v29  ;;  %v11033_v45 = vrot.slane %v22499_v29, 4  ;;  %17448 = vmatprep.mubr.msk.bf16.mxu0 %vm24508_vm14, %v11455_v3  ;;  %v22520_v1 = vrot.slane %v11083_v32, 6  ;;  %v22522_v51 = vrot.slane %v11086_v7, 7  ;;  %vm24516_vm14 = vmmov %vm24514_vm1 }
 0x6e7   : > { %v10984_v27 = vsel %vm23842_vm9, %v10975_v50, %v10983_v2  ;;  %v10985_v47 = vrot.slane %v10983_v2, 4  ;;  %11049 = vst.msk [vmem:[#allocation4 + $0x64] sm:$0xf] %vm24509_vm6, %v11032_v18  ;;  %v10553_v5 = vmax.f32 %v10517_v20, 0.0  ;;  %v10551_v48 = vmax.f32 %v10515_v56, 0.0 }
 0x6e8   : > { %11001 = vst.msk [vmem:[#allocation4 + $0x5c] sm:$0xf] %vm24510_vm12, %v10984_v27  ;;  %v11456_v35 = vshrl.u32 %v22474_v26, 16  ;;  %v11460_v31 = vshll.u32 %v22506_v23, 16  ;;  %v11089_v15 = vor.u32 %v22522_v51, %v22520_v1  ;;  %v11091_v12 = vrot.slane %v22520_v1, 4 }
 0x6e9   : > { %v10994_v25 = vsel %vm23842_vm9, %v10985_v47, %v22470_v21  ;;  %v16098_v11 = vpack.c.bf16 %v10550_v60, %v10550_v60  ;;  %v16102_v52 = vpack.c.bf16 %v10553_v5, %v10553_v5  ;;  %v16100_v50 = vpack.c.bf16 %v10551_v48, %v10551_v48  ;;  %v11095_v18 = vld [vmem:[#allocation4 + $0x6c] sm:$0xf] }
 0x6ea   : > { %v11003_v9 = vsel %vm21095_vm7, %v10994_v25, %v11002_v16  ;;  %v11458_v40 = vor.u32 %v11456_v35, %v11454_v43  ;;  %v11462_v14 = vrot.slane %v11460_v31, 1  ;;  %v11100_v21 = vsel %vm24494_vm4, %v11091_v12, %v11099_v62  ;;  %v11130_v43 = vld [vmem:[#allocation4 + $0x74] sm:$0xe] }
 0x6eb   : > { %11004 = vst [vmem:[#allocation4 + $0x60] sm:$0x7] %v11003_v9  ;;  %v11035_v57 = vshrl.u32 %v16098_v11, 16  ;;  %v11038_v4 = vshll.u32 %v16098_v11, 16  ;;  %v10520_v37 = vadd.f32 %v22440_v10, %v22293_v34  ;;  %11101 = vst [vmem:[#allocation4 + $0x74] sm:$0x1] %v11100_v21  ;;  %v10518_v47 = vadd.f32 %v22293_v34, %v22445_v54 }
 0x6ec   : > { %v11109_v42 = vshrl.u32 %v16102_v52, 16  ;;  %v11112_v55 = vshll.u32 %v16102_v52, 16  ;;  %v11073_v28 = vshrl.u32 %v16100_v50, 16  ;;  %v11076_v30 = vshll.u32 %v16100_v50, 16  ;;  %v22558_v52 = vld [vmem:[#allocation4 + $0x40] sm:$0xff]  }
 0x6ed   : > { %v11037_v29 = vrot.slane %v11035_v57, 6  ;;  %v11040_v2 = vrot.slane %v11038_v4, 7  ;;  %v11463_v20 = vsel %vm24511_vm3, %v11458_v40, %v11462_v14  ;;  %v10556_v16 = vmax.f32 %v10520_v37, 0.0  ;;  %vm24523_vm3 = vmmov %vm24512_vm0 }
 0x6ee   : > { %v11111_v32 = vrot.slane %v11109_v42, 6  ;;  %v11114_v7 = vrot.slane %v11112_v55, 7  ;;  %v11075_v3 = vrot.slane %v11073_v28, 6  ;;  %v11078_v56 = vrot.slane %v11076_v30, 7  ;;  %17449 = vmatmul.mubr.msk.bf16.gmra.mrb[76].mxu0 %vm24512_vm0, %v11463_v20  ;;  %v18945_v55 = vld [vmem:[%s23568_s6] ss:$0 sm:$0xff] }
 0x6ef   : > { %v11041_v10 = vor.u32 %v11040_v2, %v11037_v29  ;;  %v16105_v27 = vpack.c.bf16 %v10556_v16, %v10556_v16  ;;  %v11464_v62 = vshrl.u32 %v22506_v23, 16  ;;  %v11468_v60 = vshll.u32 %v22538_v63, 16  ;;  %v22579_v16 = vld [vmem:[#allocation4 + $0x48] sm:$0xff]  }
 0x6f0   : > { %v22545_v1 = vor.u32 %v11114_v7, %v11111_v32  ;;  %v11079_v51 = vor.u32 %v11078_v56, %v11075_v3  ;;  %v10521_v5 = vadd.f32 %v22449_v13, %v22293_v34  ;;  %v10554_v50 = vmax.f32 %v10518_v47, 0.0  ;;  %v11226_v47 = vld [vmem:[#allocation4 + $0x84] sm:$0x8] }
 0x6f1   : > { %v11042_v25 = vsel %vm23842_vm9, %v11033_v45, %v11041_v10  ;;  %v11071_v48 = vrot.slane %v11041_v10, 4  ;;  %v11157_v35 = vshrl.u32 %v16105_v27, 16  ;;  %v11160_v31 = vshll.u32 %v16105_v27, 16 }
 0x6f2   : > { %v11051_v9 = vsel %vm24492_vm2, %v11042_v25, %v11050_v46  ;;  %v11116_v54 = vrot.slane %v22545_v1, 4  ;;  %v11131_v12 = vsel %vm21049_vm11, %v22545_v1, %v11130_v43  ;;  %v11081_v11 = vrot.slane %v11079_v51, 4  ;;  %vm24513_vm11 = vmmov %vm24509_vm6 }
 0x6f3   : > { %11052 = vst [vmem:[#allocation4 + $0x68] sm:$0xf] %v11051_v9  ;;  %11132 = vst [vmem:[#allocation4 + $0x74] sm:$0xe] %v11131_v12  ;;  %v11080_v34 = vsel %vm23842_vm9, %v11071_v48, %v11079_v51  ;;  %v11159_v13 = vrot.slane %v11157_v35, 6  ;;  %v11162_v45 = vrot.slane %v11160_v31, 7  ;;  %v11466_v57 = vor.u32 %v11464_v62, %v11462_v14 }
 0x6f4   : > { %v11090_v40 = vsel %vm23842_vm9, %v11081_v11, %v11089_v15  ;;  %v11096_v21 = vsel %vm21119_vm8, %v11080_v34, %v11095_v18  ;;  %v11470_v22 = vrot.slane %v11468_v60, 1  ;;  %v16103_v37 = vpack.c.bf16 %v10554_v50, %v10554_v50  ;;  %v11134_v62 = vld [vmem:[#allocation4 + $0x7c] sm:$0x3]  ;;  %v11182_v35 = vld [vmem:[#allocation4 + $0x84] sm:$0x7]  ;;  %vm24517_vm6 = vmmov %vm24512_vm0 }
 0x6f5   : > { %11097 = vst [vmem:[#allocation4 + $0x6c] sm:$0xf] %v11096_v21  ;;  %11098 = vst.msk [vmem:[#allocation4 + $0x70] sm:$0xf] %vm24513_vm11, %v11090_v40  ;;  %v22567_v4 = vor.u32 %v11162_v45, %v11159_v13  ;;  %v10557_v42 = vmax.f32 %v10521_v5, 0.0  ;;  %v10519_v28 = vadd.f32 %v18945_v55, %v22455_v24  ;;  %v11472_v30 = vshrl.u32 %v22538_v63, 16 }
 0x6f6   : > { %v11471_v15 = vsel %vm24514_vm1, %v11466_v57, %v11470_v22  ;;  %v11476_v14 = vshll.u32 %v22558_v52, 16  ;;  %v10524_v29 = vadd.f32 %v18945_v55, %v22476_v36  ;;  %v11118_v46 = vshrl.u32 %v16103_v37, 16  ;;  %v11178_v21 = vld [vmem:[#allocation4 + $0x7c] sm:$0xc]  ;;  %vm24518_vm12 = vmmov %vm24513_vm11 }
 0x6f7   : > { %v11165_v2 = vrot.slane %v22567_v4, 4  ;;  %v11121_v43 = vshll.u32 %v16103_v37, 16  ;;  %17452 = vmatprep.mubr.msk.bf16.mxu0 %vm24515_vm10, %v11471_v15  ;;  %v16106_v20 = vpack.c.bf16 %v10557_v42, %v10557_v42  ;;  %v10555_v32 = vmax.f32 %v10519_v28, 0.0 }
 0x6f8   : > { %v11474_v7 = vor.u32 %v11472_v30, %v11470_v22  ;;  %v11478_v24 = vrot.slane %v11476_v14, 1  ;;  %v10560_v3 = vmax.f32 %v10524_v29, 0.0  ;;  %v11120_v56 = vrot.slane %v11118_v46, 6  ;;  %v22597_v30 = vld [vmem:[#allocation4 + $0x50] sm:$0xff]  }
 0x6f9   : > { %v11123_v10 = vrot.slane %v11121_v43, 7  ;;  %v11167_v18 = vshrl.u32 %v16106_v20, 16  ;;  %v11170_v27 = vshll.u32 %v16106_v20, 16  ;;  %v16104_v36 = vpack.c.bf16 %v10555_v32, %v10555_v32  ;;  %v22603_v43 = vld [vmem:[#allocation4 + $0x58] sm:$0xff]  }
 0x6fa   : > { %v11479_v1 = vsel %vm24516_vm14, %v11474_v7, %v11478_v24  ;;  %v16111_v51 = vpack.c.bf16 %v10560_v3, %v10560_v3  ;;  %v11480_v60 = vshrl.u32 %v22558_v52, 16  ;;  %v11484_v31 = vshll.u32 %v22579_v16, 16 }
 0x6fb   : > { %v11124_v5 = vor.u32 %v11123_v10, %v11120_v56  ;;  %v11169_v25 = vrot.slane %v11167_v18, 6  ;;  %v11172_v48 = vrot.slane %v11170_v27, 7  ;;  %17453 = vmatmul.mubr.msk.bf16.gmra.mrb[80].mxu0 %vm24517_vm6, %v11479_v1  ;;  %v11148_v9 = vshrl.u32 %v16104_v36, 16  ;;  %v22613_v56 = vld [vmem:[#allocation4 + $0x60] sm:$0xff]   ;;  %vm24530_vm6 = vmmov %vm24523_vm3 }
 0x6fc   : > { %v11151_v12 = vshll.u32 %v16104_v36, 16  ;;  %v11253_v11 = vshrl.u32 %v16111_v51, 16  ;;  %v11256_v34 = vshll.u32 %v16111_v51, 16  ;;  %v11482_v15 = vor.u32 %v11480_v60, %v11478_v24 }
 0x6fd   : > { %v11125_v13 = vsel %vm23842_vm9, %v11116_v54, %v11124_v5  ;;  %v11126_v45 = vrot.slane %v11124_v5, 4  ;;  %v22587_v50 = vor.u32 %v11172_v48, %v11169_v25  ;;  %v11227_v40 = vsel %vm21084_vm13, %v11172_v48, %v11226_v47  ;;  %vm24520_vm13 = vmmov %vm24512_vm0  ;;  %v22626_v48 = vld [vmem:[#allocation4 + $0x68] sm:$0xff]  }
 0x6fe   : > { %11133 = vst.msk [vmem:[#allocation4 + $0x78] sm:$0xf] %vm24518_vm12, %v11125_v13  ;;  %11228 = vst [vmem:[#allocation4 + $0x84] sm:$0x8] %v11227_v40  ;;  %v11150_v57 = vrot.slane %v11148_v9, 6  ;;  %v11153_v22 = vrot.slane %v11151_v12, 7  ;;  %v10522_v20 = vadd.f32 %v18945_v55, %v22482_v8  ;;  %v10523_v32 = vadd.f32 %v18945_v55, %v22492_v44 }
 0x6ff   : > { %v11255_v37 = vrot.slane %v11253_v11, 6  ;;  %v11258_v42 = vrot.slane %v11256_v34, 7  ;;  %v11135_v28 = vsel %vm21067_vm15, %v11126_v45, %v11134_v62  ;;  %v11174_v54 = vsel %vm23842_vm9, %v11165_v2, %v22587_v50  ;;  %vm24519_vm15 = vmmov %vm24514_vm1  ;;  %v11279_v11 = vld [vmem:[#allocation4 + $0x98] sm:$0x1] }
 0x700   : > { %11136 = vst [vmem:[#allocation4 + $0x7c] sm:$0x3] %v11135_v28  ;;  %v11183_v61 = vsel %vm21095_vm7, %v11174_v54, %v11182_v35  ;;  %v11154_v14 = vor.u32 %v11153_v22, %v11150_v57  ;;  %v11486_v46 = vrot.slane %v11484_v31, 1  ;;  %v11203_v0 = vrot.slane %v22587_v50, 4  ;;  %vm24522_vm7 = vmmov %vm24514_vm1 }
 0x701   : > { %v22601_v29 = vor.u32 %v11258_v42, %v11255_v37  ;;  %11184 = vst [vmem:[#allocation4 + $0x84] sm:$0x7] %v11183_v61  ;;  %v10525_v2 = vadd.f32 %v18945_v55, %v22487_v59  ;;  %v11488_v3 = vshrl.u32 %v22579_v16, 16  ;;  %v10558_v8 = vmax.f32 %v10522_v20, 0.0  ;;  %vm24524_vm0 = vmmov %vm24514_vm1 }
 0x702   : > { %v11155_v7 = vrot.slane %v11154_v14, 4  ;;  %v11179_v17 = vsel %vm21043_vm5, %v11154_v14, %v11178_v21  ;;  %v11487_v24 = vsel %vm24519_vm15, %v11482_v15, %v11486_v46  ;;  %v10559_v59 = vmax.f32 %v10523_v32, 0.0  ;;  %vm24521_vm5 = vmmov %vm24513_vm11 }
 0x703   : > { %11180 = vst [vmem:[#allocation4 + $0x7c] sm:$0xc] %v11179_v17  ;;  %v11261_v10 = vrot.slane %v22601_v29, 4  ;;  %17456 = vmatprep.mubr.msk.bf16.mxu0 %vm24520_vm13, %v11487_v24  ;;  %v10561_v18 = vmax.f32 %v10525_v2, 0.0  ;;  %v11490_v58 = vor.u32 %v11488_v3, %v11486_v46  ;;  %v11492_v55 = vshll.u32 %v22597_v30, 16  ;;  %vm24525_vm11 = vmmov %vm24523_vm3 }
 0x704   : > { %v11164_v44 = vsel %vm23842_vm9, %v11155_v7, %v22567_v4  ;;  %v11500_v27 = vshll.u32 %v22603_v43, 16  ;;  %v16108_v47 = vpack.c.bf16 %v10558_v8, %v10558_v8  ;;  %v16109_v36 = vpack.c.bf16 %v10559_v59, %v10559_v59  ;;  %v22628_v4 = vld [vmem:[#allocation4 + $0x70] sm:$0xff]   ;;  %v11230_v59 = vld [vmem:[#allocation4 + $0x8c] sm:$0xf]  ;;  %vm24526_vm1 = vmmov %vm24521_vm5 }
 0x705   : > { %11181 = vst.msk [vmem:[#allocation4 + $0x80] sm:$0xf] %vm24521_vm5, %v11164_v44  ;;  %v16112_v62 = vpack.c.bf16 %v10561_v18, %v10561_v18  ;;  %v11496_v1 = vshrl.u32 %v22597_v30, 16  ;;  %v11494_v51 = vrot.slane %v11492_v55, 1  ;;  %v11504_v5 = vshrl.u32 %v22603_v43, 16  ;;  %vm24527_vm10 = vmmov %vm24526_vm1 }
 0x706   : > { %v11502_v60 = vrot.slane %v11500_v27, 1  ;;  %v11508_v25 = vshll.u32 %v22613_v56, 16  ;;  %v11205_v35 = vshrl.u32 %v16108_v47, 16  ;;  %v11208_v31 = vshll.u32 %v16108_v47, 16  ;;  %vm24528_vm14 = vmmov %vm24524_vm0 }
 0x707   : > { %v11263_v9 = vshrl.u32 %v16112_v62, 16  ;;  %v11266_v12 = vshll.u32 %v16112_v62, 16  ;;  %v11215_v34 = vshrl.u32 %v16109_v36, 16  ;;  %v11218_v13 = vshll.u32 %v16109_v36, 16  ;;  %vm24531_vm12 = vmmov %vm24523_vm3 }
 0x708   : > { %v11495_v45 = vsel %vm24522_vm7, %v11490_v58, %v11494_v51  ;;  %v11498_v50 = vor.u32 %v11496_v1, %v11494_v51  ;;  %v11207_v40 = vrot.slane %v11205_v35, 6  ;;  %v11210_v21 = vrot.slane %v11208_v31, 7  ;;  %v11275_v58 = vld [vmem:[#allocation4 + $0x90] sm:$0xf]  ;;  %vm24535_vm15 = vmmov %vm24523_vm3 }
 0x709   : > { %v11265_v57 = vrot.slane %v11263_v9, 6  ;;  %v11268_v22 = vrot.slane %v11266_v12, 7  ;;  %17457 = vmatmul.mubr.msk.bf16.gmra.mrb[84].mxu0 %vm24523_vm3, %v11495_v45  ;;  %v11217_v37 = vrot.slane %v11215_v34, 6  ;;  %v11220_v42 = vrot.slane %v11218_v13, 7  ;;  %vm24536_vm13 = vmmov %vm24524_vm0 }
 0x70a   : > { %v11503_v28 = vsel %vm24524_vm0, %v11498_v50, %v11502_v60  ;;  %v11506_v54 = vor.u32 %v11504_v5, %v11502_v60  ;;  %v22633_v15 = vld [vmem:[#allocation4 + $0x78] sm:$0xff]   ;;  %v11211_v61 = vor.u32 %v11210_v21, %v11207_v40  ;;  %v11510_v20 = vrot.slane %v11508_v25, 1  ;;  %vm24537_vm5 = vmmov %vm24524_vm0 }
 0x70b   : > { %v11269_v14 = vor.u32 %v11268_v22, %v11265_v57  ;;  %v11271_v46 = vrot.slane %v11265_v57, 4  ;;  %17460 = vmatprep.mubr.msk.bf16.mxu0 %vm24525_vm11, %v11503_v28  ;;  %v11221_v2 = vor.u32 %v11220_v42, %v11217_v37  ;;  %v11512_v32 = vshrl.u32 %v22613_v56, 16  ;;  %vm24538_vm7 = vmmov %vm24523_vm3 }
 0x70c   : > { %v11516_v7 = vshll.u32 %v22626_v48, 16  ;;  %v11524_v17 = vshll.u32 %v22628_v4, 16  ;;  %v11212_v24 = vsel %vm23842_vm9, %v11203_v0, %v11211_v61  ;;  %v11213_v3 = vrot.slane %v11211_v61, 4  ;;  %v22661_v5 = vld [vmem:[#allocation4 + $0x80] sm:$0xff]  }
 0x70d   : > { %v11270_v8 = vsel %vm23842_vm9, %v11261_v10, %v11269_v14  ;;  %v11280_v18 = vsel %vm24494_vm4, %v11271_v46, %v11279_v11  ;;  %11229 = vst.msk [vmem:[#allocation4 + $0x88] sm:$0xf] %vm24526_vm1, %v11212_v24  ;;  %v11251_v44 = vrot.slane %v11221_v2, 4  ;;  %v11511_v55 = vsel %vm24528_vm14, %v11506_v54, %v11510_v20  ;;  %vm24529_vm4 = vmmov %vm24524_vm0  ;;  %v22691_v61 = vld [vmem:[%s23569_s7 + $0xc] sm:$0xf]  ;;  %v22693_v14 = vld [vmem:[#allocation4 + $0x8] sm:$0xff]  }
 0x70e   : > { %11278 = vst.msk [vmem:[#allocation4 + $0x94] sm:$0xf] %vm24527_vm10, %v11270_v8  ;;  %11281 = vst [vmem:[#allocation4 + $0x98] sm:$0x1] %v11280_v18  ;;  %v11514_v27 = vor.u32 %v11512_v32, %v11510_v20  ;;  %v11518_v47 = vrot.slane %v11516_v7, 1  ;;  %v11222_v0 = vsel %vm23842_vm9, %v11213_v3, %v11221_v2  ;;  %v11520_v10 = vshrl.u32 %v22626_v48, 16 }
 0x70f   : > { %v11532_v38 = vshll.u32 %v22633_v15, 16  ;;  %v11231_v62 = vsel %vm24492_vm2, %v11222_v0, %v11230_v59  ;;  %v11260_v36 = vsel %vm23842_vm9, %v11251_v44, %v22601_v29  ;;  %v11526_v60 = vrot.slane %v11524_v17, 1  ;;  %vm24532_vm9 = vmmov %vm24524_vm0  ;;  %v22697_v46 = vld [vmem:[#allocation4 + $0x10] sm:$0xff]   ;;  %v22712_v32 = vld [vmem:[#allocation4 + $0x18] sm:$0xff]  }
 0x710   : > { %v11519_v1 = vsel %vm24529_vm4, %v11514_v27, %v11518_v47  ;;  %11232 = vst [vmem:[#allocation4 + $0x8c] sm:$0xf] %v11231_v62  ;;  %v11276_v51 = vsel %vm21119_vm8, %v11260_v36, %v11275_v58  ;;  %v11522_v53 = vor.u32 %v11520_v10, %v11518_v47  ;;  %v11528_v25 = vshrl.u32 %v22628_v4, 16  ;;  %vm24533_vm2 = vmmov %vm24524_vm0  ;;  %v22710_v2 = vld [vmem:[#allocation4 + $0x10] sm:$0xff]   ;;  %v22714_v7 = vld [vmem:[#allocation4 + $0x20] sm:$0xff]  }
 0x711   : > { %17461 = vmatmul.mubr.msk.bf16.gmra.mrb[88].mxu0 %vm24530_vm6, %v11511_v55  ;;  %11277 = vst [vmem:[#allocation4 + $0x90] sm:$0xf] %v11276_v51  ;;  %v11534_v35 = vrot.slane %v11532_v38, 1  ;;  %v11540_v29 = vshll.u32 %v22661_v5, 16  ;;  %v11536_v9 = vshrl.u32 %v22633_v15, 16  ;;  %vm24534_vm8 = vmmov %vm24523_vm3  ;;  %v11544_v50 = vshrl.u32 %v22661_v5, 16 }
 0x712   : > { %17464 = vmatprep.mubr.msk.bf16.mxu0 %vm24531_vm12, %v11519_v1  ;;  %v11530_v49 = vor.u32 %v11528_v25, %v11526_v60  ;;  %v11527_v31 = vsel %vm24532_vm9, %v11522_v53, %v11526_v60  ;;  %vm24539_vm0 = vmmov %vm24523_vm3  ;;  %vm24541_vm1 = vcmask 1043456   ;;  %v22716_v17 = vld [vmem:[#allocation4 + $0x28] sm:$0xff]   ;;  %v22722_v24 = vld [vmem:[#allocation4 + $0x38] sm:$0xff]   ;;  %v13328_v18 = vrot.slane %v22710_v2, 2 }
 0x713   : > { %v11542_v34 = vrot.slane %v11540_v29, 1  ;;  %v11538_v45 = vor.u32 %v11536_v9, %v11534_v35  ;;  %vm24540_vm11 = vmmov %vm24539_vm0  ;;  %v12105_v54 = vsel %vm24541_vm1, %v22431_v41, 0  ;;  %v13321_v41 = vld [vmem:[#allocation4 + $0x8] sm:$0xc]  ;;  %v22726_v3 = vld [vmem:[#allocation4 + $0x40] sm:$0xff]   ;;  %v13330_v59 = vrot.slane %v22712_v32, 2 }
 0x714   : > { %v11535_v33 = vsel %vm24533_vm2, %v11530_v49, %v11534_v35  ;;  %v22669_v12 = vld [vmem:[#allocation4 + $0x88] sm:$0xf]  ;;  %vm24542_vm10 = vmmov %vm24539_vm0  ;;  %v22732_v44 = vld [vmem:[#allocation4 + $0x50] sm:$0xff]   ;;  %v13332_v27 = vrot.slane %v22714_v7, 2  ;;  %v13338_v36 = vrot.slane %v22722_v24, 2  ;;  %v13340_v25 = vrot.slane %v22726_v3, 2 }
 0x715   : > { %v11546_v21 = vor.u32 %v11544_v50, %v11542_v34  ;;  %v11543_v22 = vsel %vm24536_vm13, %v11538_v45, %v11542_v34  ;;  %vm24543_vm14 = vmmov %vm24539_vm0  ;;  %v22728_v8 = vld [vmem:[#allocation4 + $0x48] sm:$0xff]   ;;  %24549 = vst [vmem:[#allocation10_spill] sm:$0xff] %v22732_v44  ;;  %v22734_v58 = vld [vmem:[#allocation4 + $0x58] sm:$0xff]   ;;  %v13344_v34 = vrot.slane %v22732_v44, 2 }
 0x716   : > { %vm24544_vm4 = vmmov %vm24541_vm1  ;;  %24550 = vst [vmem:[#allocation8_spill] sm:$0xff] %v22734_v58  ;;  %v22743_v47 = vld [vmem:[#allocation4 + $0x68] sm:$0xff]   ;;  %v22745_v0 = vld [vmem:[#allocation4 + $0x70] sm:$0xff]   ;;  %v13342_v35 = vrot.slane %v22728_v8, 2  ;;  %v13346_v45 = vrot.slane %v22734_v58, 2 }
 0x717   : > { %v11319_v11 = vld [vmem:[#allocation4 + $0x8c] sm:$0xf]  ;;  %vm24545_vm6 = vmmov %vm24539_vm0  ;;  %24554 = vst [vmem:[#allocation7_spill] sm:$0xff] %v22743_v47  ;;  %v22747_v10 = vld [vmem:[#allocation4 + $0x78] sm:$0xff]  }
 0x718   : > { %v22673_v13 = vcombine.low %v22669_v12, %v11319_v11  ;;  %vm24546_vm12 = vmmov %vm24539_vm0  ;;  %24555 = vst [vmem:[#allocation12_spill] sm:$0xff] %v22745_v0  ;;  %v22754_v1 = vld [vmem:[#allocation4 + $0x80] sm:$0xff]   ;;  %v22756_v51 = vld [vmem:[#allocation4 + $0x88] sm:$0xff]  }
 0x719   : > { %17465 = vmatmul.mubr.msk.bf16.gmra.mrb[92].mxu0 %vm24534_vm8, %v11527_v31  ;;  %vm24547_vm9 = vmmov %vm24539_vm0  ;;  %vm24552_vm8 = vcmask 1045504   ;;  %24556 = vst [vmem:[#allocation16_spill] sm:$0xff] %v22747_v10  ;;  %v22772_v31 = vld [vmem:[#allocation4 + $0x90] sm:$0xff]  }
 0x71a   : > { %17468 = vmatprep.mubr.msk.bf16.mxu0 %vm24535_vm15, %v11535_v33  ;;  %v11548_v40 = vshll.u32 %v22673_v13, 16  ;;  %v11552_v42 = vshrl.u32 %v22673_v13, 16  ;;  %vm24548_vm2 = vmmov %vm24539_vm0  ;;  %24559 = vst [vmem:[#allocation27_spill] sm:$0xff] %v22754_v1  ;;  %v22774_v33 = vld [vmem:[#allocation4 + $0x98] ss:$0 sps:$4 sm:$0x11]  }
 0x71b   : > { %vm24557_vm15 = vmmov %vm24552_vm8  ;;  %24560 = vst [vmem:[#allocation28_spill] sm:$0xff] %v22756_v51  ;;  %v14519_v58 = vld [vmem:[#allocation4 + $0x10] sm:$0x8] }
 0x71c   : > { %v11550_v57 = vrot.slane %v11548_v40, 1  ;;  %v22750_v38 = vsel %vm24557_vm15, %v13328_v18, %v13330_v59  ;;  %vm24561_vm13 = vmmov %vm24552_vm8  ;;  %24569 = vst [vmem:[#allocation26_spill] sm:$0xff] %v22772_v31  ;;  %v13350_v40 = vrot.slane %v22743_v47, 2 }
 0x71d   : > { %24558 = vst [vmem:[#allocation13_spill] sm:$0xff] %v22750_v38  ;;  %v22759_v60 = vsel %vm24561_vm13, %v13330_v59, %v13332_v27  ;;  %24570 = vst [vmem:[#allocation29_spill] sm:$0xff] %v22774_v33  ;;  %v13362_v59 = vrot.slane %v22774_v33, 2 }
 0x71e   : > { %v11551_v37 = vsel %vm24537_vm5, %v11546_v21, %v11550_v57  ;;  %v11554_v28 = vor.u32 %v11552_v42, %v11550_v57  ;;  %24562 = vst [vmem:[#allocation17_spill] sm:$0xff] %v22759_v60  ;;  %vm24563_vm5 = vmmov %vm24552_vm8  ;;  %v13352_v21 = vrot.slane %v22745_v0, 2  ;;  %v13354_v57 = vrot.slane %v22747_v10, 2 }
 0x71f   : > { %vm24575_vm1 = vmmov %vm24548_vm2  ;;  %v13356_v42 = vrot.slane %v22754_v1, 2 }
 0x721   : > { %17469 = vmatmul.mubr.msk.bf16.gmra.mrb[96].mxu0 %vm24538_vm7, %v11543_v22  ;;  %vm24565_vm7 = vmmov %vm24563_vm5 }
 0x722   : > { %17472 = vmatprep.mubr.msk.bf16.mxu0 %vm24523_vm3, %v11551_v37  ;;  %vm24567_vm3 = vmmov %vm24563_vm5 }
 0x729   : > { %17473 = vmatmul.mubr.msk.bf16.gmra.mrb[100].mxu0 %vm24539_vm0, %v11554_v28  ;;  %vm24571_vm0 = vmmov %vm24567_vm3 }
 0x72a   : > { %17478 = vmatprep.mubr.msk.bf16.mxu0 %vm24540_vm11, %v22288_v6  ;;  %v22707_v6 = vld [vmem:[#allocation4 + $0xc] sm:$0xf]  ;;  %v22777_v9 = vsel %vm24571_vm0, %v13338_v36, %v13340_v25  ;;  %vm24573_vm11 = vmmov %vm24571_vm0 }
 0x72b   : > { %v15858_v20 = vcombine.low %v13321_v41, %v22707_v6  ;;  %24572 = vst [vmem:[#allocation30_spill] sm:$0xff] %v22777_v9  ;;  %v22780_v11 = vsel %vm24573_vm11, %v13340_v25, %v13342_v35  ;;  %vm24591_vm15 = vmmov %vm24571_vm0  ;;  %v13634_v25 = vld [vmem:[#allocation4 + $0x10] sm:$0xc] }
 0x72c   : > { %24574 = vst [vmem:[#allocation31_spill] sm:$0xff] %v22780_v11  ;;  %vm24593_vm13 = vmmov %vm24571_vm0 }
 0x731   : > { %17479 = vmatmul.mubr.msk.bf16.vlgmr.msra.gmra.mrb[68].mxu0 %vm24542_vm10, %v22693_v14  ;;  %vm24576_vm10 = vmmov %vm24575_vm1 }
 0x732   : > { %17482 = vmatprep.mubr.msk.bf16.mxu0 %vm24543_vm14, %v22697_v46  ;;  %17515 = vmatpush3.bf16.msra.mxu0 %v12105_v54  ;;  %vm24577_vm14 = vmmov %vm24571_vm0 }
 0x733   : > { %18668 = vmatprep.subr.msk.bf16.mxu0 %vm24544_vm4, %v22691_v61  ;;  %v22793_v22 = vsel %vm24577_vm14, %v13342_v35, %v13344_v34  ;;  %vm24579_vm4 = vmmov %vm24571_vm0 }
 0x734   : > { %24578 = vst [vmem:[#allocation32_spill] sm:$0xff] %v22793_v22  ;;  %v22796_v37 = vsel %vm24579_vm4, %v13344_v34, %v13346_v45  ;;  %v18948_v34 = vld [vmem:[#allocation4 + $0x4] sm:$0xf] }
 0x735   : > { %24580 = vst [vmem:[#allocation33_spill] sm:$0xff] %v22796_v37  ;;  %v22864_v37 = vld [vmem:[#allocation4 + $0x48] sm:$0xff]  }
 0x739   : > { %17483 = vmatmul.mubr.msk.bf16.gmra.mrb[72].mxu0 %vm24545_vm6, %v22421_v39  ;;  %v22720_v39 = vld [vmem:[#allocation4 + $0x30] sm:$0xff]   ;;  %vm24581_vm6 = vmmov %vm24571_vm0 }
 0x73a   : > { %17486 = vmatprep.mubr.msk.bf16.mxu0 %vm24546_vm12, %v22468_v19  ;;  %v13327_v19 = vrot.slane %v15858_v20, 2  ;;  %v13336_v62 = vrot.slane %v22720_v39, 2  ;;  %vm24583_vm12 = vmmov %vm24571_vm0 }
 0x73c   : > { %v22739_v55 = vsel %vm24552_vm8, %v13327_v19, %v13328_v18  ;;  %v22770_v29 = vsel %vm24567_vm3, %v13336_v62, %v13338_v36  ;;  %vm24589_vm8 = vmmov %vm24571_vm0  ;;  %v13360_v18 = vrot.slane %v22772_v31, 2  ;;  %v12009_v36 = vld [vmem:[#allocation4] sm:$0xe] }
 0x73d   : > { %24553 = vst [vmem:[#allocation9_spill] sm:$0xff] %v22739_v55  ;;  %24568 = vst [vmem:[#allocation25_spill] sm:$0xff] %v22770_v29  ;;  %v22813_v20 = vsel %vm24589_vm8, %v13354_v57, %v13356_v42 }
 0x73e   : > { %24590 = vst [vmem:[#allocation38_spill] sm:$0xff] %v22813_v20  ;;  %vm24598_vm3 = vmmov %vm24575_vm1 }
 0x741   : > { %17487 = vmatmul.mubr.msk.bf16.gmra.mrb[76].mxu0 %vm24547_vm9, %v22474_v26  ;;  %v22736_v26 = vld [vmem:[#allocation4 + $0x60] sm:$0xff]   ;;  %vm24585_vm9 = vmmov %vm24571_vm0 }
 0x742   : > { %17490 = vmatprep.mubr.msk.bf16.mxu0 %vm24548_vm2, %v22506_v23  ;;  %24551 = vst [vmem:[#allocation11_spill] sm:$0xff] %v22736_v26  ;;  %v13334_v23 = vrot.slane %v22716_v17, 2  ;;  %v13348_v50 = vrot.slane %v22736_v26, 2  ;;  %v22807_v41 = vsel %vm24585_vm9, %v13350_v40, %v13352_v21  ;;  %vm24587_vm2 = vmmov %vm24571_vm0 }
 0x743   : > { %24586 = vst [vmem:[#allocation36_spill] sm:$0xff] %v22807_v41 }
 0x744   : > { %v22762_v53 = vsel %vm24563_vm5, %v13332_v27, %v13334_v23  ;;  %v22767_v49 = vsel %vm24565_vm7, %v13334_v23, %v13336_v62  ;;  %v22801_v28 = vsel %vm24581_vm6, %v13346_v45, %v13348_v50  ;;  %v22804_v54 = vsel %vm24583_vm12, %v13348_v50, %v13350_v40  ;;  %vm24595_vm5 = vmmov %vm24571_vm0  ;;  %v22826_v62 = vld [vmem:[#allocation4 + $0x14] sm:$0xf]  ;;  %v22835_v50 = vld [vmem:[#allocation4 + $0x18] sm:$0xff]  }
 0x745   : > { %24564 = vst [vmem:[#allocation22_spill] sm:$0xff] %v22762_v53  ;;  %24566 = vst [vmem:[#allocation24_spill] sm:$0xff] %v22767_v49  ;;  %v22824_v23 = vsel %vm24595_vm5, %v13360_v18, %v13362_v59  ;;  %v22833_v35 = vcombine.low %v13634_v25, %v22826_v62  ;;  %v15763_v45 = vcombine.low %v12009_v36, %v18948_v34  ;;  %v22837_v40 = vld [vmem:[#allocation4 + $0x20] sm:$0xff]   ;;  %v14088_v36 = vshrl.u32 %v22835_v50, 16 }
 0x746   : > { %24582 = vst [vmem:[#allocation34_spill] sm:$0xff] %v22801_v28  ;;  %24584 = vst [vmem:[#allocation35_spill] sm:$0xff] %v22804_v54  ;;  %v14091_v34 = vshll.u32 %v22835_v50, 16  ;;  %v14100_v20 = vshll.u32 %v22837_v40, 16 }
 0x747   : > { %24596 = vst [vmem:[#allocation42_spill] sm:$0xff] %v22824_v23  ;;  %vm24597_vm7 = vmmov %vm24575_vm1  ;;  %v22846_v59 = vrot.slane %v15763_v45, 1  ;;  %v22851_v23 = vld [vmem:[#allocation4 + $0x38] sm:$0xff]   ;;  %v14090_v45 = vrot.slane %v14088_v36, 2 }
 0x748   : > { %24599 = vst [vmem:[#allocation41_spill] sm:$0xff] %v22833_v35  ;;  %vm24600_vm0 = vmmov %vm24575_vm1  ;;  %v14102_v54 = vrot.slane %v14100_v20, 3  ;;  %v14124_v53 = vshrl.u32 %v22851_v23, 16  ;;  %v14127_v60 = vshll.u32 %v22851_v23, 16 }
 0x749   : > { %17491 = vmatmul.mubr.msk.bf16.gmra.mrb[80].mxu0 %vm24575_vm1, %v22538_v63  ;;  %v13358_v63 = vrot.slane %v22756_v51, 2  ;;  %vm24601_vm11 = vmmov %vm24600_vm0  ;;  %vm24602_vm1 = vsmask.f32 5376 }
 0x74a   : > { %17494 = vmatprep.mubr.msk.bf16.mxu0 %vm24576_vm10, %v22558_v52  ;;  %v22810_v52 = vsel %vm24587_vm2, %v13352_v21, %v13354_v57  ;;  %v22839_v21 = vld [vmem:[#allocation4 + $0x28] sm:$0xff]   ;;  %v14097_v57 = vshrl.u32 %v22837_v40, 16  ;;  %vm24604_vm10 = vmmov %vm24602_vm1 }
 0x74b   : > { %24588 = vst [vmem:[#allocation37_spill] sm:$0xff] %v22810_v52  ;;  %v22816_v19 = vsel %vm24591_vm15, %v13356_v42, %v13358_v63  ;;  %v22821_v27 = vsel %vm24593_vm13, %v13358_v63, %v13360_v18  ;;  %v22842_v42 = vld [vmem:[#allocation4 + $0x30] sm:$0xff]   ;;  %v14080_v63 = vshrl.u32 %v22833_v35, 16  ;;  %v14083_v18 = vshll.u32 %v22833_v35, 16  ;;  %v22857_v35 = vld [vmem:[#allocation4 + $0x40] sm:$0xff]   ;;  %vm24606_vm14 = vmmov %vm24602_vm1 }
 0x74c   : > { %24592 = vst [vmem:[#allocation39_spill] sm:$0xff] %v22816_v19  ;;  %24594 = vst [vmem:[#allocation40_spill] sm:$0xff] %v22821_v27  ;;  %v14093_v52 = vrot.slane %v14091_v34, 3  ;;  %v14106_v25 = vshrl.u32 %v22839_v21, 16  ;;  %v14109_v41 = vshll.u32 %v22839_v21, 16  ;;  %v14115_v28 = vshrl.u32 %v22842_v42, 16 }
 0x74d   : > { %v14082_v27 = vrot.slane %v14080_v63, 2  ;;  %v14085_v19 = vrot.slane %v14083_v18, 3  ;;  %v14099_v18 = vrot.slane %v14097_v57, 2  ;;  %v14118_v36 = vshll.u32 %v22842_v42, 16  ;;  %v22867_v34 = vld [vmem:[#allocation4 + $0x50] sm:$0xff]   ;;  %vm24608_vm4 = vmmov %vm24600_vm0 }
 0x74e   : > { %v14094_v22 = vor.u32 %v14093_v52, %v14090_v45  ;;  %v14108_v11 = vrot.slane %v14106_v25, 2  ;;  %v14111_v9 = vrot.slane %v14109_v41, 3  ;;  %v14117_v49 = vrot.slane %v14115_v28, 2  ;;  %vm24609_vm6 = vmmov %vm24602_vm1 }
 0x74f   : > { %v14086_v63 = vor.u32 %v14085_v19, %v14082_v27  ;;  %v14103_v29 = vor.u32 %v14102_v54, %v14099_v18  ;;  %v22871_v19 = vld [vmem:[#allocation4 + $0x58] sm:$0xff]   ;;  %v14120_v57 = vrot.slane %v14118_v36, 3  ;;  %v14133_v52 = vshrl.u32 %v22857_v35, 16  ;;  %v22881_v54 = vld [vmem:[#allocation4 + $0x60] sm:$0xff]   ;;  %vm24611_vm12 = vmmov %vm24600_vm0 }
 0x750   : > { %v14112_v27 = vor.u32 %v14111_v9, %v14108_v11  ;;  %v14126_v25 = vrot.slane %v14124_v53, 2  ;;  %v14129_v45 = vrot.slane %v14127_v60, 3  ;;  %v14136_v28 = vshll.u32 %v22857_v35, 16  ;;  %v22887_v9 = vld [vmem:[#allocation4 + $0x68] sm:$0xff]   ;;  %vm24612_vm9 = vmmov %vm24602_vm1 }
 0x751   : > { %17495 = vmatmul.mubr.msk.bf16.gmra.mrb[84].mxu0 %vm24597_vm7, %v22579_v16  ;;  %v22874_v20 = vsel %vm24602_vm1, %v14086_v63, %v14094_v22  ;;  %v22878_v41 = vsel %vm24604_vm10, %v14094_v22, %v14103_v29  ;;  %v14121_v38 = vor.u32 %v14120_v57, %v14117_v49  ;;  %v14135_v55 = vrot.slane %v14133_v52, 2  ;;  %v22900_v52 = vld [vmem:[#allocation4 + $0x70] sm:$0xff]   ;;  %vm24614_vm2 = vmmov %vm24602_vm1 }
 0x752   : > { %17498 = vmatprep.mubr.msk.bf16.mxu0 %vm24598_vm3, %v22597_v30  ;;  %24603 = vst [vmem:[#allocation43_spill] sm:$0xff] %v22874_v20  ;;  %24605 = vst [vmem:[#allocation44_spill] sm:$0xff] %v22878_v41  ;;  %v22884_v18 = vsel %vm24606_vm14, %v14103_v29, %v14112_v27  ;;  %v14142_v63 = vshrl.u32 %v22864_v37, 16  ;;  %v14130_v11 = vor.u32 %v14129_v45, %v14126_v25  ;;  %v14138_v36 = vrot.slane %v14136_v28, 3 }
 0x753   : > { %24607 = vst [vmem:[#allocation45_spill] sm:$0xff] %v22884_v18  ;;  %v14145_v22 = vshll.u32 %v22864_v37, 16  ;;  %v14151_v53 = vshrl.u32 %v22867_v34, 16  ;;  %v22894_v60 = vsel %vm24609_vm6, %v14112_v27, %v14121_v38  ;;  %v14154_v49 = vshll.u32 %v22867_v34, 16  ;;  %vm24616_vm8 = vmmov %vm24602_vm1 }
 0x754   : > { %24610 = vst [vmem:[#allocation46_spill] sm:$0xff] %v22894_v60  ;;  %v14144_v29 = vrot.slane %v14142_v63, 2  ;;  %v14160_v57 = vshrl.u32 %v22871_v19, 16  ;;  %v22903_v25 = vsel %vm24612_vm9, %v14121_v38, %v14130_v11  ;;  %v14139_v45 = vor.u32 %v14138_v36, %v14135_v55  ;;  %v22907_v60 = vld [vmem:[#allocation4 + $0x78] sm:$0xff]   ;;  %vm24618_vm15 = vmmov %vm24602_vm1 }
 0x755   : > { %24613 = vst [vmem:[#allocation47_spill] sm:$0xff] %v22903_v25  ;;  %v14147_v28 = vrot.slane %v14145_v22, 3  ;;  %v14153_v18 = vrot.slane %v14151_v53, 2  ;;  %v14156_v41 = vrot.slane %v14154_v49, 3  ;;  %v14163_v27 = vshll.u32 %v22871_v19, 16  ;;  %v22914_v25 = vld [vmem:[#allocation4 + $0x80] sm:$0xff]   ;;  %vm24620_vm13 = vmmov %vm24600_vm0 }
 0x756   : > { %v14162_v20 = vrot.slane %v14160_v57, 2  ;;  %v14169_v63 = vshrl.u32 %v22881_v54, 16  ;;  %v22910_v33 = vsel %vm24614_vm2, %v14130_v11, %v14139_v45  ;;  %v14172_v51 = vshll.u32 %v22881_v54, 16  ;;  %vm24621_vm5 = vmmov %vm24602_vm1 }
 0x757   : > { %24615 = vst [vmem:[#allocation48_spill] sm:$0xff] %v22910_v33  ;;  %v14148_v31 = vor.u32 %v14147_v28, %v14144_v29  ;;  %v14178_v38 = vshrl.u32 %v22887_v9, 16  ;;  %v14157_v55 = vor.u32 %v14156_v41, %v14153_v18  ;;  %v14165_v36 = vrot.slane %v14163_v27, 3  ;;  %v22921_v33 = vld [vmem:[#allocation4 + $0x88] sm:$0xff]   ;;  %v22927_v18 = vld [vmem:[#allocation4 + $0x90] sm:$0xff]   ;;  %vm24623_vm7 = vmmov %vm24600_vm0 }
 0x758   : > { %v14171_v22 = vrot.slane %v14169_v63, 2  ;;  %v14181_v53 = vshll.u32 %v22887_v9, 16  ;;  %v14174_v57 = vrot.slane %v14172_v51, 3  ;;  %v14187_v11 = vshrl.u32 %v22900_v52, 16  ;;  %vm24624_vm3 = vmmov %vm24602_vm1 }
 0x759   : > { %17499 = vmatmul.mubr.msk.bf16.gmra.mrb[88].mxu0 %vm24600_vm0, %v22603_v43  ;;  %v22918_v49 = vsel %vm24616_vm8, %v14139_v45, %v14148_v31  ;;  %v14180_v1 = vrot.slane %v14178_v38, 2  ;;  %v22924_v29 = vsel %vm24618_vm15, %v14148_v31, %v14157_v55  ;;  %v14166_v28 = vor.u32 %v14165_v36, %v14162_v20  ;;  %v22933_v38 = vld [vmem:[#allocation4 + $0x98] sm:$0xff]   ;;  %vm24626_vm0 = vmmov %vm24602_vm1 }
 0x75a   : > { %17502 = vmatprep.mubr.msk.bf16.mxu0 %vm24601_vm11, %v22613_v56  ;;  %24617 = vst [vmem:[#allocation49_spill] sm:$0xff] %v22918_v49  ;;  %24619 = vst [vmem:[#allocation50_spill] sm:$0xff] %v22924_v29  ;;  %v14183_v10 = vrot.slane %v14181_v53, 3  ;;  %v14190_v41 = vshll.u32 %v22900_v52, 16  ;;  %v14175_v27 = vor.u32 %v14174_v57, %v14171_v22  ;;  %v14189_v63 = vrot.slane %v14187_v11, 2 }
 0x75b   : > { %v14196_v45 = vshrl.u32 %v22907_v60, 16  ;;  %v14199_v51 = vshll.u32 %v22907_v60, 16  ;;  %v22936_v31 = vsel %vm24621_vm5, %v14157_v55, %v14166_v28  ;;  %v14205_v53 = vshrl.u32 %v22914_v25, 16  ;;  %vm24628_vm11 = vmmov %vm24626_vm0 }
 0x75c   : > { %24622 = vst [vmem:[#allocation51_spill] sm:$0xff] %v22936_v31  ;;  %v14184_v20 = vor.u32 %v14183_v10, %v14180_v1  ;;  %v14192_v36 = vrot.slane %v14190_v41, 3  ;;  %v22942_v22 = vsel %vm24624_vm3, %v14166_v28, %v14175_v27  ;;  %v14208_v29 = vshll.u32 %v22914_v25, 16  ;;  %v11317_v1 = vld [vmem:[#allocation4 + $0x8c] sm:$0x7]  ;;  %vm24630_vm1 = vmmov %vm24626_vm0 }
 0x75d   : > { %24625 = vst [vmem:[#allocation52_spill] sm:$0xff] %v22942_v22  ;;  %v14198_v57 = vrot.slane %v14196_v45, 2  ;;  %v14201_v11 = vrot.slane %v14199_v51, 3  ;;  %v14207_v55 = vrot.slane %v14205_v53, 2  ;;  %v14214_v10 = vshrl.u32 %v22921_v33, 16  ;;  %vm24631_vm10 = vmmov %vm24626_vm0 }
 0x75e   : > { %v22946_v49 = vsel %vm24626_vm0, %v14175_v27, %v14184_v20  ;;  %v14193_v0 = vor.u32 %v14192_v36, %v14189_v63  ;;  %v14210_v31 = vrot.slane %v14208_v29, 3  ;;  %v14217_v47 = vshll.u32 %v22921_v33, 16  ;;  %vm24632_vm14 = vmmov %vm24608_vm4 }
 0x75f   : > { %24627 = vst [vmem:[#allocation53_spill] sm:$0xff] %v22946_v49  ;;  %v14202_v41 = vor.u32 %v14201_v11, %v14198_v57  ;;  %v14223_v26 = vshrl.u32 %v22927_v18, 16  ;;  %v14216_v45 = vrot.slane %v14214_v10, 2  ;;  %v14226_v51 = vshll.u32 %v22927_v18, 16  ;;  %vm24635_vm6 = vmmov %vm24623_vm7 }
 0x760   : > { %v22952_v28 = vsel %vm24628_vm11, %v14184_v20, %v14193_v0  ;;  %v14232_v27 = vshrl.u32 %v22933_v38, 16  ;;  %v14211_v36 = vor.u32 %v14210_v31, %v14207_v55  ;;  %v14219_v53 = vrot.slane %v14217_v47, 3  ;;  %v22961_v20 = vld [vmem:[#allocation4 + $0x18] sm:$0xff]   ;;  %vm24637_vm9 = vmmov %vm24626_vm0 }
 0x761   : > { %17503 = vmatmul.mubr.msk.bf16.gmra.mrb[92].mxu0 %vm24608_vm4, %v22626_v48  ;;  %24629 = vst [vmem:[#allocation54_spill] sm:$0xff] %v22952_v28  ;;  %v22957_v63 = vsel %vm24630_vm1, %v14193_v0, %v14202_v41  ;;  %v14225_v49 = vrot.slane %v14223_v26, 2  ;;  %v15743_v29 = vcombine.low %v22669_v12, %v11317_v1  ;;  %v14228_v57 = vrot.slane %v14226_v51, 3  ;;  %vm24638_vm2 = vmmov %vm24626_vm0 }
 0x762   : > { %17506 = vmatprep.mubr.msk.bf16.mxu0 %vm24611_vm12, %v22628_v4  ;;  %v14234_v11 = vrot.slane %v14232_v27, 2  ;;  %v14235_v22 = vshll.u32 %v22933_v38, 16  ;;  %v23698_v10 = vrot.slane %v22961_v20, 1  ;;  %v22965_v28 = vsel %vm24631_vm10, %v14202_v41, %v14211_v36  ;;  %vm24644_vm5 = vmmov %vm24626_vm0 }
 0x763   : > { %v14220_v44 = vor.u32 %v14219_v53, %v14216_v45  ;;  %v15936_v0 = vcombine.low %v14519_v58, %v22826_v62  ;;  %v24633_v26 = vrot.slane %v22693_v14, 1  ;;  %vm24634_vm4 = vcmask 1046528  }
 0x764   : > { %v14229_v47 = vor.u32 %v14228_v57, %v14225_v49  ;;  %v14237_v31 = vrot.slane %v14235_v22, 3  ;;  %v14526_v55 = vrot.slane %v22835_v50, 3  ;;  %vm24636_vm12 = vcmask 1043456   ;;  %vm24641_vm8 = vmmov %vm24634_vm4 }
 0x765   : > { %v12017_v12 = vsel %vm24634_vm4, %v22846_v59, %v24633_v26  ;;  %v12538_v1 = vsel %vm24636_vm12, %v22691_v61, 0  ;;  %v22978_v41 = vsel %vm24637_vm9, %v14211_v36, %v14220_v44  ;;  %v14525_v58 = vrot.slane %v15936_v0, 3  ;;  %vm24648_vm0 = vmmov %vm24634_vm4 }
 0x766   : > { %v14528_v62 = vrot.slane %v22837_v40, 3  ;;  %v22982_v45 = vsel %vm24638_vm2, %v14220_v44, %v14229_v47  ;;  %v22984_v51 = vor.u32 %v14237_v31, %v14234_v11  ;;  %v14530_v59 = vrot.slane %v22839_v21, 3  ;;  %vm24656_vm4 = vmmov %vm24635_vm6 }
 0x767   : > { %v14532_v49 = vrot.slane %v22842_v42, 3  ;;  %v24639_v22 = vrot.slane %v22697_v46, 1  ;;  %v24640_v27 = vmov %v24633_v26  ;;  %vm24642_vm15 = vcmask 1044480   ;;  %vm24663_vm2 = vmmov %vm24656_vm4 }
 0x768   : > { %v22994_v36 = vsel %vm24642_vm15, %v14525_v58, %v14526_v55  ;;  %v14534_v44 = vrot.slane %v22851_v23, 3  ;;  %v14536_v14 = vrot.slane %v22857_v35, 3  ;;  %v14540_v31 = vrot.slane %v22867_v34, 3 }
 0x769   : > { %17507 = vmatmul.mubr.msk.bf16.gmra.mrb[96].mxu0 %vm24620_vm13, %v22633_v15  ;;  %v12019_v61 = vsel %vm24641_vm8, %v24640_v27, %v24639_v22  ;;  %vm24643_vm13 = vmmov %vm24642_vm15  ;;  %v24647_v0 = vmov %v24639_v22  ;;  %v14546_v46 = vrot.slane %v22887_v9, 3 }
 0x76a   : > { %17510 = vmatprep.mubr.msk.bf16.mxu0 %vm24623_vm7, %v22661_v5  ;;  %v22997_v53 = vsel %vm24643_vm13, %v14526_v55, %v14528_v62  ;;  %vm24645_vm7 = vmmov %vm24643_vm13  ;;  %v12021_v26 = vsel %vm24648_vm0, %v24647_v0, %v23698_v10  ;;  %v23021_v55 = vld [vmem:[#allocation4 + $0xa0] ss:$0 sps:$4 sm:$0x33]   ;;  %v14550_v0 = vrot.slane %v22907_v60, 3  ;;  %vm24668_vm13 = vcmask 1043456  }
 0x76b   : > { %v23005_v57 = vsel %vm24645_vm7, %v14528_v62, %v14530_v59  ;;  %vm24646_vm3 = vmmov %vm24645_vm7  ;;  %v14542_v62 = vrot.slane %v22871_v19, 3 }
 0x76c   : > { %v23008_v11 = vsel %vm24646_vm3, %v14530_v59, %v14532_v49  ;;  %vm24649_vm11 = vmmov %vm24646_vm3  ;;  %v14544_v59 = vrot.slane %v22881_v54, 3 }
 0x76d   : > { %vm24651_vm1 = vmmov %vm24646_vm3 }
 0x76e   : > { %v23024_v58 = vsel %vm24651_vm1, %v14534_v44, %v14536_v14  ;;  %vm24653_vm10 = vmmov %vm24651_vm1 }
 0x76f   : > { %24652 = vst [vmem:[#allocation56_spill] sm:$0xff] %v23024_v58  ;;  %vm24659_vm12 = vmmov %vm24651_vm1 }
 0x770   : > { %v23047_v58 = vsel %vm24659_vm12, %v14542_v62, %v14544_v59  ;;  %vm24661_vm9 = vmmov %vm24651_vm1 }
 0x771   : > { %17511 = vmatmul.mubr.msk.bf16.gmra.mrb[100].mxu0 %vm24632_vm14, %v15743_v29  ;;  %v23002_v29 = vsel %vm24644_vm5, %v14229_v47, %v22984_v51  ;;  %v14538_v47 = vrot.slane %v22864_v37, 3  ;;  %vm24654_vm14 = vmmov %vm24651_vm1  ;;  %24660 = vst [vmem:[#allocation59_spill] sm:$0xff] %v23047_v58 }
 0x772   : > { %17516 = vmatprep.mubr.msk.bf16.mxu0 %vm24635_vm6, %v12017_v12  ;;  %v23017_v12 = vsel %vm24649_vm11, %v14532_v49, %v14534_v44  ;;  %v23032_v49 = vld [vmem:[%s23569_s7 + $0x10] sm:$0xf]  ;;  %v14548_v44 = vrot.slane %v22900_v52, 3  ;;  %vm24657_vm6 = vmmov %vm24651_vm1 }
 0x773   : > { %24650 = vst [vmem:[#allocation55_spill] sm:$0xff] %v23017_v12  ;;  %v23035_v22 = vsel %vm24653_vm10, %v14536_v14, %v14538_v47  ;;  %v23038_v27 = vsel %vm24654_vm14, %v14538_v47, %v14540_v31  ;;  %v23044_v10 = vsel %vm24657_vm6, %v14540_v31, %v14542_v62  ;;  %v23050_v12 = vsel %vm24661_vm9, %v14544_v59, %v14546_v46  ;;  %vm24664_vm8 = vmmov %vm24651_vm1 }
 0x774   : > { %24655 = vst [vmem:[#allocation57_spill] sm:$0xff] %v23038_v27  ;;  %24658 = vst [vmem:[#allocation58_spill] sm:$0xff] %v23044_v10  ;;  %v14552_v14 = vrot.slane %v22914_v25, 3  ;;  %v23055_v47 = vsel %vm24664_vm8, %v14546_v46, %v14548_v44  ;;  %v14556_v31 = vrot.slane %v22927_v18, 3  ;;  %v14558_v59 = vrot.slane %v22933_v38, 3 }
 0x775   : > { %24662 = vst [vmem:[#allocation60_spill] sm:$0xff] %v23050_v12  ;;  %24665 = vst [vmem:[#allocation61_spill] sm:$0xff] %v23055_v47 }
 0x776   : > { %vm24666_vm15 = vmmov %vm24651_vm1 }
 0x777   : > { %v23058_v27 = vsel %vm24666_vm15, %v14548_v44, %v14550_v0  ;;  %vm24669_vm5 = vmmov %vm24651_vm1 }
 0x778   : > { %24667 = vst [vmem:[#allocation62_spill] sm:$0xff] %v23058_v27  ;;  %v23065_v62 = vsel %vm24669_vm5, %v14550_v0, %v14552_v14  ;;  %vm24671_vm7 = vmmov %vm24651_vm1  ;;  %v18951_v27 = vld [vmem:[#allocation4 + $0x28] sm:$0xff]  }
 0x779   : > { %17517 = vmatmul.mubr.msk.bf16.vlgmr.msra.gmra.mrb[68].mxu0 %vm24656_vm4, %v12019_v61  ;;  %v14554_v61 = vrot.slane %v22921_v33, 3  ;;  %24670 = vst [vmem:[#allocation63_spill] sm:$0xff] %v23065_v62  ;;  %vm24672_vm3 = vmmov %vm24651_vm1  ;;  %v12024_v12 = vrot.slane %v18951_v27, 1  ;;  %v24676_v62 = vrot.slane %v22961_v20, 1  ;;  %v18954_v20 = vld [vmem:[#allocation4 + $0x40] sm:$0xff]  }
 0x77a   : > { %17520 = vmatprep.mubr.msk.bf16.mxu0 %vm24663_vm2, %v12021_v26  ;;  %17553 = vmatpush3.bf16.msra.mxu0 %v12538_v1  ;;  %v14560_v1 = vrot.slane %v23021_v55, 3  ;;  %v18950_v26 = vld [vmem:[#allocation4 + $0x20] sm:$0xff]   ;;  %vm24674_vm0 = vmmov %vm24651_vm1  ;;  %vm24677_vm1 = vcmask 1046528  }
 0x77b   : > { %18669 = vmatprep.subr.msk.bf16.mxu0 %vm24668_vm13, %v23032_v49  ;;  %v12022_v46 = vrot.slane %v18950_v26, 1  ;;  %v23070_v47 = vsel %vm24671_vm7, %v14552_v14, %v14554_v61  ;;  %v23073_v44 = vsel %vm24672_vm3, %v14554_v61, %v14556_v31  ;;  %v23076_v58 = vsel %vm24674_vm0, %v14556_v31, %v14558_v59  ;;  %vm24675_vm11 = vmmov %vm24674_vm0  ;;  %v18952_v61 = vld [vmem:[#allocation4 + $0x30] sm:$0xff]  }
 0x77c   : > { %24673 = vst [vmem:[#allocation64_spill] sm:$0xff] %v23073_v44  ;;  %v23079_v0 = vsel %vm24675_vm11, %v14558_v59, %v14560_v1  ;;  %vm24678_vm10 = vmmov %vm24663_vm2  ;;  %v12026_v26 = vrot.slane %v18952_v61, 1  ;;  %v18953_v44 = vld [vmem:[#allocation4 + $0x38] sm:$0xff]  }
 0x77d   : > { %v12023_v10 = vsel %vm24677_vm1, %v24676_v62, %v12022_v46  ;;  %vm24679_vm14 = vmmov %vm24677_vm1  ;;  %v12028_v27 = vrot.slane %v18953_v44, 1  ;;  %v12030_v62 = vrot.slane %v18954_v20, 1  ;;  %v12036_v44 = vrot.slane %v22603_v43, 1 }
 0x77e   : > { %v12025_v14 = vsel %vm24679_vm14, %v12022_v46, %v12024_v12  ;;  %vm24680_vm4 = vmmov %vm24663_vm2  ;;  %v12042_v43 = vrot.slane %v22628_v4, 1  ;;  %v12048_v20 = vrot.slane %v22673_v13, 1 }
 0x77f   : > { %vm24681_vm6 = vmmov %vm24677_vm1 }
 0x780   : > { %v12027_v31 = vsel %vm24681_vm6, %v12024_v12, %v12026_v26  ;;  %vm24682_vm12 = vmmov %vm24663_vm2  ;;  %v12034_v12 = vrot.slane %v22597_v30, 1 }
 0x781   : > { %17521 = vmatmul.mubr.msk.bf16.gmra.mrb[72].mxu0 %vm24678_vm10, %v12023_v10  ;;  %vm24683_vm9 = vmmov %vm24677_vm1  ;;  %v12032_v10 = vrot.slane %v22579_v16, 1  ;;  %v12038_v16 = vrot.slane %v22613_v56, 1 }
 0x782   : > { %17524 = vmatprep.mubr.msk.bf16.mxu0 %vm24680_vm4, %v12025_v14  ;;  %v12029_v59 = vsel %vm24683_vm9, %v12026_v26, %v12028_v27  ;;  %vm24684_vm8 = vmmov %vm24677_vm1  ;;  %v12040_v26 = vrot.slane %v22626_v48, 1  ;;  %v12046_v48 = vrot.slane %v22661_v5, 1  ;;  %v18863_v5 = vld [vmem:[#allocation4 + $0x20] sm:$0xff]  }
 0x783   : > { %v12031_v1 = vsel %vm24684_vm8, %v12028_v27, %v12030_v62  ;;  %vm24685_vm15 = vmmov %vm24663_vm2 }
 0x784   : > { %vm24686_vm13 = vmmov %vm24677_vm1 }
 0x785   : > { %v12033_v46 = vsel %vm24686_vm13, %v12030_v62, %v12032_v10  ;;  %vm24687_vm5 = vmmov %vm24663_vm2 }
 0x786   : > { %vm24688_vm7 = vmmov %vm24677_vm1 }
 0x787   : > { %v12035_v14 = vsel %vm24688_vm7, %v12032_v10, %v12034_v12  ;;  %vm24689_vm3 = vmmov %vm24663_vm2  ;;  %v18861_v10 = vld [vmem:[#allocation4 + $0x10] sm:$0xff]  }
 0x788   : > { %vm24690_vm0 = vmmov %vm24677_vm1 }
 0x789   : > { %17525 = vmatmul.mubr.msk.bf16.gmra.mrb[76].mxu0 %vm24682_vm12, %v12027_v31  ;;  %v12037_v61 = vsel %vm24690_vm0, %v12034_v12, %v12036_v44  ;;  %vm24691_vm11 = vmmov %vm24663_vm2  ;;  %v12044_v31 = vrot.slane %v22633_v15, 1  ;;  %v18860_v15 = vld [vmem:[#allocation4 + $0x8] sm:$0xfe]   ;;  %v18862_v12 = vld [vmem:[#allocation4 + $0x18] sm:$0xff]  }
 0x78a   : > { %17528 = vmatprep.mubr.msk.bf16.mxu0 %vm24663_vm2, %v12029_v59  ;;  %vm24692_vm1 = vmmov %vm24690_vm0  ;;  %v12451_v13 = vrot.slane %v18862_v12, 1 }
 0x78b   : > { %v12039_v27 = vsel %vm24692_vm1, %v12036_v44, %v12038_v16  ;;  %vm24693_vm10 = vmmov %vm24663_vm2 }
 0x78c   : > { %vm24694_vm14 = vmmov %vm24690_vm0 }
 0x78d   : > { %v12041_v30 = vsel %vm24694_vm14, %v12038_v16, %v12040_v26  ;;  %vm24695_vm4 = vmmov %vm24663_vm2 }
 0x78e   : > { %vm24696_vm6 = vmmov %vm24690_vm0 }
 0x78f   : > { %v12043_v59 = vsel %vm24696_vm6, %v12040_v26, %v12042_v43  ;;  %vm24697_vm12 = vmmov %vm24663_vm2  ;;  %v18864_v26 = vld [vmem:[#allocation4 + $0x28] sm:$0xff]  }
 0x790   : > { %vm24698_vm9 = vmmov %vm24690_vm0 }
 0x791   : > { %17529 = vmatmul.mubr.msk.bf16.gmra.mrb[80].mxu0 %vm24685_vm15, %v12031_v1  ;;  %v12045_v56 = vsel %vm24698_vm9, %v12042_v43, %v12044_v31  ;;  %vm24699_vm8 = vmmov %vm24690_vm0  ;;  %v12449_v1 = vrot.slane %v18861_v10, 1  ;;  %v18865_v43 = vld [vmem:[#allocation4 + $0x30] sm:$0xff]  }
 0x792   : > { %17532 = vmatprep.mubr.msk.bf16.mxu0 %vm24687_vm5, %v12033_v46  ;;  %v12047_v62 = vsel %vm24699_vm8, %v12044_v31, %v12046_v48  ;;  %vm24700_vm15 = vmmov %vm24663_vm2  ;;  %v12448_v46 = vrot.slane %v18860_v15, 1  ;;  %v12457_v31 = vrot.slane %v18865_v43, 1  ;;  %v18868_v15 = vld [vmem:[#allocation4 + $0x48] sm:$0xff]  }
 0x793   : > { %vm24701_vm13 = vmmov %vm24690_vm0  ;;  %v12452_v16 = vsel %vm24692_vm1, %v12449_v1, %v12451_v13  ;;  %v12463_v12 = vrot.slane %v18868_v15, 1  ;;  %v18872_v43 = vld [vmem:[#allocation4 + $0x68] sm:$0xff]  }
 0x794   : > { %v12049_v4 = vsel %vm24701_vm13, %v12046_v48, %v12048_v20  ;;  %vm24702_vm5 = vmmov %vm24663_vm2 }
 0x795   : > { %vm24703_vm7 = vmmov %vm24663_vm2 }
 0x796   : > { %vm24708_vm14 = vmmov %vm24692_vm1 }
 0x799   : > { %17533 = vmatmul.mubr.msk.bf16.gmra.mrb[84].mxu0 %vm24689_vm3, %v12035_v14  ;;  %vm24704_vm3 = vmmov %vm24690_vm0  ;;  %v12453_v14 = vrot.slane %v18863_v5, 1 }
 0x79a   : > { %17536 = vmatprep.mubr.msk.bf16.mxu0 %vm24691_vm11, %v12037_v61  ;;  %v12450_v44 = vsel %vm24704_vm3, %v12448_v46, %v12449_v1  ;;  %vm24705_vm0 = vmmov %vm24663_vm2  ;;  %vm24706_vm11 = vcmask 1043456   ;;  %v18869_v46 = vld [vmem:[#allocation4 + $0x50] sm:$0xff]  }
 0x79b   : > { %v13106_v61 = vsel %vm24706_vm11, %v23032_v49, 0  ;;  %vm24710_vm6 = vmmov %vm24706_vm11  ;;  %v12455_v49 = vrot.slane %v18864_v26, 1 }
 0x79c   : > { %vm24712_vm9 = vmmov %vm24705_vm0 }
 0x79d   : > { %vm24714_vm8 = vmmov %vm24705_vm0 }
 0x79e   : > { %vm24716_vm13 = vmmov %vm24705_vm0 }
 0x79f   : > { %vm24719_vm3 = vmmov %vm24692_vm1 }
 0x7a0   : > { %vm24720_vm11 = vmmov %vm24692_vm1 }
 0x7a1   : > { %17537 = vmatmul.mubr.msk.bf16.gmra.mrb[88].mxu0 %vm24693_vm10, %v12039_v27  ;;  %v23129_v27 = vld [vmem:[%s23569_s7 + $0x14] sm:$0xf]  ;;  %vm24707_vm10 = vmmov %vm24705_vm0 }
 0x7a2   : > { %17540 = vmatprep.mubr.msk.bf16.mxu0 %vm24695_vm4, %v12041_v30  ;;  %v12454_v30 = vsel %vm24708_vm14, %v12451_v13, %v12453_v14  ;;  %vm24709_vm4 = vmmov %vm24705_vm0  ;;  %v18870_v13 = vld [vmem:[#allocation4 + $0x58] sm:$0xff]  }
 0x7a3   : > { %vm24723_vm14 = vmmov %vm24705_vm0 }
 0x7a9   : > { %17541 = vmatmul.mubr.msk.bf16.gmra.mrb[92].mxu0 %vm24697_vm12, %v12043_v59  ;;  %vm24711_vm12 = vmmov %vm24692_vm1 }
 0x7aa   : > { %17544 = vmatprep.mubr.msk.bf16.mxu0 %vm24663_vm2, %v12045_v56  ;;  %v12456_v59 = vsel %vm24711_vm12, %v12453_v14, %v12455_v49  ;;  %v18866_v56 = vld [vmem:[#allocation4 + $0x38] sm:$0xff]   ;;  %vm24713_vm2 = vmmov %vm24692_vm1 }
 0x7ab   : > { %v12458_v48 = vsel %vm24713_vm2, %v12455_v49, %v12457_v31  ;;  %vm24726_vm12 = vmmov %vm24713_vm2 }
 0x7b1   : > { %17545 = vmatmul.mubr.msk.bf16.gmra.mrb[96].mxu0 %vm24700_vm15, %v12047_v62  ;;  %v12459_v62 = vrot.slane %v18866_v56, 1  ;;  %vm24715_vm15 = vmmov %vm24692_vm1 }
 0x7b2   : > { %17548 = vmatprep.mubr.msk.bf16.mxu0 %vm24702_vm5, %v12049_v4  ;;  %vm24717_vm5 = vmmov %vm24692_vm1 }
 0x7b3   : > { %v12460_v10 = vsel %vm24715_vm15, %v12457_v31, %v12459_v62  ;;  %vm24721_vm1 = vmmov %vm24705_vm0  ;;  %v18873_v31 = vld [vmem:[#allocation4 + $0x70] sm:$0xff]  }
 0x7b4   : > { %v12473_v56 = vrot.slane %v18873_v31, 1  ;;  %vm24729_vm15 = vmmov %vm24713_vm2 }
 0x7b9   : > { %17549 = vmatmul.mubr.msk.bf16.gmra.mrb[100].mxu0 %vm24703_vm7, %v12048_v20  ;;  %v18867_v20 = vld [vmem:[#allocation4 + $0x40] sm:$0xff]   ;;  %vm24718_vm7 = vmmov %vm24705_vm0 }
 0x7ba   : > { %17554 = vmatprep.mubr.msk.bf16.mxu0 %vm24705_vm0, %v12450_v44  ;;  %v12461_v4 = vrot.slane %v18867_v20, 1  ;;  %v12465_v44 = vrot.slane %v18869_v46, 1  ;;  %v18874_v20 = vld [vmem:[#allocation4 + $0x78] sm:$0xff]   ;;  %v18876_v46 = vld [vmem:[#allocation4 + $0x88] sm:$0xff]  }
 0x7bc   : > { %v12462_v1 = vsel %vm24717_vm5, %v12459_v62, %v12461_v4  ;;  %v12464_v5 = vsel %vm24719_vm3, %v12461_v4, %v12463_v12  ;;  %v12466_v14 = vsel %vm24720_vm11, %v12463_v12, %v12465_v44  ;;  %v18875_v4 = vld [vmem:[#allocation4 + $0x80] sm:$0xff]   ;;  %v18877_v12 = vld [vmem:[#allocation4 + $0x90] sm:$0xff]   ;;  %vm24731_vm5 = vmmov %vm24713_vm2 }
 0x7bd   : > { %v12477_v15 = vrot.slane %v18875_v4, 1  ;;  %vm24733_vm3 = vmmov %vm24713_vm2 }
 0x7be   : > { %vm24735_vm11 = vmmov %vm24721_vm1 }
 0x7c1   : > { %17555 = vmatmul.mubr.msk.bf16.vlgmr.msra.gmra.mrb[68].mxu0 %vm24707_vm10, %v12452_v16  ;;  %v12467_v16 = vrot.slane %v18870_v13, 1  ;;  %vm24722_vm10 = vmmov %vm24713_vm2 }
 0x7c2   : > { %17558 = vmatprep.mubr.msk.bf16.mxu0 %vm24709_vm4, %v12454_v30  ;;  %17591 = vmatpush3.bf16.msra.mxu0 %v13106_v61  ;;  %v18871_v61 = vld [vmem:[#allocation4 + $0x60] sm:$0xff]   ;;  %vm24724_vm4 = vmmov %vm24713_vm2 }
 0x7c3   : > { %18670 = vmatprep.subr.msk.bf16.mxu0 %vm24710_vm6, %v23129_v27  ;;  %v12469_v26 = vrot.slane %v18871_v61, 1  ;;  %v12468_v30 = vsel %vm24722_vm10, %v12465_v44, %v12467_v16  ;;  %vm24725_vm6 = vmmov %vm24705_vm0  ;;  %v12753_v44 = vld [vmem:[#allocation4 + $0x8] sm:$0xe]  ;;  %v12481_v61 = vrot.slane %v18877_v12, 1 }
 0x7c4   : > { %v15820_v13 = vcombine.low %v12753_v44, %v22707_v6  ;;  %vm24736_vm10 = vmmov %vm24721_vm1 }
 0x7c5   : > { %v12470_v49 = vsel %vm24724_vm4, %v12467_v16, %v12469_v26  ;;  %vm24738_vm4 = vmmov %vm24721_vm1 }
 0x7c6   : > { %v12886_v16 = vshrl.u32 %v15820_v13, 16 }
 0x7c9   : > { %17559 = vmatmul.mubr.msk.bf16.gmra.mrb[72].mxu0 %vm24712_vm9, %v12456_v59  ;;  %v12471_v59 = vrot.slane %v18872_v43, 1  ;;  %vm24727_vm9 = vmmov %vm24705_vm0  ;;  %v12897_v43 = vshll.u32 %v22710_v2, 16 }
 0x7ca   : > { %17562 = vmatprep.mubr.msk.bf16.mxu0 %vm24714_vm8, %v12458_v48  ;;  %vm24728_vm8 = vmmov %vm24705_vm0 }
 0x7cb   : > { %v12472_v48 = vsel %vm24726_vm12, %v12469_v26, %v12471_v59  ;;  %v12474_v62 = vsel %vm24713_vm2, %v12471_v59, %v12473_v56  ;;  %v12889_v26 = vshll.u32 %v15820_v13, 16  ;;  %v12888_v59 = vrot.slane %v12886_v16, 1 }
 0x7cc   : > { %v12899_v6 = vrot.slane %v12897_v43, 2 }
 0x7d1   : > { %17563 = vmatmul.mubr.msk.bf16.gmra.mrb[76].mxu0 %vm24716_vm13, %v12460_v10  ;;  %v12475_v10 = vrot.slane %v18874_v20, 1  ;;  %vm24730_vm13 = vmmov %vm24705_vm0  ;;  %v12903_v20 = vshrl.u32 %v22712_v32, 16 }
 0x7d2   : > { %17566 = vmatprep.mubr.msk.bf16.mxu0 %vm24718_vm7, %v12462_v1  ;;  %vm24732_vm7 = vmmov %vm24705_vm0 }
 0x7d3   : > { %v12476_v1 = vsel %vm24729_vm15, %v12473_v56, %v12475_v10  ;;  %v12891_v56 = vrot.slane %v12889_v26, 2  ;;  %v12930_v26 = vshrl.u32 %v22720_v39, 16 }
 0x7d5   : > { %v12892_v4 = vor.u32 %v12891_v56, %v12888_v59  ;;  %v12932_v59 = vrot.slane %v12930_v26, 1 }
 0x7d9   : > { %17567 = vmatmul.mubr.msk.bf16.gmra.mrb[80].mxu0 %vm24705_vm0, %v12464_v5  ;;  %v12478_v5 = vsel %vm24731_vm5, %v12475_v10, %v12477_v15  ;;  %vm24734_vm0 = vmmov %vm24713_vm2 }
 0x7da   : > { %17570 = vmatprep.mubr.msk.bf16.mxu0 %vm24721_vm1, %v12466_v14  ;;  %v12479_v14 = vrot.slane %v18876_v46, 1  ;;  %vm24746_vm5 = vmmov %vm24721_vm1 }
 0x7dc   : > { %v12482_v31 = vsel %vm24734_vm0, %v12479_v14, %v12481_v61 }
 0x7e1   : > { %17571 = vmatmul.mubr.msk.bf16.gmra.mrb[84].mxu0 %vm24723_vm14, %v12468_v30  ;;  %v12894_v30 = vshrl.u32 %v22710_v2, 16  ;;  %v12912_v2 = vshrl.u32 %v22714_v7, 16  ;;  %vm24737_vm14 = vsmask.f32 6400 }
 0x7e2   : > { %17574 = vmatprep.mubr.msk.bf16.mxu0 %vm24725_vm6, %v12470_v49  ;;  %v12480_v49 = vsel %vm24733_vm3, %v12477_v15, %v12479_v14  ;;  %v12915_v15 = vshll.u32 %v22714_v7, 16  ;;  %v12921_v14 = vshrl.u32 %v22716_v17, 16  ;;  %v12933_v7 = vshll.u32 %v22720_v39, 16  ;;  %vm24740_vm12 = vmmov %vm24737_vm14 }
 0x7e3   : > { %v12914_v44 = vrot.slane %v12912_v2, 1  ;;  %vm24739_vm6 = vcmask 1043456   ;;  %vm24742_vm2 = vmmov %vm24740_vm12 }
 0x7e4   : > { %v12923_v43 = vrot.slane %v12921_v14, 1  ;;  %v12935_v56 = vrot.slane %v12933_v7, 2  ;;  %vm24744_vm15 = vmmov %vm24739_vm6 }
 0x7e5   : > { %vm24748_vm3 = vmmov %vm24721_vm1 }
 0x7e6   : > { %vm24750_vm0 = vmmov %vm24742_vm2 }
 0x7e9   : > { %17575 = vmatmul.mubr.msk.bf16.gmra.mrb[88].mxu0 %vm24727_vm9, %v12472_v48  ;;  %v12896_v48 = vrot.slane %v12894_v30, 1  ;;  %v13419_v30 = vsel %vm24739_vm6, %v23129_v27, 0  ;;  %vm24741_vm9 = vmmov %vm24721_vm1  ;;  %v12939_v27 = vshrl.u32 %v22722_v24, 16 }
 0x7ea   : > { %17578 = vmatprep.mubr.msk.bf16.mxu0 %vm24728_vm8, %v12474_v62  ;;  %v12906_v62 = vshll.u32 %v22712_v32, 16  ;;  %v12924_v32 = vshll.u32 %v22716_v17, 16  ;;  %vm24743_vm8 = vmmov %vm24721_vm1 }
 0x7eb   : > { %v12900_v10 = vor.u32 %v12899_v6, %v12896_v48  ;;  %v12942_v48 = vshll.u32 %v22722_v24, 16  ;;  %v12936_v6 = vor.u32 %v12935_v56, %v12932_v59  ;;  %v12957_v24 = vshrl.u32 %v22728_v8, 16  ;;  %v24755_v56 = vld [vmem:[#allocation11_spill] sm:$0xff]  ;;  %vm24758_vm6 = vmmov %vm24750_vm0 }
 0x7ec   : > { %v12908_v46 = vrot.slane %v12906_v62, 2  ;;  %v12951_v62 = vshll.u32 %v22726_v3, 16 }
 0x7ed   : > { %v12901_v12 = vsel %vm24737_vm14, %v12892_v4, %v12900_v10  ;;  %v12944_v2 = vrot.slane %v12942_v48, 2  ;;  %vm24756_vm14 = vmmov %vm24750_vm0 }
 0x7f1   : > { %17579 = vmatmul.mubr.msk.bf16.gmra.mrb[92].mxu0 %vm24730_vm13, %v12476_v1  ;;  %v12905_v1 = vrot.slane %v12903_v20, 1  ;;  %v12948_v20 = vshrl.u32 %v22726_v3, 16  ;;  %vm24745_vm13 = vmmov %vm24742_vm2 }
 0x7f2   : > { %17582 = vmatprep.mubr.msk.bf16.mxu0 %vm24732_vm7, %v12478_v5  ;;  %v12917_v5 = vrot.slane %v12915_v15, 2  ;;  %vm24747_vm7 = vmmov %vm24742_vm2 }
 0x7f3   : > { %v12909_v13 = vor.u32 %v12908_v46, %v12905_v1  ;;  %v12950_v1 = vrot.slane %v12948_v20, 1  ;;  %v12953_v46 = vrot.slane %v12951_v62, 2 }
 0x7f4   : > { %v12918_v16 = vor.u32 %v12917_v5, %v12914_v44  ;;  %v12960_v44 = vshll.u32 %v22728_v8, 16 }
 0x7f5   : > { %v12954_v5 = vor.u32 %v12953_v46, %v12950_v1 }
 0x7f6   : > { %v12919_v17 = vsel %vm24742_vm2, %v12909_v13, %v12918_v16  ;;  %v12962_v26 = vrot.slane %v12960_v44, 2  ;;  %vm24763_vm2 = vmmov %vm24748_vm3 }
 0x7f9   : > { %17583 = vmatmul.mubr.msk.bf16.gmra.mrb[96].mxu0 %vm24735_vm11, %v12480_v49  ;;  %v12926_v49 = vrot.slane %v12924_v32, 2  ;;  %vm24751_vm11 = vmmov %vm24721_vm1 }
 0x7fa   : > { %17586 = vmatprep.mubr.msk.bf16.mxu0 %vm24721_vm1, %v12482_v31  ;;  %v23184_v31 = vld [vmem:[%s23569_s7 + $0x18] sm:$0xf]  ;;  %vm24752_vm1 = vmmov %vm24750_vm0 }
 0x7fb   : > { %v12927_v39 = vor.u32 %v12926_v49, %v12923_v43  ;;  %v24754_v49 = vld [vmem:[#allocation8_spill] sm:$0xff] }
 0x7fc   : > { %v12975_v8 = vshrl.u32 %v24754_v49, 16 }
 0x7fd   : > { %v12928_v4 = vsel %vm24745_vm13, %v12918_v16, %v12927_v39  ;;  %v12937_v15 = vsel %vm24747_vm7, %v12927_v39, %v12936_v6  ;;  %v12959_v16 = vrot.slane %v12957_v24, 1  ;;  %v12984_v39 = vshrl.u32 %v24755_v56, 16  ;;  %v24761_v24 = vld [vmem:[#allocation12_spill] sm:$0xff]  ;;  %vm24768_vm13 = vmmov %vm24750_vm0 }
 0x7fe   : > { %v13002_v44 = vshrl.u32 %v24761_v24, 16  ;;  %vm24770_vm7 = vmmov %vm24750_vm0 }
 0x7ff   : > { %v12963_v43 = vor.u32 %v12962_v26, %v12959_v16 }
 0x800   : > { %v13004_v16 = vrot.slane %v13002_v44, 1 }
 0x801   : > { %17587 = vmatmul.mubr.msk.bf16.gmra.mrb[100].mxu0 %vm24736_vm10, %v12481_v61  ;;  %v12910_v61 = vsel %vm24740_vm12, %v12900_v10, %v12909_v13  ;;  %v12941_v10 = vrot.slane %v12939_v27, 1  ;;  %v24749_v13 = vld [vmem:[#allocation10_spill] sm:$0xff]  ;;  %vm24753_vm10 = vmmov %vm24748_vm3  ;;  %v12987_v27 = vshll.u32 %v24755_v56, 16  ;;  %v12964_v48 = vsel %vm24756_vm14, %v12954_v5, %v12963_v43 }
 0x802   : > { %17592 = vmatprep.mubr.msk.bf16.mxu0 %vm24738_vm4, %v12901_v12  ;;  %v12966_v3 = vshrl.u32 %v24749_v13, 16  ;;  %v12969_v14 = vshll.u32 %v24749_v13, 16  ;;  %vm24757_vm4 = vmmov %vm24748_vm3 }
 0x803   : > { %v12945_v12 = vor.u32 %v12944_v2, %v12941_v10  ;;  %v12989_v10 = vrot.slane %v12987_v27, 2  ;;  %vm24759_vm12 = vmmov %vm24748_vm3 }
 0x804   : > { %vm24777_vm14 = vmmov %vm24750_vm0 }
 0x805   : > { %v12946_v32 = vsel %vm24750_vm0, %v12936_v6, %v12945_v12  ;;  %v12955_v7 = vsel %vm24752_vm1, %v12945_v12, %v12954_v5  ;;  %v12977_v6 = vrot.slane %v12975_v8, 1  ;;  %v13005_v5 = vshll.u32 %v24761_v24, 16  ;;  %v24767_v8 = vld [vmem:[#allocation27_spill] sm:$0xff]  ;;  %vm24775_vm1 = vmmov %vm24750_vm0 }
 0x807   : > { %v13007_v26 = vrot.slane %v13005_v5, 2 }
 0x809   : > { %17593 = vmatmul.mubr.msk.bf16.vlgmr.msra.gmra.mrb[68].mxu0 %vm24741_vm9, %v12910_v61  ;;  %v12971_v61 = vrot.slane %v12969_v14, 2  ;;  %vm24762_vm9 = vmmov %vm24750_vm0 }
 0x80a   : > { %17596 = vmatprep.mubr.msk.bf16.mxu0 %vm24743_vm8, %v12919_v17  ;;  %17629 = vmatpush3.bf16.msra.mxu0 %v13419_v30  ;;  %v12968_v30 = vrot.slane %v12966_v3, 1  ;;  %v12978_v17 = vshll.u32 %v24754_v49, 16  ;;  %vm24764_vm8 = vmmov %vm24750_vm0  ;;  %v13008_v49 = vor.u32 %v13007_v26, %v13004_v16 }
 0x80b   : > { %18671 = vmatprep.subr.msk.bf16.mxu0 %vm24744_vm15, %v23184_v31  ;;  %vm24765_vm15 = vmmov %vm24763_vm2 }
 0x80c   : > { %v12972_v59 = vor.u32 %v12971_v61, %v12968_v30  ;;  %v12980_v20 = vrot.slane %v12978_v17, 2  ;;  %v24766_v30 = vld [vmem:[#allocation16_spill] sm:$0xff]  ;;  %v13020_v17 = vshrl.u32 %v24767_v8, 16 }
 0x80d   : > { %v13011_v61 = vshrl.u32 %v24766_v30, 16 }
 0x80e   : > { %v12973_v62 = vsel %vm24758_vm6, %v12963_v43, %v12972_v59  ;;  %v12981_v2 = vor.u32 %v12980_v20, %v12977_v6  ;;  %v13014_v43 = vshll.u32 %v24766_v30, 16  ;;  %v13022_v6 = vrot.slane %v13020_v17, 1  ;;  %vm24779_vm6 = vmmov %vm24750_vm0  ;;  %v24781_v30 = vld [vmem:[#allocation29_spill] sm:$0xff] }
 0x810   : > { %v12982_v13 = vsel %vm24762_vm9, %v12972_v59, %v12981_v2  ;;  %v13023_v59 = vshll.u32 %v24767_v8, 16  ;;  %v13016_v27 = vrot.slane %v13014_v43, 2  ;;  %vm24782_vm9 = vmmov %vm24750_vm0  ;;  %v24783_v8 = vld [vmem:[#allocation9_spill] sm:$0xff] }
 0x811   : > { %17597 = vmatmul.mubr.msk.bf16.gmra.mrb[72].mxu0 %vm24746_vm5, %v12928_v4  ;;  %v12986_v4 = vrot.slane %v12984_v39, 1  ;;  %v13013_v39 = vrot.slane %v13011_v61, 1  ;;  %vm24769_vm5 = vmmov %vm24763_vm2  ;;  %v13047_v61 = vshll.u32 %v24781_v30, 16 }
 0x812   : > { %17600 = vmatprep.mubr.msk.bf16.mxu0 %vm24748_vm3, %v12937_v15  ;;  %v24760_v15 = vld [vmem:[#allocation7_spill] sm:$0xff]  ;;  %v13025_v20 = vrot.slane %v13023_v59, 2  ;;  %vm24771_vm3 = vmmov %vm24763_vm2 }
 0x813   : > { %v12993_v1 = vshrl.u32 %v24760_v15, 16  ;;  %v12996_v46 = vshll.u32 %v24760_v15, 16  ;;  %v12990_v12 = vor.u32 %v12989_v10, %v12986_v4  ;;  %v24772_v4 = vld [vmem:[#allocation28_spill] sm:$0xff]  ;;  %v13049_v43 = vrot.slane %v13047_v61, 2  ;;  %v15915_v59 = vld [vmem:[%s23569_s7 + $0x1c] sm:$0xf] }
 0x814   : > { %v13029_v10 = vshrl.u32 %v24772_v4, 16  ;;  %v13026_v15 = vor.u32 %v13025_v20, %v13022_v6  ;;  %v24797_v6 = vld [vmem:[#allocation30_spill] sm:$0xff]  ;;  %v24799_v20 = vld [vmem:[#allocation31_spill] sm:$0xff] }
 0x815   : > { %v12995_v3 = vrot.slane %v12993_v1, 1  ;;  %v12998_v14 = vrot.slane %v12996_v46, 2  ;;  %v24773_v1 = vld [vmem:[#allocation26_spill] sm:$0xff] }
 0x816   : > { %v13038_v46 = vshrl.u32 %v24773_v1, 16  ;;  %v13031_v44 = vrot.slane %v13029_v10, 1  ;;  %v24805_v10 = vld [vmem:[#allocation34_spill] sm:$0xff] }
 0x819   : > { %17601 = vmatmul.mubr.msk.bf16.gmra.mrb[76].mxu0 %vm24751_vm11, %v12946_v32  ;;  %v12991_v32 = vsel %vm24764_vm8, %v12981_v2, %v12990_v12  ;;  %v13032_v2 = vshll.u32 %v24772_v4, 16  ;;  %vm24774_vm11 = vmmov %vm24763_vm2  ;;  %v24803_v4 = vld [vmem:[#allocation33_spill] sm:$0xff] }
 0x81a   : > { %17604 = vmatprep.mubr.msk.bf16.mxu0 %vm24753_vm10, %v12955_v7  ;;  %v12999_v7 = vor.u32 %v12998_v14, %v12995_v3  ;;  %v13040_v3 = vrot.slane %v13038_v46, 1  ;;  %vm24776_vm10 = vmmov %vm24763_vm2  ;;  %v24813_v46 = vld [vmem:[#allocation38_spill] sm:$0xff] }
 0x81b   : > { %v13034_v5 = vrot.slane %v13032_v2, 2  ;;  %vm24784_vm8 = vmmov %vm24763_vm2  ;;  %v24807_v2 = vld [vmem:[#allocation35_spill] sm:$0xff] }
 0x81c   : > { %v13000_v56 = vsel %vm24768_vm13, %v12990_v12, %v12999_v7  ;;  %v13041_v12 = vshll.u32 %v24773_v1, 16  ;;  %vm24787_vm13 = vmmov %vm24763_vm2  ;;  %v24811_v1 = vld [vmem:[#allocation37_spill] sm:$0xff] }
 0x81e   : > { %v13043_v14 = vrot.slane %v13041_v12, 2  ;;  %v24815_v12 = vld [vmem:[#allocation39_spill] sm:$0xff] }
 0x820   : > { %v13044_v16 = vor.u32 %v13043_v14, %v13040_v3  ;;  %v24820_v3 = vld [vmem:[#allocation42_spill] sm:$0xff] }
 0x821   : > { %17605 = vmatmul.mubr.msk.bf16.gmra.mrb[80].mxu0 %vm24757_vm4, %v12964_v48  ;;  %v13009_v48 = vsel %vm24770_vm7, %v12999_v7, %v13008_v49  ;;  %vm24778_vm4 = vmmov %vm24763_vm2 }
 0x822   : > { %17608 = vmatprep.mubr.msk.bf16.mxu0 %vm24759_vm12, %v12973_v62  ;;  %v13017_v62 = vor.u32 %v13016_v27, %v13013_v39  ;;  %vm24780_vm12 = vmmov %vm24763_vm2  ;;  %v24788_v39 = vld [vmem:[#allocation17_spill] sm:$0xff]  ;;  %v24791_v27 = vld [vmem:[#allocation22_spill] sm:$0xff] }
 0x824   : > { %v13018_v24 = vsel %vm24750_vm0, %v13008_v49, %v13017_v62  ;;  %v13050_v49 = vsel %vm24782_vm9, %v13044_v16, %v13049_v43  ;;  %vm24794_vm0 = vmmov %vm24763_vm2 }
 0x825   : > { %vm24810_vm9 = vmmov %vm24794_vm0 }
 0x829   : > { %17609 = vmatmul.mubr.msk.bf16.gmra.mrb[84].mxu0 %vm24763_vm2, %v12982_v13  ;;  %v13027_v13 = vsel %vm24775_vm1, %v13017_v62, %v13026_v15  ;;  %vm24798_vm1 = vmmov %vm24794_vm0  ;;  %v24801_v62 = vld [vmem:[#allocation32_spill] sm:$0xff] }
 0x82a   : > { %17612 = vmatprep.mubr.msk.bf16.mxu0 %vm24765_vm15, %v12991_v32  ;;  %v13035_v32 = vor.u32 %v13034_v5, %v13031_v44  ;;  %vm24785_vm15 = vcmask 1043456   ;;  %v13767_v44 = vrot.slane %v22835_v50, 2  ;;  %v24819_v5 = vld [vmem:[#allocation41_spill] sm:$0xff]  ;;  %v15935_v50 = vld [vmem:[%s23569_s7 + $0x20] sm:$0xf] }
 0x82b   : > { %v13858_v17 = vsel %vm24785_vm15, %v23184_v31, 0  ;;  %vm24790_vm7 = vmmov %vm24785_vm15  ;;  %v24795_v31 = vld [vmem:[#allocation25_spill] sm:$0xff] }
 0x82c   : > { %v13036_v26 = vsel %vm24777_vm14, %v13026_v15, %v13035_v32  ;;  %v13045_v7 = vsel %vm24779_vm6, %v13035_v32, %v13044_v16  ;;  %vm24802_vm14 = vmmov %vm24794_vm0  ;;  %v24809_v15 = vld [vmem:[#allocation36_spill] sm:$0xff]  ;;  %v13769_v32 = vrot.slane %v22837_v40, 2  ;;  %v13771_v16 = vrot.slane %v22839_v21, 2 }
 0x82d   : > { %vm24806_vm6 = vmmov %vm24794_vm0  ;;  %v13773_v40 = vrot.slane %v22842_v42, 2  ;;  %v13775_v21 = vrot.slane %v22851_v23, 2  ;;  %v13781_v23 = vrot.slane %v22867_v34, 2 }
 0x82e   : > { %vm24816_vm15 = vmmov %vm24794_vm0 }
 0x831   : > { %17613 = vmatmul.mubr.msk.bf16.gmra.mrb[88].mxu0 %vm24769_vm5, %v13000_v56  ;;  %v24786_v56 = vld [vmem:[#allocation13_spill] sm:$0xff]  ;;  %vm24789_vm5 = vmmov %vm24763_vm2 }
 0x832   : > { %17616 = vmatprep.mubr.msk.bf16.mxu0 %vm24771_vm3, %v13009_v48  ;;  %vm24792_vm3 = vmmov %vm24763_vm2  ;;  %v24793_v48 = vld [vmem:[#allocation24_spill] sm:$0xff] }
 0x839   : > { %17617 = vmatmul.mubr.msk.bf16.gmra.mrb[92].mxu0 %vm24774_vm11, %v13018_v24  ;;  %vm24796_vm11 = vmmov %vm24794_vm0  ;;  %v24817_v24 = vld [vmem:[#allocation40_spill] sm:$0xff] }
 0x83a   : > { %17620 = vmatprep.mubr.msk.bf16.mxu0 %vm24776_vm10, %v13027_v13  ;;  %vm24800_vm10 = vmmov %vm24794_vm0  ;;  %v13766_v13 = vrot.slane %v24819_v5, 2  ;;  %v24871_v5 = vld [vmem:[#allocation50_spill] sm:$0xff] }
 0x841   : > { %17621 = vmatmul.mubr.msk.bf16.gmra.mrb[96].mxu0 %vm24778_vm4, %v13036_v26  ;;  %vm24804_vm4 = vmmov %vm24794_vm0 }
 0x842   : > { %17624 = vmatprep.mubr.msk.bf16.mxu0 %vm24780_vm12, %v13045_v7  ;;  %vm24808_vm12 = vmmov %vm24794_vm0 }
 0x849   : > { %17625 = vmatmul.mubr.msk.bf16.gmra.mrb[100].mxu0 %vm24763_vm2, %v13050_v49  ;;  %vm24812_vm2 = vmmov %vm24794_vm0  ;;  %v13777_v49 = vrot.slane %v22857_v35, 2 }
 0x84a   : > { %17630 = vmatprep.mubr.msk.bf16.mxu0 %vm24784_vm8, %v24783_v8  ;;  %vm24814_vm8 = vmmov %vm24794_vm0  ;;  %v13779_v8 = vrot.slane %v22864_v37, 2  ;;  %v13785_v37 = vrot.slane %v22881_v54, 2 }
 0x851   : > { %17631 = vmatmul.mubr.msk.bf16.vlgmr.msra.gmra.mrb[68].mxu0 %vm24787_vm13, %v24786_v56  ;;  %vm24818_vm13 = vmmov %vm24794_vm0 }
 0x852   : > { %17634 = vmatprep.mubr.msk.bf16.mxu0 %vm24789_vm5, %v24788_v39  ;;  %17667 = vmatpush3.bf16.msra.mxu0 %v13858_v17  ;;  %vm24821_vm5 = vmmov %vm24794_vm0  ;;  %v13787_v39 = vrot.slane %v22887_v9, 2  ;;  %v13793_v9 = vrot.slane %v22914_v25, 2 }
 0x853   : > { %18672 = vmatprep.subr.msk.bf16.mxu0 %vm24790_vm7, %v15915_v59  ;;  %vm24822_vm7 = vcmask 1045504  }
 0x854   : > { %v13768_v14 = vsel %vm24822_vm7, %v13766_v13, %v13767_v44  ;;  %v24873_v13 = vld [vmem:[#allocation51_spill] sm:$0xff] }
 0x859   : > { %17635 = vmatmul.mubr.msk.bf16.gmra.mrb[72].mxu0 %vm24792_vm3, %v24791_v27  ;;  %vm24823_vm3 = vmmov %vm24794_vm0 }
 0x85a   : > { %17638 = vmatprep.mubr.msk.bf16.mxu0 %vm24794_vm0, %v24793_v48  ;;  %vm24824_vm0 = vcmask 1043456   ;;  %v13791_v48 = vrot.slane %v22907_v60, 2  ;;  %v13797_v60 = vrot.slane %v22927_v18, 2 }
 0x85b   : > { %v14304_v26 = vsel %vm24824_vm0, %v15915_v59, 0  ;;  %v13783_v59 = vrot.slane %v22871_v19, 2  ;;  %v13789_v19 = vrot.slane %v22900_v52, 2 }
 0x861   : > { %17639 = vmatmul.mubr.msk.bf16.gmra.mrb[76].mxu0 %vm24796_vm11, %v24795_v31  ;;  %vm24825_vm11 = vmmov %vm24822_vm7 }
 0x862   : > { %17642 = vmatprep.mubr.msk.bf16.mxu0 %vm24798_vm1, %v24797_v6  ;;  %v13770_v7 = vsel %vm24825_vm11, %v13767_v44, %v13769_v32  ;;  %vm24840_vm11 = vmmov %vm24798_vm1  ;;  %v13795_v6 = vrot.slane %v22921_v33, 2  ;;  %v24869_v44 = vld [vmem:[#allocation49_spill] sm:$0xff] }
 0x869   : > { %17643 = vmatmul.mubr.msk.bf16.gmra.mrb[80].mxu0 %vm24800_vm10, %v24799_v20  ;;  %vm24826_vm10 = vmmov %vm24822_vm7 }
 0x86a   : > { %17646 = vmatprep.mubr.msk.bf16.mxu0 %vm24802_vm14, %v24801_v62  ;;  %v13772_v30 = vsel %vm24826_vm10, %v13769_v32, %v13771_v16  ;;  %vm24827_vm14 = vmmov %vm24798_vm1  ;;  %v13799_v62 = vrot.slane %v22933_v38, 2  ;;  %v24860_v38 = vld [vmem:[#allocation44_spill] sm:$0xff]  ;;  %v24879_v32 = vld [vmem:[#allocation54_spill] sm:$0xff] }
 0x871   : > { %17647 = vmatmul.mubr.msk.bf16.gmra.mrb[84].mxu0 %vm24804_vm4, %v24803_v4  ;;  %vm24828_vm4 = vmmov %vm24824_vm0 }
 0x872   : > { %17650 = vmatprep.mubr.msk.bf16.mxu0 %vm24806_vm6, %v24805_v10  ;;  %vm24829_vm6 = vmmov %vm24822_vm7  ;;  %v18916_v10 = vld [vmem:[#allocation4 + $0xa0] ss:$0 sps:$4 sm:$0x11]  }
 0x873   : > { %v13774_v61 = vsel %vm24829_vm6, %v13771_v16, %v13773_v40  ;;  %vm24837_vm7 = vmmov %vm24829_vm6  ;;  %v13801_v33 = vrot.slane %v18916_v10, 2  ;;  %v14241_v16 = vshrl.u32 %v23021_v55, 16 }
 0x874   : > { %v13782_v56 = vsel %vm24837_vm7, %v13779_v8, %v13781_v23  ;;  %vm24839_vm0 = vmmov %vm24829_vm6 }
 0x875   : > { %v13784_v35 = vsel %vm24839_vm0, %v13781_v23, %v13783_v59  ;;  %vm24852_vm7 = vmmov %vm24839_vm0  ;;  %v13800_v25 = vsel %vm24839_vm0, %v13797_v60, %v13799_v62 }
 0x876   : > { %v13798_v4 = vsel %vm24852_vm7, %v13795_v6, %v13797_v60 }
 0x879   : > { %17651 = vmatmul.mubr.msk.bf16.gmra.mrb[88].mxu0 %vm24808_vm12, %v24807_v2  ;;  %vm24830_vm12 = vmmov %vm24798_vm1 }
 0x87a   : > { %17654 = vmatprep.mubr.msk.bf16.mxu0 %vm24810_vm9, %v24809_v15  ;;  %vm24831_vm9 = vmmov %vm24829_vm6  ;;  %v24857_v15 = vld [vmem:[#allocation43_spill] sm:$0xff] }
 0x87b   : > { %v13776_v43 = vsel %vm24831_vm9, %v13773_v40, %v13775_v21  ;;  %vm24847_vm9 = vmmov %vm24839_vm0 }
 0x87c   : > { %v13792_v54 = vsel %vm24847_vm9, %v13789_v19, %v13791_v48 }
 0x881   : > { %17655 = vmatmul.mubr.msk.bf16.gmra.mrb[92].mxu0 %vm24812_vm2, %v24811_v1  ;;  %vm24832_vm2 = vmmov %vm24798_vm1  ;;  %v24862_v1 = vld [vmem:[#allocation45_spill] sm:$0xff] }
 0x882   : > { %17658 = vmatprep.mubr.msk.bf16.mxu0 %vm24814_vm8, %v24813_v46  ;;  %vm24833_vm8 = vmmov %vm24829_vm6  ;;  %v24864_v46 = vld [vmem:[#allocation46_spill] sm:$0xff] }
 0x883   : > { %v13778_v17 = vsel %vm24833_vm8, %v13775_v21, %v13777_v49  ;;  %vm24842_vm10 = vmmov %vm24832_vm2 }
 0x884   : > { %vm24848_vm8 = vmmov %vm24839_vm0 }
 0x885   : > { %v13794_v20 = vsel %vm24848_vm8, %v13791_v48, %v13793_v9  ;;  %vm24865_vm9 = vmmov %vm24832_vm2 }
 0x886   : > { %vm24868_vm8 = vmmov %vm24832_vm2 }
 0x887   : > { %vm24876_vm7 = vmmov %vm24832_vm2 }
 0x889   : > { %17659 = vmatmul.mubr.msk.bf16.gmra.mrb[96].mxu0 %vm24816_vm15, %v24815_v12  ;;  %vm24834_vm15 = vmmov %vm24798_vm1  ;;  %v24866_v12 = vld [vmem:[#allocation47_spill] sm:$0xff] }
 0x88a   : > { %17662 = vmatprep.mubr.msk.bf16.mxu0 %vm24818_vm13, %v24817_v24  ;;  %vm24835_vm13 = vmmov %vm24829_vm6  ;;  %v24867_v24 = vld [vmem:[#allocation48_spill] sm:$0xff] }
 0x88b   : > { %v13780_v42 = vsel %vm24835_vm13, %v13777_v49, %v13779_v8  ;;  %vm24845_vm6 = vmmov %vm24839_vm0 }
 0x88c   : > { %v13790_v31 = vsel %vm24845_vm6, %v13787_v39, %v13789_v19  ;;  %vm24850_vm13 = vmmov %vm24839_vm0 }
 0x88d   : > { %v13796_v52 = vsel %vm24850_vm13, %v13793_v9, %v13795_v6  ;;  %vm24861_vm6 = vmmov %vm24832_vm2 }
 0x88e   : > { %vm24872_vm13 = vmmov %vm24832_vm2 }
 0x891   : > { %17663 = vmatmul.mubr.msk.bf16.gmra.mrb[100].mxu0 %vm24821_vm5, %v24820_v3  ;;  %vm24836_vm5 = vmmov %vm24798_vm1  ;;  %v24875_v3 = vld [vmem:[#allocation52_spill] sm:$0xff] }
 0x892   : > { %17668 = vmatprep.mubr.msk.bf16.mxu0 %vm24823_vm3, %v13768_v14  ;;  %vm24838_vm3 = vmmov %vm24798_vm1  ;;  %v24877_v14 = vld [vmem:[#allocation53_spill] sm:$0xff] }
 0x899   : > { %17669 = vmatmul.mubr.msk.bf16.vlgmr.msra.gmra.mrb[68].mxu0 %vm24798_vm1, %v13770_v7  ;;  %vm24841_vm1 = vmmov %vm24839_vm0  ;;  %v14243_v7 = vrot.slane %v14241_v16, 2 }
 0x89a   : > { %17672 = vmatprep.mubr.msk.bf16.mxu0 %vm24827_vm14, %v13772_v30  ;;  %17705 = vmatpush3.bf16.msra.mxu0 %v14304_v26  ;;  %v13786_v27 = vsel %vm24841_vm1, %v13783_v59, %v13785_v37  ;;  %vm24843_vm14 = vmmov %vm24839_vm0  ;;  %v14244_v26 = vshll.u32 %v23021_v55, 16  ;;  %v24911_v55 = vld [vmem:[#allocation64_spill] sm:$0xff] }
 0x89b   : > { %18673 = vmatprep.subr.msk.bf16.mxu0 %vm24828_vm4, %v15935_v50  ;;  %v13788_v34 = vsel %vm24843_vm14, %v13785_v37, %v13787_v39  ;;  %vm24844_vm4 = vmmov %vm24832_vm2 }
 0x89c   : > { %vm24855_vm1 = vmmov %vm24839_vm0 }
 0x89d   : > { %v13802_v2 = vsel %vm24855_vm1, %v13799_v62, %v13801_v33  ;;  %vm24858_vm14 = vmmov %vm24832_vm2 }
 0x89e   : > { %vm24880_vm0 = vmmov %vm24832_vm2 }
 0x89f   : > { %vm24882_vm1 = vmmov %vm24880_vm0 }
 0x8a1   : > { %17673 = vmatmul.mubr.msk.bf16.gmra.mrb[72].mxu0 %vm24830_vm12, %v13774_v61  ;;  %vm24846_vm12 = vmmov %vm24832_vm2 }
 0x8a2   : > { %17676 = vmatprep.mubr.msk.bf16.mxu0 %vm24832_vm2, %v13776_v43 }
 0x8a9   : > { %17677 = vmatmul.mubr.msk.bf16.gmra.mrb[76].mxu0 %vm24834_vm15, %v13778_v17  ;;  %vm24849_vm15 = vmmov %vm24832_vm2 }
 0x8aa   : > { %17680 = vmatprep.mubr.msk.bf16.mxu0 %vm24836_vm5, %v13780_v42  ;;  %vm24851_vm5 = vmmov %vm24832_vm2 }
 0x8b1   : > { %17681 = vmatmul.mubr.msk.bf16.gmra.mrb[80].mxu0 %vm24838_vm3, %v13782_v56  ;;  %vm24853_vm3 = vmmov %vm24832_vm2 }
 0x8b2   : > { %17684 = vmatprep.mubr.msk.bf16.mxu0 %vm24840_vm11, %v13784_v35  ;;  %vm24854_vm11 = vmmov %vm24832_vm2 }
 0x8b9   : > { %17685 = vmatmul.mubr.msk.bf16.gmra.mrb[84].mxu0 %vm24842_vm10, %v13786_v27  ;;  %vm24856_vm10 = vmmov %vm24832_vm2 }
 0x8ba   : > { %17688 = vmatprep.mubr.msk.bf16.mxu0 %vm24844_vm4, %v13788_v34  ;;  %vm24859_vm4 = vcmask 1043456  }
 0x8bb   : > { %v14617_v18 = vsel %vm24859_vm4, %v15935_v50, 0  ;;  %v14246_v50 = vrot.slane %v14244_v26, 3  ;;  %vm24885_vm4 = vmmov %vm24880_vm0 }
 0x8bd   : > { %v14247_v30 = vor.u32 %v14246_v50, %v14243_v7 }
 0x8c1   : > { %17689 = vmatmul.mubr.msk.bf16.gmra.mrb[88].mxu0 %vm24846_vm12, %v13790_v31  ;;  %vm24863_vm12 = vmmov %vm24832_vm2 }
 0x8c2   : > { %17692 = vmatprep.mubr.msk.bf16.mxu0 %vm24832_vm2, %v13792_v54 }
 0x8c9   : > { %17693 = vmatmul.mubr.msk.bf16.gmra.mrb[92].mxu0 %vm24849_vm15, %v13794_v20  ;;  %vm24870_vm15 = vmmov %vm24832_vm2 }
 0x8ca   : > { %17696 = vmatprep.mubr.msk.bf16.mxu0 %vm24851_vm5, %v13796_v52  ;;  %vm24874_vm5 = vmmov %vm24832_vm2 }
 0x8d1   : > { %17697 = vmatmul.mubr.msk.bf16.gmra.mrb[96].mxu0 %vm24853_vm3, %v13798_v4  ;;  %vm24878_vm3 = vmmov %vm24832_vm2 }
 0x8d2   : > { %17700 = vmatprep.mubr.msk.bf16.mxu0 %vm24854_vm11, %v13800_v25  ;;  %vm24881_vm11 = vmmov %vm24880_vm0 }
 0x8d9   : > { %17701 = vmatmul.mubr.msk.bf16.gmra.mrb[100].mxu0 %vm24856_vm10, %v13802_v2  ;;  %vm24883_vm10 = vmmov %vm24880_vm0 }
 0x8da   : > { %17706 = vmatprep.mubr.msk.bf16.mxu0 %vm24858_vm14, %v24857_v15  ;;  %vm24884_vm14 = vmmov %vm24880_vm0 }
 0x8e1   : > { %17707 = vmatmul.mubr.msk.bf16.vlgmr.msra.gmra.mrb[68].mxu0 %vm24861_vm6, %v24860_v38  ;;  %vm24886_vm6 = vsmask.f32 5376 }
 0x8e2   : > { %17710 = vmatprep.mubr.msk.bf16.mxu0 %vm24863_vm12, %v24862_v1  ;;  %17743 = vmatpush3.bf16.msra.mxu0 %v14617_v18  ;;  %vm24887_vm12 = vmmov %vm24880_vm0 }
 0x8e9   : > { %17711 = vmatmul.mubr.msk.bf16.gmra.mrb[72].mxu0 %vm24865_vm9, %v24864_v46  ;;  %vm24888_vm9 = vmmov %vm24880_vm0 }
 0x8ea   : > { %17714 = vmatprep.mubr.msk.bf16.mxu0 %vm24832_vm2, %v24866_v12  ;;  %vm24889_vm2 = vmmov %vm24880_vm0 }
 0x8f1   : > { %17715 = vmatmul.mubr.msk.bf16.gmra.mrb[76].mxu0 %vm24868_vm8, %v24867_v24  ;;  %vm24890_vm8 = vmmov %vm24880_vm0 }
 0x8f2   : > { %17718 = vmatprep.mubr.msk.bf16.mxu0 %vm24870_vm15, %v24869_v44  ;;  %vm24891_vm15 = vmmov %vm24880_vm0 }
 0x8f9   : > { %17719 = vmatmul.mubr.msk.bf16.gmra.mrb[80].mxu0 %vm24872_vm13, %v24871_v5  ;;  %vm24893_vm13 = vmmov %vm24880_vm0 }
 0x8fa   : > { %17722 = vmatprep.mubr.msk.bf16.mxu0 %vm24874_vm5, %v24873_v13  ;;  %vm24895_vm5 = vmmov %vm24880_vm0 }
 0x901   : > { %17723 = vmatmul.mubr.msk.bf16.gmra.mrb[84].mxu0 %vm24876_vm7, %v24875_v3  ;;  %vm24896_vm7 = vmmov %vm24880_vm0 }
 0x902   : > { %17726 = vmatprep.mubr.msk.bf16.mxu0 %vm24878_vm3, %v24877_v14  ;;  %vm24898_vm3 = vmmov %vm24880_vm0 }
 0x909   : > { %17727 = vmatmul.mubr.msk.bf16.gmra.mrb[88].mxu0 %vm24880_vm0, %v24879_v32 }
 0x90a   : > { %17730 = vmatprep.mubr.msk.bf16.mxu0 %vm24881_vm11, %v22957_v63  ;;  %v14248_v63 = vsel %vm24886_vm6, %v22984_v51, %v14247_v30  ;;  %v24899_v51 = vld [vmem:[#allocation58_spill] sm:$0xff]  ;;  %vm24901_vm11 = vmmov %vm24880_vm0 }
 0x90b   : > { %vm24910_vm6 = vmmov %vm24880_vm0 }
 0x911   : > { %17731 = vmatmul.mubr.msk.bf16.gmra.mrb[92].mxu0 %vm24882_vm1, %v22965_v28  ;;  %v24892_v28 = vld [vmem:[#allocation55_spill] sm:$0xff]  ;;  %vm24903_vm1 = vmmov %vm24880_vm0 }
 0x912   : > { %17734 = vmatprep.mubr.msk.bf16.mxu0 %vm24883_vm10, %v22978_v41  ;;  %v24894_v41 = vld [vmem:[#allocation56_spill] sm:$0xff]  ;;  %vm24905_vm10 = vmmov %vm24880_vm0 }
 0x919   : > { %17735 = vmatmul.mubr.msk.bf16.gmra.mrb[96].mxu0 %vm24884_vm14, %v22982_v45  ;;  %v24897_v45 = vld [vmem:[#allocation57_spill] sm:$0xff]  ;;  %vm24907_vm14 = vmmov %vm24880_vm0 }
 0x91a   : > { %17738 = vmatprep.mubr.msk.bf16.mxu0 %vm24885_vm4, %v23002_v29  ;;  %v24904_v29 = vld [vmem:[#allocation61_spill] sm:$0xff]  ;;  %vm24909_vm4 = vmmov %vm24880_vm0 }
 0x921   : > { %17739 = vmatmul.mubr.msk.bf16.gmra.mrb[100].mxu0 %vm24887_vm12, %v14248_v63  ;;  %vm24912_vm12 = vmmov %vm24880_vm0 }
 0x922   : > { %17744 = vmatprep.mubr.msk.bf16.mxu0 %vm24888_vm9, %v22994_v36  ;;  %v24900_v36 = vld [vmem:[#allocation59_spill] sm:$0xff]  ;;  %vm24913_vm9 = vmmov %vm24880_vm0 }
 0x929   : > { %17745 = vmatmul.mubr.msk.bf16.vlgmr.msra.gmra.mrb[68].mxu0 %vm24889_vm2, %v22997_v53  ;;  %v24902_v53 = vld [vmem:[#allocation60_spill] sm:$0xff]  ;;  %vm24914_vm2 = vmmov %vm24880_vm0 }
 0x92a   : > { %17748 = vmatprep.mubr.msk.bf16.mxu0 %vm24890_vm8, %v23005_v57  ;;  %v24906_v57 = vld [vmem:[#allocation62_spill] sm:$0xff]  ;;  %vm14913_vm8 = vcmask 64514  }
 0x931   : > { %17749 = vmatmul.mubr.msk.bf16.gmra.mrb[72].mxu0 %vm24891_vm15, %v23008_v11  ;;  %v24908_v11 = vld [vmem:[#allocation63_spill] sm:$0xff]  ;;  %vm24915_vm15 = vmmov %vm24880_vm0 }
 0x932   : > { %17752 = vmatprep.mubr.msk.bf16.mxu0 %vm24893_vm13, %v24892_v28  ;;  %vm24916_vm13 = vmmov %vm24880_vm0 }
 0x939   : > { %17753 = vmatmul.mubr.msk.bf16.gmra.mrb[76].mxu0 %vm24895_vm5, %v24894_v41  ;;  %vm24917_vm5 = vmmov %vm24880_vm0 }
 0x93a   : > { %17756 = vmatprep.mubr.msk.bf16.mxu0 %vm24896_vm7, %v23035_v22  ;;  %v23426_v22 = vld [vmem:[%s23570_s8] ss:$0 sm:$0xff]  ;;  %vm14921_vm7 = vcmask 64518  }
 0x941   : > { %17757 = vmatmul.mubr.msk.bf16.gmra.mrb[80].mxu0 %vm24898_vm3, %v24897_v45  ;;  %vm14917_vm3 = vcmask 64516  }
 0x942   : > { %17760 = vmatprep.mubr.msk.bf16.mxu0 %vm24880_vm0, %v24899_v51  ;;  %vm24918_vm0 = vcmask 60416  }
 0x949   : > { %17761 = vmatmul.mubr.msk.bf16.gmra.mrb[84].mxu0 %vm24901_vm11, %v24900_v36  ;;  %vm24919_vm11 = vcmask 58368  }
 0x94a   : > { %17764 = vmatprep.mubr.msk.bf16.mxu0 %vm24903_vm1, %v24902_v53 }
 0x951   : > { %17765 = vmatmul.mubr.msk.bf16.gmra.mrb[88].mxu0 %vm24905_vm10, %v24904_v29  ;;  %vm24920_vm10 = vmmov %vm24903_vm1 }
 0x952   : > { %17768 = vmatprep.mubr.msk.bf16.mxu0 %vm24907_vm14, %v24906_v57  ;;  %vm14924_vm14 = vcmask 62464  }
 0x959   : > { %17769 = vmatmul.mubr.msk.bf16.gmra.mrb[92].mxu0 %vm24909_vm4, %v24908_v11  ;;  %vm24921_vm4 = vmmov %vm24903_vm1 }
 0x95a   : > { %17772 = vmatprep.mubr.msk.bf16.mxu0 %vm24910_vm6, %v23070_v47  ;;  %vm24922_vm6 = vmmov %vm24903_vm1 }
 0x961   : > { %17773 = vmatmul.mubr.msk.bf16.gmra.mrb[96].mxu0 %vm24912_vm12, %v24911_v55  ;;  %vm24923_vm12 = vmmov %vm24903_vm1 }
 0x962   : > { %17776 = vmatprep.mubr.msk.bf16.mxu0 %vm24913_vm9, %v23076_v58  ;;  %vm24924_vm9 = vmmov %vm24903_vm1 }
 0x969   : > { %17777 = vmatmul.mubr.msk.bf16.gmra.mrb[100].mxu0 %vm24914_vm2, %v23079_v0  ;;  %vm24925_vm2 = vmmov %vm24918_vm0 }
 0x9fc   : > { %v17746_v40 = vpop.f32.mrb[68].mxu0 }
 0x9fd   : > { %v14841_v21 = vadd.f32 %v17746_v40, %v23426_v22  ;;  %v14653_v61 = vpop.f32.mrb[69].mxu0 }
 0x9fe   : > { %v14839_v58 = vadd.f32 %v23426_v22, %v14653_v61  ;;  %v17747_v47 = vpop.f32.mrb[70].mxu0 }
 0x9ff   : > { %v14877_v0 = vmax.f32 %v14841_v21, 0.0  ;;  %v14842_v43 = vadd.f32 %v17747_v47, %v23426_v22  ;;  %v14656_v49 = vpop.f32.mrb[71].mxu0 }
 0xa00   : > { %v14875_v8 = vmax.f32 %v14839_v58, 0.0  ;;  %v14840_v17 = vadd.f32 %v23426_v22, %v14656_v49 }
 0xa01   : > { %14914 = vst.msk [vmem:[%s23434_s20 + $0xe] sm:$0xfc] %vm14913_vm8, %v14877_v0  ;;  %v14878_v42 = vmax.f32 %v14842_v43, 0.0 }
 0xa02   : > { %14911 = vst.msk [vmem:[%s23434_s20] sm:$0xff] %vm24915_vm15, %v14875_v8  ;;  %v14876_v23 = vmax.f32 %v14840_v17, 0.0  ;;  %vm24926_vm15 = vmmov %vm24919_vm11 }
 0xa03   : > { %14915 = vst.msk [vmem:[%s23434_s20 + $0x16] sm:$0xff] %vm24916_vm13, %v14878_v42  ;;  %vm24927_vm13 = vmmov %vm24903_vm1 }
 0xa04   : > { %14912 = vst.msk [vmem:[%s23434_s20 + $0x8] sm:$0xff] %vm24917_vm5, %v14876_v23  ;;  %v17750_v59 = vpop.f32.mrb[72].mxu0  ;;  %vm24928_vm5 = vmmov %vm24903_vm1 }
 0xa05   : > { %v14845_v56 = vadd.f32 %v17750_v59, %v23426_v22  ;;  %v14669_v35 = vpop.f32.mrb[73].mxu0 }
 0xa06   : > { %v14843_v37 = vadd.f32 %v23426_v22, %v14669_v35  ;;  %v17751_v39 = vpop.f32.mrb[74].mxu0 }
 0xa07   : > { %v14881_v27 = vmax.f32 %v14845_v56, 0.0  ;;  %v14846_v34 = vadd.f32 %v17751_v39, %v23426_v22  ;;  %v14672_v19 = vpop.f32.mrb[75].mxu0 }
 0xa08   : > { %v14879_v48 = vmax.f32 %v14843_v37, 0.0  ;;  %v14844_v31 = vadd.f32 %v23426_v22, %v14672_v19 }
 0xa09   : > { %14920 = vst.msk [vmem:[%s23434_s20 + $0x2c] sm:$0xf] %vm24918_vm0, %v14881_v27  ;;  %v14882_v54 = vmax.f32 %v14846_v34, 0.0  ;;  %vm24929_vm0 = vmmov %vm24903_vm1 }
 0xa0a   : > { %14922 = vst.msk [vmem:[%s23434_s20 + $0x2a] sm:$0xc0] %vm14921_vm7, %v14881_v27  ;;  %v14880_v9 = vmax.f32 %v14844_v31, 0.0 }
 0xa0b   : > { %14916 = vst.msk [vmem:[%s23434_s20 + $0x1e] sm:$0x3] %vm24919_vm11, %v14879_v48 }
 0xa0c   : > { %14918 = vst.msk [vmem:[%s23434_s20 + $0x1c] sm:$0xf0] %vm14917_vm3, %v14879_v48  ;;  %v17754_v6 = vpop.f32.mrb[76].mxu0 }
 0xa0d   : > { %14923 = vst.msk [vmem:[%s23434_s20 + $0x32] sm:$0xff] %vm24903_vm1, %v14882_v54  ;;  %v14849_v20 = vadd.f32 %v17754_v6, %v23426_v22  ;;  %v14685_v52 = vpop.f32.mrb[77].mxu0  ;;  %vm24930_vm1 = vmmov %vm24929_vm0 }
 0xa0e   : > { %14919 = vst.msk [vmem:[%s23434_s20 + $0x24] sm:$0xff] %vm24920_vm10, %v14880_v9  ;;  %v14847_v60 = vadd.f32 %v23426_v22, %v14685_v52  ;;  %v17755_v62 = vpop.f32.mrb[78].mxu0  ;;  %vm24931_vm10 = vmmov %vm24929_vm0 }
 0xa0f   : > { %v14885_v4 = vmax.f32 %v14849_v20, 0.0  ;;  %v14850_v10 = vadd.f32 %v17755_v62, %v23426_v22  ;;  %v14688_v25 = vpop.f32.mrb[79].mxu0 }
 0xa10   : > { %v14883_v33 = vmax.f32 %v14847_v60, 0.0  ;;  %v14848_v2 = vadd.f32 %v23426_v22, %v14688_v25 }
 0xa11   : > { %14927 = vst.msk [vmem:[%s23434_s20 + $0x48] sm:$0xff] %vm24921_vm4, %v14885_v4  ;;  %v14886_v15 = vmax.f32 %v14850_v10, 0.0  ;;  %vm24932_vm4 = vmmov %vm24925_vm2 }
 0xa12   : > { %14925 = vst.msk [vmem:[%s23434_s20 + $0x3a] sm:$0x3f] %vm14924_vm14, %v14883_v33  ;;  %v14884_v18 = vmax.f32 %v14848_v2, 0.0 }
 0xa13   : > { %14928 = vst.msk [vmem:[%s23434_s20 + $0x4e] sm:$0xfc] %vm14913_vm8, %v14886_v15 }
 0xa14   : > { %14926 = vst.msk [vmem:[%s23434_s20 + $0x40] sm:$0xff] %vm24922_vm6, %v14884_v18  ;;  %v17758_v38 = vpop.f32.mrb[80].mxu0  ;;  %vm24933_vm6 = vmmov %vm24929_vm0 }
 0xa15   : > { %v14853_v1 = vadd.f32 %v17758_v38, %v23426_v22  ;;  %v14701_v46 = vpop.f32.mrb[81].mxu0 }
 0xa16   : > { %v14851_v12 = vadd.f32 %v23426_v22, %v14701_v46  ;;  %v17759_v24 = vpop.f32.mrb[82].mxu0 }
 0xa17   : > { %v14889_v44 = vmax.f32 %v14853_v1, 0.0  ;;  %v14854_v5 = vadd.f32 %v17759_v24, %v23426_v22  ;;  %v14704_v13 = vpop.f32.mrb[83].mxu0 }
 0xa18   : > { %v14887_v3 = vmax.f32 %v14851_v12, 0.0  ;;  %v14852_v14 = vadd.f32 %v23426_v22, %v14704_v13 }
 0xa19   : > { %14932 = vst.msk [vmem:[%s23434_s20 + $0x64] sm:$0xff] %vm24923_vm12, %v14889_v44  ;;  %v14890_v32 = vmax.f32 %v14854_v5, 0.0  ;;  %vm24934_vm12 = vmmov %vm24929_vm0 }
 0xa1a   : > { %14929 = vst.msk [vmem:[%s23434_s20 + $0x56] sm:$0xff] %vm24924_vm9, %v14887_v3  ;;  %v14888_v16 = vmax.f32 %v14852_v14, 0.0  ;;  %vm24935_vm9 = vmmov %vm24929_vm0 }
 0xa1b   : > { %14933 = vst.msk [vmem:[%s23434_s20 + $0x6c] sm:$0xf] %vm24925_vm2, %v14890_v32  ;;  %vm24936_vm2 = vmmov %vm24929_vm0 }
 0xa1c   : > { %14934 = vst.msk [vmem:[%s23434_s20 + $0x6a] sm:$0xc0] %vm14921_vm7, %v14890_v32  ;;  %v17762_v26 = vpop.f32.mrb[84].mxu0 }
 0xa1d   : > { %14930 = vst.msk [vmem:[%s23434_s20 + $0x5e] sm:$0x3] %vm24926_vm15, %v14888_v16  ;;  %v14857_v7 = vadd.f32 %v17762_v26, %v23426_v22  ;;  %v14717_v50 = vpop.f32.mrb[85].mxu0  ;;  %vm24937_vm15 = vmmov %vm24919_vm11 }
 0xa1e   : > { %14931 = vst.msk [vmem:[%s23434_s20 + $0x5c] sm:$0xf0] %vm14917_vm3, %v14888_v16  ;;  %v14855_v30 = vadd.f32 %v23426_v22, %v14717_v50  ;;  %v17763_v63 = vpop.f32.mrb[86].mxu0 }
 0xa1f   : > { %v14893_v28 = vmax.f32 %v14857_v7, 0.0  ;;  %v14858_v41 = vadd.f32 %v17763_v63, %v23426_v22  ;;  %v14720_v45 = vpop.f32.mrb[87].mxu0 }
 0xa20   : > { %v14891_v51 = vmax.f32 %v14855_v30, 0.0  ;;  %v14856_v36 = vadd.f32 %v23426_v22, %v14720_v45 }
 0xa21   : > { %14937 = vst.msk [vmem:[%s23434_s20 + $0x80] sm:$0xff] %vm24927_vm13, %v14893_v28  ;;  %v14894_v53 = vmax.f32 %v14858_v41, 0.0  ;;  %vm24940_vm13 = vmmov %vm24932_vm4 }
 0xa22   : > { %14935 = vst.msk [vmem:[%s23434_s20 + $0x72] sm:$0xff] %vm24928_vm5, %v14891_v51  ;;  %v14892_v29 = vmax.f32 %v14856_v36, 0.0 }
 0xa23   : > { %14938 = vst.msk [vmem:[%s23434_s20 + $0x88] sm:$0xff] %vm24929_vm0, %v14894_v53 }
 0xa24   : > { %14936 = vst.msk [vmem:[%s23434_s20 + $0x7a] sm:$0x3f] %vm14924_vm14, %v14892_v29  ;;  %v17766_v57 = vpop.f32.mrb[88].mxu0 }
 0xa25   : > { %v14861_v11 = vadd.f32 %v17766_v57, %v23426_v22  ;;  %v14733_v55 = vpop.f32.mrb[89].mxu0 }
 0xa26   : > { %v14859_v40 = vadd.f32 %v23426_v22, %v14733_v55  ;;  %v17767_v21 = vpop.f32.mrb[90].mxu0 }
 0xa27   : > { %v14897_v61 = vmax.f32 %v14861_v11, 0.0  ;;  %v14862_v58 = vadd.f32 %v17767_v21, %v23426_v22  ;;  %v14736_v47 = vpop.f32.mrb[91].mxu0 }
 0xa28   : > { %v14895_v0 = vmax.f32 %v14859_v40, 0.0  ;;  %v14860_v43 = vadd.f32 %v23426_v22, %v14736_v47 }
 0xa29   : > { %14941 = vst.msk [vmem:[%s23434_s20 + $0x9e] sm:$0x3] %vm24919_vm11, %v14897_v61  ;;  %v14898_v49 = vmax.f32 %v14862_v58, 0.0 }
 0xa2a   : > { %14942 = vst.msk [vmem:[%s23434_s20 + $0x9c] sm:$0xf0] %vm14917_vm3, %v14897_v61  ;;  %v14896_v8 = vmax.f32 %v14860_v43, 0.0 }
 0xa2b   : > { %14939 = vst.msk [vmem:[%s23434_s20 + $0x8e] sm:$0xfc] %vm14913_vm8, %v14895_v0 }
 0xa2c   : > { %14943 = vst.msk [vmem:[%s23434_s20 + $0xa4] sm:$0xff] %vm24930_vm1, %v14898_v49  ;;  %v17770_v17 = vpop.f32.mrb[92].mxu0 }
 0xa2d   : > { %14940 = vst.msk [vmem:[%s23434_s20 + $0x96] sm:$0xff] %vm24931_vm10, %v14896_v8  ;;  %v14865_v42 = vadd.f32 %v17770_v17, %v23426_v22  ;;  %v14749_v23 = vpop.f32.mrb[93].mxu0 }
 0xa2e   : > { %v14863_v59 = vadd.f32 %v23426_v22, %v14749_v23  ;;  %v17771_v56 = vpop.f32.mrb[94].mxu0 }
 0xa2f   : > { %v14901_v35 = vmax.f32 %v14865_v42, 0.0  ;;  %v14866_v37 = vadd.f32 %v17771_v56, %v23426_v22  ;;  %v14752_v39 = vpop.f32.mrb[95].mxu0 }
 0xa30   : > { %v14899_v27 = vmax.f32 %v14863_v59, 0.0  ;;  %v14864_v34 = vadd.f32 %v23426_v22, %v14752_v39 }
 0xa31   : > { %14947 = vst.msk [vmem:[%s23434_s20 + $0xba] sm:$0x3f] %vm14924_vm14, %v14901_v35  ;;  %v14902_v19 = vmax.f32 %v14866_v37, 0.0 }
 0xa32   : > { %14944 = vst.msk [vmem:[%s23434_s20 + $0xac] sm:$0xf] %vm24932_vm4, %v14899_v27  ;;  %v14900_v48 = vmax.f32 %v14864_v34, 0.0 }
 0xa33   : > { %14945 = vst.msk [vmem:[%s23434_s20 + $0xaa] sm:$0xc0] %vm14921_vm7, %v14899_v27 }
 0xa34   : > { %14948 = vst.msk [vmem:[%s23434_s20 + $0xc0] sm:$0xff] %vm24933_vm6, %v14902_v19  ;;  %v17774_v31 = vpop.f32.mrb[96].mxu0 }
 0xa35   : > { %14946 = vst.msk [vmem:[%s23434_s20 + $0xb2] sm:$0xff] %vm24934_vm12, %v14900_v48  ;;  %v14869_v54 = vadd.f32 %v17774_v31, %v23426_v22  ;;  %v14765_v9 = vpop.f32.mrb[97].mxu0 }
 0xa36   : > { %v14867_v6 = vadd.f32 %v23426_v22, %v14765_v9  ;;  %v17775_v20 = vpop.f32.mrb[98].mxu0 }
 0xa37   : > { %v14905_v52 = vmax.f32 %v14869_v54, 0.0  ;;  %v14870_v60 = vadd.f32 %v17775_v20, %v23426_v22  ;;  %v14768_v62 = vpop.f32.mrb[99].mxu0 }
 0xa38   : > { %v14903_v4 = vmax.f32 %v14867_v6, 0.0  ;;  %v14868_v10 = vadd.f32 %v23426_v22, %v14768_v62 }
 0xa39   : > { %14951 = vst.msk [vmem:[%s23434_s20 + $0xd6] sm:$0xff] %vm24935_vm9, %v14905_v52  ;;  %v14906_v25 = vmax.f32 %v14870_v60, 0.0 }
 0xa3a   : > { %14949 = vst.msk [vmem:[%s23434_s20 + $0xc8] sm:$0xff] %vm24936_vm2, %v14903_v4  ;;  %v14904_v33 = vmax.f32 %v14868_v10, 0.0 }
 0xa3b   : > { %14952 = vst.msk [vmem:[%s23434_s20 + $0xde] sm:$0x3] %vm24937_vm15, %v14906_v25 }
 0xa3c   : > { %14953 = vst.msk [vmem:[%s23434_s20 + $0xdc] sm:$0xf0] %vm14917_vm3, %v14906_v25  ;;  %v17778_v2 = vpop.f32.mrb[100].mxu0  ;;  %vm24938_vm3 = vmmov %vm24929_vm0 }
 0xa3d   : > { %14950 = vst.msk [vmem:[%s23434_s20 + $0xce] sm:$0xfc] %vm14913_vm8, %v14904_v33  ;;  %v14873_v15 = vadd.f32 %v17778_v2, %v23426_v22  ;;  %v14781_v18 = vpop.f32.mrb[101].mxu0  ;;  %vm24939_vm8 = vmmov %vm24929_vm0 }
 0xa3e   : > { %v14871_v38 = vadd.f32 %v23426_v22, %v14781_v18  ;;  %v17779_v1 = vpop.f32.mrb[102].mxu0 }
 0xa3f   : > { %v14909_v46 = vmax.f32 %v14873_v15, 0.0  ;;  %v14874_v12 = vadd.f32 %v17779_v1, %v23426_v22  ;;  %v14784_v24 = vpop.f32.mrb[103].mxu0 }
 0xa40   : > { %v14907_v44 = vmax.f32 %v14871_v38, 0.0  ;;  %v14872_v5 = vadd.f32 %v23426_v22, %v14784_v24 }
 0xa41   : > { %14957 = vst.msk [vmem:[%s23434_s20 + $0xf2] sm:$0xff] %vm24938_vm3, %v14909_v46  ;;  %v14910_v13 = vmax.f32 %v14874_v12, 0.0 }
 0xa42   : > { %14954 = vst.msk [vmem:[%s23434_s20 + $0xe4] sm:$0xff] %vm24939_vm8, %v14907_v44  ;;  %v14908_v3 = vmax.f32 %v14872_v5, 0.0 }
 0xa43   : > { %14958 = vst.msk [vmem:[%s23434_s20 + $0xfa] sm:$0x3f] %vm14924_vm14, %v14910_v13 }
 0xa44   : > { %14955 = vst.msk [vmem:[%s23434_s20 + $0xec] sm:$0xf] %vm24940_vm13, %v14908_v3 }
 0xa45   : > { %14956 = vst.msk [vmem:[%s23434_s20 + $0xea] sm:$0xc0] %vm14921_vm7, %v14908_v3 }
 0xa46 PF: > { %s19_s30 = sadd.s32 1, %s18961_s30  }
 0xa47   : > { %p16_p4 = scmp.ge.s32.totalorder %s19_s30, 4  }
 0xa49   :  { %18 = sbr.rel (!%p16_p4) target bundleno = 1 (0x1), region = 113 }

</bundles_post_ra>
